<compile_context>
chip_gen: v7x
topology: tpu7x:2x2x1
jax: 0.10.0
libtpu: 0.0.40
codegen_flags: <defaults>
</compile_context>

<pallas_src>
import functools

import jax
import jax.numpy as jnp
import numpy as np
from jax.experimental import pallas as pl
from jax.experimental.pallas import tpu as pltpu


_TAPS = tuple((kh, kw) for kh in range(3) for kw in range(3))   # t = kh*3 + kw


# ------------------------------ Pallas kernel ------------------------------ #

def _zero_halo(pad_ref, H, W, C):
    """Zero only the 1-element border of a (H+2, W+2, C) padded scratch slab."""
    zrow = jnp.zeros((1, W + 2, C), pad_ref.dtype)
    pad_ref[0:1, :, :] = zrow
    pad_ref[H + 1:H + 2, :, :] = zrow
    zcol = jnp.zeros((H + 2, 1, C), pad_ref.dtype)
    pad_ref[:, 0:1, :] = zcol
    pad_ref[:, W + 1:W + 2, :] = zcol


def _conv3x3(pad_ref, w_ref, bias_f32, H, W, C, P):
    """3x3 'SAME' conv as 9 accumulating MXU matmuls over a padded bf16 slab.

    pad_ref: (H+2, W+2, C) bf16 VMEM scratch (zero halo, image in interior).
    w_ref:   (9, C, P) bf16 weights in (kh, kw) tap order (BN scale folded in).
    Returns (H*W, P) f32 = conv + bias.
    """
    acc = jnp.broadcast_to(bias_f32, (H * W, P))
    for t, (kh, kw) in enumerate(_TAPS):
        tap = pad_ref[kh:kh + H, kw:kw + W, :].reshape(H * W, C)   # bf16
        acc = acc + jnp.dot(tap, w_ref[t], preferred_element_type=jnp.float32)
    return acc


def _block_body(x_ref, w1_ref, b1_ref, w2_ref, b2_ref, out_ref,
                xpad_ref, mid_ref, shortcut_fn, *, H, W, Cin, P):
    # 1) conv1 + bn1 (scale pre-folded into w1) + ReLU.
    _zero_halo(xpad_ref, H, W, Cin)
    xpad_ref[1:H + 1, 1:W + 1, :] = x_ref[0]                 # bf16, no casts
    y1 = jnp.maximum(_conv3x3(xpad_ref, w1_ref, b1_ref[0, :], H, W, Cin, P), 0.0)

    # 2) conv2 + bn2; intermediate stays in bf16 VMEM, never touches HBM.
    _zero_halo(mid_ref, H, W, P)
    mid_ref[1:H + 1, 1:W + 1, :] = y1.reshape(H, W, P).astype(mid_ref.dtype)
    y2 = _conv3x3(mid_ref, w2_ref, b2_ref[0, :], H, W, P, P)

    # 3) Shortcut computed only now (epilogue), residual add + final ReLU.
    y = jnp.maximum(y2 + shortcut_fn(), 0.0)
    out_ref[...] = y.reshape(1, H, W, P).astype(out_ref.dtype)


def _block_kernel_proj(x_ref, w1_ref, b1_ref, w2_ref, b2_ref, wsc_ref, bsc_ref,
                       out_ref, xpad_ref, mid_ref, *, H, W, Cin, P):
    """Fused BasicBlock with 1x1-conv + BN projection shortcut."""
    def shortcut():
        xm = x_ref[0].reshape(H * W, Cin)                    # bf16
        return (jnp.dot(xm, wsc_ref[...], preferred_element_type=jnp.float32)
                + bsc_ref[0, :])
    _block_body(x_ref, w1_ref, b1_ref, w2_ref, b2_ref, out_ref,
                xpad_ref, mid_ref, shortcut, H=H, W=W, Cin=Cin, P=P)


def _block_kernel_identity(x_ref, w1_ref, b1_ref, w2_ref, b2_ref,
                           out_ref, xpad_ref, mid_ref, *, H, W, Cin, P):
    """Fused BasicBlock with identity shortcut (in_planes == planes, stride=1)."""
    def shortcut():
        return x_ref[0].reshape(H * W, P).astype(jnp.float32)
    _block_body(x_ref, w1_ref, b1_ref, w2_ref, b2_ref, out_ref,
                xpad_ref, mid_ref, shortcut, H=H, W=W, Cin=Cin, P=P)


# ------------------------------ JAX wrappers -------------------------------- #

def prepare_block_params(params):
    """One-time (load-time) weight prep: fold eval-mode BN scale into the conv
    weights, reshape to per-tap (9, Cin, Cout) layout, cast to bf16."""
    Cin, P = params["w1"].shape[-2], params["w1"].shape[-1]
    pp = {
        "w1": (params["w1"] * params["s1"]).reshape(9, Cin, P).astype(jnp.bfloat16),
        "b1": params["b1"].reshape(1, P).astype(jnp.float32),
        "w2": (params["w2"] * params["s2"]).reshape(9, P, P).astype(jnp.bfloat16),
        "b2": params["b2"].reshape(1, P).astype(jnp.float32),
    }
    if "w_sc" in params:
        pp["w_sc"] = (params["w_sc"] * params["s_sc"]).astype(jnp.bfloat16)
        pp["b_sc"] = params["b_sc"].reshape(1, P).astype(jnp.float32)
    return pp


def basic_block_apply_nhwc(x_nhwc, pp):
    """NHWC entry point (use this when chaining blocks): bf16 NHWC in, f32 NHWC out."""
    N, H, W, Cin = x_nhwc.shape
    P = pp["b1"].shape[-1]
    x = x_nhwc.astype(jnp.bfloat16)

    in_specs = [
        pl.BlockSpec((1, H, W, Cin), lambda n: (n, 0, 0, 0)),
        pl.BlockSpec((9, Cin, P), lambda n: (0, 0, 0)),
        pl.BlockSpec((1, P), lambda n: (0, 0)),
        pl.BlockSpec((9, P, P), lambda n: (0, 0, 0)),
        pl.BlockSpec((1, P), lambda n: (0, 0)),
    ]
    args = [x, pp["w1"], pp["b1"], pp["w2"], pp["b2"]]

    if "w_sc" in pp:       # projection shortcut (1x1 conv + BN), fused in-kernel
        in_specs += [pl.BlockSpec((Cin, P), lambda n: (0, 0)),
                     pl.BlockSpec((1, P), lambda n: (0, 0))]
        args += [pp["w_sc"], pp["b_sc"]]
        kernel = functools.partial(_block_kernel_proj, H=H, W=W, Cin=Cin, P=P)
    else:                  # identity shortcut
        assert Cin == P, "identity shortcut requires in_planes == planes"
        kernel = functools.partial(_block_kernel_identity, H=H, W=W, Cin=Cin, P=P)

    # Explicit scoped-VMEM budget (double-buffered blocks + scratch + headroom).
    bf16, f32 = 2, 4
    est = (2 * H * W * Cin * bf16                      # input block x2
           + 2 * H * W * P * f32                       # output block x2
           + (H + 2) * (W + 2) * (Cin + P) * bf16      # padded scratch slabs
           + 2 * (9 * Cin * P + 9 * P * P + Cin * P) * bf16
           + 4 * H * W * P * f32)                      # accumulators / shortcut
    vmem_limit = int(min(max(2 * est, 32 << 20), 64 << 20))

    return pl.pallas_call(
        kernel,
        out_shape=jax.ShapeDtypeStruct((N, H, W, P), jnp.float32),
        grid=(N,),
        in_specs=in_specs,
        out_specs=pl.BlockSpec((1, H, W, P), lambda n: (n, 0, 0, 0)),
        scratch_shapes=[
            pltpu.VMEM((H + 2, W + 2, Cin), jnp.bfloat16),  # zero-padded input
            pltpu.VMEM((H + 2, W + 2, P), jnp.bfloat16),    # zero-padded relu(bn1(conv1))
        ],
        compiler_params=pltpu.CompilerParams(
            dimension_semantics=("parallel",),
            vmem_limit_bytes=vmem_limit),
    )(*args)


def basic_block_forward(x_nchw, prepped):
    """NCHW adapter matching the PyTorch module layout (test convenience only)."""
    x = jnp.transpose(x_nchw, (0, 2, 3, 1)).astype(jnp.bfloat16)
    out = basic_block_apply_nhwc(x, prepped)
    return jnp.transpose(out, (0, 3, 1, 2))


# --------------------------- pure-JAX reference ---------------------------- #

def ref_forward(x_nchw, params):
    """Pure-JAX reference with the same bf16-matmul / f32-accumulate policy."""
    x = jnp.transpose(x_nchw, (0, 2, 3, 1)).astype(jnp.bfloat16)
    dn = ("NHWC", "HWIO", "NHWC")
    w1 = (params["w1"] * params["s1"]).astype(jnp.bfloat16)
    w2 = (params["w2"] * params["s2"]).astype(jnp.bfloat16)
    out = jax.lax.conv_general_dilated(
        x, w1, (1, 1), "SAME", dimension_numbers=dn,
        preferred_element_type=jnp.float32) + params["b1"]
    out = jnp.maximum(out, 0.0).astype(jnp.bfloat16)
    out = jax.lax.conv_general_dilated(
        out, w2, (1, 1), "SAME", dimension_numbers=dn,
        preferred_element_type=jnp.float32) + params["b2"]
    if "w_sc" in params:
        wsc = (params["w_sc"] * params["s_sc"]).astype(jnp.bfloat16)
        sc = jnp.einsum("nhwc,co->nhwo", x, wsc,
                        preferred_element_type=jnp.float32) + params["b_sc"]
    else:
        sc = x.astype(jnp.float32)
    out = jnp.maximum(out + sc, 0.0)
    return jnp.transpose(out, (0, 3, 1, 2))


# --------------------------------- main ------------------------------------ #

def _fold_bn(gamma, beta, mean, var, eps=1e-5):
    scale = gamma / jnp.sqrt(var + eps)
    bias = beta - mean * scale
    return scale, bias


def _make_block_params(key, cin, planes, with_proj):
    ks = jax.random.split(key, 16)

    def fold(kg, kb, km, kv):
        gamma = jax.random.uniform(kg, (planes,), minval=0.5, maxval=1.5)
        beta = 0.1 * jax.random.normal(kb, (planes,))
        mean = 0.1 * jax.random.normal(km, (planes,))
        var = jax.random.uniform(kv, (planes,), minval=0.5, maxval=1.5)
        return _fold_bn(gamma, beta, mean, var)

    w1 = 0.1 * jax.random.normal(ks[0], (3, 3, cin, planes), jnp.float32)
    s1, b1 = fold(ks[1], ks[2], ks[3], ks[4])
    w2 = 0.1 * jax.random.normal(ks[5], (3, 3, planes, planes), jnp.float32)
    s2, b2 = fold(ks[6], ks[7], ks[8], ks[9])
    p = dict(w1=w1, s1=s1, b1=b1, w2=w2, s2=s2, b2=b2)
    if with_proj:
        w_sc = 0.1 * jax.random.normal(ks[10], (cin, planes), jnp.float32)
        s_sc, b_sc = fold(ks[11], ks[12], ks[13], ks[14])
        p.update(w_sc=w_sc, s_sc=s_sc, b_sc=b_sc)
    return p


if __name__ == "__main__":
    N, H, W = 2, 16, 16
    k1, k2, k3, k4 = jax.random.split(jax.random.PRNGKey(0), 4)

    # Case 1: in_planes != planes -> 1x1-conv + BN projection shortcut.
    x1 = jax.random.normal(k1, (N, 4, H, W), jnp.float32)
    p1 = _make_block_params(k2, 4, 8, with_proj=True)
    pp1 = prepare_block_params(p1)           # one-time, load-time weight prep
    out1 = jax.block_until_ready(basic_block_forward(x1, pp1))
    ref1 = jax.block_until_ready(ref_forward(x1, p1))
    assert out1.shape == (N, 8, H, W), out1.shape
    np.testing.assert_allclose(np.asarray(out1), np.asarray(ref1),
                               rtol=2e-2, atol=2e-2)

    # Case 2: in_planes == planes, stride=1 -> identity shortcut.
    x2 = jax.random.normal(k3, (N, 8, H, W), jnp.float32)
    p2 = _make_block_params(k4, 8, 8, with_proj=False)
    pp2 = prepare_block_params(p2)
    out2 = jax.block_until_ready(basic_block_forward(x2, pp2))
    ref2 = jax.block_until_ready(ref_forward(x2, p2))
    assert out2.shape == (N, 8, H, W), out2.shape
    np.testing.assert_allclose(np.asarray(out2), np.asarray(ref2),
                               rtol=2e-2, atol=2e-2)

    print("KERNEL_OK")
</pallas_src>

<mosaic_0001>
module attributes {stable_mosaic.version = 11 : i64} {
  func.func @_block_kernel_proj(%arg0: i32, %arg1: memref<1x16x16x4xbf16, #tpu.memory_space<vmem>>, %arg2: memref<9x4x8xbf16, #tpu.memory_space<vmem>>, %arg3: memref<1x8xf32, #tpu.memory_space<vmem>>, %arg4: memref<9x8x8xbf16, #tpu.memory_space<vmem>>, %arg5: memref<1x8xf32, #tpu.memory_space<vmem>>, %arg6: memref<4x8xbf16, #tpu.memory_space<vmem>>, %arg7: memref<1x8xf32, #tpu.memory_space<vmem>>, %arg8: memref<1x16x16x8xf32, #tpu.memory_space<vmem>>, %arg9: memref<18x18x4xbf16, #tpu.memory_space<vmem>>, %arg10: memref<18x18x8xbf16, #tpu.memory_space<vmem>>) attributes {dimension_semantics = [#tpu.dimension_semantics<parallel>], iteration_bounds = array<i64: 2>, scalar_prefetch = 0 : i64, scratch_operands = 2 : i64, tpu.core_type = #tpu.core_type<tc>, window_params = [{transform_indices = @transform_0, window_bounds = array<i64: 1, 16, 16, 4>}, {pipeline_mode = #tpu.pipeline_mode<synchronous>, transform_indices = @transform_1, window_bounds = array<i64: 9, 4, 8>}, {pipeline_mode = #tpu.pipeline_mode<synchronous>, transform_indices = @transform_2, window_bounds = array<i64: 1, 8>}, {pipeline_mode = #tpu.pipeline_mode<synchronous>, transform_indices = @transform_3, window_bounds = array<i64: 9, 8, 8>}, {pipeline_mode = #tpu.pipeline_mode<synchronous>, transform_indices = @transform_4, window_bounds = array<i64: 1, 8>}, {pipeline_mode = #tpu.pipeline_mode<synchronous>, transform_indices = @transform_5, window_bounds = array<i64: 4, 8>}, {pipeline_mode = #tpu.pipeline_mode<synchronous>, transform_indices = @transform_6, window_bounds = array<i64: 1, 8>}, {transform_indices = @transform_7, window_bounds = array<i64: 1, 16, 16, 8>}]} {
    %cst = arith.constant 0.000000e+00 : bf16
    %0 = vector.broadcast %cst : bf16 to vector<1x18x4xbf16>
    %c0 = arith.constant 0 : index
    %c0_0 = arith.constant 0 : index
    %c0_1 = arith.constant 0 : index
    %1 = vector.load %arg9[%c0, %c0_0, %c0_1] : memref<18x18x4xbf16, #tpu.memory_space<vmem>>, vector<1x18x4xbf16>
    tpu.vector_store %arg9[%c0, %c0_0, %c0_1], %0 {strides = array<i32>} : memref<18x18x4xbf16, #tpu.memory_space<vmem>>, vector<1x18x4xbf16>,
    %c17 = arith.constant 17 : index
    %c0_2 = arith.constant 0 : index
    %c0_3 = arith.constant 0 : index
    %2 = vector.load %arg9[%c17, %c0_2, %c0_3] : memref<18x18x4xbf16, #tpu.memory_space<vmem>>, vector<1x18x4xbf16>
    tpu.vector_store %arg9[%c17, %c0_2, %c0_3], %0 {strides = array<i32>} : memref<18x18x4xbf16, #tpu.memory_space<vmem>>, vector<1x18x4xbf16>,
    %cst_4 = arith.constant 0.000000e+00 : bf16
    %3 = vector.broadcast %cst_4 : bf16 to vector<18x1x4xbf16>
    %c0_5 = arith.constant 0 : index
    %c0_6 = arith.constant 0 : index
    %c0_7 = arith.constant 0 : index
    %4 = vector.load %arg9[%c0_5, %c0_6, %c0_7] : memref<18x18x4xbf16, #tpu.memory_space<vmem>>, vector<18x1x4xbf16>
    tpu.vector_store %arg9[%c0_5, %c0_6, %c0_7], %3 {strides = array<i32>} : memref<18x18x4xbf16, #tpu.memory_space<vmem>>, vector<18x1x4xbf16>,
    %c0_8 = arith.constant 0 : index
    %c17_9 = arith.constant 17 : index
    %c0_10 = arith.constant 0 : index
    %5 = vector.load %arg9[%c0_8, %c17_9, %c0_10] : memref<18x18x4xbf16, #tpu.memory_space<vmem>>, vector<18x1x4xbf16>
    tpu.vector_store %arg9[%c0_8, %c17_9, %c0_10], %3 {strides = array<i32>} : memref<18x18x4xbf16, #tpu.memory_space<vmem>>, vector<18x1x4xbf16>,
    %c0_11 = arith.constant 0 : index
    %c0_12 = arith.constant 0 : index
    %c0_13 = arith.constant 0 : index
    %c0_14 = arith.constant 0 : index
    %6 = vector.load %arg1[%c0_11, %c0_12, %c0_13, %c0_14] : memref<1x16x16x4xbf16, #tpu.memory_space<vmem>>, vector<1x16x16x4xbf16>
    %7 = vector.shape_cast %6 : vector<1x16x16x4xbf16> to vector<16x16x4xbf16>
    %c1 = arith.constant 1 : index
    %c1_15 = arith.constant 1 : index
    %c0_16 = arith.constant 0 : index
    %8 = vector.load %arg9[%c1, %c1_15, %c0_16] : memref<18x18x4xbf16, #tpu.memory_space<vmem>>, vector<16x16x4xbf16>
    tpu.vector_store %arg9[%c1, %c1_15, %c0_16], %7 {strides = array<i32>} : memref<18x18x4xbf16, #tpu.memory_space<vmem>>, vector<16x16x4xbf16>,
    %c0_17 = arith.constant 0 : index
    %c0_18 = arith.constant 0 : index
    %9 = vector.load %arg3[%c0_17, %c0_18] : memref<1x8xf32, #tpu.memory_space<vmem>>, vector<1x8xf32>
    %10 = vector.shape_cast %9 : vector<1x8xf32> to vector<8xf32>
    %11 = vector.shape_cast %10 : vector<8xf32> to vector<1x8xf32>
    %12 = vector.broadcast %11 : vector<1x8xf32> to vector<256x8xf32>
    %c0_19 = arith.constant 0 : index
    %c0_20 = arith.constant 0 : index
    %c0_21 = arith.constant 0 : index
    %13 = vector.load %arg9[%c0_19, %c0_20, %c0_21] : memref<18x18x4xbf16, #tpu.memory_space<vmem>>, vector<16x16x4xbf16>
    %14 = vector.shape_cast %13 : vector<16x16x4xbf16> to vector<256x4xbf16>
    %c0_22 = arith.constant 0 : index
    %c0_23 = arith.constant 0 : index
    %c0_24 = arith.constant 0 : index
    %15 = vector.load %arg2[%c0_22, %c0_23, %c0_24] : memref<9x4x8xbf16, #tpu.memory_space<vmem>>, vector<1x4x8xbf16>
    %16 = vector.shape_cast %15 : vector<1x4x8xbf16> to vector<4x8xbf16>
    %cst_25 = arith.constant dense<0.000000e+00> : vector<256x8xf32>
    %17 = tpu.matmul %14, %16, %cst_25 {dimension_numbers = #tpu.dot_dimension_numbers<[1], [0], [0], [1], [0, 0, 1, 1], [], []>} : vector<256x4xbf16>, vector<4x8xbf16>, vector<256x8xf32> -> vector<256x8xf32>
    %18 = arith.addf %12, %17 : vector<256x8xf32>
    %c0_26 = arith.constant 0 : index
    %c1_27 = arith.constant 1 : index
    %c0_28 = arith.constant 0 : index
    %19 = vector.load %arg9[%c0_26, %c1_27, %c0_28] : memref<18x18x4xbf16, #tpu.memory_space<vmem>>, vector<16x16x4xbf16>
    %20 = vector.shape_cast %19 : vector<16x16x4xbf16> to vector<256x4xbf16>
    %c1_29 = arith.constant 1 : index
    %c0_30 = arith.constant 0 : index
    %c0_31 = arith.constant 0 : index
    %21 = vector.load %arg2[%c1_29, %c0_30, %c0_31] : memref<9x4x8xbf16, #tpu.memory_space<vmem>>, vector<1x4x8xbf16>
    %22 = vector.shape_cast %21 : vector<1x4x8xbf16> to vector<4x8xbf16>
    %cst_32 = arith.constant dense<0.000000e+00> : vector<256x8xf32>
    %23 = tpu.matmul %20, %22, %cst_32 {dimension_numbers = #tpu.dot_dimension_numbers<[1], [0], [0], [1], [0, 0, 1, 1], [], []>} : vector<256x4xbf16>, vector<4x8xbf16>, vector<256x8xf32> -> vector<256x8xf32>
    %24 = arith.addf %18, %23 : vector<256x8xf32>
    %c0_33 = arith.constant 0 : index
    %c2 = arith.constant 2 : index
    %c0_34 = arith.constant 0 : index
    %25 = vector.load %arg9[%c0_33, %c2, %c0_34] : memref<18x18x4xbf16, #tpu.memory_space<vmem>>, vector<16x16x4xbf16>
    %26 = vector.shape_cast %25 : vector<16x16x4xbf16> to vector<256x4xbf16>
    %c2_35 = arith.constant 2 : index
    %c0_36 = arith.constant 0 : index
    %c0_37 = arith.constant 0 : index
    %27 = vector.load %arg2[%c2_35, %c0_36, %c0_37] : memref<9x4x8xbf16, #tpu.memory_space<vmem>>, vector<1x4x8xbf16>
    %28 = vector.shape_cast %27 : vector<1x4x8xbf16> to vector<4x8xbf16>
    %cst_38 = arith.constant dense<0.000000e+00> : vector<256x8xf32>
    %29 = tpu.matmul %26, %28, %cst_38 {dimension_numbers = #tpu.dot_dimension_numbers<[1], [0], [0], [1], [0, 0, 1, 1], [], []>} : vector<256x4xbf16>, vector<4x8xbf16>, vector<256x8xf32> -> vector<256x8xf32>
    %30 = arith.addf %24, %29 : vector<256x8xf32>
    %c1_39 = arith.constant 1 : index
    %c0_40 = arith.constant 0 : index
    %c0_41 = arith.constant 0 : index
    %31 = vector.load %arg9[%c1_39, %c0_40, %c0_41] : memref<18x18x4xbf16, #tpu.memory_space<vmem>>, vector<16x16x4xbf16>
    %32 = vector.shape_cast %31 : vector<16x16x4xbf16> to vector<256x4xbf16>
    %c3 = arith.constant 3 : index
    %c0_42 = arith.constant 0 : index
    %c0_43 = arith.constant 0 : index
    %33 = vector.load %arg2[%c3, %c0_42, %c0_43] : memref<9x4x8xbf16, #tpu.memory_space<vmem>>, vector<1x4x8xbf16>
    %34 = vector.shape_cast %33 : vector<1x4x8xbf16> to vector<4x8xbf16>
    %cst_44 = arith.constant dense<0.000000e+00> : vector<256x8xf32>
    %35 = tpu.matmul %32, %34, %cst_44 {dimension_numbers = #tpu.dot_dimension_numbers<[1], [0], [0], [1], [0, 0, 1, 1], [], []>} : vector<256x4xbf16>, vector<4x8xbf16>, vector<256x8xf32> -> vector<256x8xf32>
    %36 = arith.addf %30, %35 : vector<256x8xf32>
    %c1_45 = arith.constant 1 : index
    %c1_46 = arith.constant 1 : index
    %c0_47 = arith.constant 0 : index
    %37 = vector.load %arg9[%c1_45, %c1_46, %c0_47] : memref<18x18x4xbf16, #tpu.memory_space<vmem>>, vector<16x16x4xbf16>
    %38 = vector.shape_cast %37 : vector<16x16x4xbf16> to vector<256x4xbf16>
    %c4 = arith.constant 4 : index
    %c0_48 = arith.constant 0 : index
    %c0_49 = arith.constant 0 : index
    %39 = vector.load %arg2[%c4, %c0_48, %c0_49] : memref<9x4x8xbf16, #tpu.memory_space<vmem>>, vector<1x4x8xbf16>
    %40 = vector.shape_cast %39 : vector<1x4x8xbf16> to vector<4x8xbf16>
    %cst_50 = arith.constant dense<0.000000e+00> : vector<256x8xf32>
    %41 = tpu.matmul %38, %40, %cst_50 {dimension_numbers = #tpu.dot_dimension_numbers<[1], [0], [0], [1], [0, 0, 1, 1], [], []>} : vector<256x4xbf16>, vector<4x8xbf16>, vector<256x8xf32> -> vector<256x8xf32>
    %42 = arith.addf %36, %41 : vector<256x8xf32>
    %c1_51 = arith.constant 1 : index
    %c2_52 = arith.constant 2 : index
    %c0_53 = arith.constant 0 : index
    %43 = vector.load %arg9[%c1_51, %c2_52, %c0_53] : memref<18x18x4xbf16, #tpu.memory_space<vmem>>, vector<16x16x4xbf16>
    %44 = vector.shape_cast %43 : vector<16x16x4xbf16> to vector<256x4xbf16>
    %c5 = arith.constant 5 : index
    %c0_54 = arith.constant 0 : index
    %c0_55 = arith.constant 0 : index
    %45 = vector.load %arg2[%c5, %c0_54, %c0_55] : memref<9x4x8xbf16, #tpu.memory_space<vmem>>, vector<1x4x8xbf16>
    %46 = vector.shape_cast %45 : vector<1x4x8xbf16> to vector<4x8xbf16>
    %cst_56 = arith.constant dense<0.000000e+00> : vector<256x8xf32>
    %47 = tpu.matmul %44, %46, %cst_56 {dimension_numbers = #tpu.dot_dimension_numbers<[1], [0], [0], [1], [0, 0, 1, 1], [], []>} : vector<256x4xbf16>, vector<4x8xbf16>, vector<256x8xf32> -> vector<256x8xf32>
    %48 = arith.addf %42, %47 : vector<256x8xf32>
    %c2_57 = arith.constant 2 : index
    %c0_58 = arith.constant 0 : index
    %c0_59 = arith.constant 0 : index
    %49 = vector.load %arg9[%c2_57, %c0_58, %c0_59] : memref<18x18x4xbf16, #tpu.memory_space<vmem>>, vector<16x16x4xbf16>
    %50 = vector.shape_cast %49 : vector<16x16x4xbf16> to vector<256x4xbf16>
    %c6 = arith.constant 6 : index
    %c0_60 = arith.constant 0 : index
    %c0_61 = arith.constant 0 : index
    %51 = vector.load %arg2[%c6, %c0_60, %c0_61] : memref<9x4x8xbf16, #tpu.memory_space<vmem>>, vector<1x4x8xbf16>
    %52 = vector.shape_cast %51 : vector<1x4x8xbf16> to vector<4x8xbf16>
    %cst_62 = arith.constant dense<0.000000e+00> : vector<256x8xf32>
    %53 = tpu.matmul %50, %52, %cst_62 {dimension_numbers = #tpu.dot_dimension_numbers<[1], [0], [0], [1], [0, 0, 1, 1], [], []>} : vector<256x4xbf16>, vector<4x8xbf16>, vector<256x8xf32> -> vector<256x8xf32>
    %54 = arith.addf %48, %53 : vector<256x8xf32>
    %c2_63 = arith.constant 2 : index
    %c1_64 = arith.constant 1 : index
    %c0_65 = arith.constant 0 : index
    %55 = vector.load %arg9[%c2_63, %c1_64, %c0_65] : memref<18x18x4xbf16, #tpu.memory_space<vmem>>, vector<16x16x4xbf16>
    %56 = vector.shape_cast %55 : vector<16x16x4xbf16> to vector<256x4xbf16>
    %c7 = arith.constant 7 : index
    %c0_66 = arith.constant 0 : index
    %c0_67 = arith.constant 0 : index
    %57 = vector.load %arg2[%c7, %c0_66, %c0_67] : memref<9x4x8xbf16, #tpu.memory_space<vmem>>, vector<1x4x8xbf16>
    %58 = vector.shape_cast %57 : vector<1x4x8xbf16> to vector<4x8xbf16>
    %cst_68 = arith.constant dense<0.000000e+00> : vector<256x8xf32>
    %59 = tpu.matmul %56, %58, %cst_68 {dimension_numbers = #tpu.dot_dimension_numbers<[1], [0], [0], [1], [0, 0, 1, 1], [], []>} : vector<256x4xbf16>, vector<4x8xbf16>, vector<256x8xf32> -> vector<256x8xf32>
    %60 = arith.addf %54, %59 : vector<256x8xf32>
    %c2_69 = arith.constant 2 : index
    %c2_70 = arith.constant 2 : index
    %c0_71 = arith.constant 0 : index
    %61 = vector.load %arg9[%c2_69, %c2_70, %c0_71] : memref<18x18x4xbf16, #tpu.memory_space<vmem>>, vector<16x16x4xbf16>
    %62 = vector.shape_cast %61 : vector<16x16x4xbf16> to vector<256x4xbf16>
    %c8 = arith.constant 8 : index
    %c0_72 = arith.constant 0 : index
    %c0_73 = arith.constant 0 : index
    %63 = vector.load %arg2[%c8, %c0_72, %c0_73] : memref<9x4x8xbf16, #tpu.memory_space<vmem>>, vector<1x4x8xbf16>
    %64 = vector.shape_cast %63 : vector<1x4x8xbf16> to vector<4x8xbf16>
    %cst_74 = arith.constant dense<0.000000e+00> : vector<256x8xf32>
    %65 = tpu.matmul %62, %64, %cst_74 {dimension_numbers = #tpu.dot_dimension_numbers<[1], [0], [0], [1], [0, 0, 1, 1], [], []>} : vector<256x4xbf16>, vector<4x8xbf16>, vector<256x8xf32> -> vector<256x8xf32>
    %66 = arith.addf %60, %65 : vector<256x8xf32>
    %cst_75 = arith.constant 0.000000e+00 : f32
    %67 = vector.broadcast %cst_75 : f32 to vector<256x8xf32>
    %68 = arith.maximumf %66, %67 : vector<256x8xf32>
    %cst_76 = arith.constant 0.000000e+00 : bf16
    %69 = vector.broadcast %cst_76 : bf16 to vector<1x18x8xbf16>
    %c0_77 = arith.constant 0 : index
    %c0_78 = arith.constant 0 : index
    %c0_79 = arith.constant 0 : index
    %70 = vector.load %arg10[%c0_77, %c0_78, %c0_79] : memref<18x18x8xbf16, #tpu.memory_space<vmem>>, vector<1x18x8xbf16>
    tpu.vector_store %arg10[%c0_77, %c0_78, %c0_79], %69 {strides = array<i32>} : memref<18x18x8xbf16, #tpu.memory_space<vmem>>, vector<1x18x8xbf16>,
    %c17_80 = arith.constant 17 : index
    %c0_81 = arith.constant 0 : index
    %c0_82 = arith.constant 0 : index
    %71 = vector.load %arg10[%c17_80, %c0_81, %c0_82] : memref<18x18x8xbf16, #tpu.memory_space<vmem>>, vector<1x18x8xbf16>
    tpu.vector_store %arg10[%c17_80, %c0_81, %c0_82], %69 {strides = array<i32>} : memref<18x18x8xbf16, #tpu.memory_space<vmem>>, vector<1x18x8xbf16>,
    %cst_83 = arith.constant 0.000000e+00 : bf16
    %72 = vector.broadcast %cst_83 : bf16 to vector<18x1x8xbf16>
    %c0_84 = arith.constant 0 : index
    %c0_85 = arith.constant 0 : index
    %c0_86 = arith.constant 0 : index
    %73 = vector.load %arg10[%c0_84, %c0_85, %c0_86] : memref<18x18x8xbf16, #tpu.memory_space<vmem>>, vector<18x1x8xbf16>
    tpu.vector_store %arg10[%c0_84, %c0_85, %c0_86], %72 {strides = array<i32>} : memref<18x18x8xbf16, #tpu.memory_space<vmem>>, vector<18x1x8xbf16>,
    %c0_87 = arith.constant 0 : index
    %c17_88 = arith.constant 17 : index
    %c0_89 = arith.constant 0 : index
    %74 = vector.load %arg10[%c0_87, %c17_88, %c0_89] : memref<18x18x8xbf16, #tpu.memory_space<vmem>>, vector<18x1x8xbf16>
    tpu.vector_store %arg10[%c0_87, %c17_88, %c0_89], %72 {strides = array<i32>} : memref<18x18x8xbf16, #tpu.memory_space<vmem>>, vector<18x1x8xbf16>,
    %75 = vector.shape_cast %68 : vector<256x8xf32> to vector<16x16x8xf32>
    %76 = arith.truncf %75 : vector<16x16x8xf32> to vector<16x16x8xbf16>
    %c1_90 = arith.constant 1 : index
    %c1_91 = arith.constant 1 : index
    %c0_92 = arith.constant 0 : index
    %77 = vector.load %arg10[%c1_90, %c1_91, %c0_92] : memref<18x18x8xbf16, #tpu.memory_space<vmem>>, vector<16x16x8xbf16>
    tpu.vector_store %arg10[%c1_90, %c1_91, %c0_92], %76 {strides = array<i32>} : memref<18x18x8xbf16, #tpu.memory_space<vmem>>, vector<16x16x8xbf16>,
    %c0_93 = arith.constant 0 : index
    %c0_94 = arith.constant 0 : index
    %78 = vector.load %arg5[%c0_93, %c0_94] : memref<1x8xf32, #tpu.memory_space<vmem>>, vector<1x8xf32>
    %79 = vector.shape_cast %78 : vector<1x8xf32> to vector<8xf32>
    %80 = vector.shape_cast %79 : vector<8xf32> to vector<1x8xf32>
    %81 = vector.broadcast %80 : vector<1x8xf32> to vector<256x8xf32>
    %c0_95 = arith.constant 0 : index
    %c0_96 = arith.constant 0 : index
    %c0_97 = arith.constant 0 : index
    %82 = vector.load %arg10[%c0_95, %c0_96, %c0_97] : memref<18x18x8xbf16, #tpu.memory_space<vmem>>, vector<16x16x8xbf16>
    %83 = vector.shape_cast %82 : vector<16x16x8xbf16> to vector<256x8xbf16>
    %c0_98 = arith.constant 0 : index
    %c0_99 = arith.constant 0 : index
    %c0_100 = arith.constant 0 : index
    %84 = vector.load %arg4[%c0_98, %c0_99, %c0_100] : memref<9x8x8xbf16, #tpu.memory_space<vmem>>, vector<1x8x8xbf16>
    %85 = vector.shape_cast %84 : vector<1x8x8xbf16> to vector<8x8xbf16>
    %cst_101 = arith.constant dense<0.000000e+00> : vector<256x8xf32>
    %86 = tpu.matmul %83, %85, %cst_101 {dimension_numbers = #tpu.dot_dimension_numbers<[1], [0], [0], [1], [0, 0, 1, 1], [], []>} : vector<256x8xbf16>, vector<8x8xbf16>, vector<256x8xf32> -> vector<256x8xf32>
    %87 = arith.addf %81, %86 : vector<256x8xf32>
    %c0_102 = arith.constant 0 : index
    %c1_103 = arith.constant 1 : index
    %c0_104 = arith.constant 0 : index
    %88 = vector.load %arg10[%c0_102, %c1_103, %c0_104] : memref<18x18x8xbf16, #tpu.memory_space<vmem>>, vector<16x16x8xbf16>
    %89 = vector.shape_cast %88 : vector<16x16x8xbf16> to vector<256x8xbf16>
    %c1_105 = arith.constant 1 : index
    %c0_106 = arith.constant 0 : index
    %c0_107 = arith.constant 0 : index
    %90 = vector.load %arg4[%c1_105, %c0_106, %c0_107] : memref<9x8x8xbf16, #tpu.memory_space<vmem>>, vector<1x8x8xbf16>
    %91 = vector.shape_cast %90 : vector<1x8x8xbf16> to vector<8x8xbf16>
    %cst_108 = arith.constant dense<0.000000e+00> : vector<256x8xf32>
    %92 = tpu.matmul %89, %91, %cst_108 {dimension_numbers = #tpu.dot_dimension_numbers<[1], [0], [0], [1], [0, 0, 1, 1], [], []>} : vector<256x8xbf16>, vector<8x8xbf16>, vector<256x8xf32> -> vector<256x8xf32>
    %93 = arith.addf %87, %92 : vector<256x8xf32>
    %c0_109 = arith.constant 0 : index
    %c2_110 = arith.constant 2 : index
    %c0_111 = arith.constant 0 : index
    %94 = vector.load %arg10[%c0_109, %c2_110, %c0_111] : memref<18x18x8xbf16, #tpu.memory_space<vmem>>, vector<16x16x8xbf16>
    %95 = vector.shape_cast %94 : vector<16x16x8xbf16> to vector<256x8xbf16>
    %c2_112 = arith.constant 2 : index
    %c0_113 = arith.constant 0 : index
    %c0_114 = arith.constant 0 : index
    %96 = vector.load %arg4[%c2_112, %c0_113, %c0_114] : memref<9x8x8xbf16, #tpu.memory_space<vmem>>, vector<1x8x8xbf16>
    %97 = vector.shape_cast %96 : vector<1x8x8xbf16> to vector<8x8xbf16>
    %cst_115 = arith.constant dense<0.000000e+00> : vector<256x8xf32>
    %98 = tpu.matmul %95, %97, %cst_115 {dimension_numbers = #tpu.dot_dimension_numbers<[1], [0], [0], [1], [0, 0, 1, 1], [], []>} : vector<256x8xbf16>, vector<8x8xbf16>, vector<256x8xf32> -> vector<256x8xf32>
    %99 = arith.addf %93, %98 : vector<256x8xf32>
    %c1_116 = arith.constant 1 : index
    %c0_117 = arith.constant 0 : index
    %c0_118 = arith.constant 0 : index
    %100 = vector.load %arg10[%c1_116, %c0_117, %c0_118] : memref<18x18x8xbf16, #tpu.memory_space<vmem>>, vector<16x16x8xbf16>
    %101 = vector.shape_cast %100 : vector<16x16x8xbf16> to vector<256x8xbf16>
    %c3_119 = arith.constant 3 : index
    %c0_120 = arith.constant 0 : index
    %c0_121 = arith.constant 0 : index
    %102 = vector.load %arg4[%c3_119, %c0_120, %c0_121] : memref<9x8x8xbf16, #tpu.memory_space<vmem>>, vector<1x8x8xbf16>
    %103 = vector.shape_cast %102 : vector<1x8x8xbf16> to vector<8x8xbf16>
    %cst_122 = arith.constant dense<0.000000e+00> : vector<256x8xf32>
    %104 = tpu.matmul %101, %103, %cst_122 {dimension_numbers = #tpu.dot_dimension_numbers<[1], [0], [0], [1], [0, 0, 1, 1], [], []>} : vector<256x8xbf16>, vector<8x8xbf16>, vector<256x8xf32> -> vector<256x8xf32>
    %105 = arith.addf %99, %104 : vector<256x8xf32>
    %c1_123 = arith.constant 1 : index
    %c1_124 = arith.constant 1 : index
    %c0_125 = arith.constant 0 : index
    %106 = vector.load %arg10[%c1_123, %c1_124, %c0_125] : memref<18x18x8xbf16, #tpu.memory_space<vmem>>, vector<16x16x8xbf16>
    %107 = vector.shape_cast %106 : vector<16x16x8xbf16> to vector<256x8xbf16>
    %c4_126 = arith.constant 4 : index
    %c0_127 = arith.constant 0 : index
    %c0_128 = arith.constant 0 : index
    %108 = vector.load %arg4[%c4_126, %c0_127, %c0_128] : memref<9x8x8xbf16, #tpu.memory_space<vmem>>, vector<1x8x8xbf16>
    %109 = vector.shape_cast %108 : vector<1x8x8xbf16> to vector<8x8xbf16>
    %cst_129 = arith.constant dense<0.000000e+00> : vector<256x8xf32>
    %110 = tpu.matmul %107, %109, %cst_129 {dimension_numbers = #tpu.dot_dimension_numbers<[1], [0], [0], [1], [0, 0, 1, 1], [], []>} : vector<256x8xbf16>, vector<8x8xbf16>, vector<256x8xf32> -> vector<256x8xf32>
    %111 = arith.addf %105, %110 : vector<256x8xf32>
    %c1_130 = arith.constant 1 : index
    %c2_131 = arith.constant 2 : index
    %c0_132 = arith.constant 0 : index
    %112 = vector.load %arg10[%c1_130, %c2_131, %c0_132] : memref<18x18x8xbf16, #tpu.memory_space<vmem>>, vector<16x16x8xbf16>
    %113 = vector.shape_cast %112 : vector<16x16x8xbf16> to vector<256x8xbf16>
    %c5_133 = arith.constant 5 : index
    %c0_134 = arith.constant 0 : index
    %c0_135 = arith.constant 0 : index
    %114 = vector.load %arg4[%c5_133, %c0_134, %c0_135] : memref<9x8x8xbf16, #tpu.memory_space<vmem>>, vector<1x8x8xbf16>
    %115 = vector.shape_cast %114 : vector<1x8x8xbf16> to vector<8x8xbf16>
    %cst_136 = arith.constant dense<0.000000e+00> : vector<256x8xf32>
    %116 = tpu.matmul %113, %115, %cst_136 {dimension_numbers = #tpu.dot_dimension_numbers<[1], [0], [0], [1], [0, 0, 1, 1], [], []>} : vector<256x8xbf16>, vector<8x8xbf16>, vector<256x8xf32> -> vector<256x8xf32>
    %117 = arith.addf %111, %116 : vector<256x8xf32>
    %c2_137 = arith.constant 2 : index
    %c0_138 = arith.constant 0 : index
    %c0_139 = arith.constant 0 : index
    %118 = vector.load %arg10[%c2_137, %c0_138, %c0_139] : memref<18x18x8xbf16, #tpu.memory_space<vmem>>, vector<16x16x8xbf16>
    %119 = vector.shape_cast %118 : vector<16x16x8xbf16> to vector<256x8xbf16>
    %c6_140 = arith.constant 6 : index
    %c0_141 = arith.constant 0 : index
    %c0_142 = arith.constant 0 : index
    %120 = vector.load %arg4[%c6_140, %c0_141, %c0_142] : memref<9x8x8xbf16, #tpu.memory_space<vmem>>, vector<1x8x8xbf16>
    %121 = vector.shape_cast %120 : vector<1x8x8xbf16> to vector<8x8xbf16>
    %cst_143 = arith.constant dense<0.000000e+00> : vector<256x8xf32>
    %122 = tpu.matmul %119, %121, %cst_143 {dimension_numbers = #tpu.dot_dimension_numbers<[1], [0], [0], [1], [0, 0, 1, 1], [], []>} : vector<256x8xbf16>, vector<8x8xbf16>, vector<256x8xf32> -> vector<256x8xf32>
    %123 = arith.addf %117, %122 : vector<256x8xf32>
    %c2_144 = arith.constant 2 : index
    %c1_145 = arith.constant 1 : index
    %c0_146 = arith.constant 0 : index
    %124 = vector.load %arg10[%c2_144, %c1_145, %c0_146] : memref<18x18x8xbf16, #tpu.memory_space<vmem>>, vector<16x16x8xbf16>
    %125 = vector.shape_cast %124 : vector<16x16x8xbf16> to vector<256x8xbf16>
    %c7_147 = arith.constant 7 : index
    %c0_148 = arith.constant 0 : index
    %c0_149 = arith.constant 0 : index
    %126 = vector.load %arg4[%c7_147, %c0_148, %c0_149] : memref<9x8x8xbf16, #tpu.memory_space<vmem>>, vector<1x8x8xbf16>
    %127 = vector.shape_cast %126 : vector<1x8x8xbf16> to vector<8x8xbf16>
    %cst_150 = arith.constant dense<0.000000e+00> : vector<256x8xf32>
    %128 = tpu.matmul %125, %127, %cst_150 {dimension_numbers = #tpu.dot_dimension_numbers<[1], [0], [0], [1], [0, 0, 1, 1], [], []>} : vector<256x8xbf16>, vector<8x8xbf16>, vector<256x8xf32> -> vector<256x8xf32>
    %129 = arith.addf %123, %128 : vector<256x8xf32>
    %c2_151 = arith.constant 2 : index
    %c2_152 = arith.constant 2 : index
    %c0_153 = arith.constant 0 : index
    %130 = vector.load %arg10[%c2_151, %c2_152, %c0_153] : memref<18x18x8xbf16, #tpu.memory_space<vmem>>, vector<16x16x8xbf16>
    %131 = vector.shape_cast %130 : vector<16x16x8xbf16> to vector<256x8xbf16>
    %c8_154 = arith.constant 8 : index
    %c0_155 = arith.constant 0 : index
    %c0_156 = arith.constant 0 : index
    %132 = vector.load %arg4[%c8_154, %c0_155, %c0_156] : memref<9x8x8xbf16, #tpu.memory_space<vmem>>, vector<1x8x8xbf16>
    %133 = vector.shape_cast %132 : vector<1x8x8xbf16> to vector<8x8xbf16>
    %cst_157 = arith.constant dense<0.000000e+00> : vector<256x8xf32>
    %134 = tpu.matmul %131, %133, %cst_157 {dimension_numbers = #tpu.dot_dimension_numbers<[1], [0], [0], [1], [0, 0, 1, 1], [], []>} : vector<256x8xbf16>, vector<8x8xbf16>, vector<256x8xf32> -> vector<256x8xf32>
    %135 = arith.addf %129, %134 : vector<256x8xf32>
    %c0_158 = arith.constant 0 : index
    %c0_159 = arith.constant 0 : index
    %c0_160 = arith.constant 0 : index
    %c0_161 = arith.constant 0 : index
    %136 = vector.load %arg1[%c0_158, %c0_159, %c0_160, %c0_161] : memref<1x16x16x4xbf16, #tpu.memory_space<vmem>>, vector<1x16x16x4xbf16>
    %137 = vector.shape_cast %136 : vector<1x16x16x4xbf16> to vector<16x16x4xbf16>
    %138 = vector.shape_cast %137 : vector<16x16x4xbf16> to vector<256x4xbf16>
    %c0_162 = arith.constant 0 : index
    %c0_163 = arith.constant 0 : index
    %139 = vector.load %arg6[%c0_162, %c0_163] : memref<4x8xbf16, #tpu.memory_space<vmem>>, vector<4x8xbf16>
    %cst_164 = arith.constant dense<0.000000e+00> : vector<256x8xf32>
    %140 = tpu.matmul %138, %139, %cst_164 {dimension_numbers = #tpu.dot_dimension_numbers<[1], [0], [0], [1], [0, 0, 1, 1], [], []>} : vector<256x4xbf16>, vector<4x8xbf16>, vector<256x8xf32> -> vector<256x8xf32>
    %c0_165 = arith.constant 0 : index
    %c0_166 = arith.constant 0 : index
    %141 = vector.load %arg7[%c0_165, %c0_166] : memref<1x8xf32, #tpu.memory_space<vmem>>, vector<1x8xf32>
    %142 = vector.shape_cast %141 : vector<1x8xf32> to vector<8xf32>
    %143 = vector.shape_cast %142 : vector<8xf32> to vector<1x8xf32>
    %144 = vector.broadcast %143 : vector<1x8xf32> to vector<256x8xf32>
    %145 = arith.addf %140, %144 : vector<256x8xf32>
    %146 = arith.addf %135, %145 : vector<256x8xf32>
    %cst_167 = arith.constant 0.000000e+00 : f32
    %147 = vector.broadcast %cst_167 : f32 to vector<256x8xf32>
    %148 = arith.maximumf %146, %147 : vector<256x8xf32>
    %149 = vector.shape_cast %148 : vector<256x8xf32> to vector<1x16x16x8xf32>
    %c0_168 = arith.constant 0 : index
    %c0_169 = arith.constant 0 : index
    %c0_170 = arith.constant 0 : index
    %c0_171 = arith.constant 0 : index
    %150 = vector.load %arg8[%c0_168, %c0_169, %c0_170, %c0_171] : memref<1x16x16x8xf32, #tpu.memory_space<vmem>>, vector<1x16x16x8xf32>
    tpu.vector_store %arg8[%c0_168, %c0_169, %c0_170, %c0_171], %149 {strides = array<i32>} : memref<1x16x16x8xf32, #tpu.memory_space<vmem>>, vector<1x16x16x8xf32>,
    return
  }
  func.func @transform_0(%arg0: i32) -> (i32, i32, i32, i32) {
    %c0_i32 = arith.constant 0 : i32
    %c0_i32_0 = arith.constant 0 : i32
    %c0_i32_1 = arith.constant 0 : i32
    %c0_i32_2 = arith.constant 0 : i32
    return %arg0, %c0_i32, %c0_i32_0, %c0_i32_1 : i32, i32, i32, i32
  }
  func.func @transform_1(%arg0: i32) -> (i32, i32, i32) {
    %c0_i32 = arith.constant 0 : i32
    %c0_i32_0 = arith.constant 0 : i32
    %c0_i32_1 = arith.constant 0 : i32
    %c0_i32_2 = arith.constant 0 : i32
    return %c0_i32, %c0_i32_0, %c0_i32_1 : i32, i32, i32
  }
  func.func @transform_2(%arg0: i32) -> (i32, i32) {
    %c0_i32 = arith.constant 0 : i32
    %c0_i32_0 = arith.constant 0 : i32
    %c0_i32_1 = arith.constant 0 : i32
    return %c0_i32, %c0_i32_0 : i32, i32
  }
  func.func @transform_3(%arg0: i32) -> (i32, i32, i32) {
    %c0_i32 = arith.constant 0 : i32
    %c0_i32_0 = arith.constant 0 : i32
    %c0_i32_1 = arith.constant 0 : i32
    %c0_i32_2 = arith.constant 0 : i32
    return %c0_i32, %c0_i32_0, %c0_i32_1 : i32, i32, i32
  }
  func.func @transform_4(%arg0: i32) -> (i32, i32) {
    %c0_i32 = arith.constant 0 : i32
    %c0_i32_0 = arith.constant 0 : i32
    %c0_i32_1 = arith.constant 0 : i32
    return %c0_i32, %c0_i32_0 : i32, i32
  }
  func.func @transform_5(%arg0: i32) -> (i32, i32) {
    %c0_i32 = arith.constant 0 : i32
    %c0_i32_0 = arith.constant 0 : i32
    %c0_i32_1 = arith.constant 0 : i32
    return %c0_i32, %c0_i32_0 : i32, i32
  }
  func.func @transform_6(%arg0: i32) -> (i32, i32) {
    %c0_i32 = arith.constant 0 : i32
    %c0_i32_0 = arith.constant 0 : i32
    %c0_i32_1 = arith.constant 0 : i32
    return %c0_i32, %c0_i32_0 : i32, i32
  }
  func.func @transform_7(%arg0: i32) -> (i32, i32, i32, i32) {
    %c0_i32 = arith.constant 0 : i32
    %c0_i32_0 = arith.constant 0 : i32
    %c0_i32_1 = arith.constant 0 : i32
    %c0_i32_2 = arith.constant 0 : i32
    return %arg0, %c0_i32, %c0_i32_0, %c0_i32_1 : i32, i32, i32, i32
  }
}

</mosaic_0001>

<bundles_post_ra>
// kernel: tpu_custom_call.1
= control target key start
LH: loop header
LB: loop body
LE: loop exit
PB: predicated region body
PF: predicated region fallthrough
CT: control target
= control target key end

     0   :  { %s13988_s24 = smov 0   ;;  %s18086_s0 = inlined_call_operand.vmem [shape: bf16[2,16,16,4], index: 0, kind: input, shape index: {}]   ;;  %s18087_s1 = inlined_call_operand.vmem [shape: bf16[9,4,8], index: 1, kind: input, shape index: {}]   ;;  %s18088_s2 = inlined_call_operand.vmem [shape: f32[1,8], index: 2, kind: input, shape index: {}]   ;;  %s18089_s3 = inlined_call_operand.vmem [shape: bf16[9,8,8], index: 3, kind: input, shape index: {}]   ;;  %s18090_s4 = inlined_call_operand.vmem [shape: f32[1,8], index: 4, kind: input, shape index: {}]   ;;  %s18091_s5 = inlined_call_operand.vmem [shape: bf16[4,8], index: 5, kind: input, shape index: {}]   ;;  %s18092_s6 = inlined_call_operand.vmem [shape: f32[1,8], index: 6, kind: input, shape index: {}]   ;;  %s18093_s7 = inlined_call_operand.vmem [shape: f32[2,16,16,8], index: 7, kind: output, shape index: {}]  }
   0x1 LB: > { %s11385_s25 = sadd.s32 4294967295, %s13945_s24   ;;  %p11389_p0 = scmp.ge.s32.totalorder %s13945_s24, 1  ;;  %s13945_s24 = sphi %s13988_s24, %s17_s24  }
   0x2   : > { %p237_p1 = scmp.lt.s32.totalorder %s13945_s24, 3 }
   0x4   : > { %p238_p2 = pnand %p11389_p0, %p237_p1 }
   0x6   : > { %241 = sbr.rel (%p238_p2) target bundleno = 1678 (0x68e), region = 48 }
   0xd   : > { %v910_v0 = vld [vmem:[%s18087_s1] sm:$0x3]  ;;  %vm1040_vm0 = vcmask 1041408   ;;  %vm280_vm1 = vcmask 27648   ;;  %vm283_vm2 = vcmask 24576   ;;  %v18094_v2 = vmov 0  }
   0xe   : > { %13796 = vmatprep.subr.msk.bf16.mxu0 %vm1040_vm0, %v910_v0  ;;  %v1042_v1 = vsel %vm1040_vm0, %v910_v0, 0  ;;  %281 = vst.msk [vmem:[#allocation2] sm:$0xf] %vm280_vm1, %v18094_v2  ;;  %282 = vst.msk [vmem:[#allocation2 + $0x4] sm:$0xf] %vm280_vm1, %v18094_v2  ;;  %p269_p3 = scmp.lt.s32.totalorder %s11385_s25, 1 }
   0xf   : > { %vm290_vm3 = vsmask.f32 256  ;;  %284 = vst.msk [vmem:[#allocation2 + $0x8] sm:$0x1] %vm283_vm2, %v18094_v2  ;;  %288 = vst.msk [vmem:[#allocation2 + $0xd4] sm:$0x1] %vm283_vm2, %v18094_v2  ;;  %12509 = vmatpush3.bf16.msra.mxu0 %v1042_v1 }
  0x10   : > { %286 = vst.msk [vmem:[#allocation2 + $0xcc] sm:$0xf] %vm280_vm1, %v18094_v2  ;;  %287 = vst.msk [vmem:[#allocation2 + $0xd0] sm:$0xf] %vm280_vm1, %v18094_v2  ;;  %v14016_v3 = vld [vmem:[%s18087_s1 + $0x2] sm:$0x3] }
  0x11   : > { %vm14020_vm4 = vmand %vm283_vm2, %vm290_vm3  ;;  %v295_v5 = vld [vmem:[#allocation2 + $0xc] sm:$0x1]  ;;  %vm346_vm5 = vsmask.f32 7938  ;;  %13797 = vmatprep.subr.msk.bf16.mxu0 %vm1040_vm0, %v14016_v3  ;;  %v18202_v7 = vmov 0  ;;  %s18521_s25 = smov (!%p269_p3, %s11385_s25), 1 }
  0x12   : > { %v296_v6 = vsel %vm14020_vm4, 0, %v295_v5  ;;  %vm14030_vm6 = vmand %vm283_vm2, %vm346_vm5  ;;  %v351_v8 = vld [vmem:[#allocation2 + $0x14] sm:$0x1]  ;;  %v298_v10 = vld [vmem:[#allocation2 + $0x18] sm:$0x1]  ;;  %s12151_s30 = sshll.u32 %s18521_s25, 7 }
  0x13   : > { %v18203_v7 = vsel %vm14030_vm6, 4294967295, %v18202_v7  ;;  %297 = vst [vmem:[#allocation2 + $0xc] sm:$0x1] %v296_v6  ;;  %v352_v9 = vsel %vm14030_vm6, 0, %v351_v8  ;;  %v301_v11 = vld [vmem:[#allocation2 + $0x24] sm:$0x1]  ;;  %s14050_s10 = scalar_lea.vmem %s18086_s0, %s12151_s30  ;;  %vm14064_vm8 = vmand %vm280_vm1, %vm346_vm5 }
  0x14   : > { %18204 = vst [vmem:[#allocation4_spill] sm:$0xff] %v18203_v7  ;;  %353 = vst [vmem:[#allocation2 + $0x14] sm:$0x1] %v352_v9  ;;  %v299_v12 = vsel %vm14020_vm4, 0, %v298_v10  ;;  %v302_v13 = vsel %vm14020_vm4, 0, %v301_v11  ;;  %v18205_v38 = vmov 0 }
  0x15   : > { %v304_v14 = vld [vmem:[#allocation2 + $0x30] sm:$0x1]  ;;  %v307_v15 = vld [vmem:[#allocation2 + $0x3c] sm:$0x1]  ;;  %300 = vst [vmem:[#allocation2 + $0x18] sm:$0x1] %v299_v12 }
  0x16   : > { %303 = vst [vmem:[#allocation2 + $0x24] sm:$0x1] %v302_v13  ;;  %v305_v16 = vsel %vm14020_vm4, 0, %v304_v14  ;;  %v308_v17 = vsel %vm14020_vm4, 0, %v307_v15  ;;  %v310_v18 = vld [vmem:[#allocation2 + $0x48] sm:$0x1] }
  0x17   : > { %vm434_vm7 = vsmask.f32 4368  ;;  %306 = vst [vmem:[#allocation2 + $0x30] sm:$0x1] %v305_v16  ;;  %309 = vst [vmem:[#allocation2 + $0x3c] sm:$0x1] %v308_v17 }
  0x18   : > { %v311_v19 = vsel %vm14020_vm4, 0, %v310_v18  ;;  %v313_v20 = vld [vmem:[#allocation2 + $0x54] sm:$0x1]  ;;  %v292_v21 = vld [vmem:[#allocation2] sm:$0x1]  ;;  %v18206_v38 = vsel %vm14064_vm8, 4294967295, %v18205_v38  ;;  %vm14071_vm9 = vmor %vm290_vm3, %vm434_vm7 }
  0x19   : > { %v402_v22 = vld [vmem:[%s14050_s10] sm:$0xf]  ;;  %312 = vst [vmem:[#allocation2 + $0x48] sm:$0x1] %v311_v19  ;;  %v293_v23 = vsel %vm14020_vm4, 0, %v292_v21  ;;  %v314_v27 = vsel %vm14020_vm4, 0, %v313_v20 }
  0x1a   : > { %v403_v24 = vld [vmem:[%s14050_s10 + $0x4] sm:$0xf]  ;;  %v437_v25 = vshrl.u32 %v402_v22, 16  ;;  %v440_v26 = vshll.u32 %v402_v22, 16  ;;  %294 = vst [vmem:[#allocation2] sm:$0x1] %v293_v23 }
  0x1b   : > { %v445_v28 = vshrl.u32 %v403_v24, 16  ;;  %v448_v29 = vshll.u32 %v403_v24, 16  ;;  %v404_v30 = vld [vmem:[%s14050_s10 + $0x8] sm:$0xf]  ;;  %v405_v31 = vld [vmem:[%s14050_s10 + $0xc] sm:$0xf] }
  0x1c   : > { %315 = vst [vmem:[#allocation2 + $0x54] sm:$0x1] %v314_v27  ;;  %v439_v32 = vrot.slane %v437_v25, 7  ;;  %v759_v33 = vld [vmem:[#allocation2 + $0xc] sm:$0xf]  ;;  %v454_v34 = vshrl.u32 %v404_v30, 16 }
  0x1d   : > { %v457_v35 = vshll.u32 %v404_v30, 16  ;;  %v462_v36 = vshrl.u32 %v405_v31, 16  ;;  %v447_v37 = vrot.slane %v445_v28, 7  ;;  %18207 = vst [vmem:[#allocation5_spill] sm:$0xff] %v18206_v38  ;;  %v763_v39 = vld [vmem:[#allocation2 + $0x14] sm:$0x1] }
  0x1e   : > { %v465_v40 = vshll.u32 %v405_v31, 16  ;;  %v406_v41 = vld [vmem:[%s14050_s10 + $0x10] sm:$0xf]  ;;  %v18208_v42 = vmov 0  ;;  %v442_v43 = vor.u32 %v440_v26, %v439_v32  ;;  %v443_v44 = vrot.slane %v439_v32, 4 }
  0x1f   : > { %v18209_v42 = vsel %vm14071_vm9, 4294967295, %v18208_v42  ;;  %v456_v45 = vrot.slane %v454_v34, 7  ;;  %v14075_v46 = vrot.slane %v462_v36, 7  ;;  %v766_v47 = vld [vmem:[#allocation2 + $0x18] sm:$0xf]  ;;  %v450_v48 = vor.u32 %v448_v29, %v447_v37 }
  0x20   : > { %18210 = vst [vmem:[#allocation6_spill] sm:$0xff] %v18209_v42  ;;  %v452_v49 = vrot.slane %v447_v37, 4  ;;  %v407_v50 = vld [vmem:[%s14050_s10 + $0x14] sm:$0xf]  ;;  %v471_v51 = vshrl.u32 %v406_v41, 16  ;;  %v474_v52 = vshll.u32 %v406_v41, 16  ;;  %v760_v53 = vsel %vm14064_vm8, %v442_v43, %v759_v33 }
  0x21   : > { %v459_v54 = vor.u32 %v457_v35, %v456_v45  ;;  %v460_v55 = vrot.slane %v456_v45, 4  ;;  %v467_v56 = vor.u32 %v465_v40, %v14075_v46  ;;  %v408_v57 = vld [vmem:[%s14050_s10 + $0x18] sm:$0xf]  ;;  %vm991_vm10 = vcmask 31744   ;;  %761 = vst [vmem:[#allocation2 + $0xc] sm:$0xf] %v760_v53 }
  0x22   : > { %v451_v58 = vsel %vm14071_vm9, %v443_v44, %v450_v48  ;;  %v764_v59 = vsel %vm14020_vm4, %v452_v49, %v763_v39  ;;  %v473_v60 = vrot.slane %v471_v51, 7  ;;  %v773_v61 = vld [vmem:[#allocation2 + $0x24] sm:$0xf]  ;;  %v409_v62 = vld [vmem:[%s14050_s10 + $0x1c] sm:$0xf]  ;;  %v479_v5 = vshrl.u32 %v407_v50, 16 }
  0x23   : > { %v13825_v63 = vld [vmem:[#allocation2] sm:$0xff]   ;;  %762 = vst.msk [vmem:[#allocation2 + $0x10] sm:$0xf] %vm280_vm1, %v451_v58  ;;  %765 = vst [vmem:[#allocation2 + $0x14] sm:$0x1] %v764_v59  ;;  %v468_v0 = vsel %vm14071_vm9, %v460_v55, %v467_v56  ;;  %v767_v1 = vsel %vm14064_vm8, %v459_v54, %v766_v47  ;;  %v482_v6 = vshll.u32 %v407_v50, 16 }
  0x24   : > { %768 = vst [vmem:[#allocation2 + $0x18] sm:$0xf] %v767_v1  ;;  %769 = vst.msk [vmem:[#allocation2 + $0x1c] sm:$0xf] %vm280_vm1, %v468_v0  ;;  %v476_v8 = vor.u32 %v474_v52, %v473_v60  ;;  %v477_v9 = vrot.slane %v473_v60, 4  ;;  %v488_v10 = vshrl.u32 %v408_v57, 16  ;;  %12510 = vmatprep.mubr.msk.bf16.mxu0 %vm991_vm10, %v13825_v63 }
  0x25   : > { %v491_v11 = vshll.u32 %v408_v57, 16  ;;  %v410_v12 = vld [vmem:[%s14050_s10 + $0x20] sm:$0xf]  ;;  %v14095_v13 = vrot.slane %v479_v5, 7  ;;  %v496_v14 = vshrl.u32 %v409_v62, 16  ;;  %v499_v15 = vshll.u32 %v409_v62, 16 }
  0x26   : > { %v411_v16 = vld [vmem:[%s14050_s10 + $0x24] sm:$0xf]  ;;  %v505_v17 = vshrl.u32 %v410_v12, 16  ;;  %v774_v18 = vsel %vm14064_vm8, %v476_v8, %v773_v61  ;;  %v490_v19 = vrot.slane %v488_v10, 7  ;;  %v508_v20 = vshll.u32 %v410_v12, 16 }
  0x27   : > { %v513_v21 = vshrl.u32 %v411_v16, 16  ;;  %v484_v22 = vor.u32 %v482_v6, %v14095_v13  ;;  %775 = vst [vmem:[#allocation2 + $0x24] sm:$0xf] %v774_v18  ;;  %v14101_v23 = vrot.slane %v496_v14, 7  ;;  %v780_v24 = vld [vmem:[#allocation2 + $0x30] sm:$0xf] }
  0x28   : > { %v507_v25 = vrot.slane %v505_v17, 7  ;;  %v787_v26 = vld [vmem:[#allocation2 + $0x3c] sm:$0xf]  ;;  %v493_v27 = vor.u32 %v491_v11, %v490_v19  ;;  %v494_v28 = vrot.slane %v490_v19, 4  ;;  %v516_v30 = vshll.u32 %v411_v16, 16 }
  0x29   : > { %v14103_v29 = vrot.slane %v513_v21, 7  ;;  %v412_v31 = vld [vmem:[%s14050_s10 + $0x28] sm:$0xf]  ;;  %v1771_v32 = vsel %vm1040_vm0, %v14016_v3, 0  ;;  %v485_v33 = vsel %vm14071_vm9, %v477_v9, %v484_v22  ;;  %v501_v34 = vor.u32 %v499_v15, %v14101_v23  ;;  %v413_v36 = vld [vmem:[%s14050_s10 + $0x2c] sm:$0xf] }
  0x2a   : > { %v510_v35 = vor.u32 %v508_v20, %v507_v25  ;;  %v13826_v37 = vld [vmem:[#allocation2 + $0xc] sm:$0xff]   ;;  %776 = vst.msk [vmem:[#allocation2 + $0x28] sm:$0xf] %vm280_vm1, %v485_v33  ;;  %v781_v39 = vsel %vm14064_vm8, %v493_v27, %v780_v24  ;;  %v511_v40 = vrot.slane %v507_v25, 4  ;;  %v316_v43 = vld [vmem:[#allocation2 + $0x60] sm:$0x1] }
  0x2b   : > { %v518_v41 = vor.u32 %v516_v30, %v14103_v29  ;;  %v13827_v44 = vld [vmem:[#allocation2 + $0x18] sm:$0xff]   ;;  %v502_v3 = vsel %vm14071_vm9, %v494_v28, %v501_v34  ;;  %782 = vst [vmem:[#allocation2 + $0x30] sm:$0xf] %v781_v39  ;;  %v522_v47 = vshrl.u32 %v412_v31, 16  ;;  %12511 = vmatmul.mubr.msk.bf16.vlgmr.msra.gmra.mrb[0].mxu0 %vm991_vm10, %v13826_v37  ;;  %v525_v49 = vshll.u32 %v412_v31, 16 }
  0x2c   : > { %v788_v45 = vsel %vm14064_vm8, %v510_v35, %v787_v26  ;;  %783 = vst.msk [vmem:[#allocation2 + $0x34] sm:$0xf] %vm280_vm1, %v502_v3  ;;  %v530_v50 = vshrl.u32 %v413_v36, 16  ;;  %v533_v51 = vshll.u32 %v413_v36, 16  ;;  %v794_v52 = vld [vmem:[#allocation2 + $0x48] sm:$0xf]  ;;  %12543 = vmatpush3.bf16.msra.mxu0 %v1771_v32  ;;  %12514 = vmatprep.mubr.msk.bf16.mxu0 %vm991_vm10, %v13827_v44 }
  0x2d   : > { %v519_v48 = vsel %vm14071_vm9, %v511_v40, %v518_v41  ;;  %789 = vst [vmem:[#allocation2 + $0x3c] sm:$0xf] %v788_v45  ;;  %v414_v53 = vld [vmem:[%s14050_s10 + $0x30] sm:$0xf]  ;;  %v524_v54 = vrot.slane %v522_v47, 7  ;;  %v317_v58 = vsel %vm14020_vm4, 0, %v316_v43 }
  0x2e   : > { %790 = vst.msk [vmem:[#allocation2 + $0x40] sm:$0xf] %vm280_vm1, %v519_v48  ;;  %v415_v55 = vld [vmem:[%s14050_s10 + $0x34] sm:$0xf]  ;;  %v539_v56 = vshrl.u32 %v414_v53, 16  ;;  %v542_v57 = vshll.u32 %v414_v53, 16 }
  0x2f   : > { %v14130_v59 = vrot.slane %v530_v50, 7  ;;  %v547_v60 = vshrl.u32 %v415_v55, 16  ;;  %v550_v61 = vshll.u32 %v415_v55, 16  ;;  %318 = vst [vmem:[#allocation2 + $0x60] sm:$0x1] %v317_v58  ;;  %v527_v62 = vor.u32 %v525_v49, %v524_v54 }
  0x30   : > { %v528_v63 = vrot.slane %v524_v54, 4  ;;  %v541_v0 = vrot.slane %v539_v56, 7  ;;  %v416_v1 = vld [vmem:[%s14050_s10 + $0x38] sm:$0xf]  ;;  %v801_v8 = vld [vmem:[#allocation2 + $0x54] sm:$0xf] }
  0x31   : > { %v535_v5 = vor.u32 %v533_v51, %v14130_v59  ;;  %v14134_v6 = vrot.slane %v547_v60, 7  ;;  %v417_v9 = vld [vmem:[%s14050_s10 + $0x3c] sm:$0xf]  ;;  %v556_v10 = vshrl.u32 %v416_v1, 16  ;;  %v13828_v11 = vld [vmem:[#allocation2 + $0x24] sm:$0xff]   ;;  %v795_v12 = vsel %vm14064_vm8, %v527_v62, %v794_v52 }
  0x32   : > { %v544_v14 = vor.u32 %v542_v57, %v541_v0  ;;  %v545_v15 = vrot.slane %v541_v0, 4  ;;  %v559_v16 = vshll.u32 %v416_v1, 16  ;;  %796 = vst [vmem:[#allocation2 + $0x48] sm:$0xf] %v795_v12  ;;  %v319_v20 = vld [vmem:[#allocation2 + $0x6c] sm:$0x1] }
  0x33   : > { %v536_v17 = vsel %vm14071_vm9, %v528_v63, %v535_v5  ;;  %v552_v18 = vor.u32 %v550_v61, %v14134_v6  ;;  %v558_v19 = vrot.slane %v556_v10, 7  ;;  %v13829_v21 = vld [vmem:[#allocation2 + $0x30] sm:$0xff]   ;;  %v564_v24 = vshrl.u32 %v417_v9, 16  ;;  %12515 = vmatmul.mubr.msk.bf16.gmra.mrb[4].mxu0 %vm991_vm10, %v13828_v11  ;;  %v418_v33 = vld [vmem:[%s14050_s10 + $0x40] sm:$0xf] }
  0x34   : > { %797 = vst.msk [vmem:[#allocation2 + $0x4c] sm:$0xf] %vm280_vm1, %v536_v17  ;;  %v802_v22 = vsel %vm14064_vm8, %v544_v14, %v801_v8  ;;  %v567_v28 = vshll.u32 %v417_v9, 16  ;;  %12518 = vmatprep.mubr.msk.bf16.mxu0 %vm991_vm10, %v13829_v21  ;;  %v320_v32 = vsel %vm14020_vm4, 0, %v319_v20  ;;  %v419_v35 = vld [vmem:[%s14050_s10 + $0x44] sm:$0xf] }
  0x35   : > { %v553_v25 = vsel %vm14071_vm9, %v545_v15, %v552_v18  ;;  %803 = vst [vmem:[#allocation2 + $0x54] sm:$0xf] %v802_v22  ;;  %v561_v26 = vor.u32 %v559_v16, %v558_v19  ;;  %v562_v27 = vrot.slane %v558_v19, 4  ;;  %v14150_v30 = vrot.slane %v564_v24, 7  ;;  %321 = vst [vmem:[#allocation2 + $0x6c] sm:$0x1] %v320_v32 }
  0x36   : > { %804 = vst.msk [vmem:[#allocation2 + $0x58] sm:$0xf] %vm280_vm1, %v553_v25  ;;  %v808_v31 = vld [vmem:[#allocation2 + $0x60] sm:$0xf]  ;;  %v573_v36 = vshrl.u32 %v418_v33, 16  ;;  %v576_v37 = vshll.u32 %v418_v33, 16 }
  0x37   : > { %v809_v34 = vsel %vm14064_vm8, %v561_v26, %v808_v31  ;;  %v322_v39 = vld [vmem:[#allocation2 + $0x78] sm:$0x1]  ;;  %v469_v40 = vrot.slane %v14075_v46, 4  ;;  %v13830_v41 = vld [vmem:[#allocation2 + $0x3c] sm:$0xff]   ;;  %v569_v43 = vor.u32 %v567_v28, %v14150_v30  ;;  %v581_v44 = vshrl.u32 %v419_v35, 16 }
  0x38   : > { %810 = vst [vmem:[#allocation2 + $0x60] sm:$0xf] %v809_v34  ;;  %v584_v3 = vshll.u32 %v419_v35, 16  ;;  %v420_v45 = vld [vmem:[%s14050_s10 + $0x48] sm:$0xf]  ;;  %v575_v47 = vrot.slane %v573_v36, 7 }
  0x39   : > { %v323_v48 = vsel %vm14020_vm4, 0, %v322_v39  ;;  %v421_v49 = vld [vmem:[%s14050_s10 + $0x4c] sm:$0xf]  ;;  %v590_v50 = vshrl.u32 %v420_v45, 16  ;;  %v593_v51 = vshll.u32 %v420_v45, 16  ;;  %v570_v52 = vsel %vm14071_vm9, %v562_v27, %v569_v43 }
  0x3a   : > { %v14166_v53 = vrot.slane %v581_v44, 7  ;;  %324 = vst [vmem:[#allocation2 + $0x78] sm:$0x1] %v323_v48  ;;  %v598_v54 = vshrl.u32 %v421_v49, 16  ;;  %v601_v55 = vshll.u32 %v421_v49, 16  ;;  %v486_v56 = vrot.slane %v14095_v13, 4 }
  0x3b   : > { %v13831_v57 = vld [vmem:[#allocation2 + $0x48] sm:$0xff]   ;;  %811 = vst.msk [vmem:[#allocation2 + $0x64] sm:$0xf] %vm280_vm1, %v570_v52  ;;  %v578_v58 = vor.u32 %v576_v37, %v575_v47  ;;  %v579_v60 = vrot.slane %v575_v47, 4  ;;  %v592_v61 = vrot.slane %v590_v50, 7  ;;  %v503_v62 = vrot.slane %v14101_v23, 4  ;;  %12519 = vmatmul.mubr.msk.bf16.gmra.mrb[8].mxu0 %vm991_vm10, %v13830_v41 }
  0x3c   : > { %v586_v63 = vor.u32 %v584_v3, %v14166_v53  ;;  %v14172_v0 = vrot.slane %v598_v54, 7  ;;  %v325_v1 = vld [vmem:[#allocation2 + $0x84] sm:$0x1]  ;;  %v520_v5 = vrot.slane %v14103_v29, 4  ;;  %v537_v8 = vrot.slane %v14130_v59, 4  ;;  %12522 = vmatprep.mubr.msk.bf16.mxu0 %vm991_vm10, %v13831_v57 }
  0x3d   : > { %v596_v9 = vrot.slane %v592_v61, 4  ;;  %v326_v10 = vsel %vm14020_vm4, 0, %v325_v1  ;;  %v554_v11 = vrot.slane %v14134_v6, 4  ;;  %v815_v14 = vld [vmem:[#allocation2 + $0x6c] sm:$0xf]  ;;  %v595_v15 = vor.u32 %v593_v51, %v592_v61  ;;  %v13832_v18 = vld [vmem:[#allocation2 + $0x54] sm:$0xff]  }
  0x3e   : > { %v587_v12 = vsel %vm14071_vm9, %v579_v60, %v586_v63  ;;  %v603_v16 = vor.u32 %v601_v55, %v14172_v0  ;;  %327 = vst [vmem:[#allocation2 + $0x84] sm:$0x1] %v326_v10  ;;  %v422_v17 = vld [vmem:[%s14050_s10 + $0x50] sm:$0xf]  ;;  %v816_v19 = vsel %vm14064_vm8, %v578_v58, %v815_v14  ;;  %v423_v20 = vld [vmem:[%s14050_s10 + $0x54] sm:$0xf] }
  0x3f   : > { %818 = vst.msk [vmem:[#allocation2 + $0x70] sm:$0xf] %vm280_vm1, %v587_v12  ;;  %v607_v21 = vshrl.u32 %v422_v17, 16  ;;  %v610_v22 = vshll.u32 %v422_v17, 16  ;;  %817 = vst [vmem:[#allocation2 + $0x6c] sm:$0xf] %v816_v19 }
  0x40   : > { %v604_v24 = vsel %vm14071_vm9, %v596_v9, %v603_v16  ;;  %v615_v25 = vshrl.u32 %v423_v20, 16  ;;  %v618_v26 = vshll.u32 %v423_v20, 16  ;;  %v328_v27 = vld [vmem:[#allocation2 + $0x90] sm:$0x1]  ;;  %v424_v28 = vld [vmem:[%s14050_s10 + $0x58] sm:$0xf] }
  0x41   : > { %v822_v31 = vld [vmem:[#allocation2 + $0x78] sm:$0xf]  ;;  %825 = vst.msk [vmem:[#allocation2 + $0x7c] sm:$0xf] %vm280_vm1, %v604_v24  ;;  %v609_v32 = vrot.slane %v607_v21, 7  ;;  %v329_v33 = vsel %vm14020_vm4, 0, %v328_v27 }
  0x42   : > { %v425_v34 = vld [vmem:[%s14050_s10 + $0x5c] sm:$0xf]  ;;  %v13833_v35 = vld [vmem:[#allocation2 + $0x60] sm:$0xff]   ;;  %v823_v36 = vsel %vm14064_vm8, %v595_v15, %v822_v31  ;;  %v14198_v37 = vrot.slane %v615_v25, 7  ;;  %330 = vst [vmem:[#allocation2 + $0x90] sm:$0x1] %v329_v33 }
  0x43   : > { %v624_v39 = vshrl.u32 %v424_v28, 16  ;;  %v627_v41 = vshll.u32 %v424_v28, 16  ;;  %824 = vst [vmem:[#allocation2 + $0x78] sm:$0xf] %v823_v36  ;;  %v612_v43 = vor.u32 %v610_v22, %v609_v32  ;;  %v613_v44 = vrot.slane %v609_v32, 4  ;;  %12523 = vmatmul.mubr.msk.bf16.gmra.mrb[12].mxu0 %vm991_vm10, %v13832_v18 }
  0x44   : > { %v632_v3 = vshrl.u32 %v425_v34, 16  ;;  %v635_v45 = vshll.u32 %v425_v34, 16  ;;  %v331_v47 = vld [vmem:[#allocation2 + $0x9c] sm:$0x1]  ;;  %v571_v48 = vrot.slane %v14150_v30, 4  ;;  %v620_v49 = vor.u32 %v618_v26, %v14198_v37  ;;  %12526 = vmatprep.mubr.msk.bf16.mxu0 %vm991_vm10, %v13833_v35 }
  0x45   : > { %v626_v50 = vrot.slane %v624_v39, 7  ;;  %v332_v51 = vsel %vm14020_vm4, 0, %v331_v47  ;;  %v426_v52 = vld [vmem:[%s14050_s10 + $0x60] sm:$0xf]  ;;  %v829_v54 = vld [vmem:[#allocation2 + $0x84] sm:$0xf] }
  0x46   : > { %v14206_v55 = vrot.slane %v632_v3, 7  ;;  %333 = vst [vmem:[#allocation2 + $0x9c] sm:$0x1] %v332_v51  ;;  %v427_v57 = vld [vmem:[%s14050_s10 + $0x64] sm:$0xf]  ;;  %v641_v58 = vshrl.u32 %v426_v52, 16  ;;  %v621_v60 = vsel %vm14071_vm9, %v613_v44, %v620_v49  ;;  %v830_v61 = vsel %vm14064_vm8, %v612_v43, %v829_v54 }
  0x47   : > { %v629_v63 = vor.u32 %v627_v41, %v626_v50  ;;  %v630_v1 = vrot.slane %v626_v50, 4  ;;  %v334_v9 = vld [vmem:[#allocation2 + $0xa8] sm:$0x1]  ;;  %v588_v10 = vrot.slane %v14166_v53, 4  ;;  %831 = vst [vmem:[#allocation2 + $0x84] sm:$0xf] %v830_v61 }
  0x48   : > { %832 = vst.msk [vmem:[#allocation2 + $0x88] sm:$0xf] %vm280_vm1, %v621_v60  ;;  %v637_v12 = vor.u32 %v635_v45, %v14206_v55  ;;  %v643_v14 = vrot.slane %v641_v58, 7  ;;  %v644_v15 = vshll.u32 %v426_v52, 16  ;;  %v649_v17 = vshrl.u32 %v427_v57, 16  ;;  %v13834_v20 = vld [vmem:[#allocation2 + $0x6c] sm:$0xff]  }
  0x49   : > { %v652_v18 = vshll.u32 %v427_v57, 16  ;;  %v335_v19 = vsel %vm14020_vm4, 0, %v334_v9  ;;  %v836_v22 = vld [vmem:[#allocation2 + $0x90] sm:$0xf]  ;;  %v428_v26 = vld [vmem:[%s14050_s10 + $0x68] sm:$0xf] }
  0x4a   : > { %v638_v21 = vsel %vm14071_vm9, %v630_v1, %v637_v12  ;;  %v646_v24 = vor.u32 %v644_v15, %v643_v14  ;;  %v647_v25 = vrot.slane %v643_v14, 4  ;;  %336 = vst [vmem:[#allocation2 + $0xa8] sm:$0x1] %v335_v19  ;;  %v13835_v27 = vld [vmem:[#allocation2 + $0x78] sm:$0xff]   ;;  %v837_v28 = vsel %vm14064_vm8, %v629_v63, %v836_v22  ;;  %v429_v32 = vld [vmem:[%s14050_s10 + $0x6c] sm:$0xf] }
  0x4b   : > { %839 = vst.msk [vmem:[#allocation2 + $0x94] sm:$0xf] %vm280_vm1, %v638_v21  ;;  %v14226_v31 = vrot.slane %v649_v17, 7  ;;  %838 = vst [vmem:[#allocation2 + $0x90] sm:$0xf] %v837_v28  ;;  %v658_v33 = vshrl.u32 %v428_v26, 16  ;;  %12527 = vmatmul.mubr.msk.bf16.gmra.mrb[16].mxu0 %vm991_vm10, %v13834_v20 }
  0x4c   : > { %v661_v34 = vshll.u32 %v428_v26, 16  ;;  %v666_v35 = vshrl.u32 %v429_v32, 16  ;;  %v669_v36 = vshll.u32 %v429_v32, 16  ;;  %v337_v39 = vld [vmem:[#allocation2 + $0xb4] sm:$0x1]  ;;  %12530 = vmatprep.mubr.msk.bf16.mxu0 %vm991_vm10, %v13835_v27  ;;  %vm2030_vm14 = vcmask 1042432  }
  0x4d   : > { %v654_v43 = vor.u32 %v652_v18, %v14226_v31  ;;  %v843_v44 = vld [vmem:[#allocation2 + $0x9c] sm:$0xf]  ;;  %v338_v3 = vsel %vm14020_vm4, 0, %v337_v39  ;;  %v430_v45 = vld [vmem:[%s14050_s10 + $0x70] sm:$0xf]  ;;  %v660_v49 = vrot.slane %v658_v33, 7 }
  0x4e   : > { %v844_v47 = vsel %vm14064_vm8, %v646_v24, %v843_v44  ;;  %v14237_v50 = vrot.slane %v666_v35, 7  ;;  %339 = vst [vmem:[#allocation2 + $0xb4] sm:$0x1] %v338_v3  ;;  %v431_v51 = vld [vmem:[%s14050_s10 + $0x74] sm:$0xf]  ;;  %v675_v52 = vshrl.u32 %v430_v45, 16 }
  0x4f   : > { %v655_v57 = vsel %vm14071_vm9, %v647_v25, %v654_v43  ;;  %845 = vst [vmem:[#allocation2 + $0x9c] sm:$0xf] %v844_v47  ;;  %v678_v58 = vshll.u32 %v430_v45, 16  ;;  %v13836_v60 = vld [vmem:[#allocation2 + $0x84] sm:$0xff]   ;;  %v663_v61 = vor.u32 %v661_v34, %v660_v49  ;;  %v664_v63 = vrot.slane %v660_v49, 4 }
  0x50   : > { %846 = vst.msk [vmem:[#allocation2 + $0xa0] sm:$0xf] %vm280_vm1, %v655_v57  ;;  %v671_v1 = vor.u32 %v669_v36, %v14237_v50  ;;  %v348_v9 = vld [vmem:[#allocation2 + $0x8] sm:$0x1]  ;;  %v1237_v12 = vld [vmem:[#allocation2] sm:$0xf] }
  0x51   : > { %v850_v14 = vld [vmem:[#allocation2 + $0xa8] sm:$0xf]  ;;  %v677_v15 = vrot.slane %v675_v52, 7  ;;  %v683_v17 = vshrl.u32 %v431_v51, 16  ;;  %v686_v18 = vshll.u32 %v431_v51, 16  ;;  %v349_v19 = vsel %vm14030_vm6, 0, %v348_v9 }
  0x52   : > { %v672_v20 = vsel %vm14071_vm9, %v664_v63, %v671_v1  ;;  %v851_v21 = vsel %vm14064_vm8, %v663_v61, %v850_v14  ;;  %350 = vst [vmem:[#allocation2 + $0x8] sm:$0x1] %v349_v19  ;;  %v14252_v22 = vld [vmem:[#allocation2 + $0x4] sm:$0xf]  ;;  %vm1285_vm11 = vsmask.f32 3328 }
  0x53   : > { %v13837_v24 = vld [vmem:[#allocation2 + $0x90] sm:$0xff]   ;;  %852 = vst [vmem:[#allocation2 + $0xa8] sm:$0xf] %v851_v21  ;;  %853 = vst.msk [vmem:[#allocation2 + $0xac] sm:$0xf] %vm280_vm1, %v672_v20  ;;  %v680_v25 = vor.u32 %v678_v58, %v677_v15  ;;  %v681_v26 = vrot.slane %v677_v15, 4  ;;  %12531 = vmatmul.mubr.msk.bf16.gmra.mrb[20].mxu0 %vm991_vm10, %v13836_v60 }
  0x54   : > { %v14255_v27 = vrot.slane %v683_v17, 7  ;;  %v1289_v28 = vshrl.u32 %v1237_v12, 16  ;;  %vm1286_vm12 = vsmask.f32 7440  ;;  %v1292_v32 = vshll.u32 %v1237_v12, 16  ;;  %12534 = vmatprep.mubr.msk.bf16.mxu0 %vm991_vm10, %v13837_v24 }
  0x55   : > { %v1298_v33 = vshll.u32 %v14252_v22, 16  ;;  %v1302_v34 = vshrl.u32 %v14252_v22, 16  ;;  %v857_v39 = vld [vmem:[#allocation2 + $0xb4] sm:$0xf]  ;;  %v11476_v44 = vld [vmem:[%s18087_s1 + $0x4] sm:$0x3]  ;;  %vm14292_vm13 = vmor %vm1285_vm11, %vm1286_vm12 }
  0x56   : > { %v688_v36 = vor.u32 %v686_v18, %v14255_v27  ;;  %v1291_v43 = vrot.slane %v1289_v28, 4  ;;  %v858_v3 = vsel %vm14064_vm8, %v680_v25, %v857_v39  ;;  %v1294_v45 = vrot.slane %v1292_v32, 5  ;;  %13798 = vmatprep.subr.msk.bf16.mxu0 %vm1040_vm0, %v11476_v44  ;;  %v1240_v58 = vld [vmem:[#allocation2 + $0xc] sm:$0xf]  ;;  %v14277_v1 = vld [vmem:[#allocation2 + $0x10] sm:$0xf] }
  0x57   : > { %v14267_v47 = vrot.slane %v1298_v33, 5  ;;  %v1304_v49 = vrot.slane %v1302_v34, 4  ;;  %859 = vst [vmem:[#allocation2 + $0xb4] sm:$0xf] %v858_v3  ;;  %v13838_v60 = vld [vmem:[#allocation2 + $0x9c] sm:$0xff]   ;;  %v1313_v12 = vshrl.u32 %v1240_v58, 16 }
  0x58   : > { %v689_v52 = vsel %vm14071_vm9, %v681_v26, %v688_v36  ;;  %v1295_v61 = vor.u32 %v1294_v45, %v1291_v43  ;;  %v14279_v9 = vld [vmem:[#allocation2 + $0x14] sm:$0x1]  ;;  %v1316_v14 = vshll.u32 %v1240_v58, 16  ;;  %v1322_v17 = vshll.u32 %v14277_v1, 16  ;;  %v354_v33 = vld [vmem:[#allocation2 + $0x20] sm:$0x1] }
  0x59   : > { %860 = vst.msk [vmem:[#allocation2 + $0xb8] sm:$0xf] %vm280_vm1, %v689_v52  ;;  %v1305_v63 = vor.u32 %v1304_v49, %v14267_v47  ;;  %v14281_v15 = vld [vmem:[#allocation2 + $0x8] sm:$0x1]  ;;  %v1326_v18 = vshrl.u32 %v14277_v1, 16  ;;  %v1332_v19 = vshll.u32 %v14279_v9, 16 }
  0x5a   : > { %v14287_v20 = vsel %vm1040_vm0, %v11476_v44, 0  ;;  %v13839_v21 = vld [vmem:[#allocation2 + $0xa8] sm:$0xff]   ;;  %v1296_v24 = vrot.slane %v1295_v61, 4  ;;  %v1308_v26 = vshll.u32 %v14281_v15, 16  ;;  %v1315_v28 = vrot.slane %v1313_v12, 4 }
  0x5b   : > { %v1306_v25 = vrot.slane %v1305_v63, 4  ;;  %v1318_v32 = vrot.slane %v1316_v14, 5  ;;  %v1324_v36 = vrot.slane %v1322_v17, 5  ;;  %v1328_v39 = vrot.slane %v1326_v18, 4  ;;  %v1243_v3 = vld [vmem:[#allocation2 + $0x18] sm:$0xf]  ;;  %12535 = vmatmul.mubr.msk.bf16.gmra.mrb[24].mxu0 %vm991_vm10, %v13838_v60 }
  0x5c   : > { %v1334_v43 = vrot.slane %v1332_v19, 5  ;;  %v18096_v44 = vrot.slane %v14252_v22, 5  ;;  %v1310_v45 = vrot.slane %v1308_v26, 5  ;;  %v355_v52 = vsel %vm14030_vm6, 0, %v354_v33  ;;  %v14299_v58 = vld [vmem:[#allocation2 + $0x1c] sm:$0xf]  ;;  %12538 = vmatprep.mubr.msk.bf16.mxu0 %vm991_vm10, %v13839_v21 }
  0x5d   : > { %v1319_v49 = vor.u32 %v1318_v32, %v1315_v28  ;;  %v1337_v61 = vshrl.u32 %v1243_v3, 16  ;;  %v1329_v63 = vor.u32 %v1328_v39, %v1324_v36  ;;  %356 = vst [vmem:[#allocation2 + $0x20] sm:$0x1] %v355_v52  ;;  %v1340_v12 = vshll.u32 %v1243_v3, 16  ;;  %v357_v3 = vld [vmem:[#allocation2 + $0x2c] sm:$0x1] }
  0x5e   : > { %v1346_v14 = vshll.u32 %v14299_v58, 16  ;;  %v1350_v17 = vshrl.u32 %v14299_v58, 16  ;;  %v1301_v18 = vsel %vm14292_vm13, %v1296_v24, %v14267_v47  ;;  %v1311_v19 = vsel %vm14292_vm13, %v1306_v25, %v1310_v45  ;;  %v1246_v24 = vld [vmem:[#allocation2 + $0x24] sm:$0xf]  ;;  %v14320_v25 = vld [vmem:[#allocation2 + $0x28] sm:$0xf] }
  0x5f   : > { %v1320_v26 = vrot.slane %v1319_v49, 4  ;;  %v1339_v28 = vrot.slane %v1337_v61, 4  ;;  %v1330_v60 = vrot.slane %v1329_v63, 4  ;;  %v1342_v33 = vrot.slane %v1340_v12, 5  ;;  %v360_v12 = vld [vmem:[#allocation2 + $0x38] sm:$0x1] }
  0x60   : > { %v13840_v32 = vld [vmem:[#allocation2 + $0xb4] sm:$0xff]   ;;  %v14310_v39 = vrot.slane %v1346_v14, 5  ;;  %v14314_v52 = vrot.slane %v18096_v44, 4  ;;  %v1352_v2 = vrot.slane %v1350_v17, 4  ;;  %v358_v47 = vsel %vm14030_vm6, 0, %v357_v3 }
  0x61   : > { %v1325_v21 = vsel %vm14292_vm13, %v1320_v26, %v1324_v36  ;;  %v1335_v45 = vsel %vm14292_vm13, %v1330_v60, %v1334_v43  ;;  %v1343_v49 = vor.u32 %v1342_v33, %v1339_v28  ;;  %359 = vst [vmem:[#allocation2 + $0x2c] sm:$0x1] %v358_v47  ;;  %v1361_v61 = vshrl.u32 %v1246_v24, 16  ;;  %v1249_v14 = vld [vmem:[#allocation2 + $0x30] sm:$0xf] }
  0x62   : > { %v1364_v63 = vshll.u32 %v1246_v24, 16  ;;  %v11428_v57 = vcombine.low %v1301_v18, %v1311_v19  ;;  %v1370_v44 = vshll.u32 %v14320_v25, 16  ;;  %v1374_v36 = vshrl.u32 %v14320_v25, 16  ;;  %v14326_v17 = vld [vmem:[#allocation2 + $0x34] sm:$0xf] }
  0x63   : > { %v363_v26 = vld [vmem:[#allocation2 + $0x44] sm:$0x1]  ;;  %v11429_v3 = vcombine.low %v1325_v21, %v1335_v45  ;;  %v1363_v51 = vrot.slane %v1361_v61, 4  ;;  %v361_v43 = vsel %vm14030_vm6, 0, %v360_v12  ;;  %v1252_v28 = vld [vmem:[#allocation2 + $0x3c] sm:$0xf]  ;;  %v1353_v33 = vor.u32 %v1352_v2, %v14310_v39  ;;  %12539 = vmatmul.mubr.msk.bf16.gmra.mrb[28].mxu0 %vm991_vm10, %v13840_v32 }
  0x64   : > { %v1366_v35 = vrot.slane %v1364_v63, 5  ;;  %v770_v60 = vld [vmem:[#allocation2 + $0x20] sm:$0x1]  ;;  %v14331_v47 = vrot.slane %v1370_v44, 5  ;;  %v1376_v18 = vrot.slane %v1374_v36, 4  ;;  %v1385_v19 = vshrl.u32 %v1249_v14, 16  ;;  %12544 = vmatprep.mubr.msk.bf16.mxu0 %vm991_vm10, %v11428_v57 }
  0x65   : > { %362 = vst [vmem:[#allocation2 + $0x38] sm:$0x1] %v361_v43  ;;  %v771_v21 = vsel %vm14020_vm4, %v469_v40, %v770_v60  ;;  %v14338_v24 = vrot.slane %v1343_v49, 4  ;;  %v1388_v61 = vshll.u32 %v1249_v14, 16  ;;  %v14340_v63 = vld [vmem:[#allocation2 + $0x40] sm:$0xf] }
  0x66   : > { %v1367_v45 = vor.u32 %v1366_v35, %v1363_v51  ;;  %772 = vst [vmem:[#allocation2 + $0x20] sm:$0x1] %v771_v21  ;;  %v1377_v2 = vor.u32 %v1376_v18, %v14331_v47  ;;  %v1387_v44 = vrot.slane %v1385_v19, 4  ;;  %v1394_v12 = vshll.u32 %v14326_v17, 16  ;;  %v366_v46 = vld [vmem:[#allocation2 + $0x50] sm:$0x1] }
  0x67   : > { %v1398_v32 = vshrl.u32 %v14326_v17, 16  ;;  %v1390_v40 = vrot.slane %v1388_v61, 5  ;;  %v364_v35 = vsel %vm14030_vm6, 0, %v363_v26  ;;  %v1409_v51 = vshrl.u32 %v1252_v28, 16  ;;  %v1255_v49 = vld [vmem:[#allocation2 + $0x48] sm:$0xf] }
  0x68   : > { %v14346_v36 = vrot.slane %v1367_v45, 4  ;;  %v14350_v14 = vrot.slane %v1353_v33, 4  ;;  %v777_v57 = vld [vmem:[#allocation2 + $0x2c] sm:$0x1]  ;;  %v14352_v43 = vrot.slane %v1394_v12, 5  ;;  %v1412_v18 = vshll.u32 %v1252_v28, 16 }
  0x69   : > { %v1400_v60 = vrot.slane %v1398_v32, 4  ;;  %365 = vst [vmem:[#allocation2 + $0x44] sm:$0x1] %v364_v35  ;;  %v1349_v19 = vsel %vm14292_vm13, %v14338_v24, %v14310_v39  ;;  %v778_v26 = vsel %vm14020_vm4, %v486_v56, %v777_v57  ;;  %v1391_v21 = vor.u32 %v1390_v40, %v1387_v44  ;;  %v14366_v32 = vld [vmem:[#allocation2 + $0x4c] sm:$0xf] }
  0x6a   : > { %v1411_v45 = vrot.slane %v1409_v51, 4  ;;  %779 = vst [vmem:[#allocation2 + $0x2c] sm:$0x1] %v778_v26  ;;  %v14362_v33 = vrot.slane %v1377_v2, 4  ;;  %v1414_v61 = vrot.slane %v1412_v18, 5  ;;  %v1418_v12 = vshll.u32 %v14340_v63, 16 }
  0x6b   : > { %v1422_v28 = vshrl.u32 %v14340_v63, 16  ;;  %v1373_v13 = vsel %vm14292_vm13, %v14346_v36, %v14331_v47  ;;  %v367_v56 = vsel %vm14030_vm6, 0, %v366_v46  ;;  %v1433_v24 = vshrl.u32 %v1255_v49, 16  ;;  %v369_v57 = vld [vmem:[#allocation2 + $0x5c] sm:$0x1]  ;;  %12545 = vmatmul.mubr.msk.bf16.vlgmr.msra.gmra.mrb[0].mxu0 %vm991_vm10, %v11429_v3 }
  0x6c   : > { %v784_v39 = vld [vmem:[#allocation2 + $0x38] sm:$0x1]  ;;  %v1436_v44 = vshll.u32 %v1255_v49, 16  ;;  %v1401_v40 = vor.u32 %v1400_v60, %v14352_v43  ;;  %v1415_v35 = vor.u32 %v1414_v61, %v1411_v45  ;;  %v14379_v51 = vrot.slane %v1418_v12, 5  ;;  %368 = vst [vmem:[#allocation2 + $0x50] sm:$0x1] %v367_v56  ;;  %12577 = vmatpush3.bf16.msra.mxu0 %v14287_v20 }
  0x6d   : > { %v785_v2 = vsel %vm14020_vm4, %v503_v62, %v784_v39  ;;  %v1258_v18 = vld [vmem:[#allocation2 + $0x54] sm:$0xf]  ;;  %v14382_v26 = vld [vmem:[#allocation2 + $0x20] sm:$0x1]  ;;  %v14384_v46 = vrot.slane %v1391_v21, 4  ;;  %v1424_v49 = vrot.slane %v1422_v28, 4 }
  0x6e   : > { %786 = vst [vmem:[#allocation2 + $0x38] sm:$0x1] %v785_v2  ;;  %v1435_v23 = vrot.slane %v1433_v24, 4  ;;  %v1438_v54 = vrot.slane %v1436_v44, 5  ;;  %v1356_v62 = vshll.u32 %v14382_v26, 16  ;;  %v14388_v60 = vrot.slane %v1415_v35, 4 }
  0x6f   : > { %v1442_v45 = vshll.u32 %v14366_v32, 16  ;;  %v1446_v61 = vshrl.u32 %v14366_v32, 16  ;;  %v1425_v3 = vor.u32 %v1424_v49, %v14379_v51  ;;  %v370_v21 = vsel %vm14030_vm6, 0, %v369_v57  ;;  %v14395_v28 = vld [vmem:[#allocation2 + $0x58] sm:$0xf] }
  0x70   : > { %v791_v12 = vld [vmem:[#allocation2 + $0x44] sm:$0x1]  ;;  %v1439_v39 = vor.u32 %v1438_v54, %v1435_v23  ;;  %v1457_v56 = vshrl.u32 %v1258_v18, 16  ;;  %v1358_v24 = vrot.slane %v1356_v62, 5  ;;  %v1402_v20 = vrot.slane %v1401_v40, 4 }
  0x71   : > { %v792_v44 = vsel %vm14020_vm4, %v520_v5, %v791_v12  ;;  %v14401_v2 = vrot.slane %v1442_v45, 5  ;;  %371 = vst [vmem:[#allocation2 + $0x5c] sm:$0x1] %v370_v21  ;;  %v14403_v35 = vld [vmem:[#allocation2 + $0x2c] sm:$0x1]  ;;  %v1397_v54 = vsel %vm14292_vm13, %v14384_v46, %v14352_v43  ;;  %v1421_v40 = vsel %vm14292_vm13, %v14388_v60, %v14379_v51 }
  0x72   : > { %793 = vst [vmem:[#allocation2 + $0x44] sm:$0x1] %v792_v44  ;;  %v1448_v29 = vrot.slane %v1446_v61, 4  ;;  %v1459_v57 = vrot.slane %v1457_v56, 4  ;;  %v372_v49 = vld [vmem:[#allocation2 + $0x68] sm:$0x1]  ;;  %v1359_v5 = vsel %vm14292_vm13, %v14350_v14, %v1358_v24 }
  0x73   : > { %v1380_v23 = vshll.u32 %v14403_v35, 16  ;;  %v1460_v62 = vshll.u32 %v1258_v18, 16  ;;  %v1466_v45 = vshll.u32 %v14395_v28, 16  ;;  %v1261_v12 = vld [vmem:[#allocation2 + $0x60] sm:$0xf]  ;;  %v11430_v43 = vcombine.low %v1349_v19, %v1359_v5 }
  0x74   : > { %v14418_v46 = vrot.slane %v1425_v3, 4  ;;  %v798_v21 = vld [vmem:[#allocation2 + $0x50] sm:$0x1]  ;;  %v14420_v44 = vrot.slane %v1439_v39, 4  ;;  %v1470_v61 = vshrl.u32 %v14395_v28, 16  ;;  %v1449_v18 = vor.u32 %v1448_v29, %v14401_v2 }
  0x75   : > { %v1382_v56 = vrot.slane %v1380_v23, 5  ;;  %v14423_v41 = vld [vmem:[#allocation2 + $0x38] sm:$0x1]  ;;  %v799_v14 = vsel %vm14020_vm4, %v537_v8, %v798_v21  ;;  %v1462_v24 = vrot.slane %v1460_v62, 5  ;;  %v14430_v16 = vld [vmem:[#allocation2 + $0x64] sm:$0xf]  ;;  %12548 = vmatprep.mubr.msk.bf16.mxu0 %vm991_vm10, %v11430_v43 }
  0x76   : > { %v1404_v19 = vshll.u32 %v14423_v41, 16  ;;  %800 = vst [vmem:[#allocation2 + $0x50] sm:$0x1] %v799_v14  ;;  %v14434_v3 = vrot.slane %v1466_v45, 5  ;;  %v1472_v39 = vrot.slane %v1470_v61, 4  ;;  %v373_v5 = vsel %vm14030_vm6, 0, %v372_v49 }
  0x77   : > { %v1383_v59 = vsel %vm14292_vm13, %v14362_v33, %v1382_v56  ;;  %v1463_v8 = vor.u32 %v1462_v24, %v1459_v57  ;;  %374 = vst [vmem:[#allocation2 + $0x68] sm:$0x1] %v373_v5  ;;  %v1481_v29 = vshrl.u32 %v1261_v12, 16  ;;  %v1484_v23 = vshll.u32 %v1261_v12, 16  ;;  %v375_v62 = vld [vmem:[#allocation2 + $0x74] sm:$0x1] }
  0x78   : > { %v11431_v45 = vcombine.low %v1373_v13, %v1383_v59  ;;  %v1406_v43 = vrot.slane %v1404_v19, 5  ;;  %v1445_v49 = vsel %vm14292_vm13, %v14420_v44, %v14401_v2  ;;  %v805_v21 = vld [vmem:[#allocation2 + $0x5c] sm:$0x1]  ;;  %v1490_v33 = vshll.u32 %v14430_v16, 16  ;;  %v1264_v57 = vld [vmem:[#allocation2 + $0x6c] sm:$0xf] }
  0x79   : > { %v14451_v61 = vld [vmem:[#allocation2 + $0x44] sm:$0x1]  ;;  %v1450_v12 = vrot.slane %v1449_v18, 4  ;;  %v806_v56 = vsel %vm14020_vm4, %v554_v11, %v805_v21  ;;  %v1483_v47 = vrot.slane %v1481_v29, 4  ;;  %v1486_v36 = vrot.slane %v1484_v23, 5 }
  0x7a   : > { %12549 = vmatmul.mubr.msk.bf16.gmra.mrb[4].mxu0 %vm991_vm10, %v11431_v45  ;;  %v1407_v13 = vsel %vm14292_vm13, %v1402_v20, %v1406_v43  ;;  %v1428_v2 = vshll.u32 %v14451_v61, 16  ;;  %807 = vst [vmem:[#allocation2 + $0x5c] sm:$0x1] %v806_v56  ;;  %v14461_v44 = vrot.slane %v1463_v8, 4  ;;  %v1473_v14 = vor.u32 %v1472_v39, %v14434_v3  ;;  %v14464_v18 = vld [vmem:[#allocation2 + $0x70] sm:$0xf] }
  0x7b   : > { %v11432_v6 = vcombine.low %v1397_v54, %v1407_v13  ;;  %v1487_v24 = vor.u32 %v1486_v36, %v1483_v47  ;;  %v14466_v19 = vrot.slane %v1490_v33, 5  ;;  %v1494_v11 = vshrl.u32 %v14430_v16, 16  ;;  %v378_v23 = vld [vmem:[#allocation2 + $0x80] sm:$0x1]  ;;  %v1267_v45 = vld [vmem:[#allocation2 + $0x78] sm:$0xf] }
  0x7c   : > { %v1430_v5 = vrot.slane %v1428_v2, 5  ;;  %v376_v59 = vsel %vm14030_vm6, 0, %v375_v62  ;;  %v1505_v20 = vshrl.u32 %v1264_v57, 16  ;;  %v1508_v29 = vshll.u32 %v1264_v57, 16  ;;  %v14533_v53 = vld [vmem:[%s18087_s1 + $0x6] sm:$0x3] }
  0x7d   : > { %12552 = vmatprep.mubr.msk.bf16.mxu0 %vm991_vm10, %v11432_v6  ;;  %v14472_v8 = vld [vmem:[#allocation2 + $0x50] sm:$0x1]  ;;  %v14474_v39 = vrot.slane %v1487_v24, 4  ;;  %v1496_v54 = vrot.slane %v1494_v11, 4  ;;  %377 = vst [vmem:[#allocation2 + $0x74] sm:$0x1] %v376_v59  ;;  %v1469_v30 = vsel %vm14292_vm13, %v14461_v44, %v14434_v3  ;;  %13799 = vmatprep.subr.msk.bf16.mxu0 %vm1040_vm0, %v14533_v53 }
  0x7e   : > { %v1514_v43 = vshll.u32 %v14464_v18, 16  ;;  %v1518_v21 = vshrl.u32 %v14464_v18, 16  ;;  %v1431_v62 = vsel %vm14292_vm13, %v14418_v46, %v1430_v5  ;;  %v1452_v33 = vshll.u32 %v14472_v8, 16  ;;  %v812_v57 = vld [vmem:[#allocation2 + $0x68] sm:$0x1] }
  0x7f   : > { %v1507_v56 = vrot.slane %v1505_v20, 4  ;;  %v1510_v47 = vrot.slane %v1508_v29, 5  ;;  %v11433_v36 = vcombine.low %v1421_v40, %v1431_v62  ;;  %v1474_v13 = vrot.slane %v1473_v14, 4  ;;  %v14494_v59 = vld [vmem:[#allocation2 + $0x7c] sm:$0xf] }
  0x80   : > { %v813_v2 = vsel %vm14020_vm4, %v571_v48, %v812_v57  ;;  %v1497_v6 = vor.u32 %v1496_v54, %v14466_v19  ;;  %v1454_v46 = vrot.slane %v1452_v33, 5  ;;  %v14492_v11 = vrot.slane %v1514_v43, 5  ;;  %v381_v3 = vld [vmem:[#allocation2 + $0x8c] sm:$0x1]  ;;  %v1270_v44 = vld [vmem:[#allocation2 + $0x84] sm:$0xf] }
  0x81   : > { %814 = vst [vmem:[#allocation2 + $0x68] sm:$0x1] %v813_v2  ;;  %v1511_v24 = vor.u32 %v1510_v47, %v1507_v56  ;;  %v1520_v5 = vrot.slane %v1518_v21, 4  ;;  %v14496_v20 = vld [vmem:[#allocation2 + $0x5c] sm:$0x1]  ;;  %v379_v48 = vsel %vm14030_vm6, 0, %v378_v23 }
  0x82   : > { %v1529_v51 = vshrl.u32 %v1267_v45, 16  ;;  %v1532_v60 = vshll.u32 %v1267_v45, 16  ;;  %12553 = vmatmul.mubr.msk.bf16.gmra.mrb[8].mxu0 %vm991_vm10, %v11433_v36  ;;  %v1455_v40 = vsel %vm14292_vm13, %v1450_v12, %v1454_v46  ;;  %v1476_v14 = vshll.u32 %v14496_v20, 16  ;;  %380 = vst [vmem:[#allocation2 + $0x80] sm:$0x1] %v379_v48 }
  0x83   : > { %v14512_v54 = vrot.slane %v1511_v24, 4  ;;  %v11434_v23 = vcombine.low %v1445_v49, %v1455_v40  ;;  %v1538_v21 = vshll.u32 %v14494_v59, 16  ;;  %v14515_v62 = vld [vmem:[#allocation2 + $0x88] sm:$0xf]  ;;  %v1498_v33 = vrot.slane %v1497_v6, 4 }
  0x84   : > { %v1531_v43 = vrot.slane %v1529_v51, 4  ;;  %v1534_v45 = vrot.slane %v1532_v60, 5  ;;  %v1478_v12 = vrot.slane %v1476_v14, 5  ;;  %v819_v57 = vld [vmem:[#allocation2 + $0x74] sm:$0x1]  ;;  %v1521_v56 = vor.u32 %v1520_v5, %v14492_v11 }
  0x85   : > { %v1542_v47 = vshrl.u32 %v14494_v59, 16  ;;  %12556 = vmatprep.mubr.msk.bf16.mxu0 %vm991_vm10, %v11434_v23  ;;  %v820_v49 = vsel %vm14020_vm4, %v588_v10, %v819_v57  ;;  %v14524_v2 = vrot.slane %v1538_v21, 5  ;;  %v382_v46 = vsel %vm14030_vm6, 0, %v381_v3  ;;  %v384_v24 = vld [vmem:[#allocation2 + $0x98] sm:$0x1] }
  0x86   : > { %v1535_v36 = vor.u32 %v1534_v45, %v1531_v43  ;;  %v1479_v6 = vsel %vm14292_vm13, %v1474_v13, %v1478_v12  ;;  %821 = vst [vmem:[#allocation2 + $0x74] sm:$0x1] %v820_v49  ;;  %383 = vst [vmem:[#allocation2 + $0x8c] sm:$0x1] %v382_v46  ;;  %v1553_v48 = vshrl.u32 %v1270_v44, 16  ;;  %v1556_v51 = vshll.u32 %v1270_v44, 16 }
  0x87   : > { %v1544_v5 = vrot.slane %v1542_v47, 4  ;;  %v1273_v60 = vld [vmem:[#allocation2 + $0x90] sm:$0xf]  ;;  %v11435_v10 = vcombine.low %v1469_v30, %v1479_v6  ;;  %v1562_v13 = vshll.u32 %v14515_v62, 16  ;;  %v1566_v3 = vshrl.u32 %v14515_v62, 16 }
  0x88   : > { %v14535_v40 = vld [vmem:[#allocation2 + $0x68] sm:$0x1]  ;;  %v14543_v23 = vld [vmem:[#allocation2 + $0x94] sm:$0xf]  ;;  %v1555_v43 = vrot.slane %v1553_v48, 4  ;;  %v1558_v45 = vrot.slane %v1556_v51, 5 }
  0x89   : > { %v1500_v44 = vshll.u32 %v14535_v40, 16  ;;  %v1545_v30 = vor.u32 %v1544_v5, %v14524_v2  ;;  %v387_v21 = vld [vmem:[#allocation2 + $0xa4] sm:$0x1]  ;;  %v826_v12 = vld [vmem:[#allocation2 + $0x80] sm:$0x1]  ;;  %v14549_v57 = vrot.slane %v1535_v36, 4 }
  0x8a   : > { %v14551_v47 = vrot.slane %v1562_v13, 5  ;;  %v1568_v49 = vrot.slane %v1566_v3, 4  ;;  %v385_v46 = vsel %vm14030_vm6, 0, %v384_v24  ;;  %12557 = vmatmul.mubr.msk.bf16.gmra.mrb[12].mxu0 %vm991_vm10, %v11435_v10  ;;  %v1522_v14 = vrot.slane %v1521_v56, 4  ;;  %v1276_v38 = vld [vmem:[#allocation2 + $0x9c] sm:$0xf] }
  0x8b   : > { %v1502_v6 = vrot.slane %v1500_v44, 5  ;;  %v18213_v29 = vrot.slane %v14172_v0, 4  ;;  %v1559_v48 = vor.u32 %v1558_v45, %v1555_v43  ;;  %386 = vst [vmem:[#allocation2 + $0x98] sm:$0x1] %v385_v46  ;;  %v1577_v51 = vshrl.u32 %v1273_v60, 16 }
  0x8c   : > { %v1569_v36 = vor.u32 %v1568_v49, %v14551_v47  ;;  %v1580_v13 = vshll.u32 %v1273_v60, 16  ;;  %v1586_v3 = vshll.u32 %v14543_v23, 16  ;;  %v14564_v10 = vrot.slane %v1545_v30, 4  ;;  %v14569_v56 = vld [vmem:[#allocation2 + $0xa0] sm:$0xf] }
  0x8d   : > { %v827_v5 = vsel %vm14020_vm4, %v18213_v29, %v826_v12  ;;  %v1503_v24 = vsel %vm14292_vm13, %v1498_v33, %v1502_v6  ;;  %v1590_v0 = vshrl.u32 %v14543_v23, 16  ;;  %v388_v29 = vsel %vm14030_vm6, 0, %v387_v21  ;;  %v14576_v43 = vld [vmem:[#allocation2 + $0x74] sm:$0x1]  ;;  %v833_v30 = vld [vmem:[#allocation2 + $0x8c] sm:$0x1] }
  0x8e   : > { %828 = vst [vmem:[#allocation2 + $0x80] sm:$0x1] %v827_v5  ;;  %v18214_v60 = vsel %vm14292_vm13, %v14474_v39, %v14466_v19  ;;  %v14582_v45 = vrot.slane %v1559_v48, 4  ;;  %v1579_v12 = vrot.slane %v1577_v51, 4  ;;  %389 = vst [vmem:[#allocation2 + $0xa4] sm:$0x1] %v388_v29 }
  0x8f   : > { %v11436_v44 = vcombine.low %v18214_v60, %v1503_v24  ;;  %v1524_v21 = vshll.u32 %v14576_v43, 16  ;;  %v18215_v49 = vrot.slane %v14198_v37, 4  ;;  %v14589_v39 = vrot.slane %v1569_v36, 4  ;;  %v390_v6 = vld [vmem:[#allocation2 + $0xb0] sm:$0x1] }
  0x90   : > { %v1582_v46 = vrot.slane %v1580_v13, 5  ;;  %v14592_v5 = vrot.slane %v1586_v3, 5  ;;  %v1592_v48 = vrot.slane %v1590_v0, 4  ;;  %v1601_v24 = vshrl.u32 %v1276_v38, 16  ;;  %v1279_v42 = vld [vmem:[#allocation2 + $0xa8] sm:$0xf] }
  0x91   : > { %v834_v19 = vsel %vm14020_vm4, %v18215_v49, %v833_v30  ;;  %12560 = vmatprep.mubr.msk.bf16.mxu0 %vm991_vm10, %v11436_v44  ;;  %v1604_v51 = vshll.u32 %v1276_v38, 16  ;;  %v1526_v29 = vrot.slane %v1524_v21, 5  ;;  %v1610_v33 = vshll.u32 %v14569_v56, 16 }
  0x92   : > { %835 = vst [vmem:[#allocation2 + $0x8c] sm:$0x1] %v834_v19  ;;  %v1583_v60 = vor.u32 %v1582_v46, %v1579_v12  ;;  %v1614_v37 = vshrl.u32 %v14569_v56, 16  ;;  %v840_v30 = vld [vmem:[#allocation2 + $0x98] sm:$0x1]  ;;  %v1593_v36 = vor.u32 %v1592_v48, %v14592_v5  ;;  %v1603_v13 = vrot.slane %v1601_v24, 4 }
  0x93   : > { %v1606_v49 = vrot.slane %v1604_v51, 5  ;;  %v391_v44 = vsel %vm14030_vm6, 0, %v390_v6  ;;  %vm2031_vm15 = vcmask 1046532   ;;  %v1527_v38 = vsel %vm14292_vm13, %v1522_v14, %v1526_v29  ;;  %v14613_v46 = vld [vmem:[#allocation2 + $0xac] sm:$0xf] }
  0x94   : > { %v1565_v0 = vsel %vm14292_vm13, %v14582_v45, %v14551_v47  ;;  %v18216_v12 = vrot.slane %v14206_v55, 4  ;;  %v14611_v19 = vrot.slane %v1610_v33, 5  ;;  %392 = vst [vmem:[#allocation2 + $0xb0] sm:$0x1] %v391_v44  ;;  %18217 = vst [vmem:[#allocation7_spill] sm:$0xff] %v14613_v46  ;;  %v18218_v14 = vsel %vm14292_vm13, %v14512_v54, %v14492_v11 }
  0x95   : > { %v14601_v3 = vld [vmem:[#allocation2 + $0x80] sm:$0x1]  ;;  %v11437_v6 = vcombine.low %v18218_v14, %v1527_v38  ;;  %v14621_v47 = vrot.slane %v1583_v60, 4  ;;  %v1607_v55 = vor.u32 %v1606_v49, %v1603_v13  ;;  %v14623_v45 = vrot.slane %v1593_v36, 4  ;;  %v847_v24 = vld [vmem:[#allocation2 + $0xa4] sm:$0x1]  ;;  %vm14683_vm2 = vmor %vm2030_vm14, %vm2031_vm15 }
  0x96   : > { %v841_v21 = vsel %vm14020_vm4, %v18216_v12, %v840_v30  ;;  %v1548_v48 = vshll.u32 %v14601_v3, 16  ;;  %v1616_v33 = vrot.slane %v1614_v37, 4  ;;  %v1625_v51 = vshrl.u32 %v1279_v42, 16  ;;  %v393_v30 = vld [vmem:[#allocation2 + $0xbc] sm:$0x1] }
  0x97   : > { %842 = vst [vmem:[#allocation2 + $0x98] sm:$0x1] %v841_v21  ;;  %v1628_v29 = vshll.u32 %v1279_v42, 16  ;;  %12561 = vmatmul.mubr.msk.bf16.gmra.mrb[16].mxu0 %vm991_vm10, %v11437_v6  ;;  %v18219_v12 = vrot.slane %v14226_v31, 4  ;;  %v14630_v54 = vrot.slane %v1607_v55, 4  ;;  %v1634_v60 = vshll.u32 %v14613_v46, 16 }
  0x98   : > { %v1550_v44 = vrot.slane %v1548_v48, 5  ;;  %v1282_v13 = vld [vmem:[#allocation2 + $0xb4] sm:$0xf]  ;;  %v1617_v37 = vor.u32 %v1616_v33, %v14611_v19  ;;  %v1627_v42 = vrot.slane %v1625_v51, 4  ;;  %v1638_v38 = vshrl.u32 %v14613_v46, 16 }
  0x99   : > { %v848_v11 = vsel %vm14020_vm4, %v18219_v12, %v847_v24  ;;  %v14633_v36 = vld [vmem:[#allocation2 + $0x8c] sm:$0x1]  ;;  %v1630_v49 = vrot.slane %v1628_v29, 5  ;;  %v1589_v14 = vsel %vm14292_vm13, %v14621_v47, %v14592_v5  ;;  %v1613_v6 = vsel %vm14292_vm13, %v14630_v54, %v14611_v19  ;;  %v14649_v48 = vld [vmem:[#allocation2 + $0xb8] sm:$0xf] }
  0x9a   : > { %849 = vst [vmem:[#allocation2 + $0xa4] sm:$0x1] %v848_v11  ;;  %v1551_v31 = vsel %vm14292_vm13, %v14564_v10, %v1550_v44  ;;  %v1572_v21 = vshll.u32 %v14633_v36, 16  ;;  %v18220_v55 = vsel %vm14292_vm13, %v14549_v57, %v14524_v2  ;;  %v14656_v33 = vrot.slane %v1634_v60, 5  ;;  %v1966_v29 = vld [vmem:[#allocation2] sm:$0xe] }
  0x9b   : > { %v11438_v10 = vcombine.low %v18220_v55, %v1551_v31  ;;  %v1631_v24 = vor.u32 %v1630_v49, %v1627_v42  ;;  %v1640_v51 = vrot.slane %v1638_v38, 4  ;;  %v854_v5 = vld [vmem:[#allocation2 + $0xb0] sm:$0x1]  ;;  %v394_v47 = vsel %vm14030_vm6, 0, %v393_v30  ;;  %v1967_v11 = vld [vmem:[#allocation2 + $0xc] sm:$0xe] }
  0x9c   : > { %v1574_v44 = vrot.slane %v1572_v21, 5  ;;  %v1649_v12 = vshrl.u32 %v1282_v13, 16  ;;  %v1652_v19 = vshll.u32 %v1282_v13, 16  ;;  %v1618_v46 = vrot.slane %v1617_v37, 4  ;;  %395 = vst [vmem:[#allocation2 + $0xbc] sm:$0x1] %v394_v47 }
  0x9d   : > { %12564 = vmatprep.mubr.msk.bf16.mxu0 %vm991_vm10, %v11438_v10  ;;  %v18221_v2 = vrot.slane %v14237_v50, 4  ;;  %v14667_v60 = vrot.slane %v1631_v24, 4  ;;  %v1658_v42 = vshll.u32 %v14649_v48, 16  ;;  %v1641_v31 = vor.u32 %v1640_v51, %v14656_v33 }
  0x9e   : > { %v14661_v54 = vld [vmem:[#allocation2 + $0x98] sm:$0x1]  ;;  %v1575_v30 = vsel %vm14292_vm13, %v14589_v39, %v1574_v44  ;;  %v1651_v49 = vrot.slane %v1649_v12, 4  ;;  %v1654_v38 = vrot.slane %v1652_v19, 5  ;;  %v18222_v55 = vmov 0 }
  0x9f   : > { %v855_v57 = vsel %vm14020_vm4, %v18221_v2, %v854_v5  ;;  %v1596_v13 = vshll.u32 %v14661_v54, 16  ;;  %v11439_v37 = vcombine.low %v1565_v0, %v1575_v30  ;;  %v1637_v50 = vsel %vm14292_vm13, %v14667_v60, %v14656_v33  ;;  %v1968_v12 = vld [vmem:[#allocation2 + $0x18] sm:$0xe] }
  0xa0   : > { %856 = vst [vmem:[#allocation2 + $0xb0] sm:$0x1] %v855_v57  ;;  %v14679_v21 = vrot.slane %v1658_v42, 5  ;;  %v18223_v55 = vsel %vm14683_vm2, 4294967295, %v18222_v55  ;;  %v1655_v24 = vor.u32 %v1654_v38, %v1651_v49  ;;  %v1662_v0 = vshrl.u32 %v14649_v48, 16 }
  0xa1   : > { %18224 = vst [vmem:[#allocation8_spill] sm:$0xff] %v18223_v55  ;;  %v1598_v39 = vrot.slane %v1596_v13, 5  ;;  %v14687_v10 = vld [vmem:[#allocation2 + $0xa4] sm:$0x1]  ;;  %v11460_v44 = vrot.slane %v1966_v29, 9  ;;  %12565 = vmatmul.mubr.msk.bf16.gmra.mrb[20].mxu0 %vm991_vm10, %v11439_v37  ;;  %v2038_v33 = vrot.slane %v14281_v15, 5 }
  0xa2   : > { %v1620_v5 = vshll.u32 %v14687_v10, 16  ;;  %v11461_v51 = vrot.slane %v1967_v11, 9  ;;  %v2042_v47 = vrot.slane %v14277_v1, 5  ;;  %v14697_v2 = vrot.slane %v1655_v24, 4  ;;  %v1969_v11 = vld [vmem:[#allocation2 + $0x24] sm:$0xe] }
  0xa3   : > { %v1599_v19 = vsel %vm14292_vm13, %v14623_v45, %v1598_v39  ;;  %v1664_v57 = vrot.slane %v1662_v0, 4  ;;  %v18225_v60 = vrot.slane %v14252_v22, 5  ;;  %v1642_v15 = vrot.slane %v1641_v31, 4  ;;  %v861_v13 = vld [vmem:[#allocation2 + $0xbc] sm:$0x1] }
  0xa4   : > { %v11440_v42 = vcombine.low %v1589_v14, %v1599_v19  ;;  %v1622_v30 = vrot.slane %v1620_v5, 5  ;;  %v14708_v1 = vsel %vm14683_vm2, %v14314_v52, %v2038_v33  ;;  %v1661_v45 = vsel %vm14292_vm13, %v14697_v2, %v14679_v21  ;;  %v1970_v38 = vld [vmem:[#allocation2 + $0x30] sm:$0xe]  ;;  %v1977_v2 = vld [vmem:[#allocation2 + $0x84] sm:$0xe] }
  0xa5   : > { %v14703_v29 = vsel %vm14683_vm2, %v11460_v44, %v18225_v60  ;;  %v1665_v22 = vor.u32 %v1664_v57, %v14679_v21  ;;  %v14717_v49 = vsel %vm14683_vm2, %v11461_v51, %v2042_v47  ;;  %v2044_v14 = vrot.slane %v2042_v47, 4  ;;  %v1971_v57 = vld [vmem:[#allocation2 + $0x3c] sm:$0xe] }
  0xa6   : > { %12568 = vmatprep.mubr.msk.bf16.mxu0 %vm991_vm10, %v11440_v42  ;;  %v1623_v52 = vsel %vm14292_vm13, %v1618_v46, %v1622_v30  ;;  %v18226_v31 = vrot.slane %v14255_v27, 4  ;;  %v11477_v24 = vcombine.low %v14703_v29, %v14708_v1  ;;  %v2045_v0 = vrot.slane %v14279_v9, 5  ;;  %v1972_v30 = vld [vmem:[#allocation2 + $0x48] sm:$0xe] }
  0xa7   : > { %v14722_v37 = vld [vmem:[#allocation2 + $0xb0] sm:$0x1]  ;;  %v11441_v44 = vcombine.low %v1613_v6, %v1623_v52  ;;  %v14734_v33 = vsel %vm1040_vm0, %v14533_v53, 0  ;;  %v11462_v46 = vrot.slane %v1968_v12, 9  ;;  %v1666_v51 = vrot.slane %v1665_v22, 4 }
  0xa8   : > { %v862_v39 = vsel %vm14020_vm4, %v18226_v31, %v861_v13  ;;  %v1644_v5 = vshll.u32 %v14722_v37, 16  ;;  %v14738_v27 = vsel %vm14683_vm2, %v2044_v14, %v2045_v0  ;;  %v2049_v47 = vrot.slane %v14299_v58, 5  ;;  %v1973_v22 = vld [vmem:[#allocation2 + $0x54] sm:$0xe]  ;;  %v1974_v31 = vld [vmem:[#allocation2 + $0x60] sm:$0xe] }
  0xa9   : > { %863 = vst [vmem:[#allocation2 + $0xbc] sm:$0x1] %v862_v39  ;;  %v2052_v19 = vrot.slane %v14382_v26, 5  ;;  %v11463_v6 = vrot.slane %v1969_v11, 9  ;;  %v2056_v60 = vrot.slane %v14320_v25, 5  ;;  %v2059_v42 = vrot.slane %v14403_v35, 5  ;;  %12569 = vmatmul.mubr.msk.bf16.gmra.mrb[24].mxu0 %vm991_vm10, %v11441_v44 }
  0xaa   : > { %v1646_v9 = vrot.slane %v1644_v5, 5  ;;  %v14747_v53 = vsel %vm14683_vm2, %v11462_v46, %v2049_v47  ;;  %v2051_v12 = vrot.slane %v2049_v47, 4  ;;  %v11464_v13 = vrot.slane %v1970_v38, 9 }
  0xab   : > { %v2063_v58 = vrot.slane %v14326_v17, 5  ;;  %v11478_v11 = vcombine.low %v14717_v49, %v14738_v27  ;;  %v2058_v25 = vrot.slane %v2056_v60, 4  ;;  %v2066_v35 = vrot.slane %v14423_v41, 5 }
  0xac   : > { %v1647_v26 = vsel %vm14292_vm13, %v1642_v15, %v1646_v9  ;;  %v14757_v52 = vsel %vm14683_vm2, %v2051_v12, %v2052_v19  ;;  %v14767_v39 = vsel %vm14683_vm2, %v11463_v6, %v2056_v60  ;;  %v11465_v41 = vrot.slane %v1971_v57, 9  ;;  %v1975_v6 = vld [vmem:[#allocation2 + $0x6c] sm:$0xe] }
  0xad   : > { %v11442_v14 = vcombine.low %v1637_v50, %v1647_v26  ;;  %v14761_v38 = vsel %vm14683_vm2, %v11464_v13, %v2063_v58  ;;  %v2065_v17 = vrot.slane %v2063_v58, 4  ;;  %v11479_v15 = vcombine.low %v14747_v53, %v14757_v52 }
  0xae   : > { %v2070_v50 = vrot.slane %v14340_v63, 5  ;;  %v14775_v44 = vsel %vm14683_vm2, %v2058_v25, %v2059_v42  ;;  %v2073_v46 = vrot.slane %v14451_v61, 5  ;;  %v11466_v47 = vrot.slane %v1972_v30, 9 }
  0xaf   : > { %12572 = vmatprep.mubr.msk.bf16.mxu0 %vm991_vm10, %v11442_v14  ;;  %v14779_v5 = vsel %vm14683_vm2, %v2065_v17, %v2066_v35  ;;  %v2077_v60 = vrot.slane %v14366_v32, 5  ;;  %v2080_v42 = vrot.slane %v14472_v8, 5  ;;  %v11467_v12 = vrot.slane %v1973_v22, 9 }
  0xb0   : > { %v14771_v0 = vld [vmem:[#allocation2 + $0xbc] sm:$0x1]  ;;  %v11481_v63 = vcombine.low %v14761_v38, %v14779_v5  ;;  %v14787_v57 = vsel %vm14683_vm2, %v11465_v41, %v2070_v50  ;;  %v2072_v9 = vrot.slane %v2070_v50, 4  ;;  %v2084_v13 = vrot.slane %v14395_v28, 5  ;;  %v13841_v38 = vld [vmem:[#allocation2 + $0xc] sm:$0xff]  }
  0xb1   : > { %v1668_v19 = vshll.u32 %v14771_v0, 16  ;;  %v2087_v58 = vrot.slane %v14496_v20, 5  ;;  %v11468_v26 = vrot.slane %v1974_v31, 9  ;;  %v14801_v35 = vsel %vm14683_vm2, %v11466_v47, %v2077_v60  ;;  %v13842_v5 = vld [vmem:[#allocation2 + $0x18] sm:$0xff]  }
  0xb2   : > { %v14794_v30 = vsel %vm14683_vm2, %v2072_v9, %v2073_v46  ;;  %v2079_v32 = vrot.slane %v2077_v60, 4  ;;  %v14805_v8 = vsel %vm14683_vm2, %v11467_v12, %v2084_v13  ;;  %v2086_v22 = vrot.slane %v2084_v13, 4  ;;  %v1976_v46 = vld [vmem:[#allocation2 + $0x78] sm:$0xe]  ;;  %v1978_v12 = vld [vmem:[#allocation2 + $0x90] sm:$0xe] }
  0xb3   : > { %v1670_v61 = vrot.slane %v1668_v19, 5  ;;  %v11482_v25 = vcombine.low %v14787_v57, %v14794_v30  ;;  %v2091_v14 = vrot.slane %v14430_v16, 5  ;;  %v2094_v20 = vrot.slane %v14535_v40, 5  ;;  %v13843_v57 = vld [vmem:[#allocation2 + $0x24] sm:$0xff]   ;;  %v14962_v30 = vld [vmem:[#allocation2 + $0x10] sm:$0xf] }
  0xb4   : > { %v14818_v31 = vsel %vm14683_vm2, %v2079_v32, %v2080_v42  ;;  %v11469_v41 = vrot.slane %v1975_v6, 9  ;;  %v2098_v50 = vrot.slane %v14464_v18, 5  ;;  %v14825_v16 = vsel %vm14683_vm2, %v2086_v22, %v2087_v58 }
  0xb5   : > { %v1671_v28 = vsel %vm14292_vm13, %v1666_v51, %v1670_v61  ;;  %v11483_v51 = vcombine.low %v14801_v35, %v14818_v31  ;;  %v14829_v40 = vsel %vm14683_vm2, %v11468_v26, %v2091_v14  ;;  %v2093_v21 = vrot.slane %v2091_v14, 4  ;;  %v1980_v26 = vld [vmem:[#allocation2 + $0xa8] sm:$0xe]  ;;  %v1981_v14 = vld [vmem:[#allocation2 + $0xb4] sm:$0xe] }
  0xb6   : > { %v11443_v17 = vcombine.low %v1661_v45, %v1671_v28  ;;  %v11484_v45 = vcombine.low %v14805_v8, %v14825_v16  ;;  %v14836_v18 = vsel %vm14683_vm2, %v11469_v41, %v2098_v50  ;;  %v2100_v47 = vrot.slane %v2098_v50, 4  ;;  %v14877_v50 = vld [vmem:[%s18087_s1 + $0x8] sm:$0x3]  ;;  %v11591_v31 = vld [vmem:[%s18087_s1 + $0xa] sm:$0x3] }
  0xb7   : > { %v2101_v19 = vrot.slane %v14576_v43, 5  ;;  %v14845_v9 = vsel %vm14683_vm2, %v2093_v21, %v2094_v20  ;;  %v11470_v6 = vrot.slane %v1976_v46, 9  ;;  %v2105_v60 = vrot.slane %v14494_v59, 5 }
  0xb8   : > { %12573 = vmatmul.mubr.msk.bf16.gmra.mrb[28].mxu0 %vm991_vm10, %v11443_v17  ;;  %v2108_v42 = vrot.slane %v14601_v3, 5  ;;  %v11485_v13 = vcombine.low %v14829_v40, %v14845_v9  ;;  %v11471_v29 = vrot.slane %v1977_v2, 9  ;;  %v2112_v1 = vrot.slane %v14515_v62, 5  ;;  %v13844_v40 = vld [vmem:[#allocation2 + $0x30] sm:$0xff]   ;;  %v396_v9 = vld [vmem:[#allocation2 + $0xc8] sm:$0x1] }
  0xb9   : > { %12578 = vmatprep.mubr.msk.bf16.mxu0 %vm991_vm10, %v11477_v24  ;;  %v14853_v43 = vsel %vm14683_vm2, %v2100_v47, %v2101_v19  ;;  %v1979_v24 = vld [vmem:[#allocation2 + $0x9c] sm:$0xe]  ;;  %v14860_v59 = vsel %vm14683_vm2, %v11470_v6, %v2105_v60  ;;  %v2107_v3 = vrot.slane %v2105_v60, 4  ;;  %v2115_v58 = vrot.slane %v14633_v36, 5  ;;  %v432_v60 = vld [vmem:[%s14050_s10 + $0x78] sm:$0xf] }
  0xba   : > { %v11486_v61 = vcombine.low %v14836_v18, %v14853_v43  ;;  %v14865_v32 = vsel %vm14683_vm2, %v11471_v29, %v2112_v1  ;;  %v2114_v28 = vrot.slane %v2112_v1, 4  ;;  %v11472_v22 = vrot.slane %v1978_v12, 9  ;;  %v18227_v29 = vld [vmem:[#allocation7_spill] sm:$0xff]  ;;  %v2800_v18 = vld [vmem:[#allocation2 + $0x18] sm:$0xf] }
  0xbb   : > { %v2119_v62 = vrot.slane %v14543_v23, 5  ;;  %v14870_v20 = vsel %vm14683_vm2, %v2107_v3, %v2108_v42  ;;  %v2122_v17 = vrot.slane %v14661_v54, 5  ;;  %v11473_v41 = vrot.slane %v1979_v24, 9  ;;  %v340_v54 = vld [vmem:[#allocation2 + $0xc0] sm:$0x1] }
  0xbc   : > { %v2126_v36 = vrot.slane %v14569_v56, 5  ;;  %v11487_v23 = vcombine.low %v14860_v59, %v14870_v20  ;;  %v2116_v46 = vsel %vm14683_vm2, %v2114_v28, %v2115_v58  ;;  %v2129_v6 = vrot.slane %v14687_v10, 5  ;;  %v433_v59 = vld [vmem:[%s14050_s10 + $0x7c] sm:$0xf] }
  0xbd   : > { %v2120_v21 = vsel %vm14683_vm2, %v11472_v22, %v2119_v62  ;;  %v2121_v2 = vrot.slane %v2119_v62, 4  ;;  %v11488_v47 = vcombine.low %v14865_v32, %v2116_v46  ;;  %v11474_v12 = vrot.slane %v1980_v26, 9  ;;  %v15146_v46 = vld [vmem:[#allocation2 + $0x30] sm:$0xf] }
  0xbe   : > { %v2127_v56 = vsel %vm14683_vm2, %v11473_v41, %v2126_v36  ;;  %v2128_v19 = vrot.slane %v2126_v36, 4  ;;  %v2133_v1 = vrot.slane %v18227_v29, 5  ;;  %v2136_v24 = vrot.slane %v14722_v37, 5 }
  0xbf   : > { %v2123_v42 = vsel %vm14683_vm2, %v2121_v2, %v2122_v17  ;;  %v11475_v27 = vrot.slane %v1981_v14, 9  ;;  %v2143_v26 = vrot.slane %v14771_v0, 5  ;;  %v692_v32 = vshrl.u32 %v432_v60, 16 }
  0xc0   : > { %12579 = vmatmul.mubr.msk.bf16.vlgmr.msra.gmra.mrb[0].mxu0 %vm991_vm10, %v11478_v11  ;;  %v11489_v10 = vcombine.low %v2120_v21, %v2123_v42  ;;  %v2130_v49 = vsel %vm14683_vm2, %v2128_v19, %v2129_v6  ;;  %v2140_v11 = vrot.slane %v14649_v48, 5  ;;  %v2134_v58 = vsel %vm14683_vm2, %v11474_v12, %v2133_v1  ;;  %v14983_v12 = vld [vmem:[#allocation2 + $0x20] sm:$0x1] }
  0xc1   : > { %12611 = vmatpush3.bf16.msra.mxu0 %v14734_v33  ;;  %12582 = vmatprep.mubr.msk.bf16.mxu0 %vm991_vm10, %v11479_v15  ;;  %v11490_v3 = vcombine.low %v2127_v56, %v2130_v49  ;;  %v2135_v37 = vrot.slane %v2133_v1, 4  ;;  %v11480_v33 = vcombine.low %v14767_v39, %v14775_v44  ;;  %v341_v48 = vsel %vm14020_vm4, 0, %v340_v54  ;;  %18230 = vst [vmem:[#allocation7_spill] sm:$0xff] %v14983_v12 }
  0xc2   : > { %13800 = vmatprep.subr.msk.bf16.mxu0 %vm1040_vm0, %v14877_v50  ;;  %v2141_v53 = vsel %vm14683_vm2, %v11475_v27, %v2140_v11  ;;  %v2142_v52 = vrot.slane %v2140_v11, 4  ;;  %342 = vst [vmem:[#allocation2 + $0xc0] sm:$0x1] %v341_v48  ;;  %v695_v28 = vshll.u32 %v432_v60, 16  ;;  %v700_v0 = vshrl.u32 %v433_v59, 16 }
  0xc3   : > { %v2137_v15 = vsel %vm14683_vm2, %v2135_v37, %v2136_v24  ;;  %v703_v14 = vshll.u32 %v433_v59, 16  ;;  %v694_v44 = vrot.slane %v692_v32, 7  ;;  %v2859_v16 = vshrl.u32 %v14962_v30, 16  ;;  %v3525_v37 = vld [vmem:[#allocation2 + $0x24] sm:$0xe] }
  0xc4   : > { %v11491_v22 = vcombine.low %v2134_v58, %v2137_v15  ;;  %v2144_v62 = vsel %vm14683_vm2, %v2142_v52, %v2143_v26  ;;  %v14922_v20 = vrot.slane %v700_v0, 7  ;;  %v2870_v6 = vshrl.u32 %v2800_v18, 16  ;;  %v13846_v58 = vld [vmem:[#allocation2 + $0x48] sm:$0xff]   ;;  %v13847_v26 = vld [vmem:[#allocation2 + $0x54] sm:$0xff]  }
  0xc5   : > { %v11492_v39 = vcombine.low %v2141_v53, %v2144_v62  ;;  %v697_v17 = vor.u32 %v695_v28, %v694_v44  ;;  %v698_v41 = vrot.slane %v694_v44, 4  ;;  %v2873_v60 = vshll.u32 %v2800_v18, 16  ;;  %v15006_v15 = vld [vmem:[#allocation2 + $0x28] sm:$0xf]  ;;  %v15008_v32 = vld [vmem:[#allocation2 + $0x2c] sm:$0x1] }
  0xc6   : > { %v705_v36 = vor.u32 %v703_v14, %v14922_v20  ;;  %v397_v42 = vsel %vm14030_vm6, 0, %v396_v9  ;;  %v707_v24 = vrot.slane %v14922_v20, 4  ;;  %v14993_v27 = vrot.slane %v2870_v6, 4  ;;  %v3526_v28 = vld [vmem:[#allocation2 + $0x30] sm:$0xe] }
  0xc7   : > { %398 = vst [vmem:[#allocation2 + $0xc8] sm:$0x1] %v397_v42  ;;  %v14995_v11 = vrot.slane %v2873_v60, 5  ;;  %v15014_v62 = vld [vmem:[#allocation2 + $0x34] sm:$0xf]  ;;  %v11577_v20 = vrot.slane %v3525_v37, 9 }
  0xc8   : > { %12583 = vmatmul.mubr.msk.bf16.gmra.mrb[4].mxu0 %vm991_vm10, %v11480_v33  ;;  %v706_v21 = vsel %vm14071_vm9, %v698_v41, %v705_v36  ;;  %v15016_v14 = vld [vmem:[#allocation2 + $0x38] sm:$0x1]  ;;  %v15020_v41 = vld [vmem:[#allocation2 + $0x44] sm:$0x1]  ;;  %v3606_v54 = vrot.slane %v15008_v32, 5  ;;  %vm6400_vm7 = vcmask 1043456  }
  0xc9   : > { %12586 = vmatprep.mubr.msk.bf16.mxu0 %vm991_vm10, %v11481_v63  ;;  %v864_v2 = vld [vmem:[#allocation2 + $0xc0] sm:$0xf]  ;;  %867 = vst.msk [vmem:[#allocation2 + $0xc4] sm:$0xf] %vm280_vm1, %v706_v21  ;;  %v2797_v63 = vld [vmem:[#allocation2 + $0xc] sm:$0xf] }
  0xca   : > { %v865_v56 = vsel %vm14064_vm8, %v697_v17, %v864_v2  ;;  %v2846_v35 = vshrl.u32 %v2797_v63, 16  ;;  %v2849_v8 = vshll.u32 %v2797_v63, 16  ;;  %v3527_v17 = vld [vmem:[#allocation2 + $0x3c] sm:$0xe]  ;;  %v15025_v21 = vsel %vm1040_vm0, %v11591_v31, 0 }
  0xcb   : > { %866 = vst [vmem:[#allocation2 + $0xc0] sm:$0xf] %v865_v56  ;;  %v3603_v2 = vrot.slane %v15006_v15, 5  ;;  %v11578_v56 = vrot.slane %v3526_v28, 9  ;;  %v3613_v63 = vrot.slane %v15016_v14, 5  ;;  %vm5583_vm1 = vcmask 57344  }
  0xcc   : > { %v2848_v43 = vrot.slane %v2846_v35, 4  ;;  %v3528_v35 = vld [vmem:[#allocation2 + $0x48] sm:$0xe]  ;;  %v15044_v9 = vld [vmem:[#allocation2 + $0x50] sm:$0x1]  ;;  %vm6351_vm8 = vcmask 64512  }
  0xcd   : > { %v11580_v6 = vrot.slane %v3528_v35, 9  ;;  %v3530_v42 = vld [vmem:[#allocation2 + $0x60] sm:$0xe] }
  0xce   : > { %v868_v44 = vld [vmem:[#allocation2 + $0xc8] sm:$0x1] }
  0xcf   : > { %v869_v36 = vsel %vm14020_vm4, %v707_v24, %v868_v44  ;;  %v2913_v24 = vshll.u32 %v15008_v32, 16 }
  0xd0   : > { %12587 = vmatmul.mubr.msk.bf16.gmra.mrb[8].mxu0 %vm991_vm10, %v11482_v25  ;;  %v3328_v25 = vsel %vm1040_vm0, %v14877_v50, 0  ;;  %870 = vst [vmem:[#allocation2 + $0xc8] sm:$0x1] %v869_v36 }
  0xd1   : > { %12590 = vmatprep.mubr.msk.bf16.mxu0 %vm991_vm10, %v11483_v51  ;;  %v2855_v51 = vshll.u32 %v14962_v30, 16 }
  0xd3   : > { %v14976_v50 = vrot.slane %v2855_v51, 5  ;;  %v3605_v51 = vrot.slane %v3603_v2, 4 }
  0xd8   : > { %12591 = vmatmul.mubr.msk.bf16.gmra.mrb[12].mxu0 %vm991_vm10, %v11484_v45  ;;  %v14973_v45 = vld [vmem:[#allocation2 + $0x14] sm:$0x1] }
  0xd9   : > { %12594 = vmatprep.mubr.msk.bf16.mxu0 %vm991_vm10, %v11485_v13  ;;  %v13845_v13 = vld [vmem:[#allocation2 + $0x3c] sm:$0xff]   ;;  %v2865_v19 = vshll.u32 %v14973_v45, 16 }
  0xdb   : > { %v14991_v49 = vrot.slane %v2865_v19, 5 }
  0xe0   : > { %12595 = vmatmul.mubr.msk.bf16.gmra.mrb[16].mxu0 %vm991_vm10, %v11486_v61  ;;  %v2851_v61 = vrot.slane %v2849_v8, 5  ;;  %v2876_v8 = vor.u32 %v14995_v11, %v14993_v27  ;;  %v13849_v11 = vld [vmem:[#allocation2 + $0x6c] sm:$0xff]  }
  0xe1   : > { %12598 = vmatprep.mubr.msk.bf16.mxu0 %vm991_vm10, %v11487_v23  ;;  %v2861_v23 = vrot.slane %v2859_v16, 4  ;;  %v3620_v16 = vrot.slane %v15020_v41, 5 }
  0xe2   : > { %v2852_v29 = vor.u32 %v2851_v61, %v2848_v43 }
  0xe3   : > { %v2862_v59 = vor.u32 %v2861_v23, %v14976_v50  ;;  %v15056_v23 = vsel %vm14683_vm2, %v3605_v51, %v3606_v54  ;;  %v11582_v54 = vrot.slane %v3530_v42, 9  ;;  %v3532_v42 = vld [vmem:[#allocation2 + $0x78] sm:$0xe] }
  0xe4   : > { %v14998_v33 = vrot.slane %v2852_v29, 4  ;;  %18234 = vst [vmem:[#allocation11_spill] sm:$0xff] %v15056_v23  ;;  %v13848_v29 = vld [vmem:[#allocation2 + $0x60] sm:$0xff]  }
  0xe5   : > { %v15002_v52 = vrot.slane %v2862_v59, 4 }
  0xe8   : > { %12599 = vmatmul.mubr.msk.bf16.gmra.mrb[20].mxu0 %vm991_vm10, %v11488_v47  ;;  %v14978_v47 = vld [vmem:[#allocation2 + $0x1c] sm:$0xf] }
  0xe9   : > { %12602 = vmatprep.mubr.msk.bf16.mxu0 %vm991_vm10, %v11489_v10  ;;  %v2879_v1 = vshll.u32 %v14978_v47, 16  ;;  %v2883_v10 = vshrl.u32 %v14978_v47, 16 }
  0xeb   : > { %v15000_v53 = vrot.slane %v2879_v1, 5  ;;  %v15004_v48 = vrot.slane %v2883_v10, 4  ;;  %v15059_v1 = vld [vmem:[#allocation2 + $0x58] sm:$0xf]  ;;  %v3627_v10 = vrot.slane %v15044_v9, 5 }
  0xec   : > { %v3631_v36 = vrot.slane %v15059_v1, 5 }
  0xf0   : > { %12603 = vmatmul.mubr.msk.bf16.gmra.mrb[24].mxu0 %vm991_vm10, %v11490_v3  ;;  %v2889_v3 = vshll.u32 %v14983_v12, 16 }
  0xf1   : > { %12606 = vmatprep.mubr.msk.bf16.mxu0 %vm991_vm10, %v11491_v22  ;;  %v15012_v22 = vld [vmem:[#allocation2 + $0x24] sm:$0xf] }
  0xf2   : > { %v15010_v0 = vrot.slane %v2889_v3, 5  ;;  %v2894_v18 = vshrl.u32 %v15012_v22, 16  ;;  %v15068_v3 = vld [vmem:[#allocation2 + $0x5c] sm:$0x1] }
  0xf8   : > { %12607 = vmatmul.mubr.msk.bf16.gmra.mrb[28].mxu0 %vm991_vm10, %v11492_v39  ;;  %v15018_v39 = vld [vmem:[#allocation2 + $0x40] sm:$0xf] }
  0xf9   : > { %12612 = vmatprep.mubr.msk.bf16.mxu0 %vm991_vm10, %v13841_v38  ;;  %v15030_v38 = vld [vmem:[#allocation2 + $0x4c] sm:$0xf] }
  0xfa   : > { %v3624_v60 = vrot.slane %v15030_v38, 5 }
  0xfc   : > { %v15080_v28 = vsel %vm14683_vm2, %v11580_v6, %v3624_v60  ;;  %v3626_v44 = vrot.slane %v3624_v60, 4 }
  0xfd   : > { %18237 = vst [vmem:[#allocation14_spill] sm:$0xff] %v15080_v28 }
 0x100   : > { %12613 = vmatmul.mubr.msk.bf16.vlgmr.msra.gmra.mrb[0].mxu0 %vm991_vm10, %v13842_v5  ;;  %v3610_v5 = vrot.slane %v15014_v62, 5 }
 0x101   : > { %12645 = vmatpush3.bf16.msra.mxu0 %v3328_v25  ;;  %12616 = vmatprep.mubr.msk.bf16.mxu0 %vm991_vm10, %v13843_v57  ;;  %v11579_v57 = vrot.slane %v3527_v17, 9  ;;  %v3617_v25 = vrot.slane %v15018_v39, 5 }
 0x102   : > { %13801 = vmatprep.subr.msk.bf16.mxu0 %vm1040_vm0, %v11591_v31  ;;  %v15040_v31 = vsel %vm14683_vm2, %v11577_v20, %v3603_v2  ;;  %v3612_v43 = vrot.slane %v3610_v5, 4  ;;  %v15082_v20 = vld [vmem:[#allocation2 + $0x68] sm:$0x1]  ;;  %v3634_v2 = vrot.slane %v15068_v3, 5 }
 0x103   : > { %18231 = vst [vmem:[#allocation5_spill] sm:$0xff] %v15040_v31  ;;  %v15052_v61 = vsel %vm14683_vm2, %v11579_v57, %v3617_v25  ;;  %v3619_v19 = vrot.slane %v3617_v25, 4  ;;  %v3641_v25 = vrot.slane %v15082_v20, 5 }
 0x104   : > { %18233 = vst [vmem:[#allocation10_spill] sm:$0xff] %v15052_v61  ;;  %v15065_v59 = vsel %vm14683_vm2, %v3612_v43, %v3613_v63  ;;  %v15093_v63 = vsel %vm14683_vm2, %v3626_v44, %v3627_v10  ;;  %v15106_v43 = vld [vmem:[#allocation2 + $0x74] sm:$0x1]  ;;  %v11584_v44 = vrot.slane %v3532_v42, 9  ;;  %v15156_v42 = vld [vmem:[#allocation2 + $0x8c] sm:$0x1] }
 0x105   : > { %18235 = vst [vmem:[#allocation12_spill] sm:$0xff] %v15065_v59  ;;  %18238 = vst [vmem:[#allocation15_spill] sm:$0xff] %v15093_v63  ;;  %v3662_v7 = vrot.slane %v15156_v42, 5 }
 0x108   : > { %12617 = vmatmul.mubr.msk.bf16.gmra.mrb[4].mxu0 %vm991_vm10, %v13844_v40  ;;  %v3529_v40 = vld [vmem:[#allocation2 + $0x54] sm:$0xe] }
 0x109   : > { %12620 = vmatprep.mubr.msk.bf16.mxu0 %vm991_vm10, %v13845_v13  ;;  %v15048_v13 = vsel %vm14683_vm2, %v11578_v56, %v3610_v5  ;;  %v11581_v27 = vrot.slane %v3529_v40, 9  ;;  %v2897_v56 = vshll.u32 %v15012_v22, 16  ;;  %v15089_v5 = vld [vmem:[#allocation2 + $0x70] sm:$0xf]  ;;  %v3633_v22 = vrot.slane %v3631_v36, 4 }
 0x10a   : > { %18232 = vst [vmem:[#allocation9_spill] sm:$0xff] %v15048_v13  ;;  %v3645_v40 = vrot.slane %v15089_v5, 5 }
 0x10b   : > { %v15102_v51 = vsel %vm14683_vm2, %v11581_v27, %v3631_v36  ;;  %v3648_v27 = vrot.slane %v15106_v43, 5  ;;  %v2903_v36 = vshll.u32 %v15006_v15, 16  ;;  %v2899_v37 = vrot.slane %v2897_v56, 5  ;;  %v15154_v56 = vld [vmem:[#allocation2 + $0x88] sm:$0xf] }
 0x10c   : > { %18239 = vst [vmem:[#allocation16_spill] sm:$0xff] %v15102_v51  ;;  %v3647_v10 = vrot.slane %v3645_v40, 4 }
 0x10d   : > { %v15177_v63 = vrot.slane %v2903_v36, 5  ;;  %v15192_v36 = vrot.slane %v2913_v24, 5 }
 0x10e   : > { %v15138_v17 = vsel %vm14683_vm2, %v3647_v10, %v3648_v27 }
 0x10f   : > { %18244 = vst [vmem:[#allocation21_spill] sm:$0xff] %v15138_v17 }
 0x110   : > { %12621 = vmatmul.mubr.msk.bf16.gmra.mrb[8].mxu0 %vm991_vm10, %v13846_v58  ;;  %v15070_v58 = vld [vmem:[#allocation2 + $0x64] sm:$0xf] }
 0x111   : > { %12624 = vmatprep.mubr.msk.bf16.mxu0 %vm991_vm10, %v13847_v26  ;;  %v15076_v26 = vsel %vm14683_vm2, %v3619_v19, %v3620_v16  ;;  %v3638_v57 = vrot.slane %v15070_v58, 5  ;;  %v3531_v16 = vld [vmem:[#allocation2 + $0x6c] sm:$0xe] }
 0x112   : > { %18236 = vst [vmem:[#allocation13_spill] sm:$0xff] %v15076_v26  ;;  %v11583_v60 = vrot.slane %v3531_v16, 9  ;;  %v15132_v16 = vld [vmem:[#allocation2 + $0x80] sm:$0x1]  ;;  %v13854_v26 = vld [vmem:[#allocation2 + $0xa8] sm:$0xff]  }
 0x113   : > { %v15110_v19 = vsel %vm14683_vm2, %v11582_v54, %v3638_v57  ;;  %v3640_v6 = vrot.slane %v3638_v57, 4 }
 0x114   : > { %18240 = vst [vmem:[#allocation17_spill] sm:$0xff] %v15110_v19  ;;  %v15128_v57 = vsel %vm14683_vm2, %v11583_v60, %v3645_v40  ;;  %v2907_v60 = vshrl.u32 %v15006_v15, 16  ;;  %v15158_v40 = vld [vmem:[#allocation2 + $0x94] sm:$0xf]  ;;  %v15161_v15 = vld [vmem:[#allocation2 + $0x98] sm:$0x1] }
 0x115   : > { %v15124_v54 = vsel %vm14683_vm2, %v3640_v6, %v3641_v25  ;;  %18243 = vst [vmem:[#allocation20_spill] sm:$0xff] %v15128_v57  ;;  %v13851_v25 = vld [vmem:[#allocation2 + $0x84] sm:$0xff]   ;;  %v2896_v6 = vrot.slane %v2894_v18, 4  ;;  %v2886_v18 = vor.u32 %v15004_v48, %v15000_v53  ;;  %v3534_v57 = vld [vmem:[#allocation2 + $0x90] sm:$0xe] }
 0x116   : > { %18242 = vst [vmem:[#allocation19_spill] sm:$0xff] %v15124_v54  ;;  %v3669_v54 = vrot.slane %v15161_v15, 5 }
 0x117   : > { %v2900_v19 = vor.u32 %v2899_v37, %v2896_v6  ;;  %v15175_v51 = vrot.slane %v2886_v18, 4  ;;  %v13853_v6 = vld [vmem:[#allocation2 + $0x9c] sm:$0xff]   ;;  %v2927_v18 = vshll.u32 %v15014_v62, 16 }
 0x118   : > { %12625 = vmatmul.mubr.msk.bf16.gmra.mrb[12].mxu0 %vm991_vm10, %v13848_v29  ;;  %v15114_v29 = vsel %vm14683_vm2, %v3633_v22, %v3634_v2  ;;  %v13850_v2 = vld [vmem:[#allocation2 + $0x78] sm:$0xff]   ;;  %v15130_v22 = vrot.slane %v2876_v8, 4  ;;  %v3655_v8 = vrot.slane %v15132_v16, 5 }
 0x119   : > { %12628 = vmatprep.mubr.msk.bf16.mxu0 %vm991_vm10, %v13849_v11  ;;  %18241 = vst [vmem:[#allocation18_spill] sm:$0xff] %v15114_v29  ;;  %v15118_v11 = vld [vmem:[#allocation2 + $0x7c] sm:$0xf]  ;;  %v11586_v29 = vrot.slane %v3534_v57, 9 }
 0x11a   : > { %v3652_v35 = vrot.slane %v15118_v11, 5 }
 0x11c   : > { %v15150_v10 = vsel %vm14683_vm2, %v11584_v44, %v3652_v35  ;;  %v3654_v27 = vrot.slane %v3652_v35, 4  ;;  %v3533_v44 = vld [vmem:[#allocation2 + $0x84] sm:$0xe]  ;;  %v3659_v35 = vrot.slane %v15154_v56, 5 }
 0x11d   : > { %18245 = vst [vmem:[#allocation22_spill] sm:$0xff] %v15150_v10  ;;  %v11585_v17 = vrot.slane %v3533_v44, 9  ;;  %v13852_v44 = vld [vmem:[#allocation2 + $0x90] sm:$0xff]   ;;  %v2921_v10 = vshll.u32 %v15146_v46, 16 }
 0x11e   : > { %v15165_v32 = vsel %vm14683_vm2, %v3654_v27, %v3655_v8  ;;  %v2918_v8 = vshrl.u32 %v15146_v46, 16  ;;  %v3661_v27 = vrot.slane %v3659_v35, 4  ;;  %v15201_v46 = vrot.slane %v2900_v19, 4 }
 0x11f   : > { %18246 = vst [vmem:[#allocation23_spill] sm:$0xff] %v15165_v32  ;;  %v2909_v32 = vrot.slane %v2907_v60, 4  ;;  %v2882_v19 = vsel %vm14292_vm13, %v15130_v22, %v15000_v53 }
 0x120   : > { %12629 = vmatmul.mubr.msk.bf16.gmra.mrb[16].mxu0 %vm991_vm10, %v13850_v2  ;;  %v3666_v2 = vrot.slane %v15158_v40, 5  ;;  %v15186_v37 = vsel %vm14683_vm2, %v3661_v27, %v3662_v7  ;;  %v15203_v7 = vrot.slane %v2918_v8, 4  ;;  %v15224_v8 = vld [vmem:[#allocation2 + $0xac] sm:$0xf] }
 0x121   : > { %12632 = vmatprep.mubr.msk.bf16.mxu0 %vm991_vm10, %v13851_v25  ;;  %v15181_v25 = vsel %vm14683_vm2, %v11585_v17, %v3659_v35  ;;  %18248 = vst [vmem:[#allocation25_spill] sm:$0xff] %v15186_v37  ;;  %v2931_v35 = vshrl.u32 %v15014_v62, 16  ;;  %v15220_v62 = vld [vmem:[#allocation2 + $0xa0] sm:$0xf]  ;;  %v3536_v17 = vld [vmem:[#allocation2 + $0xa8] sm:$0xe] }
 0x122   : > { %18247 = vst [vmem:[#allocation24_spill] sm:$0xff] %v15181_v25  ;;  %v3668_v48 = vrot.slane %v3666_v2, 4  ;;  %v15190_v57 = vsel %vm14683_vm2, %v11586_v29, %v3666_v2  ;;  %v2809_v29 = vld [vmem:[#allocation2 + $0x3c] sm:$0xf]  ;;  %v2858_v2 = vsel %vm14292_vm13, %v14998_v33, %v14976_v50  ;;  %v2892_v50 = vsel %vm14292_vm13, %v15175_v51, %v15010_v0  ;;  %v15232_v33 = vld [vmem:[#allocation2 + $0xb0] sm:$0x1] }
 0x123   : > { %18249 = vst [vmem:[#allocation26_spill] sm:$0xff] %v15190_v57  ;;  %v3673_v53 = vrot.slane %v15220_v62, 5  ;;  %v2942_v27 = vshrl.u32 %v2809_v29, 16  ;;  %v2945_v57 = vshll.u32 %v2809_v29, 16  ;;  %v2951_v0 = vshll.u32 %v15018_v39, 16 }
 0x124   : > { %v15199_v60 = vsel %vm14683_vm2, %v3668_v48, %v3669_v54  ;;  %v2868_v54 = vsel %vm14292_vm13, %v15002_v52, %v14991_v49  ;;  %v15222_v48 = vld [vmem:[#allocation2 + $0xa4] sm:$0x1]  ;;  %v2910_v49 = vor.u32 %v2909_v32, %v15177_v63  ;;  %v3535_v52 = vld [vmem:[#allocation2 + $0x9c] sm:$0xe]  ;;  %v11588_v32 = vrot.slane %v3536_v17, 9  ;;  %v13855_v17 = vld [vmem:[#allocation2 + $0xb4] sm:$0xff]  }
 0x125   : > { %18250 = vst [vmem:[#allocation27_spill] sm:$0xff] %v15199_v60  ;;  %v3676_v22 = vrot.slane %v15222_v48, 5  ;;  %v11587_v24 = vrot.slane %v3535_v52, 9  ;;  %v3683_v60 = vrot.slane %v15232_v33, 5  ;;  %v3675_v51 = vrot.slane %v3673_v53, 4 }
 0x126   : > { %v2923_v37 = vrot.slane %v2921_v10, 5  ;;  %v15240_v25 = vrot.slane %v2927_v18, 5  ;;  %v2911_v52 = vrot.slane %v2910_v49, 4  ;;  %v2933_v61 = vrot.slane %v2931_v35, 4 }
 0x127   : > { %v15244_v28 = vsel %vm14683_vm2, %v11587_v24, %v3673_v53  ;;  %v15248_v59 = vsel %vm14683_vm2, %v3675_v51, %v3676_v22  ;;  %v2937_v10 = vshll.u32 %v15016_v14, 16  ;;  %v2944_v18 = vrot.slane %v2942_v27, 4  ;;  %v2812_v51 = vld [vmem:[#allocation2 + $0x48] sm:$0xf]  ;;  %v15273_v27 = vld [vmem:[#allocation2 + $0xb8] sm:$0xf] }
 0x128   : > { %12633 = vmatmul.mubr.msk.bf16.gmra.mrb[20].mxu0 %vm991_vm10, %v13852_v44  ;;  %v3680_v44 = vrot.slane %v15224_v8, 5  ;;  %18251 = vst [vmem:[#allocation28_spill] sm:$0xff] %v15244_v28  ;;  %18252 = vst [vmem:[#allocation29_spill] sm:$0xff] %v15248_v59  ;;  %v2947_v35 = vrot.slane %v2945_v57, 5  ;;  %v15261_v49 = vrot.slane %v2951_v0, 5  ;;  %v2955_v22 = vshrl.u32 %v15018_v39, 16 }
 0x129   : > { %12636 = vmatprep.mubr.msk.bf16.mxu0 %vm991_vm10, %v13853_v6  ;;  %v15266_v13 = vcombine.low %v2882_v19, %v2892_v50  ;;  %v2906_v14 = vsel %vm14292_vm13, %v15201_v46, %v15177_v63  ;;  %v15275_v57 = vld [vmem:[#allocation2 + $0xbc] sm:$0x1]  ;;  %v15277_v0 = vld [vmem:[#allocation2 + $0xc4] sm:$0xf]  ;;  %v2916_v39 = vsel %vm14292_vm13, %v2911_v52, %v15192_v36  ;;  %v3537_v19 = vld [vmem:[#allocation2 + $0xb4] sm:$0xe] }
 0x12a   : > { %v3682_v6 = vrot.slane %v3680_v44, 4  ;;  %v15252_v29 = vsel %vm14683_vm2, %v11588_v32, %v3680_v44  ;;  %v11543_v32 = vcombine.low %v2858_v2, %v2868_v54  ;;  %v2934_v2 = vor.u32 %v2933_v61, %v15240_v25  ;;  %v15284_v54 = vld [vmem:[#allocation2 + $0xc8] sm:$0x1]  ;;  %v3538_v50 = vld [vmem:[#allocation2 + $0xc0] sm:$0xe] }
 0x12b   : > { %18253 = vst [vmem:[#allocation30_spill] sm:$0xff] %v15252_v29  ;;  %v3687_v63 = vrot.slane %v15273_v27, 5  ;;  %v2961_v46 = vshll.u32 %v15020_v41, 16  ;;  %v2948_v36 = vor.u32 %v2947_v35, %v2944_v18  ;;  %v2957_v52 = vrot.slane %v2955_v22, 4  ;;  %v2815_v61 = vld [vmem:[#allocation2 + $0x54] sm:$0xf] }
 0x12c   : > { %v15259_v53 = vsel %vm14683_vm2, %v3682_v6, %v3683_v60  ;;  %v2924_v60 = vor.u32 %v2923_v37, %v15203_v7  ;;  %v3690_v37 = vrot.slane %v15275_v57, 5  ;;  %v11589_v7 = vrot.slane %v3537_v19, 9  ;;  %v13856_v28 = vld [vmem:[#allocation2 + $0xc0] sm:$0xff]  }
 0x12d   : > { %18254 = vst [vmem:[#allocation31_spill] sm:$0xff] %v15259_v53  ;;  %v3697_v6 = vrot.slane %v15284_v54, 5  ;;  %v3689_v44 = vrot.slane %v3687_v63, 4  ;;  %v11590_v24 = vrot.slane %v3538_v50, 9  ;;  %v2966_v53 = vshrl.u32 %v2812_v51, 16 }
 0x12e   : > { %v2969_v29 = vshll.u32 %v2812_v51, 16  ;;  %v15294_v59 = vsel %vm14683_vm2, %v11589_v7, %v3687_v63  ;;  %v2975_v41 = vshll.u32 %v15030_v38, 16  ;;  %v2979_v19 = vshrl.u32 %v15030_v38, 16 }
 0x12f   : > { %18255 = vst [vmem:[#allocation32_spill] sm:$0xff] %v15294_v59  ;;  %v15300_v23 = vsel %vm14683_vm2, %v3689_v44, %v3690_v37  ;;  %v2990_v35 = vshrl.u32 %v2815_v61, 16  ;;  %v2993_v22 = vshll.u32 %v2815_v61, 16  ;;  %v2958_v7 = vor.u32 %v2957_v52, %v15261_v49 }
 0x130   : > { %12637 = vmatmul.mubr.msk.bf16.gmra.mrb[24].mxu0 %vm991_vm10, %v13854_v26  ;;  %v3694_v26 = vrot.slane %v15277_v0, 5  ;;  %18256 = vst [vmem:[#allocation33_spill] sm:$0xff] %v15300_v23  ;;  %v2999_v38 = vshll.u32 %v15059_v1, 16  ;;  %v3003_v44 = vshrl.u32 %v15059_v1, 16  ;;  %v2925_v50 = vrot.slane %v2924_v60, 4 }
 0x131   : > { %12640 = vmatprep.mubr.msk.bf16.mxu0 %vm991_vm10, %v13855_v17  ;;  %v2939_v61 = vrot.slane %v2937_v10, 5  ;;  %v2968_v51 = vrot.slane %v2966_v53, 4  ;;  %v2971_v23 = vrot.slane %v2969_v29, 5  ;;  %v15318_v59 = vrot.slane %v2975_v41, 5 }
 0x132   : > { %v3696_v17 = vrot.slane %v3694_v26, 4  ;;  %v15304_v18 = vsel %vm14683_vm2, %v11590_v24, %v3694_v26  ;;  %v11545_v24 = vcombine.low %v2906_v14, %v2916_v39  ;;  %v2935_v26 = vrot.slane %v2934_v2, 4  ;;  %v2821_v39 = vld [vmem:[#allocation2 + $0x6c] sm:$0xf] }
 0x133   : > { %v2949_v52 = vrot.slane %v2948_v36, 4  ;;  %v2963_v31 = vrot.slane %v2961_v46, 5  ;;  %v2992_v1 = vrot.slane %v2990_v35, 4  ;;  %v2995_v12 = vrot.slane %v2993_v22, 5 }
 0x134   : > { %v15310_v63 = vsel %vm14683_vm2, %v3696_v17, %v3697_v6  ;;  %v2981_v6 = vrot.slane %v2979_v19, 4  ;;  %v2818_v17 = vld [vmem:[#allocation2 + $0x60] sm:$0xf]  ;;  %v2959_v55 = vrot.slane %v2958_v7, 4  ;;  %v2985_v14 = vshll.u32 %v15044_v9, 16 }
 0x135   : > { %v11607_v37 = vcombine.low %v15304_v18, %v15310_v63  ;;  %v15322_v60 = vrot.slane %v2999_v38, 5  ;;  %v3005_v10 = vrot.slane %v3003_v44, 4  ;;  %v3017_v53 = vshll.u32 %v2818_v17, 16  ;;  %v2824_v44 = vld [vmem:[#allocation2 + $0x78] sm:$0xf] }
 0x136   : > { %v3023_v29 = vshll.u32 %v15070_v58, 16  ;;  %v3027_v2 = vshrl.u32 %v15070_v58, 16  ;;  %v2940_v46 = vsel %vm14292_vm13, %v2935_v26, %v2939_v61  ;;  %v2972_v36 = vor.u32 %v2971_v23, %v2968_v51  ;;  %v5081_v18 = vld [vmem:[#allocation2 + $0x3c] sm:$0xe] }
 0x137   : > { %v2982_v9 = vor.u32 %v2981_v6, %v15318_v59  ;;  %v2996_v41 = vor.u32 %v2995_v12, %v2992_v1  ;;  %v3009_v19 = vshll.u32 %v15068_v3, 16  ;;  %v3038_v35 = vshrl.u32 %v2821_v39, 16  ;;  %v15344_v3 = vld [vmem:[%s18087_s1 + $0xc] sm:$0x3] }
 0x138   : > { %12641 = vmatmul.mubr.msk.bf16.gmra.mrb[28].mxu0 %vm991_vm10, %v13856_v28  ;;  %v3014_v28 = vshrl.u32 %v2818_v17, 16  ;;  %v3041_v22 = vshll.u32 %v2821_v39, 16  ;;  %v2954_v7 = vsel %vm14292_vm13, %v2949_v52, %v15261_v49  ;;  %v2964_v58 = vsel %vm14292_vm13, %v2959_v55, %v2963_v31 }
 0x139   : > { %12646 = vmatprep.mubr.msk.bf16.mxu0 %vm991_vm10, %v11543_v32  ;;  %v2930_v32 = vsel %vm14292_vm13, %v2925_v50, %v15240_v25  ;;  %v2987_v38 = vrot.slane %v2985_v14, 5  ;;  %v3006_v25 = vor.u32 %v3005_v10, %v15322_v60  ;;  %v3019_v23 = vrot.slane %v3017_v53, 5 }
 0x13a   : > { %v3016_v50 = vrot.slane %v3014_v28, 4  ;;  %v15339_v51 = vrot.slane %v3023_v29, 5  ;;  %v3029_v12 = vrot.slane %v3027_v2, 4  ;;  %v2973_v49 = vrot.slane %v2972_v36, 4 }
 0x13b   : > { %v2983_v26 = vrot.slane %v2982_v9, 4  ;;  %v3047_v55 = vshll.u32 %v15089_v5, 16  ;;  %v3051_v31 = vshrl.u32 %v15089_v5, 16  ;;  %v2997_v61 = vrot.slane %v2996_v41, 4 }
 0x13c   : > { %v3011_v6 = vrot.slane %v3009_v19, 5  ;;  %v3040_v17 = vrot.slane %v3038_v35, 4  ;;  %v3043_v52 = vrot.slane %v3041_v22, 5  ;;  %v3062_v1 = vshrl.u32 %v2824_v44, 16  ;;  %v2827_v19 = vld [vmem:[#allocation2 + $0x84] sm:$0xf] }
 0x13d   : > { %v3065_v14 = vshll.u32 %v2824_v44, 16  ;;  %v3071_v10 = vshll.u32 %v15118_v11, 16  ;;  %v3007_v39 = vrot.slane %v3006_v25, 4  ;;  %v3020_v28 = vor.u32 %v3019_v23, %v3016_v50 }
 0x13e   : > { %v3030_v5 = vor.u32 %v3029_v12, %v15339_v51  ;;  %v11547_v53 = vcombine.low %v2954_v7, %v2964_v58  ;;  %v15358_v29 = vrot.slane %v3047_v55, 5  ;;  %v3053_v2 = vrot.slane %v3051_v31, 4  ;;  %v2830_v31 = vld [vmem:[#allocation2 + $0x90] sm:$0xf] }
 0x13f   : > { %v2978_v36 = vsel %vm14292_vm13, %v2973_v49, %v15318_v59  ;;  %v3002_v9 = vsel %vm14292_vm13, %v2997_v61, %v15322_v60  ;;  %v3044_v41 = vor.u32 %v3043_v52, %v3040_v17  ;;  %v3064_v35 = vrot.slane %v3062_v1, 4 }
 0x140   : > { %12647 = vmatmul.mubr.msk.bf16.vlgmr.msra.gmra.mrb[0].mxu0 %vm991_vm10, %v15266_v13  ;;  %v3075_v13 = vshrl.u32 %v15118_v11, 16  ;;  %v2988_v11 = vsel %vm14292_vm13, %v2983_v26, %v2987_v38  ;;  %v3012_v22 = vsel %vm14292_vm13, %v3007_v39, %v3011_v6  ;;  %v3021_v7 = vrot.slane %v3020_v28, 4 }
 0x141   : > { %12679 = vmatpush3.bf16.msra.mxu0 %v15025_v21  ;;  %12650 = vmatprep.mubr.msk.bf16.mxu0 %vm991_vm10, %v11545_v24  ;;  %v3033_v21 = vshll.u32 %v15082_v20, 16  ;;  %v11546_v24 = vcombine.low %v2930_v32, %v2940_v46  ;;  %v3067_v20 = vrot.slane %v3065_v14, 5  ;;  %v15368_v32 = vrot.slane %v3071_v10, 5  ;;  %v2833_v10 = vld [vmem:[#allocation2 + $0x9c] sm:$0xf] }
 0x142   : > { %13802 = vmatprep.subr.msk.bf16.mxu0 %vm1040_vm0, %v15344_v3  ;;  %v3077_v46 = vrot.slane %v3075_v13, 4  ;;  %v3031_v58 = vrot.slane %v3030_v5, 4  ;;  %v3054_v38 = vor.u32 %v3053_v2, %v15358_v29  ;;  %v3057_v25 = vshll.u32 %v15106_v43, 16 }
 0x143   : > { %v3035_v59 = vrot.slane %v3033_v21, 5  ;;  %v3086_v60 = vshrl.u32 %v2827_v19, 16  ;;  %v3089_v44 = vshll.u32 %v2827_v19, 16  ;;  %v3095_v50 = vshll.u32 %v15154_v56, 16 }
 0x144   : > { %v3099_v23 = vshrl.u32 %v15154_v56, 16  ;;  %v3045_v12 = vrot.slane %v3044_v41, 4  ;;  %v3068_v49 = vor.u32 %v3067_v20, %v3064_v35  ;;  %v3078_v26 = vor.u32 %v3077_v46, %v15368_v32 }
 0x145   : > { %v3081_v55 = vshll.u32 %v15132_v16, 16  ;;  %v11548_v61 = vcombine.low %v2978_v36, %v2988_v11  ;;  %v11549_v6 = vcombine.low %v3002_v9, %v3012_v22  ;;  %v3026_v43 = vsel %vm14292_vm13, %v3021_v7, %v15339_v51 }
 0x146   : > { %v3036_v17 = vsel %vm14292_vm13, %v3031_v58, %v3035_v59  ;;  %v3055_v52 = vrot.slane %v3054_v38, 4  ;;  %v3059_v1 = vrot.slane %v3057_v25, 5  ;;  %v3088_v14 = vrot.slane %v3086_v60, 4 }
 0x147   : > { %v3091_v56 = vrot.slane %v3089_v44, 5  ;;  %v15385_v13 = vrot.slane %v3095_v50, 5  ;;  %v3101_v39 = vrot.slane %v3099_v23, 4  ;;  %v3110_v28 = vshrl.u32 %v2830_v31, 16  ;;  %v2836_v23 = vld [vmem:[#allocation2 + $0xa8] sm:$0xf] }
 0x148   : > { %12651 = vmatmul.mubr.msk.bf16.gmra.mrb[4].mxu0 %vm991_vm10, %v11546_v24  ;;  %v3113_v16 = vshll.u32 %v2830_v31, 16  ;;  %v3050_v5 = vsel %vm14292_vm13, %v3045_v12, %v15358_v29  ;;  %v3069_v21 = vrot.slane %v3068_v49, 4  ;;  %v3079_v24 = vrot.slane %v3078_v26, 4 }
 0x149   : > { %12654 = vmatprep.mubr.msk.bf16.mxu0 %vm991_vm10, %v11547_v53  ;;  %v3083_v51 = vrot.slane %v3081_v55, 5  ;;  %v3119_v53 = vshll.u32 %v15158_v40, 16  ;;  %v3123_v2 = vshrl.u32 %v15158_v40, 16  ;;  %v3134_v36 = vshrl.u32 %v2833_v10, 16 }
 0x14a   : > { %v3137_v11 = vshll.u32 %v2833_v10, 16  ;;  %v3060_v9 = vsel %vm14292_vm13, %v3055_v52, %v3059_v1  ;;  %v3105_v41 = vshll.u32 %v15156_v42, 16  ;;  %v3143_v19 = vshll.u32 %v15220_v62, 16 }
 0x14b   : > { %v3147_v29 = vshrl.u32 %v15220_v62, 16  ;;  %v3092_v35 = vor.u32 %v3091_v56, %v3088_v14  ;;  %v3102_v20 = vor.u32 %v3101_v39, %v15385_v13  ;;  %v3112_v46 = vrot.slane %v3110_v28, 4 }
 0x14c   : > { %v3115_v40 = vrot.slane %v3113_v16, 5  ;;  %v11550_v22 = vcombine.low %v3026_v43, %v3036_v17  ;;  %v3074_v7 = vsel %vm14292_vm13, %v3069_v21, %v15368_v32  ;;  %v3084_v58 = vsel %vm14292_vm13, %v3079_v24, %v3083_v51  ;;  %v2839_v17 = vld [vmem:[#allocation2 + $0xb4] sm:$0xf] }
 0x14d   : > { %v15405_v42 = vrot.slane %v3119_v53, 5  ;;  %v3125_v59 = vrot.slane %v3123_v2, 4  ;;  %v3136_v38 = vrot.slane %v3134_v36, 4  ;;  %v3139_v62 = vrot.slane %v3137_v11, 5 }
 0x14e   : > { %v11551_v25 = vcombine.low %v3050_v5, %v3060_v9  ;;  %v3107_v60 = vrot.slane %v3105_v41, 5  ;;  %v3145_v44 = vrot.slane %v3143_v19, 5  ;;  %v3149_v50 = vrot.slane %v3147_v29, 4 }
 0x14f   : > { %v3093_v12 = vrot.slane %v3092_v35, 4  ;;  %v3103_v49 = vrot.slane %v3102_v20, 4  ;;  %v3116_v26 = vor.u32 %v3115_v40, %v3112_v46  ;;  %v3129_v55 = vshll.u32 %v15161_v15, 16  ;;  %v2842_v20 = vld [vmem:[#allocation2 + $0xc0] sm:$0xf] }
 0x150   : > { %12655 = vmatmul.mubr.msk.bf16.gmra.mrb[8].mxu0 %vm991_vm10, %v11548_v61  ;;  %v11552_v31 = vcombine.low %v3074_v7, %v3084_v58  ;;  %v3126_v32 = vor.u32 %v3125_v59, %v15405_v42  ;;  %v3140_v61 = vor.u32 %v3139_v62, %v3136_v38  ;;  %v3158_v43 = vshrl.u32 %v2836_v23, 16 }
 0x151   : > { %12658 = vmatprep.mubr.msk.bf16.mxu0 %vm991_vm10, %v11549_v6  ;;  %v3153_v6 = vshll.u32 %v15222_v48, 16  ;;  %v3150_v52 = vor.u32 %v3149_v50, %v3145_v44  ;;  %v3161_v1 = vshll.u32 %v2836_v23, 16  ;;  %v3167_v14 = vshll.u32 %v15224_v8, 16 }
 0x152   : > { %v3171_v56 = vshrl.u32 %v15224_v8, 16  ;;  %v3098_v15 = vsel %vm14292_vm13, %v3093_v12, %v15385_v13  ;;  %v3108_v10 = vsel %vm14292_vm13, %v3103_v49, %v3107_v60  ;;  %v3117_v48 = vrot.slane %v3116_v26, 4 }
 0x153   : > { %v3131_v39 = vrot.slane %v3129_v55, 5  ;;  %v3182_v28 = vshrl.u32 %v2839_v17, 16  ;;  %v3185_v16 = vshll.u32 %v2839_v17, 16  ;;  %v3191_v5 = vshll.u32 %v15273_v27, 16 }
 0x154   : > { %v3195_v21 = vshrl.u32 %v15273_v27, 16  ;;  %v3127_v24 = vrot.slane %v3126_v32, 4  ;;  %v3141_v51 = vrot.slane %v3140_v61, 4  ;;  %v3155_v8 = vrot.slane %v3153_v6, 5 }
 0x155   : > { %v3160_v53 = vrot.slane %v3158_v43, 4  ;;  %v3151_v2 = vrot.slane %v3150_v52, 4  ;;  %v3163_v36 = vrot.slane %v3161_v1, 5  ;;  %v3169_v11 = vrot.slane %v3167_v14, 5 }
 0x156   : > { %v3173_v9 = vrot.slane %v3171_v56, 4  ;;  %v11553_v13 = vcombine.low %v3098_v15, %v3108_v10  ;;  %v3184_v41 = vrot.slane %v3182_v28, 4  ;;  %v3187_v19 = vrot.slane %v3185_v16, 5 }
 0x157   : > { %v3193_v29 = vrot.slane %v3191_v5, 5  ;;  %v3197_v35 = vrot.slane %v3195_v21, 4  ;;  %v3122_v46 = vsel %vm14292_vm13, %v3117_v48, %v15405_v42  ;;  %v3132_v27 = vsel %vm14292_vm13, %v3127_v24, %v3131_v39  ;;  %v3523_v48 = vld [vmem:[#allocation2 + $0xc] sm:$0xe]  ;;  %v343_v24 = vld [vmem:[#allocation2 + $0xcc] sm:$0x1] }
 0x158   : > { %12659 = vmatmul.mubr.msk.bf16.gmra.mrb[12].mxu0 %vm991_vm10, %v11550_v22  ;;  %v3146_v40 = vsel %vm14292_vm13, %v3141_v51, %v3145_v44  ;;  %v3156_v22 = vsel %vm14292_vm13, %v3151_v2, %v3155_v8  ;;  %v3164_v7 = vor.u32 %v3163_v36, %v3160_v53  ;;  %v3174_v58 = vor.u32 %v3173_v9, %v3169_v11 }
 0x159   : > { %12662 = vmatprep.mubr.msk.bf16.mxu0 %vm991_vm10, %v11551_v25  ;;  %v3177_v59 = vshll.u32 %v15232_v33, 16  ;;  %v3206_v38 = vshrl.u32 %v2842_v20, 16  ;;  %v3209_v62 = vshll.u32 %v2842_v20, 16  ;;  %v3215_v42 = vshll.u32 %v15277_v0, 16 }
 0x15a   : > { %v3219_v25 = vshrl.u32 %v15277_v0, 16  ;;  %v3188_v60 = vor.u32 %v3187_v19, %v3184_v41  ;;  %v3198_v50 = vor.u32 %v3197_v35, %v3193_v29  ;;  %v3201_v44 = vshll.u32 %v15275_v57, 16  ;;  %v18258_v35 = vld [vmem:[#allocation7_spill] sm:$0xff] }
 0x15b   : > { %v11554_v23 = vcombine.low %v3122_v46, %v3132_v27  ;;  %v11555_v12 = vcombine.low %v3146_v40, %v3156_v22  ;;  %v3165_v49 = vrot.slane %v3164_v7, 4  ;;  %v3175_v26 = vrot.slane %v3174_v58, 4  ;;  %v11657_v22 = vld [vmem:[%s18087_s1 + $0xe] sm:$0x3]  ;;  %v18259_v7 = vld [vmem:[#allocation5_spill] sm:$0xff] }
 0x15c   : > { %v3179_v55 = vrot.slane %v3177_v59, 5  ;;  %v3211_v32 = vrot.slane %v3209_v62, 5  ;;  %v3217_v33 = vrot.slane %v3215_v42, 5  ;;  %v3221_v61 = vrot.slane %v3219_v25, 4  ;;  %v18260_v58 = vld [vmem:[#allocation11_spill] sm:$0xff]  ;;  %v18263_v62 = vld [vmem:[#allocation12_spill] sm:$0xff] }
 0x15d   : > { %v3189_v6 = vrot.slane %v3188_v60, 4  ;;  %v3199_v43 = vrot.slane %v3198_v50, 4  ;;  %v3203_v17 = vrot.slane %v3201_v44, 5  ;;  %v3170_v0 = vsel %vm14292_vm13, %v3165_v49, %v3169_v11  ;;  %v18266_v25 = vld [vmem:[#allocation13_spill] sm:$0xff]  ;;  %v18268_v50 = vld [vmem:[#allocation14_spill] sm:$0xff]  ;;  %v18269_v44 = vld [vmem:[#allocation15_spill] sm:$0xff] }
 0x15e   : > { %v3180_v57 = vsel %vm14292_vm13, %v3175_v26, %v3179_v55  ;;  %v3222_v1 = vor.u32 %v3221_v61, %v3217_v33  ;;  %v3225_v14 = vshll.u32 %v15284_v54, 16  ;;  %v3589_v10 = vrot.slane %v14962_v30, 5  ;;  %v18272_v49 = vld [vmem:[#allocation18_spill] sm:$0xff]  ;;  %v18274_v55 = vld [vmem:[#allocation17_spill] sm:$0xff] }
 0x15f   : > { %v3194_v56 = vsel %vm14292_vm13, %v3189_v6, %v3193_v29  ;;  %v3204_v15 = vsel %vm14292_vm13, %v3199_v43, %v3203_v17  ;;  %v11556_v39 = vcombine.low %v3170_v0, %v3180_v57  ;;  %v11575_v51 = vrot.slane %v3523_v48, 9  ;;  %v18278_v61 = vld [vmem:[#allocation21_spill] sm:$0xff]  ;;  %v18280_v43 = vld [vmem:[#allocation22_spill] sm:$0xff]  ;;  %v18281_v17 = vld [vmem:[#allocation23_spill] sm:$0xff] }
 0x160   : > { %12663 = vmatmul.mubr.msk.bf16.gmra.mrb[16].mxu0 %vm991_vm10, %v11552_v31  ;;  %v3208_v31 = vrot.slane %v3206_v38, 4  ;;  %v11557_v28 = vcombine.low %v3194_v56, %v3204_v15  ;;  %v3223_v5 = vrot.slane %v3222_v1, 4  ;;  %v3227_v21 = vrot.slane %v3225_v14, 5  ;;  %v18262_v38 = vld [vmem:[#allocation9_spill] sm:$0xff]  ;;  %v18283_v57 = vld [vmem:[#allocation24_spill] sm:$0xff]  ;;  %v18286_v14 = vld [vmem:[#allocation26_spill] sm:$0xff] }
 0x161   : > { %12666 = vmatprep.mubr.msk.bf16.mxu0 %vm991_vm10, %v11553_v13  ;;  %v3591_v8 = vrot.slane %v3589_v10, 4  ;;  %v3592_v53 = vrot.slane %v14973_v45, 5  ;;  %v344_v54 = vsel %vm14020_vm4, 0, %v343_v24  ;;  %v3596_v36 = vrot.slane %v14978_v47, 5  ;;  %v3524_v45 = vld [vmem:[#allocation2 + $0x18] sm:$0xe] }
 0x162   : > { %v3212_v52 = vor.u32 %v3211_v32, %v3208_v31  ;;  %345 = vst [vmem:[#allocation2 + $0xcc] sm:$0x1] %v344_v54  ;;  %v3228_v2 = vsel %vm14292_vm13, %v3223_v5, %v3227_v21  ;;  %v3590_v9 = vsel %vm14683_vm2, %v11575_v51, %v3589_v10  ;;  %v11576_v19 = vrot.slane %v3524_v45, 9  ;;  %v18275_v31 = vld [vmem:[#allocation19_spill] sm:$0xff]  ;;  %v18289_v10 = vld [vmem:[#allocation28_spill] sm:$0xff]  ;;  %v18290_v48 = vld [vmem:[#allocation29_spill] sm:$0xff] }
 0x163   : > { %v3593_v4 = vsel %vm14683_vm2, %v3591_v8, %v3592_v53  ;;  %v3598_v29 = vrot.slane %v3596_v36, 4  ;;  %v3599_v20 = vrot.slane %v18258_v35, 5  ;;  %v4157_v40 = vsel %vm1040_vm0, %v15344_v3, 0  ;;  %v18265_v3 = vld [vmem:[#allocation10_spill] sm:$0xff]  ;;  %v18287_v56 = vld [vmem:[#allocation27_spill] sm:$0xff]  ;;  %v18295_v24 = vld [vmem:[#allocation32_spill] sm:$0xff] }
 0x164   : > { %v3213_v16 = vrot.slane %v3212_v52, 4  ;;  %v11592_v41 = vcombine.low %v3590_v9, %v3593_v4  ;;  %v3597_v47 = vsel %vm14683_vm2, %v11576_v19, %v3596_v36  ;;  %v18261_v59 = vcombine.low %v18259_v7, %v18260_v58  ;;  %v18284_v52 = vld [vmem:[#allocation25_spill] sm:$0xff]  ;;  %v399_v21 = vld [vmem:[#allocation2 + $0xd4] sm:$0x1]  ;;  %v15539_v4 = vld [vmem:[%s18087_s1 + $0x10] sm:$0x3] }
 0x165   : > { %v3600_v46 = vsel %vm14683_vm2, %v3598_v29, %v3599_v20  ;;  %v18264_v42 = vcombine.low %v18262_v38, %v18263_v62  ;;  %v18267_v60 = vcombine.low %v18265_v3, %v18266_v25  ;;  %v18276_v32 = vcombine.low %v18274_v55, %v18275_v31  ;;  %v18296_v51 = vld [vmem:[#allocation33_spill] sm:$0xff]  ;;  %v13859_v36 = vld [vmem:[#allocation2 + $0x30] sm:$0xff]   ;;  %v15542_v45 = vld [vmem:[#allocation2 + $0x40] sm:$0xf] }
 0x166   : > { %v3218_v30 = vsel %vm14292_vm13, %v3213_v16, %v3217_v33  ;;  %v11593_v27 = vcombine.low %v3597_v47, %v3600_v46  ;;  %v18277_v33 = vld [vmem:[#allocation20_spill] sm:$0xff]  ;;  %v18282_v0 = vcombine.low %v18280_v43, %v18281_v17  ;;  %v18285_v1 = vcombine.low %v18283_v57, %v18284_v52  ;;  %v18293_v16 = vld [vmem:[#allocation31_spill] sm:$0xff]  ;;  %v13860_v29 = vld [vmem:[#allocation2 + $0x3c] sm:$0xff]  }
 0x167   : > { %v11558_v13 = vcombine.low %v3218_v30, %v3228_v2  ;;  %v18279_v6 = vcombine.low %v18277_v33, %v18278_v61  ;;  %v18288_v15 = vcombine.low %v18286_v14, %v18287_v56  ;;  %v18297_v8 = vcombine.low %v18295_v24, %v18296_v51  ;;  %v13857_v30 = vld [vmem:[#allocation2 + $0x18] sm:$0xff]   ;;  %v13858_v2 = vld [vmem:[#allocation2 + $0x24] sm:$0xff]   ;;  %v13864_v31 = vld [vmem:[#allocation2 + $0x6c] sm:$0xff]  }
 0x168   : > { %12667 = vmatmul.mubr.msk.bf16.gmra.mrb[20].mxu0 %vm991_vm10, %v11554_v23  ;;  %v18270_v23 = vcombine.low %v18268_v50, %v18269_v44  ;;  %v400_v54 = vsel %vm14030_vm6, 0, %v399_v21  ;;  %v4883_v9 = vsel %vm1040_vm0, %v11657_v22, 0  ;;  %v5165_v63 = vrot.slane %v15542_v45, 5  ;;  %v13861_v20 = vld [vmem:[#allocation2 + $0x48] sm:$0xff]   ;;  %v13862_v62 = vld [vmem:[#allocation2 + $0x54] sm:$0xff]   ;;  %v13863_v3 = vld [vmem:[#allocation2 + $0x60] sm:$0xff]  }
 0x169   : > { %12670 = vmatprep.mubr.msk.bf16.mxu0 %vm991_vm10, %v11555_v12  ;;  %v18271_v12 = vld [vmem:[#allocation16_spill] sm:$0xff]  ;;  %401 = vst [vmem:[#allocation2 + $0xd4] sm:$0x1] %v400_v54  ;;  %v15587_v33 = vld [vmem:[#allocation2 + $0x1c] sm:$0xf]  ;;  %v13866_v54 = vld [vmem:[#allocation2 + $0x84] sm:$0xff]  }
 0x16a   : > { %v18273_v26 = vcombine.low %v18271_v12, %v18272_v49  ;;  %v5167_v19 = vrot.slane %v5165_v63, 4  ;;  %v15580_v50 = vld [vmem:[#allocation2 + $0x70] sm:$0xf]  ;;  %v15582_v44 = vld [vmem:[#allocation2 + $0x74] sm:$0x1]  ;;  %v4414_v14 = vshrl.u32 %v15587_v33, 16  ;;  %vm15994_vm6 = vmand %vm5583_vm1, %vm290_vm3 }
 0x16b   : > { %v5193_v12 = vrot.slane %v15580_v50, 5  ;;  %v5196_v49 = vrot.slane %v15582_v44, 5  ;;  %v4355_v43 = vld [vmem:[#allocation2 + $0x24] sm:$0xf]  ;;  %vm5580_vm4 = vcmask 60416   ;;  %vm16013_vm3 = vmand %vm5583_vm1, %vm346_vm5 }
 0x16c   : > { %v4425_v56 = vshrl.u32 %v4355_v43, 16  ;;  %vm16116_vm11 = vmand %vm5580_vm4, %vm346_vm5 }
 0x16d   : > { %v5195_v55 = vrot.slane %v5193_v12, 4 }
 0x16f   : > { %v15595_v17 = vsel %vm14683_vm2, %v5195_v55, %v5196_v49 }
 0x170   : > { %12671 = vmatmul.mubr.msk.bf16.gmra.mrb[24].mxu0 %vm991_vm10, %v11556_v39  ;;  %v18291_v39 = vcombine.low %v18289_v10, %v18290_v48  ;;  %18300 = vst [vmem:[#allocation7_spill] sm:$0xff] %v15595_v17  ;;  %v15602_v10 = vld [vmem:[#allocation2 + $0x88] sm:$0xf]  ;;  %v15604_v48 = vld [vmem:[#allocation2 + $0x8c] sm:$0x1] }
 0x171   : > { %12674 = vmatprep.mubr.msk.bf16.mxu0 %vm991_vm10, %v11557_v28  ;;  %v18292_v28 = vld [vmem:[#allocation30_spill] sm:$0xff] }
 0x172   : > { %v18294_v5 = vcombine.low %v18292_v28, %v18293_v16  ;;  %v5207_v28 = vrot.slane %v15602_v10, 5  ;;  %v5210_v16 = vrot.slane %v15604_v48, 5 }
 0x174   : > { %v5209_v53 = vrot.slane %v5207_v28, 4 }
 0x178   : > { %12675 = vmatmul.mubr.msk.bf16.gmra.mrb[28].mxu0 %vm991_vm10, %v11558_v13  ;;  %v15544_v13 = vld [vmem:[#allocation2 + $0x44] sm:$0x1] }
 0x179   : > { %12680 = vmatprep.mubr.msk.bf16.mxu0 %vm991_vm10, %v11592_v41  ;;  %v11693_v41 = vrot.slane %v5081_v18, 9  ;;  %v4492_v46 = vshll.u32 %v15544_v13, 16 }
 0x17b   : > { %v15553_v35 = vsel %vm14683_vm2, %v11693_v41, %v5165_v63  ;;  %v13867_v63 = vld [vmem:[#allocation2 + $0x90] sm:$0xff]   ;;  %v15622_v41 = vsel %vm14683_vm2, %v5209_v53, %v5210_v16 }
 0x17c   : > { %18302 = vst [vmem:[#allocation11_spill] sm:$0xff] %v15622_v41 }
 0x180   : > { %12681 = vmatmul.mubr.msk.bf16.vlgmr.msra.gmra.mrb[0].mxu0 %vm991_vm10, %v11593_v27  ;;  %v15562_v27 = vld [vmem:[#allocation2 + $0x58] sm:$0xf] }
 0x181   : > { %12713 = vmatpush3.bf16.msra.mxu0 %v4157_v40  ;;  %12684 = vmatprep.mubr.msk.bf16.mxu0 %vm991_vm10, %v18261_v59  ;;  %v15564_v40 = vld [vmem:[#allocation2 + $0x5c] sm:$0x1]  ;;  %v5179_v7 = vrot.slane %v15562_v27, 5 }
 0x182   : > { %13803 = vmatprep.subr.msk.bf16.mxu0 %vm1040_vm0, %v11657_v22  ;;  %v5083_v22 = vld [vmem:[#allocation2 + $0x54] sm:$0xe]  ;;  %v5182_v58 = vrot.slane %v15564_v40, 5 }
 0x183   : > { %v11695_v59 = vrot.slane %v5083_v22, 9  ;;  %v5181_v38 = vrot.slane %v5179_v7, 4 }
 0x185   : > { %v15575_v25 = vsel %vm14683_vm2, %v5181_v38, %v5182_v58 }
 0x188   : > { %12685 = vmatmul.mubr.msk.bf16.gmra.mrb[4].mxu0 %vm991_vm10, %v18264_v42  ;;  %v15571_v42 = vsel %vm14683_vm2, %v11695_v59, %v5179_v7  ;;  %v4358_v7 = vld [vmem:[#allocation2 + $0x30] sm:$0xf] }
 0x189   : > { %12688 = vmatprep.mubr.msk.bf16.mxu0 %vm991_vm10, %v18267_v60 }
 0x190   : > { %12689 = vmatmul.mubr.msk.bf16.gmra.mrb[8].mxu0 %vm991_vm10, %v18270_v23  ;;  %v5085_v23 = vld [vmem:[#allocation2 + $0x6c] sm:$0xe] }
 0x191   : > { %12692 = vmatprep.mubr.msk.bf16.mxu0 %vm991_vm10, %v18273_v26  ;;  %v11697_v26 = vrot.slane %v5085_v23, 9  ;;  %v15636_v23 = vld [vmem:[#allocation2 + $0xa4] sm:$0x1] }
 0x193   : > { %v15591_v61 = vsel %vm14683_vm2, %v11697_v26, %v5193_v12  ;;  %v5089_v26 = vld [vmem:[#allocation2 + $0x9c] sm:$0xe] }
 0x194   : > { %18299 = vst [vmem:[#allocation8_spill] sm:$0xff] %v15591_v61 }
 0x198   : > { %12693 = vmatmul.mubr.msk.bf16.gmra.mrb[12].mxu0 %vm991_vm10, %v18276_v32  ;;  %v4352_v32 = vld [vmem:[#allocation2 + $0x18] sm:$0xf] }
 0x199   : > { %12696 = vmatprep.mubr.msk.bf16.mxu0 %vm991_vm10, %v18279_v6  ;;  %v13865_v6 = vld [vmem:[#allocation2 + $0x78] sm:$0xff]   ;;  %v4401_v57 = vshrl.u32 %v4352_v32, 16  ;;  %v4404_v52 = vshll.u32 %v4352_v32, 16 }
 0x19b   : > { %v4403_v24 = vrot.slane %v4401_v57, 4  ;;  %v4406_v51 = vrot.slane %v4404_v52, 5  ;;  %v11701_v57 = vrot.slane %v5089_v26, 9  ;;  %v15670_v26 = vld [vmem:[#allocation2 + $0xbc] sm:$0x1] }
 0x19d   : > { %v4407_v58 = vor.u32 %v4406_v51, %v4403_v24 }
 0x1a0   : > { %12697 = vmatmul.mubr.msk.bf16.gmra.mrb[16].mxu0 %vm991_vm10, %v18282_v0 }
 0x1a1   : > { %12700 = vmatprep.mubr.msk.bf16.mxu0 %vm991_vm10, %v18285_v1  ;;  %v4410_v1 = vshll.u32 %v15587_v33, 16 }
 0x1a8   : > { %12701 = vmatmul.mubr.msk.bf16.gmra.mrb[20].mxu0 %vm991_vm10, %v18288_v15  ;;  %v4428_v15 = vshll.u32 %v4355_v43, 16  ;;  %v4452_v43 = vshll.u32 %v4358_v7, 16 }
 0x1a9   : > { %12704 = vmatprep.mubr.msk.bf16.mxu0 %vm991_vm10, %v18291_v39  ;;  %v5087_v39 = vld [vmem:[#allocation2 + $0x84] sm:$0xe] }
 0x1aa   : > { %v11699_v21 = vrot.slane %v5087_v39, 9 }
 0x1ac   : > { %v15617_v18 = vsel %vm14683_vm2, %v11699_v21, %v5207_v28  ;;  %v4361_v28 = vld [vmem:[#allocation2 + $0x3c] sm:$0xf]  ;;  %v13869_v21 = vld [vmem:[#allocation2 + $0xa8] sm:$0xff]  }
 0x1ad   : > { %18301 = vst [vmem:[#allocation5_spill] sm:$0xff] %v15617_v18 }
 0x1b0   : > { %12705 = vmatmul.mubr.msk.bf16.gmra.mrb[24].mxu0 %vm991_vm10, %v18294_v5  ;;  %v15609_v5 = vld [vmem:[#allocation2 + $0x28] sm:$0xf] }
 0x1b1   : > { %12708 = vmatprep.mubr.msk.bf16.mxu0 %vm991_vm10, %v18297_v8  ;;  %v15611_v8 = vrot.slane %v4410_v1, 5 }
 0x1b8   : > { %12709 = vmatmul.mubr.msk.bf16.gmra.mrb[28].mxu0 %vm991_vm10, %v11607_v37  ;;  %v5168_v37 = vrot.slane %v15544_v13, 5  ;;  %v5093_v13 = vld [vmem:[#allocation2 + $0xcc] sm:$0xe] }
 0x1b9   : > { %12714 = vmatprep.mubr.msk.bf16.mxu0 %vm991_vm10, %v13857_v30  ;;  %v15613_v30 = vld [vmem:[#allocation2 + $0x20] sm:$0x1] }
 0x1ba   : > { %v15557_v47 = vsel %vm14683_vm2, %v5167_v19, %v5168_v37  ;;  %v4434_v37 = vshll.u32 %v15609_v5, 16  ;;  %v15624_v19 = vld [vmem:[#allocation2 + $0x2c] sm:$0x1]  ;;  %v4420_v22 = vshll.u32 %v15613_v30, 16 }
 0x1bb   : > { %v4444_v49 = vshll.u32 %v15624_v19, 16 }
 0x1bc   : > { %v15639_v12 = vrot.slane %v4434_v37, 5  ;;  %v4422_v39 = vrot.slane %v4420_v22, 5  ;;  %v15661_v37 = vld [vmem:[#allocation2 + $0x38] sm:$0x1] }
 0x1bd   : > { %v15652_v53 = vrot.slane %v4444_v49, 5  ;;  %v15668_v49 = vld [vmem:[#allocation2 + $0xb8] sm:$0xf] }
 0x1c0   : > { %12715 = vmatmul.mubr.msk.bf16.vlgmr.msra.gmra.mrb[0].mxu0 %vm991_vm10, %v13858_v2  ;;  %v4416_v2 = vrot.slane %v4414_v14, 4 }
 0x1c1   : > { %12747 = vmatpush3.bf16.msra.mxu0 %v4883_v9  ;;  %12718 = vmatprep.mubr.msk.bf16.mxu0 %vm991_vm10, %v13859_v36  ;;  %v4427_v36 = vrot.slane %v4425_v56, 4  ;;  %v4430_v9 = vrot.slane %v4428_v15, 5  ;;  %v13868_v56 = vld [vmem:[#allocation2 + $0x9c] sm:$0xff]   ;;  %v4408_v15 = vrot.slane %v4407_v58, 4  ;;  %v4476_v58 = vshll.u32 %v4361_v28, 16 }
 0x1c2   : > { %13804 = vmatprep.subr.msk.bf16.mxu0 %vm1040_vm0, %v15539_v4  ;;  %v4417_v59 = vor.u32 %v4416_v2, %v15611_v8 }
 0x1c3   : > { %v4431_v38 = vor.u32 %v4430_v9, %v4427_v36  ;;  %v4454_v9 = vrot.slane %v4452_v43, 5  ;;  %v5235_v43 = vrot.slane %v15668_v49, 5 }
 0x1c4   : > { %v4418_v24 = vrot.slane %v4417_v59, 4  ;;  %v4482_v59 = vshll.u32 %v15542_v45, 16 }
 0x1c5   : > { %v15650_v51 = vrot.slane %v4431_v38, 4  ;;  %v4486_v38 = vshrl.u32 %v15542_v45, 16 }
 0x1c8   : > { %12719 = vmatmul.mubr.msk.bf16.gmra.mrb[4].mxu0 %vm991_vm10, %v13860_v29  ;;  %v4438_v29 = vshrl.u32 %v15609_v5, 16 }
 0x1c9   : > { %12722 = vmatprep.mubr.msk.bf16.mxu0 %vm991_vm10, %v13861_v20 }
 0x1ca   : > { %v4440_v32 = vrot.slane %v4438_v29, 4 }
 0x1cc   : > { %v4441_v2 = vor.u32 %v4440_v32, %v15639_v12  ;;  %v4364_v32 = vld [vmem:[#allocation2 + $0x48] sm:$0xf] }
 0x1cd   : > { %v4497_v20 = vshrl.u32 %v4364_v32, 16 }
 0x1ce   : > { %v15680_v45 = vrot.slane %v4441_v2, 4 }
 0x1d0   : > { %12723 = vmatmul.mubr.msk.bf16.gmra.mrb[8].mxu0 %vm991_vm10, %v13862_v62  ;;  %v15632_v62 = vld [vmem:[#allocation2 + $0x34] sm:$0xf] }
 0x1d1   : > { %12726 = vmatprep.mubr.msk.bf16.mxu0 %vm991_vm10, %v13863_v3  ;;  %v15634_v3 = vld [vmem:[#allocation2 + $0xa0] sm:$0xf]  ;;  %v4458_v52 = vshll.u32 %v15632_v62, 16  ;;  %v4462_v1 = vshrl.u32 %v15632_v62, 16 }
 0x1d2   : > { %v5221_v55 = vrot.slane %v15634_v3, 5 }
 0x1d3   : > { %v15663_v29 = vrot.slane %v4458_v52, 5  ;;  %v4464_v22 = vrot.slane %v4462_v1, 4  ;;  %v4468_v1 = vshll.u32 %v15661_v37, 16 }
 0x1d4   : > { %v5223_v14 = vrot.slane %v5221_v55, 4  ;;  %v15648_v16 = vsel %vm14683_vm2, %v11701_v57, %v5221_v55  ;;  %v4413_v55 = vsel %vm14292_vm13, %v4408_v15, %v15611_v8  ;;  %v5238_v57 = vrot.slane %v15670_v26, 5  ;;  %v15684_v8 = vld [vmem:[#allocation2 + $0x4c] sm:$0xf] }
 0x1d5   : > { %18303 = vst [vmem:[#allocation9_spill] sm:$0xff] %v15648_v16  ;;  %v5237_v15 = vrot.slane %v5235_v43, 4  ;;  %v4470_v0 = vrot.slane %v4468_v1, 5 }
 0x1d8   : > { %12727 = vmatmul.mubr.msk.bf16.gmra.mrb[12].mxu0 %vm991_vm10, %v13864_v31  ;;  %v5224_v31 = vrot.slane %v15636_v23, 5 }
 0x1d9   : > { %12730 = vmatprep.mubr.msk.bf16.mxu0 %vm991_vm10, %v13865_v6  ;;  %v4449_v6 = vshrl.u32 %v4358_v7, 16  ;;  %v4473_v7 = vshrl.u32 %v4361_v28, 16 }
 0x1db   : > { %v4451_v36 = vrot.slane %v4449_v6, 4  ;;  %v5091_v6 = vld [vmem:[#allocation2 + $0xb4] sm:$0xe]  ;;  %v4475_v28 = vrot.slane %v4473_v7, 4  ;;  %v15698_v7 = vsel %vm14683_vm2, %v5237_v15, %v5238_v57  ;;  %v15713_v57 = vld [vmem:[#allocation2 + $0xd4] sm:$0x1] }
 0x1dc   : > { %18306 = vst [vmem:[#allocation13_spill] sm:$0xff] %v15698_v7  ;;  %v15718_v15 = vld [vmem:[#allocation2 + $0x50] sm:$0x1] }
 0x1dd   : > { %v4455_v52 = vor.u32 %v4454_v9, %v4451_v36  ;;  %v13871_v36 = vld [vmem:[#allocation2 + $0xc0] sm:$0xff]   ;;  %v4437_v9 = vsel %vm14292_vm13, %v15650_v51, %v15639_v12  ;;  %v4447_v12 = vsel %vm14292_vm13, %v15680_v45, %v15652_v53 }
 0x1e0   : > { %12731 = vmatmul.mubr.msk.bf16.gmra.mrb[16].mxu0 %vm991_vm10, %v13866_v54  ;;  %v15656_v54 = vsel %vm14683_vm2, %v5223_v14, %v5224_v31  ;;  %v4423_v31 = vsel %vm14292_vm13, %v4418_v24, %v4422_v39  ;;  %v11703_v14 = vrot.slane %v5091_v6, 9  ;;  %v13870_v39 = vld [vmem:[#allocation2 + $0xb4] sm:$0xff]   ;;  %v15686_v24 = vrot.slane %v4482_v59, 5 }
 0x1e1   : > { %12734 = vmatprep.mubr.msk.bf16.mxu0 %vm991_vm10, %v13867_v63  ;;  %18304 = vst [vmem:[#allocation12_spill] sm:$0xff] %v15656_v54  ;;  %v4488_v63 = vrot.slane %v4486_v38, 4  ;;  %v4506_v59 = vshll.u32 %v15684_v8, 16  ;;  %v4510_v38 = vshrl.u32 %v15684_v8, 16  ;;  %v4367_v6 = vld [vmem:[#allocation2 + $0x54] sm:$0xf] }
 0x1e2   : > { %v15690_v2 = vsel %vm14683_vm2, %v11703_v14, %v5235_v43  ;;  %v4456_v14 = vrot.slane %v4455_v52, 4  ;;  %v4521_v1 = vshrl.u32 %v4367_v6, 16 }
 0x1e3   : > { %18305 = vst [vmem:[#allocation10_spill] sm:$0xff] %v15690_v2  ;;  %v15720_v53 = vrot.slane %v4506_v59, 5  ;;  %v4512_v45 = vrot.slane %v4510_v38, 4  ;;  %v4530_v2 = vshll.u32 %v15562_v27, 16  ;;  %v4534_v59 = vshrl.u32 %v15562_v27, 16 }
 0x1e4   : > { %v4370_v38 = vld [vmem:[#allocation2 + $0x60] sm:$0xf] }
 0x1e5   : > { %v4545_v16 = vshrl.u32 %v4370_v38, 16  ;;  %v4548_v41 = vshll.u32 %v4370_v38, 16 }
 0x1e8   : > { %12735 = vmatmul.mubr.msk.bf16.gmra.mrb[20].mxu0 %vm991_vm10, %v13868_v56  ;;  %v4465_v56 = vor.u32 %v4464_v22, %v15663_v29  ;;  %v4500_v22 = vshll.u32 %v4364_v32, 16  ;;  %v15711_v32 = vld [vmem:[#allocation2 + $0xd0] sm:$0xf] }
 0x1e9   : > { %12738 = vmatprep.mubr.msk.bf16.mxu0 %vm991_vm10, %v13869_v21  ;;  %v4478_v21 = vrot.slane %v4476_v58, 5  ;;  %v11658_v58 = vcombine.low %v4413_v55, %v4423_v31  ;;  %v4489_v55 = vor.u32 %v4488_v63, %v15686_v24  ;;  %v4499_v31 = vrot.slane %v4497_v20, 4 }
 0x1ea   : > { %v4466_v51 = vrot.slane %v4465_v56, 4  ;;  %v4502_v52 = vrot.slane %v4500_v22, 5  ;;  %v4524_v63 = vshll.u32 %v4367_v6, 16  ;;  %v11705_v20 = vrot.slane %v5093_v13, 9  ;;  %v13872_v56 = vld [vmem:[#allocation2 + $0xcc] sm:$0xff]  }
 0x1eb   : > { %v4479_v60 = vor.u32 %v4478_v21, %v4475_v28  ;;  %v5249_v28 = vrot.slane %v15711_v32, 5  ;;  %v5252_v21 = vrot.slane %v15713_v57, 5  ;;  %v15727_v22 = vrot.slane %v4492_v46, 5  ;;  %v15733_v6 = vld [vmem:[#allocation2 + $0x64] sm:$0xf] }
 0x1ec   : > { %v4471_v7 = vsel %vm14292_vm13, %v4466_v51, %v4470_v0  ;;  %v4516_v46 = vshll.u32 %v15718_v15, 16  ;;  %v4513_v0 = vor.u32 %v4512_v45, %v15720_v53  ;;  %v4523_v51 = vrot.slane %v4521_v1, 4 }
 0x1ed   : > { %v5251_v43 = vrot.slane %v5249_v28, 4  ;;  %v15737_v13 = vsel %vm14683_vm2, %v11705_v20, %v5249_v28  ;;  %v4526_v27 = vrot.slane %v4524_v63, 5  ;;  %v4554_v28 = vshll.u32 %v15733_v6, 16 }
 0x1ee   : > { %18307 = vst [vmem:[#allocation14_spill] sm:$0xff] %v15737_v13  ;;  %v4514_v20 = vrot.slane %v4513_v0, 4  ;;  %v4582_v0 = vshrl.u32 %v15580_v50, 16  ;;  %v4379_v13 = vld [vmem:[#allocation2 + $0x84] sm:$0xf] }
 0x1ef   : > { %v15768_v38 = vrot.slane %v4554_v28, 5 }
 0x1f0   : > { %12739 = vmatmul.mubr.msk.bf16.gmra.mrb[24].mxu0 %vm991_vm10, %v13870_v39  ;;  %v4461_v39 = vsel %vm14292_vm13, %v4456_v14, %v15663_v29  ;;  %v15739_v29 = vrot.slane %v4489_v55, 4  ;;  %v15744_v14 = vsel %vm14683_vm2, %v5251_v43, %v5252_v21  ;;  %v4558_v55 = vshrl.u32 %v15733_v6, 16 }
 0x1f1   : > { %12742 = vmatprep.mubr.msk.bf16.mxu0 %vm991_vm10, %v13871_v36  ;;  %v15725_v36 = vrot.slane %v4479_v60, 4  ;;  %v4503_v60 = vor.u32 %v4502_v52, %v4499_v31  ;;  %18308 = vst [vmem:[#allocation15_spill] sm:$0xff] %v15744_v14  ;;  %v11659_v31 = vcombine.low %v4437_v9, %v4447_v12  ;;  %v5353_v43 = vsel %vm1040_vm0, %v15539_v4, 0  ;;  %v15765_v12 = vld [vmem:[#allocation2 + $0x68] sm:$0x1] }
 0x1f2   : > { %v15754_v52 = vrot.slane %v4530_v2, 5  ;;  %v4536_v21 = vrot.slane %v4534_v59, 4  ;;  %v11660_v1 = vcombine.low %v4461_v39, %v4471_v7  ;;  %v4495_v63 = vsel %vm14292_vm13, %v15739_v29, %v15727_v22  ;;  %v4373_v4 = vld [vmem:[#allocation2 + $0x6c] sm:$0xf]  ;;  %v4376_v7 = vld [vmem:[#allocation2 + $0x78] sm:$0xf] }
 0x1f3   : > { %v4485_v45 = vsel %vm14292_vm13, %v15725_v36, %v15686_v24  ;;  %v4518_v9 = vrot.slane %v4516_v46, 5  ;;  %v4504_v2 = vrot.slane %v4503_v60, 4  ;;  %v4547_v39 = vrot.slane %v4545_v16, 4  ;;  %v15770_v36 = vld [vmem:[#allocation2 + $0x7c] sm:$0xf] }
 0x1f4   : > { %v4550_v59 = vrot.slane %v4548_v41, 5  ;;  %v4560_v24 = vrot.slane %v4558_v55, 4  ;;  %v4537_v54 = vor.u32 %v4536_v21, %v15754_v52  ;;  %v4564_v22 = vshll.u32 %v15765_v12, 16 }
 0x1f5   : > { %v4569_v29 = vshrl.u32 %v4373_v4, 16  ;;  %v4572_v46 = vshll.u32 %v4373_v4, 16  ;;  %v4578_v60 = vshll.u32 %v15580_v50, 16  ;;  %v4509_v41 = vsel %vm14292_vm13, %v4504_v2, %v15720_v53 }
 0x1f6   : > { %v4606_v28 = vshrl.u32 %v15770_v36, 16  ;;  %v4519_v55 = vsel %vm14292_vm13, %v4514_v20, %v4518_v9  ;;  %v4551_v4 = vor.u32 %v4550_v59, %v4547_v39  ;;  %v4561_v14 = vor.u32 %v4560_v24, %v15768_v38 }
 0x1f7   : > { %v4538_v50 = vrot.slane %v4537_v54, 4  ;;  %v4571_v18 = vrot.slane %v4569_v29, 4  ;;  %v4574_v17 = vrot.slane %v4572_v46, 5  ;;  %v15786_v53 = vrot.slane %v4578_v60, 5 }
 0x1f8   : > { %12743 = vmatmul.mubr.msk.bf16.gmra.mrb[28].mxu0 %vm991_vm10, %v13872_v56  ;;  %v4527_v56 = vor.u32 %v4526_v27, %v4523_v51  ;;  %v4593_v51 = vshrl.u32 %v4376_v7, 16  ;;  %v4602_v27 = vshll.u32 %v15770_v36, 16  ;;  %v4584_v2 = vrot.slane %v4582_v0, 4 }
 0x1f9   : > { %12748 = vmatprep.mubr.msk.bf16.mxu0 %vm991_vm10, %v11658_v58  ;;  %v4540_v58 = vshll.u32 %v15564_v40, 16  ;;  %v4596_v40 = vshll.u32 %v4376_v7, 16  ;;  %v4566_v7 = vrot.slane %v4564_v22, 5  ;;  %v4608_v20 = vrot.slane %v4606_v28, 4 }
 0x1fa   : > { %v4528_v16 = vrot.slane %v4527_v56, 4  ;;  %v4595_v56 = vrot.slane %v4593_v51, 4  ;;  %v15788_v9 = vrot.slane %v4602_v27, 5  ;;  %v4620_v39 = vshll.u32 %v4379_v13, 16  ;;  %v4382_v51 = vld [vmem:[#allocation2 + $0x90] sm:$0xf] }
 0x1fb   : > { %v4542_v21 = vrot.slane %v4540_v58, 5  ;;  %v4598_v61 = vrot.slane %v4596_v40, 5  ;;  %v4617_v58 = vshrl.u32 %v4379_v13, 16  ;;  %v4552_v59 = vrot.slane %v4551_v4, 4  ;;  %v15801_v40 = vld [vmem:[#allocation2 + $0x94] sm:$0xf] }
 0x1fc   : > { %v4562_v24 = vrot.slane %v4561_v14, 4  ;;  %v4626_v54 = vshll.u32 %v15602_v10, 16  ;;  %v11661_v22 = vcombine.low %v4485_v45, %v4495_v63  ;;  %v4533_v29 = vsel %vm14292_vm13, %v4528_v16, %v15754_v52 }
 0x1fd   : > { %v4543_v46 = vsel %vm14292_vm13, %v4538_v50, %v4542_v21  ;;  %v4575_v60 = vor.u32 %v4574_v17, %v4571_v18  ;;  %v4585_v13 = vor.u32 %v4584_v2, %v15786_v53  ;;  %v4588_v14 = vshll.u32 %v15582_v44, 16 }
 0x1fe   : > { %v4599_v0 = vor.u32 %v4598_v61, %v4595_v56  ;;  %v4619_v63 = vrot.slane %v4617_v58, 4  ;;  %v4557_v52 = vsel %vm14292_vm13, %v4552_v59, %v15768_v38  ;;  %v4567_v17 = vsel %vm14292_vm13, %v4562_v24, %v4566_v7  ;;  %v15818_v24 = vld [vmem:[#allocation2 + $0x98] sm:$0x1] }
 0x1ff   : > { %v15810_v18 = vrot.slane %v4626_v54, 5  ;;  %v4641_v61 = vshrl.u32 %v4382_v51, 16  ;;  %v4644_v16 = vshll.u32 %v4382_v51, 16  ;;  %v4650_v27 = vshll.u32 %v15801_v40, 16 }
 0x200   : > { %12749 = vmatmul.mubr.msk.bf16.vlgmr.msra.gmra.mrb[0].mxu0 %vm991_vm10, %v11659_v31  ;;  %v15790_v31 = vld [vmem:[#allocation2 + $0x80] sm:$0x1]  ;;  %v4654_v28 = vshrl.u32 %v15801_v40, 16  ;;  %v4586_v21 = vrot.slane %v4585_v13, 4  ;;  %v4590_v4 = vrot.slane %v4588_v14, 5  ;;  %v4600_v38 = vrot.slane %v4599_v0, 4 }
 0x201   : > { %12781 = vmatpush3.bf16.msra.mxu0 %v5353_v43  ;;  %12752 = vmatprep.mubr.msk.bf16.mxu0 %vm991_vm10, %v11660_v1  ;;  %v4630_v43 = vshrl.u32 %v15602_v10, 16  ;;  %v11662_v1 = vcombine.low %v4509_v41, %v4519_v55  ;;  %v4609_v10 = vor.u32 %v4608_v20, %v15788_v9  ;;  %v4612_v45 = vshll.u32 %v15790_v31, 16  ;;  %v4385_v20 = vld [vmem:[#allocation2 + $0x9c] sm:$0xf] }
 0x202   : > { %v4622_v41 = vrot.slane %v4620_v39, 5  ;;  %v4576_v55 = vrot.slane %v4575_v60, 4  ;;  %v4636_v56 = vshll.u32 %v15604_v48, 16  ;;  %v11663_v58 = vcombine.low %v4533_v29, %v4543_v46  ;;  %v4388_v29 = vld [vmem:[#allocation2 + $0xa8] sm:$0xf] }
 0x203   : > { %v4632_v44 = vrot.slane %v4630_v43, 4  ;;  %v4610_v50 = vrot.slane %v4609_v10, 4  ;;  %v4614_v2 = vrot.slane %v4612_v45, 5  ;;  %v11664_v39 = vcombine.low %v4557_v52, %v4567_v17  ;;  %v15827_v46 = vld [vmem:[#allocation2 + $0xac] sm:$0xf] }
 0x204   : > { %v4623_v7 = vor.u32 %v4622_v41, %v4619_v63  ;;  %v4643_v54 = vrot.slane %v4641_v61, 4  ;;  %v4646_v43 = vrot.slane %v4644_v16, 5  ;;  %v4581_v60 = vsel %vm14292_vm13, %v4576_v55, %v15786_v53 }
 0x205   : > { %v4633_v59 = vor.u32 %v4632_v44, %v15810_v18  ;;  %v4591_v13 = vsel %vm14292_vm13, %v4586_v21, %v4590_v4  ;;  %v4665_v48 = vshrl.u32 %v4385_v20, 16  ;;  %v4668_v14 = vshll.u32 %v4385_v20, 16 }
 0x206   : > { %v4605_v0 = vsel %vm14292_vm13, %v4600_v38, %v15788_v9  ;;  %v4615_v51 = vsel %vm14292_vm13, %v4610_v50, %v4614_v2  ;;  %v4624_v10 = vrot.slane %v4623_v7, 4  ;;  %v4638_v45 = vrot.slane %v4636_v56, 5  ;;  %v15849_v56 = vld [vmem:[#allocation2 + $0xb0] sm:$0x1] }
 0x207   : > { %v4634_v63 = vrot.slane %v4633_v59, 4  ;;  %v4660_v53 = vshll.u32 %v15818_v24, 16  ;;  %v4674_v41 = vshll.u32 %v15634_v3, 16  ;;  %v4678_v52 = vshrl.u32 %v15634_v3, 16 }
 0x208   : > { %12753 = vmatmul.mubr.msk.bf16.gmra.mrb[4].mxu0 %vm991_vm10, %v11661_v22  ;;  %v15820_v22 = vrot.slane %v4650_v27, 5  ;;  %v4689_v17 = vshrl.u32 %v4388_v29, 16  ;;  %v4692_v44 = vshll.u32 %v4388_v29, 16  ;;  %v4698_v61 = vshll.u32 %v15827_v46, 16 }
 0x209   : > { %12756 = vmatprep.mubr.msk.bf16.mxu0 %vm991_vm10, %v11662_v1  ;;  %v4656_v1 = vrot.slane %v4654_v28, 4  ;;  %v4702_v9 = vshrl.u32 %v15827_v46, 16  ;;  %v4647_v16 = vor.u32 %v4646_v43, %v4643_v54  ;;  %v4667_v28 = vrot.slane %v4665_v48, 4  ;;  %v4391_v54 = vld [vmem:[#allocation2 + $0xb4] sm:$0xf] }
 0x20a   : > { %v4670_v55 = vrot.slane %v4668_v14, 5  ;;  %v11665_v21 = vcombine.low %v4581_v60, %v4591_v13  ;;  %v11666_v4 = vcombine.low %v4605_v0, %v4615_v51  ;;  %v4629_v3 = vsel %vm14292_vm13, %v4624_v10, %v15810_v18  ;;  %v4394_v51 = vld [vmem:[#allocation2 + $0xc0] sm:$0xf]  ;;  %v15854_v10 = vld [vmem:[#allocation2 + $0xc4] sm:$0xf] }
 0x20b   : > { %v4657_v27 = vor.u32 %v4656_v1, %v15820_v22  ;;  %v4639_v38 = vsel %vm14292_vm13, %v4634_v63, %v4638_v45  ;;  %v4662_v50 = vrot.slane %v4660_v53, 5  ;;  %v15847_v2 = vrot.slane %v4674_v41, 5 }
 0x20c   : > { %v4680_v7 = vrot.slane %v4678_v52, 4  ;;  %v4691_v20 = vrot.slane %v4689_v17, 4  ;;  %v4704_v59 = vrot.slane %v4702_v9, 4  ;;  %v4648_v43 = vrot.slane %v4647_v16, 4 }
 0x20d   : > { %v4658_v1 = vrot.slane %v4657_v27, 4  ;;  %v4671_v60 = vor.u32 %v4670_v55, %v4667_v28  ;;  %v4684_v13 = vshll.u32 %v15636_v23, 16  ;;  %v4708_v18 = vshll.u32 %v15849_v56, 16 }
 0x20e   : > { %v11667_v48 = vcombine.low %v4629_v3, %v4639_v38  ;;  %v4681_v14 = vor.u32 %v4680_v7, %v15847_v2  ;;  %v4713_v29 = vshrl.u32 %v4391_v54, 16  ;;  %v4716_v0 = vshll.u32 %v4391_v54, 16  ;;  %v4397_v54 = vld [vmem:[#allocation2 + $0xcc] sm:$0xf] }
 0x20f   : > { %v4722_v53 = vshll.u32 %v15668_v49, 16  ;;  %v4726_v41 = vshrl.u32 %v15668_v49, 16  ;;  %v4653_v23 = vsel %vm14292_vm13, %v4648_v43, %v15820_v22  ;;  %v4663_v52 = vsel %vm14292_vm13, %v4658_v1, %v4662_v50 }
 0x210   : > { %12757 = vmatmul.mubr.msk.bf16.gmra.mrb[8].mxu0 %vm991_vm10, %v11663_v58  ;;  %v4694_v58 = vrot.slane %v4692_v44, 5  ;;  %v4672_v17 = vrot.slane %v4671_v60, 4  ;;  %v4686_v44 = vrot.slane %v4684_v13, 5  ;;  %v4740_v9 = vshll.u32 %v4394_v51, 16  ;;  %v15872_v13 = vld [vmem:[#allocation2 + $0xc8] sm:$0x1] }
 0x211   : > { %12760 = vmatprep.mubr.msk.bf16.mxu0 %vm991_vm10, %v11664_v39  ;;  %v4700_v39 = vrot.slane %v4698_v61, 5  ;;  %v4737_v61 = vshrl.u32 %v4394_v51, 16  ;;  %v4746_v16 = vshll.u32 %v15854_v10, 16  ;;  %v4750_v27 = vshrl.u32 %v15854_v10, 16 }
 0x212   : > { %v4695_v45 = vor.u32 %v4694_v58, %v4691_v20  ;;  %v4682_v28 = vrot.slane %v4681_v14, 4  ;;  %v4710_v55 = vrot.slane %v4708_v18, 5  ;;  %v4715_v49 = vrot.slane %v4713_v29, 4 }
 0x213   : > { %v4705_v63 = vor.u32 %v4704_v59, %v4700_v39  ;;  %v4724_v38 = vrot.slane %v4722_v53, 5  ;;  %v4728_v7 = vrot.slane %v4726_v41, 4  ;;  %v11668_v22 = vcombine.low %v4653_v23, %v4663_v52 }
 0x214   : > { %v4739_v20 = vrot.slane %v4737_v61, 4  ;;  %v4742_v58 = vrot.slane %v4740_v9, 5  ;;  %v4748_v50 = vrot.slane %v4746_v16, 5  ;;  %v4752_v59 = vrot.slane %v4750_v27, 4 }
 0x215   : > { %v4706_v3 = vrot.slane %v4705_v63, 4  ;;  %v4677_v43 = vsel %vm14292_vm13, %v4672_v17, %v15847_v2  ;;  %v4687_v1 = vsel %vm14292_vm13, %v4682_v28, %v4686_v44  ;;  %v4729_v29 = vor.u32 %v4728_v7, %v4724_v38 }
 0x216   : > { %v4761_v2 = vshrl.u32 %v4397_v54, 16  ;;  %v4764_v51 = vshll.u32 %v4397_v54, 16  ;;  %v4774_v63 = vshrl.u32 %v15711_v32, 16  ;;  %v4743_v53 = vor.u32 %v4742_v58, %v4739_v20  ;;  %v5078_v58 = vld [vmem:[#allocation2 + $0x18] sm:$0xe] }
 0x217   : > { %v4711_v14 = vsel %vm14292_vm13, %v4706_v3, %v4710_v55  ;;  %v4753_v41 = vor.u32 %v4752_v59, %v4748_v50  ;;  %v11669_v23 = vcombine.low %v4677_v43, %v4687_v1  ;;  %v4730_v17 = vrot.slane %v4729_v29, 4 }
 0x218   : > { %12761 = vmatmul.mubr.msk.bf16.gmra.mrb[12].mxu0 %vm991_vm10, %v11665_v21  ;;  %v4718_v21 = vrot.slane %v4716_v0, 5  ;;  %v4732_v0 = vshll.u32 %v15670_v26, 16  ;;  %v4763_v61 = vrot.slane %v4761_v2, 4  ;;  %v4766_v9 = vrot.slane %v4764_v51, 5  ;;  %v5079_v2 = vld [vmem:[#allocation2 + $0x24] sm:$0xe] }
 0x219   : > { %12764 = vmatprep.mubr.msk.bf16.mxu0 %vm991_vm10, %v11666_v4  ;;  %v4696_v4 = vrot.slane %v4695_v45, 4  ;;  %v4770_v45 = vshll.u32 %v15711_v32, 16  ;;  %v4776_v16 = vrot.slane %v4774_v63, 4  ;;  %v4744_v27 = vrot.slane %v4743_v53, 4  ;;  %v5080_v51 = vld [vmem:[#allocation2 + $0x30] sm:$0xe] }
 0x21a   : > { %v4719_v60 = vor.u32 %v4718_v21, %v4715_v49  ;;  %v4734_v44 = vrot.slane %v4732_v0, 5  ;;  %v4754_v28 = vrot.slane %v4753_v41, 4  ;;  %v4767_v21 = vor.u32 %v4766_v9, %v4763_v61  ;;  %v5082_v61 = vld [vmem:[#allocation2 + $0x48] sm:$0xe] }
 0x21b   : > { %v4701_v18 = vsel %vm14292_vm13, %v4696_v4, %v4700_v39  ;;  %v4772_v26 = vrot.slane %v4770_v45, 5  ;;  %v4780_v3 = vshll.u32 %v15713_v57, 16  ;;  %v4749_v7 = vsel %vm14292_vm13, %v4744_v27, %v4748_v50 }
 0x21c   : > { %v11670_v39 = vcombine.low %v4701_v18, %v4711_v14  ;;  %v4720_v52 = vrot.slane %v4719_v60, 4  ;;  %v4735_v49 = vsel %vm14292_vm13, %v4730_v17, %v4734_v44  ;;  %v5144_v20 = vrot.slane %v15587_v33, 5 }
 0x21d   : > { %v4777_v4 = vor.u32 %v4776_v16, %v4772_v26  ;;  %v4768_v54 = vrot.slane %v4767_v21, 4  ;;  %v4782_v1 = vrot.slane %v4780_v3, 5  ;;  %v11690_v60 = vrot.slane %v5078_v58, 9 }
 0x21e   : > { %v4725_v32 = vsel %vm14292_vm13, %v4720_v52, %v4724_v38  ;;  %v5146_v18 = vrot.slane %v5144_v20, 4  ;;  %v5147_v14 = vrot.slane %v15613_v30, 5  ;;  %v5151_v50 = vrot.slane %v15609_v5, 5 }
 0x21f   : > { %v11671_v59 = vcombine.low %v4725_v32, %v4735_v49  ;;  %v4778_v43 = vrot.slane %v4777_v4, 4  ;;  %v4773_v57 = vsel %vm14292_vm13, %v4768_v54, %v4772_v26  ;;  %v5145_v29 = vsel %vm14683_vm2, %v11690_v60, %v5144_v20  ;;  %v5086_v20 = vld [vmem:[#allocation2 + $0x78] sm:$0xe] }
 0x220   : > { %12765 = vmatmul.mubr.msk.bf16.gmra.mrb[16].mxu0 %vm991_vm10, %v11667_v48  ;;  %v4756_v48 = vshll.u32 %v15872_v13, 16  ;;  %v5148_v0 = vsel %vm14683_vm2, %v5146_v18, %v5147_v14  ;;  %v5158_v30 = vrot.slane %v15632_v62, 5  ;;  %v11691_v53 = vrot.slane %v5079_v2, 9  ;;  %v18311_v14 = vld [vmem:[#allocation8_spill] sm:$0xff] }
 0x221   : > { %12768 = vmatprep.mubr.msk.bf16.mxu0 %vm991_vm10, %v11668_v22  ;;  %v4783_v33 = vsel %vm14292_vm13, %v4778_v43, %v4782_v1  ;;  %v11707_v63 = vcombine.low %v5145_v29, %v5148_v0  ;;  %v5153_v41 = vrot.slane %v5151_v50, 4  ;;  %v5161_v5 = vrot.slane %v15661_v37, 5  ;;  %v5088_v43 = vld [vmem:[#allocation2 + $0x90] sm:$0xe] }
 0x222   : > { %v4758_v55 = vrot.slane %v4756_v48, 5  ;;  %v11673_v45 = vcombine.low %v4773_v57, %v4783_v33  ;;  %v5154_v48 = vrot.slane %v15624_v19, 5  ;;  %v5152_v52 = vsel %vm14683_vm2, %v11691_v53, %v5151_v50  ;;  %v5090_v50 = vld [vmem:[#allocation2 + $0xa8] sm:$0xe] }
 0x223   : > { %v5172_v44 = vrot.slane %v15684_v8, 5  ;;  %v11694_v26 = vrot.slane %v5082_v61, 9  ;;  %v5175_v27 = vrot.slane %v15718_v15, 5  ;;  %v5186_v32 = vrot.slane %v15733_v6, 5  ;;  %v5084_v8 = vld [vmem:[#allocation2 + $0x60] sm:$0xe] }
 0x224   : > { %v4759_v22 = vsel %vm14292_vm13, %v4754_v28, %v4758_v55  ;;  %v5155_v62 = vsel %vm14683_vm2, %v5153_v41, %v5154_v48  ;;  %v11696_v21 = vrot.slane %v5084_v8, 9  ;;  %v5189_v3 = vrot.slane %v15765_v12, 5  ;;  %v5092_v41 = vld [vmem:[#allocation2 + $0xc0] sm:$0xe]  ;;  %v18321_v61 = vld [vmem:[#allocation13_spill] sm:$0xff] }
 0x225   : > { %v11672_v38 = vcombine.low %v4749_v7, %v4759_v22  ;;  %v11708_v37 = vcombine.low %v5152_v52, %v5155_v62  ;;  %v5174_v16 = vrot.slane %v5172_v44, 4  ;;  %v5173_v28 = vsel %vm14683_vm2, %v11694_v26, %v5172_v44  ;;  %v18318_v52 = vld [vmem:[#allocation12_spill] sm:$0xff]  ;;  %v18320_v44 = vld [vmem:[#allocation10_spill] sm:$0xff] }
 0x226   : > { %v5188_v4 = vrot.slane %v5186_v32, 4  ;;  %v18309_v15 = vcombine.low %v15553_v35, %v15557_v47  ;;  %v5187_v7 = vsel %vm14683_vm2, %v11696_v21, %v5186_v32  ;;  %v5200_v6 = vrot.slane %v15770_v36, 5  ;;  %v5594_v32 = vld [vmem:[#allocation3 + $0xc] sm:$0x1]  ;;  %v5652_v21 = vld [vmem:[#allocation3 + $0x20] sm:$0x1] }
 0x227   : > { %v5176_v55 = vsel %vm14683_vm2, %v5174_v16, %v5175_v27  ;;  %v5203_v12 = vrot.slane %v15790_v31, 5  ;;  %v18310_v35 = vcombine.low %v15571_v42, %v15575_v25  ;;  %v5214_v36 = vrot.slane %v15801_v40, 5  ;;  %v18312_v42 = vld [vmem:[#allocation7_spill] sm:$0xff]  ;;  %v5597_v27 = vld [vmem:[#allocation3 + $0x18] sm:$0x1] }
 0x228   : > { %12769 = vmatmul.mubr.msk.bf16.gmra.mrb[20].mxu0 %vm991_vm10, %v11669_v23  ;;  %v11692_v23 = vrot.slane %v5080_v51, 9  ;;  %v11711_v49 = vcombine.low %v5173_v28, %v5176_v55  ;;  %v5190_v22 = vsel %vm14683_vm2, %v5188_v4, %v5189_v3  ;;  %v11700_v60 = vrot.slane %v5088_v43, 9  ;;  %v18315_v51 = vld [vmem:[#allocation11_spill] sm:$0xff]  ;;  %v5606_v43 = vld [vmem:[#allocation3 + $0x3c] sm:$0x1] }
 0x229   : > { %12772 = vmatprep.mubr.msk.bf16.mxu0 %vm991_vm10, %v11670_v39  ;;  %v5160_v39 = vrot.slane %v5158_v30, 4  ;;  %v11713_v58 = vcombine.low %v5187_v7, %v5190_v22  ;;  %v5216_v18 = vrot.slane %v5214_v36, 4  ;;  %v5217_v31 = vrot.slane %v15818_v24, 5  ;;  %v5649_v3 = vld [vmem:[#allocation3 + $0x14] sm:$0x1] }
 0x22a   : > { %v5159_v17 = vsel %vm14683_vm2, %v11692_v23, %v5158_v30  ;;  %v18313_v25 = vcombine.low %v18311_v14, %v18312_v42  ;;  %v5215_v57 = vsel %vm14683_vm2, %v11700_v60, %v5214_v36  ;;  %v5228_v40 = vrot.slane %v15827_v46, 5  ;;  %v18314_v30 = vld [vmem:[#allocation5_spill] sm:$0xff]  ;;  %v5603_v7 = vld [vmem:[#allocation3 + $0x30] sm:$0x1] }
 0x22b   : > { %v5162_v19 = vsel %vm14683_vm2, %v5160_v39, %v5161_v5  ;;  %v5218_v33 = vsel %vm14683_vm2, %v5216_v18, %v5217_v31  ;;  %v11702_v0 = vrot.slane %v5090_v50, 9  ;;  %v5231_v24 = vrot.slane %v15849_v56, 5  ;;  %v18317_v5 = vld [vmem:[#allocation9_spill] sm:$0xff]  ;;  %v5664_v60 = vld [vmem:[#allocation3 + $0x50] sm:$0x1] }
 0x22c   : > { %v11709_v9 = vcombine.low %v5159_v17, %v5162_v19  ;;  %v11717_v29 = vcombine.low %v5215_v57, %v5218_v33  ;;  %v5230_v2 = vrot.slane %v5228_v40, 4  ;;  %v5242_v46 = vrot.slane %v15854_v10, 5  ;;  %v6270_v31 = vld [vmem:[%s18089_s3] sm:$0xf]  ;;  %v5661_v14 = vld [vmem:[#allocation3 + $0x44] sm:$0x1] }
 0x22d   : > { %v11704_v23 = vrot.slane %v5092_v41, 9  ;;  %v5245_v56 = vrot.slane %v15872_v13, 5  ;;  %v18319_v62 = vcombine.low %v18317_v5, %v18318_v52  ;;  %v18323_v13 = vld [vmem:[#allocation14_spill] sm:$0xff]  ;;  %v18326_v16 = vmov 0  ;;  %13805 = vmatprep.subr.msk.bf16.mxu0 %vm6400_vm7, %v6270_v31  ;;  %13806 = vmatprep.subr.msk.bf16.mxu1 %vm6400_vm7, %v6270_v31  ;;  %v5615_v33 = vld [vmem:[#allocation3 + $0x60] sm:$0x1] }
 0x22e   : > { %v5232_v53 = vsel %vm14683_vm2, %v5230_v2, %v5231_v24  ;;  %v5244_v39 = vrot.slane %v5242_v46, 4  ;;  %v18327_v16 = vsel %vm15994_vm6, 4294967295, %v18326_v16  ;;  %v18329_v28 = vmov 0   ;;  %v5612_v50 = vld [vmem:[#allocation3 + $0x54] sm:$0x1] }
 0x22f   : > { %v5243_v17 = vsel %vm14683_vm2, %v11704_v23, %v5242_v46  ;;  %18328 = vst [vmem:[#allocation16_spill] sm:$0xff] %v18327_v16  ;;  %5584 = vst.msk [vmem:[#allocation3 + $0x8] sm:$0x1] %vm5583_vm1, %v18329_v28  ;;  %v5598_v55 = vsel %vm15994_vm6, 0, %v5597_v27  ;;  %v5595_v8 = vsel %vm15994_vm6, 0, %v5594_v32  ;;  %v5653_v4 = vsel %vm16013_vm3, 0, %v5652_v21 }
 0x230   : > { %12773 = vmatmul.mubr.msk.bf16.gmra.mrb[24].mxu0 %vm991_vm10, %v11671_v59  ;;  %v11698_v59 = vrot.slane %v5086_v20, 9  ;;  %v5246_v19 = vsel %vm14683_vm2, %v5244_v39, %v5245_v56  ;;  %5588 = vst.msk [vmem:[#allocation3 + $0xd4] sm:$0x1] %vm5583_vm1, %v18329_v28  ;;  %5599 = vst [vmem:[#allocation3 + $0x18] sm:$0x1] %v5598_v55  ;;  %v5604_v22 = vsel %vm15994_vm6, 0, %v5603_v7 }
 0x231   : > { %12776 = vmatprep.mubr.msk.bf16.mxu0 %vm991_vm10, %v11672_v38  ;;  %v5202_v38 = vrot.slane %v5200_v6, 4  ;;  %v11721_v10 = vcombine.low %v5243_v17, %v5246_v19  ;;  %5581 = vst.msk [vmem:[#allocation3] sm:$0xf] %vm5580_vm4, %v18329_v28  ;;  %5582 = vst.msk [vmem:[#allocation3 + $0x4] sm:$0xf] %vm5580_vm4, %v18329_v28  ;;  %v5665_v18 = vsel %vm16013_vm3, 0, %v5664_v60 }
 0x232   : > { %v5201_v47 = vsel %vm14683_vm2, %v11698_v59, %v5200_v6  ;;  %5586 = vst.msk [vmem:[#allocation3 + $0xcc] sm:$0xf] %vm5580_vm4, %v18329_v28  ;;  %5587 = vst.msk [vmem:[#allocation3 + $0xd0] sm:$0xf] %vm5580_vm4, %v18329_v28  ;;  %v5600_v6 = vld [vmem:[#allocation3 + $0x24] sm:$0x1] }
 0x233   : > { %v5204_v54 = vsel %vm14683_vm2, %v5202_v38, %v5203_v12  ;;  %5596 = vst [vmem:[#allocation3 + $0xc] sm:$0x1] %v5595_v8  ;;  %5654 = vst [vmem:[#allocation3 + $0x20] sm:$0x1] %v5653_v4  ;;  %v5601_v20 = vsel %vm15994_vm6, 0, %v5600_v6  ;;  %v6402_v42 = vsel %vm6400_vm7, %v6270_v31, 0 }
 0x234   : > { %v11715_v1 = vcombine.low %v5201_v47, %v5204_v54  ;;  %5605 = vst [vmem:[#allocation3 + $0x30] sm:$0x1] %v5604_v22  ;;  %5602 = vst [vmem:[#allocation3 + $0x24] sm:$0x1] %v5601_v20  ;;  %v5655_v38 = vld [vmem:[#allocation3 + $0x2c] sm:$0x1]  ;;  %13155 = vmatpush3.bf16.msra.mxu1 %v6402_v42 }
 0x235   : > { %v5656_v12 = vsel %vm16013_vm3, 0, %v5655_v38  ;;  %v5609_v54 = vld [vmem:[#allocation3 + $0x48] sm:$0x1]  ;;  %5666 = vst [vmem:[#allocation3 + $0x50] sm:$0x1] %v5665_v18 }
 0x236   : > { %5657 = vst [vmem:[#allocation3 + $0x2c] sm:$0x1] %v5656_v12  ;;  %v5610_v36 = vsel %vm15994_vm6, 0, %v5609_v54  ;;  %v5667_v24 = vld [vmem:[#allocation3 + $0x5c] sm:$0x1] }
 0x237   : > { %5611 = vst [vmem:[#allocation3 + $0x48] sm:$0x1] %v5610_v36  ;;  %v5676_v46 = vld [vmem:[#allocation3 + $0x80] sm:$0x1]  ;;  %v5627_v39 = vld [vmem:[#allocation3 + $0x90] sm:$0x1] }
 0x238   : > { %12777 = vmatmul.mubr.msk.bf16.gmra.mrb[28].mxu0 %vm991_vm10, %v11673_v45  ;;  %v18316_v45 = vcombine.low %v18314_v30, %v18315_v51  ;;  %v5668_v30 = vsel %vm16013_vm3, 0, %v5667_v24  ;;  %v5621_v51 = vld [vmem:[#allocation3 + $0x78] sm:$0x1]  ;;  %v5677_v41 = vsel %vm16013_vm3, 0, %v5676_v46  ;;  %v5628_v56 = vsel %vm15994_vm6, 0, %v5627_v39 }
 0x239   : > { %12782 = vmatprep.mubr.msk.bf16.mxu0 %vm991_vm10, %v11707_v63  ;;  %v5229_v63 = vsel %vm14683_vm2, %v11702_v0, %v5228_v40  ;;  %v5616_v40 = vsel %vm15994_vm6, 0, %v5615_v33  ;;  %v5670_v0 = vld [vmem:[#allocation3 + $0x68] sm:$0x1]  ;;  %5669 = vst [vmem:[#allocation3 + $0x5c] sm:$0x1] %v5668_v30 }
 0x23a   : > { %v11719_v48 = vcombine.low %v5229_v63, %v5232_v53  ;;  %5617 = vst [vmem:[#allocation3 + $0x60] sm:$0x1] %v5616_v40  ;;  %v5671_v2 = vsel %vm16013_vm3, 0, %v5670_v0  ;;  %v5618_v63 = vld [vmem:[#allocation3 + $0x6c] sm:$0x1] }
 0x23b   : > { %5672 = vst [vmem:[#allocation3 + $0x68] sm:$0x1] %v5671_v2  ;;  %v5619_v53 = vsel %vm15994_vm6, 0, %v5618_v63  ;;  %5678 = vst [vmem:[#allocation3 + $0x80] sm:$0x1] %v5677_v41 }
 0x23c   : > { %5620 = vst [vmem:[#allocation3 + $0x6c] sm:$0x1] %v5619_v53  ;;  %v5624_v5 = vld [vmem:[#allocation3 + $0x84] sm:$0x1]  ;;  %5629 = vst [vmem:[#allocation3 + $0x90] sm:$0x1] %v5628_v56 }
 0x23d   : > { %v5625_v52 = vsel %vm15994_vm6, 0, %v5624_v5  ;;  %v5679_v19 = vld [vmem:[#allocation3 + $0x8c] sm:$0x1]  ;;  %v5685_v27 = vld [vmem:[#allocation3 + $0xa4] sm:$0x1] }
 0x23e   : > { %5626 = vst [vmem:[#allocation3 + $0x84] sm:$0x1] %v5625_v52  ;;  %v5686_v28 = vsel %vm16013_vm3, 0, %v5685_v27  ;;  %v5639_v55 = vld [vmem:[#allocation3 + $0xc0] sm:$0x1] }
 0x23f   : > { %5687 = vst [vmem:[#allocation3 + $0xa4] sm:$0x1] %v5686_v28  ;;  %v5640_v32 = vsel %vm15994_vm6, 0, %v5639_v55  ;;  %v5636_v8 = vld [vmem:[#allocation3 + $0xb4] sm:$0x1] }
 0x240   : > { %12783 = vmatmul.mubr.msk.bf16.vlgmr.msra.gmra.mrb[0].mxu0 %vm991_vm10, %v11708_v37  ;;  %v18322_v37 = vcombine.low %v18320_v44, %v18321_v61  ;;  %v5633_v44 = vld [vmem:[#allocation3 + $0xa8] sm:$0x1]  ;;  %5641 = vst [vmem:[#allocation3 + $0xc0] sm:$0x1] %v5640_v32  ;;  %v5637_v21 = vsel %vm15994_vm6, 0, %v5636_v8 }
 0x241   : > { %12786 = vmatprep.mubr.msk.bf16.mxu0 %vm991_vm10, %v11709_v9  ;;  %v18324_v9 = vld [vmem:[#allocation15_spill] sm:$0xff]  ;;  %12815 = vmatpush3.bf16.msra.mxu0 %v6402_v42  ;;  %v5634_v61 = vsel %vm15994_vm6, 0, %v5633_v44  ;;  %5638 = vst [vmem:[#allocation3 + $0xb4] sm:$0x1] %v5637_v21  ;;  %v5694_v4 = vld [vmem:[#allocation3 + $0xc8] sm:$0x1] }
 0x242   : > { %v18325_v26 = vcombine.low %v18323_v13, %v18324_v9  ;;  %5635 = vst [vmem:[#allocation3 + $0xa8] sm:$0x1] %v5634_v61  ;;  %v5688_v9 = vld [vmem:[#allocation3 + $0xb0] sm:$0x1]  ;;  %v11804_v22 = vld [vmem:[%s18089_s3 + $0x4] sm:$0xf] }
 0x243   : > { %v5646_v6 = vld [vmem:[#allocation3 + $0x8] sm:$0x1]  ;;  %13807 = vmatprep.subr.msk.bf16.mxu1 %vm6400_vm7, %v11804_v22  ;;  %v16105_v46 = vsel %vm6400_vm7, %v11804_v22, 0 }
 0x244   : > { %v5647_v20 = vsel %vm16013_vm3, 0, %v5646_v6  ;;  %v16095_v54 = vld [vmem:[%s18088_s2] ss:$0 sm:$0xff] }
 0x245   : > { %5648 = vst [vmem:[#allocation3 + $0x8] sm:$0x1] %v5647_v20 }
 0x248   : > { %12787 = vmatmul.mubr.msk.bf16.gmra.mrb[4].mxu0 %vm991_vm10, %v18309_v15  ;;  %v5650_v15 = vsel %vm16013_vm3, 0, %v5649_v3  ;;  %v5695_v3 = vsel %vm16013_vm3, 0, %v5694_v4 }
 0x249   : > { %12790 = vmatprep.mubr.msk.bf16.mxu0 %vm991_vm10, %v11711_v49  ;;  %v18330_v49 = vmov 0  ;;  %5651 = vst [vmem:[#allocation3 + $0x14] sm:$0x1] %v5650_v15  ;;  %v5691_v15 = vld [vmem:[#allocation3 + $0xbc] sm:$0x1] }
 0x24a   : > { %v18331_v49 = vsel %vm16013_vm3, 4294967295, %v18330_v49  ;;  %5696 = vst [vmem:[#allocation3 + $0xc8] sm:$0x1] %v5695_v3  ;;  %v5692_v7 = vsel %vm16013_vm3, 0, %v5691_v15  ;;  %v6119_v3 = vld [vmem:[#allocation3 + $0xc] sm:$0xf] }
 0x24b   : > { %18332 = vst [vmem:[#allocation18_spill] sm:$0xff] %v18331_v49  ;;  %5693 = vst [vmem:[#allocation3 + $0xbc] sm:$0x1] %v5692_v7 }
 0x24c   : > { %v6599_v31 = vld [vmem:[#allocation3 + $0x8] sm:$0x1] }
 0x24d   : > { %v6665_v2 = vshll.u32 %v6599_v31, 16 }
 0x24f   : > { %v16111_v56 = vrot.slane %v6665_v2, 5 }
 0x250   : > { %12791 = vmatmul.mubr.msk.bf16.gmra.mrb[8].mxu0 %vm991_vm10, %v18310_v35  ;;  %v5591_v35 = vld [vmem:[#allocation3] sm:$0x1] }
 0x251   : > { %12794 = vmatprep.mubr.msk.bf16.mxu0 %vm991_vm10, %v11713_v58  ;;  %v5658_v58 = vld [vmem:[#allocation3 + $0x38] sm:$0x1]  ;;  %v5592_v47 = vsel %vm15994_vm6, 0, %v5591_v35 }
 0x252   : > { %v5659_v59 = vsel %vm16013_vm3, 0, %v5658_v58  ;;  %5593 = vst [vmem:[#allocation3] sm:$0x1] %v5592_v47 }
 0x253   : > { %5660 = vst [vmem:[#allocation3 + $0x38] sm:$0x1] %v5659_v59  ;;  %v6598_v59 = vld [vmem:[#allocation3 + $0x4] sm:$0xf] }
 0x254   : > { %v6655_v35 = vshll.u32 %v6598_v59, 16  ;;  %v6659_v47 = vshrl.u32 %v6598_v59, 16 }
 0x256   : > { %v6661_v60 = vrot.slane %v6659_v47, 4 }
 0x258   : > { %12795 = vmatmul.mubr.msk.bf16.gmra.mrb[12].mxu0 %vm991_vm10, %v18313_v25  ;;  %v5662_v25 = vsel %vm16013_vm3, 0, %v5661_v14 }
 0x259   : > { %12798 = vmatprep.mubr.msk.bf16.mxu0 %vm991_vm10, %v11715_v1  ;;  %v5607_v1 = vsel %vm15994_vm6, 0, %v5606_v43  ;;  %v13873_v57 = vld [vmem:[#allocation3] sm:$0xff]   ;;  %5663 = vst [vmem:[#allocation3 + $0x44] sm:$0x1] %v5662_v25 }
 0x25a   : > { %5608 = vst [vmem:[#allocation3 + $0x3c] sm:$0x1] %v5607_v1  ;;  %v6597_v58 = vld [vmem:[#allocation3] sm:$0xf]  ;;  %v16097_v1 = vrot.slane %v6655_v35, 5 }
 0x25b   : > { %v6646_v38 = vshrl.u32 %v6597_v58, 16  ;;  %v6649_v12 = vshll.u32 %v6597_v58, 16  ;;  %v6130_v58 = vld [vmem:[#allocation3 + $0x20] sm:$0x1] }
 0x25c   : > { %v6662_v0 = vor.u32 %v6661_v60, %v16097_v1 }
 0x25d   : > { %v6648_v36 = vrot.slane %v6646_v38, 4  ;;  %v6651_v43 = vrot.slane %v6649_v12, 5 }
 0x25e   : > { %v16109_v39 = vrot.slane %v6662_v0, 4 }
 0x25f   : > { %v6652_v33 = vor.u32 %v6651_v43, %v6648_v36  ;;  %v6123_v36 = vld [vmem:[#allocation3 + $0x14] sm:$0x1] }
 0x260   : > { %12799 = vmatmul.mubr.msk.bf16.gmra.mrb[16].mxu0 %vm991_vm10, %v18316_v45  ;;  %v5622_v45 = vsel %vm15994_vm6, 0, %v5621_v51 }
 0x261   : > { %12802 = vmatprep.mubr.msk.bf16.mxu0 %vm991_vm10, %v11717_v29  ;;  %v5613_v29 = vsel %vm15994_vm6, 0, %v5612_v50  ;;  %5623 = vst [vmem:[#allocation3 + $0x78] sm:$0x1] %v5622_v45  ;;  %v16107_v41 = vrot.slane %v6652_v33, 4 }
 0x262   : > { %5614 = vst [vmem:[#allocation3 + $0x54] sm:$0x1] %v5613_v29 }
 0x268   : > { %12803 = vmatmul.mubr.msk.bf16.gmra.mrb[20].mxu0 %vm991_vm10, %v18319_v62  ;;  %v5682_v62 = vld [vmem:[#allocation3 + $0x98] sm:$0x1] }
 0x269   : > { %12806 = vmatprep.mubr.msk.bf16.mxu0 %vm991_vm10, %v11719_v48  ;;  %v5673_v48 = vld [vmem:[#allocation3 + $0x74] sm:$0x1]  ;;  %v5683_v17 = vsel %vm16013_vm3, 0, %v5682_v62 }
 0x26a   : > { %v5674_v23 = vsel %vm16013_vm3, 0, %v5673_v48  ;;  %5684 = vst [vmem:[#allocation3 + $0x98] sm:$0x1] %v5683_v17 }
 0x26b   : > { %5675 = vst [vmem:[#allocation3 + $0x74] sm:$0x1] %v5674_v23 }
 0x270   : > { %12807 = vmatmul.mubr.msk.bf16.gmra.mrb[24].mxu0 %vm991_vm10, %v18322_v37  ;;  %v5630_v37 = vld [vmem:[#allocation3 + $0x9c] sm:$0x1] }
 0x271   : > { %12810 = vmatprep.mubr.msk.bf16.mxu0 %vm991_vm10, %v11721_v10  ;;  %v5680_v10 = vsel %vm16013_vm3, 0, %v5679_v19  ;;  %v5631_v13 = vsel %vm15994_vm6, 0, %v5630_v37 }
 0x272   : > { %5681 = vst [vmem:[#allocation3 + $0x8c] sm:$0x1] %v5680_v10  ;;  %5632 = vst [vmem:[#allocation3 + $0x9c] sm:$0x1] %v5631_v13 }
 0x278   : > { %12811 = vmatmul.mubr.msk.bf16.gmra.mrb[28].mxu0 %vm991_vm10, %v18325_v26  ;;  %v5689_v26 = vsel %vm16013_vm3, 0, %v5688_v9 }
 0x279   : > { %12816 = vmatprep.mubr.msk.bf16.mxu0 %vm6351_vm8, %v13873_v57  ;;  %5690 = vst [vmem:[#allocation3 + $0xb0] sm:$0x1] %v5689_v26  ;;  %v6126_v26 = vld [vmem:[#allocation3 + $0x18] sm:$0xf] }
 0x313   : > { %v12784_v18 = vpop.f32.mrb[0].mxu0 }
 0x314   : > { %v13156_v14 = vadd.f32 %v12784_v18, %v16095_v54  ;;  %v5389_v42 = vpop.f32.mrb[1].mxu0 }
 0x315   : > { %v13157_v25 = vadd.f32 %v16095_v54, %v5389_v42  ;;  %v12785_v57 = vpop.f32.mrb[2].mxu0 }
 0x316   : > { %v5550_v40 = vmax.f32 %v13156_v14, 0.0  ;;  %v13158_v50 = vadd.f32 %v12785_v57, %v16095_v54  ;;  %v5392_v29 = vpop.f32.mrb[3].mxu0 }
 0x317   : > { %v5548_v24 = vmax.f32 %v13157_v25, 0.0  ;;  %v13159_v30 = vadd.f32 %v16095_v54, %v5392_v29 }
 0x318   : > { %v12155_v51 = vpack.c.bf16 %v5550_v40, %v5550_v40  ;;  %v5551_v45 = vmax.f32 %v13158_v50, 0.0  ;;  %v6658_v40 = vsel %vm14292_vm13, %v16107_v41, %v16097_v1 }
 0x319   : > { %v12153_v63 = vpack.c.bf16 %v5548_v24, %v5548_v24  ;;  %v5549_v53 = vmax.f32 %v13159_v30, 0.0 }
 0x31a   : > { %v5814_v48 = vshrl.u32 %v12155_v51, 16  ;;  %v12156_v23 = vpack.c.bf16 %v5551_v45, %v5551_v45  ;;  %v5817_v5 = vshll.u32 %v12155_v51, 16 }
 0x31b   : > { %v5797_v52 = vshrl.u32 %v12153_v63, 16  ;;  %v5800_v62 = vshll.u32 %v12153_v63, 16  ;;  %v12154_v17 = vpack.c.bf16 %v5549_v53, %v5549_v53  ;;  %v12788_v19 = vpop.f32.mrb[4].mxu0 }
 0x31c   : > { %v5816_v10 = vrot.slane %v5814_v48, 7  ;;  %v5822_v44 = vshrl.u32 %v12156_v23, 16  ;;  %v5825_v61 = vshll.u32 %v12156_v23, 16  ;;  %v13160_v37 = vadd.f32 %v12788_v19, %v16095_v54  ;;  %v5405_v13 = vpop.f32.mrb[5].mxu0  ;;  %v6140_v48 = vld [vmem:[#allocation3 + $0x30] sm:$0xf] }
 0x31d   : > { %v5799_v27 = vrot.slane %v5797_v52, 7  ;;  %v5805_v28 = vshrl.u32 %v12154_v17, 16  ;;  %v5808_v55 = vshll.u32 %v12154_v17, 16  ;;  %v13161_v32 = vadd.f32 %v16095_v54, %v5405_v13  ;;  %v12789_v8 = vpop.f32.mrb[6].mxu0 }
 0x31e   : > { %v5819_v21 = vor.u32 %v5817_v5, %v5816_v10  ;;  %v5820_v4 = vrot.slane %v5816_v10, 4  ;;  %v5824_v15 = vrot.slane %v5822_v44, 7  ;;  %v5554_v7 = vmax.f32 %v13160_v37, 0.0  ;;  %v5408_v22 = vpop.f32.mrb[7].mxu0  ;;  %v6133_v44 = vld [vmem:[#allocation3 + $0x24] sm:$0xf] }
 0x31f   : > { %v5802_v6 = vor.u32 %v5800_v62, %v5799_v27  ;;  %v5803_v20 = vrot.slane %v5799_v27, 4  ;;  %v5807_v59 = vrot.slane %v5805_v28, 7  ;;  %v5552_v38 = vmax.f32 %v13161_v32, 0.0 }
 0x320   : > { %v6127_v12 = vsel %vm16116_vm11, %v5819_v21, %v6126_v26  ;;  %v5827_v35 = vor.u32 %v5825_v61, %v5824_v15  ;;  %v5829_v47 = vrot.slane %v5824_v15, 4  ;;  %v12159_v43 = vpack.c.bf16 %v5554_v7, %v5554_v7 }
 0x321   : > { %6128 = vst [vmem:[#allocation3 + $0x18] sm:$0xf] %v6127_v12  ;;  %v6120_v60 = vsel %vm16116_vm11, %v5802_v6, %v6119_v3  ;;  %v5810_v18 = vor.u32 %v5808_v55, %v5807_v59  ;;  %v5812_v31 = vrot.slane %v5807_v59, 4  ;;  %v12157_v14 = vpack.c.bf16 %v5552_v38, %v5552_v38  ;;  %v6144_v38 = vld [vmem:[#allocation3 + $0x38] sm:$0x1] }
 0x322   : > { %6121 = vst [vmem:[#allocation3 + $0xc] sm:$0xf] %v6120_v60  ;;  %v5828_v25 = vsel %vm14071_vm9, %v5820_v4, %v5827_v35  ;;  %v6131_v57 = vsel %vm15994_vm6, %v5829_v47, %v6130_v58  ;;  %v5848_v33 = vshrl.u32 %v12159_v43, 16  ;;  %v5851_v0 = vshll.u32 %v12159_v43, 16  ;;  %v6137_v12 = vld [vmem:[#allocation3 + $0x2c] sm:$0x1] }
 0x323   : > { %6129 = vst.msk [vmem:[#allocation3 + $0x1c] sm:$0xf] %vm5580_vm4, %v5828_v25  ;;  %6132 = vst [vmem:[#allocation3 + $0x20] sm:$0x1] %v6131_v57  ;;  %v5811_v50 = vsel %vm14071_vm9, %v5803_v20, %v5810_v18  ;;  %v6124_v29 = vsel %vm15994_vm6, %v5812_v31, %v6123_v36  ;;  %v5831_v2 = vshrl.u32 %v12157_v14, 16  ;;  %v12792_v24 = vpop.f32.mrb[8].mxu0  ;;  %v13162_v51 = vadd.f32 %v12789_v8, %v16095_v54 }
 0x324   : > { %6122 = vst.msk [vmem:[#allocation3 + $0x10] sm:$0xf] %vm5580_vm4, %v5811_v50  ;;  %6125 = vst [vmem:[#allocation3 + $0x14] sm:$0x1] %v6124_v29  ;;  %v16139_v30 = vrot.slane %v5848_v33, 7  ;;  %v13163_v45 = vadd.f32 %v16095_v54, %v5408_v22  ;;  %v13164_v63 = vadd.f32 %v12792_v24, %v16095_v54  ;;  %v5421_v53 = vpop.f32.mrb[9].mxu0  ;;  %v6668_v17 = vsel %vm14292_vm13, %v16109_v39, %v16111_v56 }
 0x325   : > { %v16144_v23 = vrot.slane %v5831_v2, 7  ;;  %v5834_v5 = vshll.u32 %v12157_v14, 16  ;;  %v13165_v52 = vadd.f32 %v16095_v54, %v5421_v53  ;;  %v12793_v62 = vpop.f32.mrb[10].mxu0  ;;  %v5555_v61 = vmax.f32 %v13162_v51, 0.0  ;;  %v6154_v25 = vld [vmem:[#allocation3 + $0x48] sm:$0xf] }
 0x326   : > { %v5853_v19 = vor.u32 %v5851_v0, %v16139_v30  ;;  %v5854_v10 = vrot.slane %v16139_v30, 4  ;;  %v5553_v37 = vmax.f32 %v13163_v45, 0.0  ;;  %v5424_v13 = vpop.f32.mrb[11].mxu0  ;;  %v5558_v28 = vmax.f32 %v13164_v63, 0.0 }
 0x327   : > { %v5836_v26 = vor.u32 %v5834_v5, %v16144_v23  ;;  %v5837_v27 = vrot.slane %v16144_v23, 4  ;;  %v5556_v55 = vmax.f32 %v13165_v52, 0.0  ;;  %v12160_v8 = vpack.c.bf16 %v5555_v61, %v5555_v61  ;;  %v6147_v23 = vld [vmem:[#allocation3 + $0x3c] sm:$0xf] }
 0x328   : > { %v6141_v32 = vsel %vm16116_vm11, %v5853_v19, %v6140_v48  ;;  %v12158_v21 = vpack.c.bf16 %v5553_v37, %v5553_v37  ;;  %v13166_v4 = vadd.f32 %v12793_v62, %v16095_v54  ;;  %v12163_v15 = vpack.c.bf16 %v5558_v28, %v5558_v28 }
 0x329   : > { %6142 = vst [vmem:[#allocation3 + $0x30] sm:$0xf] %v6141_v32  ;;  %v6134_v3 = vsel %vm16116_vm11, %v5836_v26, %v6133_v44  ;;  %v12161_v7 = vpack.c.bf16 %v5556_v55, %v5556_v55  ;;  %v13167_v22 = vadd.f32 %v16095_v54, %v5424_v13  ;;  %v5856_v6 = vshrl.u32 %v12160_v8, 16 }
 0x32a   : > { %6135 = vst [vmem:[#allocation3 + $0x24] sm:$0xf] %v6134_v3  ;;  %v5859_v20 = vshll.u32 %v12160_v8, 16  ;;  %v5839_v58 = vshrl.u32 %v12158_v21, 16  ;;  %v5842_v59 = vshll.u32 %v12158_v21, 16  ;;  %v5882_v35 = vshrl.u32 %v12163_v15, 16 }
 0x32b   : > { %v5885_v47 = vshll.u32 %v12163_v15, 16  ;;  %v5865_v36 = vshrl.u32 %v12161_v7, 16  ;;  %v5868_v43 = vshll.u32 %v12161_v7, 16  ;;  %v12796_v60 = vpop.f32.mrb[12].mxu0  ;;  %v13874_v18 = vld [vmem:[#allocation3 + $0xc] sm:$0xff]   ;;  %v5858_v31 = vrot.slane %v5856_v6, 7 }
 0x32c   : > { %v5841_v14 = vrot.slane %v5839_v58, 7  ;;  %v5559_v57 = vmax.f32 %v13166_v4, 0.0  ;;  %v5557_v33 = vmax.f32 %v13167_v22, 0.0  ;;  %v5437_v50 = vpop.f32.mrb[13].mxu0  ;;  %v13875_v29 = vld [vmem:[#allocation3 + $0x18] sm:$0xff]   ;;  %v16161_v0 = vrot.slane %v5882_v35, 7  ;;  %12817 = vmatmul.mubr.msk.bf16.vlgmr.msra.gmra.mrb[32].mxu0 %vm6351_vm8, %v13874_v18 }
 0x32d   : > { %v16163_v2 = vrot.slane %v5865_v36, 7  ;;  %v13168_v24 = vadd.f32 %v12796_v60, %v16095_v54  ;;  %v13169_v30 = vadd.f32 %v16095_v54, %v5437_v50  ;;  %v12797_v51 = vpop.f32.mrb[14].mxu0  ;;  %v5861_v45 = vor.u32 %v5859_v20, %v5858_v31  ;;  %12820 = vmatprep.mubr.msk.bf16.mxu0 %vm6351_vm8, %v13875_v29  ;;  %v6158_v20 = vld [vmem:[#allocation3 + $0x50] sm:$0x1]  ;;  %v6151_v58 = vld [vmem:[#allocation3 + $0x44] sm:$0x1] }
 0x32e   : > { %v5863_v63 = vrot.slane %v5858_v31, 4  ;;  %v5844_v53 = vor.u32 %v5842_v59, %v5841_v14  ;;  %v5846_v48 = vrot.slane %v5841_v14, 4  ;;  %v5440_v5 = vpop.f32.mrb[15].mxu0  ;;  %v5887_v52 = vor.u32 %v5885_v47, %v16161_v0 }
 0x32f   : > { %v5888_v62 = vrot.slane %v16161_v0, 4  ;;  %v5870_v19 = vor.u32 %v5868_v43, %v16163_v2  ;;  %v5871_v44 = vrot.slane %v16163_v2, 4  ;;  %v5862_v61 = vsel %vm14071_vm9, %v5854_v10, %v5861_v45 }
 0x330   : > { %v6145_v37 = vsel %vm15994_vm6, %v5863_v63, %v6144_v38  ;;  %v5845_v13 = vsel %vm14071_vm9, %v5837_v27, %v5844_v53  ;;  %v6138_v26 = vsel %vm15994_vm6, %v5846_v48, %v6137_v12  ;;  %6143 = vst.msk [vmem:[#allocation3 + $0x34] sm:$0xf] %vm5580_vm4, %v5862_v61  ;;  %v6155_v28 = vsel %vm16116_vm11, %v5887_v52, %v6154_v25 }
 0x331   : > { %6146 = vst [vmem:[#allocation3 + $0x38] sm:$0x1] %v6145_v37  ;;  %6136 = vst.msk [vmem:[#allocation3 + $0x28] sm:$0xf] %vm5580_vm4, %v5845_v13  ;;  %v6148_v10 = vsel %vm16116_vm11, %v5870_v19, %v6147_v23  ;;  %v12164_v55 = vpack.c.bf16 %v5559_v57, %v5559_v57  ;;  %v12162_v32 = vpack.c.bf16 %v5557_v33, %v5557_v33  ;;  %v5562_v27 = vmax.f32 %v13168_v24, 0.0 }
 0x332   : > { %6139 = vst [vmem:[#allocation3 + $0x2c] sm:$0x1] %v6138_v26  ;;  %6156 = vst [vmem:[#allocation3 + $0x48] sm:$0xf] %v6155_v28  ;;  %v5560_v8 = vmax.f32 %v13169_v30, 0.0  ;;  %v13170_v21 = vadd.f32 %v12797_v51, %v16095_v54  ;;  %v13171_v4 = vadd.f32 %v16095_v54, %v5440_v5 }
 0x333   : > { %6149 = vst [vmem:[#allocation3 + $0x3c] sm:$0xf] %v6148_v10  ;;  %v5890_v3 = vshrl.u32 %v12164_v55, 16  ;;  %v5893_v15 = vshll.u32 %v12164_v55, 16  ;;  %v5873_v7 = vshrl.u32 %v12162_v32, 16  ;;  %v5876_v22 = vshll.u32 %v12162_v32, 16 }
 0x334   : > { %v12800_v6 = vpop.f32.mrb[16].mxu0  ;;  %v12167_v59 = vpack.c.bf16 %v5562_v27, %v5562_v27  ;;  %v12165_v38 = vpack.c.bf16 %v5560_v8, %v5560_v8  ;;  %v5563_v12 = vmax.f32 %v13170_v21, 0.0  ;;  %v5561_v35 = vmax.f32 %v13171_v4, 0.0  ;;  %v6168_v30 = vld [vmem:[#allocation3 + $0x60] sm:$0xf] }
 0x335   : > { %v5453_v47 = vpop.f32.mrb[17].mxu0  ;;  %v5892_v36 = vrot.slane %v5890_v3, 7  ;;  %v5875_v43 = vrot.slane %v5873_v7, 7  ;;  %v13172_v60 = vadd.f32 %v12800_v6, %v16095_v54  ;;  %v6161_v51 = vld [vmem:[#allocation3 + $0x54] sm:$0xf] }
 0x336   : > { %v13173_v18 = vadd.f32 %v16095_v54, %v5453_v47  ;;  %v12801_v31 = vpop.f32.mrb[18].mxu0  ;;  %v5916_v14 = vshrl.u32 %v12167_v59, 16  ;;  %v5919_v25 = vshll.u32 %v12167_v59, 16  ;;  %v5899_v57 = vshrl.u32 %v12165_v38, 16  ;;  %v6172_v59 = vld [vmem:[#allocation3 + $0x68] sm:$0x1] }
 0x337   : > { %v5902_v33 = vshll.u32 %v12165_v38, 16  ;;  %v5456_v50 = vpop.f32.mrb[19].mxu0  ;;  %v5895_v29 = vor.u32 %v5893_v15, %v5892_v36  ;;  %v5897_v0 = vrot.slane %v5892_v36, 4  ;;  %v5878_v2 = vor.u32 %v5876_v22, %v5875_v43  ;;  %v13877_v5 = vld [vmem:[#allocation3 + $0x30] sm:$0xff]   ;;  %v6165_v38 = vld [vmem:[#allocation3 + $0x5c] sm:$0x1] }
 0x338   : > { %v5880_v24 = vrot.slane %v5875_v43, 4  ;;  %v5918_v45 = vrot.slane %v5916_v14, 7  ;;  %v5901_v63 = vrot.slane %v5899_v57, 7  ;;  %v12168_v53 = vpack.c.bf16 %v5563_v12, %v5563_v12  ;;  %v13876_v23 = vld [vmem:[#allocation3 + $0x24] sm:$0xff]  }
 0x339   : > { %v12166_v48 = vpack.c.bf16 %v5561_v35, %v5561_v35  ;;  %v5896_v52 = vsel %vm14071_vm9, %v5888_v62, %v5895_v29  ;;  %v6159_v19 = vsel %vm15994_vm6, %v5897_v0, %v6158_v20  ;;  %v5879_v61 = vsel %vm14071_vm9, %v5871_v44, %v5878_v2  ;;  %12821 = vmatmul.mubr.msk.bf16.gmra.mrb[36].mxu0 %vm6351_vm8, %v13876_v23 }
 0x33a   : > { %v6152_v37 = vsel %vm15994_vm6, %v5880_v24, %v6151_v58  ;;  %6157 = vst.msk [vmem:[#allocation3 + $0x4c] sm:$0xf] %vm5580_vm4, %v5896_v52  ;;  %6160 = vst [vmem:[#allocation3 + $0x50] sm:$0x1] %v6159_v19  ;;  %v5921_v13 = vor.u32 %v5919_v25, %v5918_v45  ;;  %v5922_v26 = vrot.slane %v5918_v45, 4  ;;  %v5904_v28 = vor.u32 %v5902_v33, %v5901_v63 }
 0x33b   : > { %6150 = vst.msk [vmem:[#allocation3 + $0x40] sm:$0xf] %vm5580_vm4, %v5879_v61  ;;  %6153 = vst [vmem:[#allocation3 + $0x44] sm:$0x1] %v6152_v37  ;;  %v5905_v10 = vrot.slane %v5901_v63, 4  ;;  %v5924_v62 = vshrl.u32 %v12168_v53, 16  ;;  %12824 = vmatprep.mubr.msk.bf16.mxu0 %vm6351_vm8, %v13877_v5  ;;  %v13174_v6 = vadd.f32 %v12801_v31, %v16095_v54  ;;  %v13175_v20 = vadd.f32 %v16095_v54, %v5456_v50 }
 0x33c   : > { %v5927_v55 = vshll.u32 %v12168_v53, 16  ;;  %v5907_v32 = vshrl.u32 %v12166_v48, 16  ;;  %v5910_v27 = vshll.u32 %v12166_v48, 16  ;;  %v12804_v44 = vpop.f32.mrb[20].mxu0  ;;  %v6169_v8 = vsel %vm16116_vm11, %v5921_v13, %v6168_v30  ;;  %v6182_v30 = vld [vmem:[#allocation3 + $0x78] sm:$0xf] }
 0x33d   : > { %v6162_v21 = vsel %vm16116_vm11, %v5904_v28, %v6161_v51  ;;  %v5566_v4 = vmax.f32 %v13172_v60, 0.0  ;;  %v5564_v3 = vmax.f32 %v13173_v18, 0.0  ;;  %v5469_v15 = vpop.f32.mrb[21].mxu0  ;;  %6170 = vst [vmem:[#allocation3 + $0x60] sm:$0xf] %v6169_v8  ;;  %v5926_v7 = vrot.slane %v5924_v62, 7 }
 0x33e   : > { %6163 = vst [vmem:[#allocation3 + $0x54] sm:$0xf] %v6162_v21  ;;  %v5909_v22 = vrot.slane %v5907_v32, 7  ;;  %v12805_v58 = vpop.f32.mrb[22].mxu0  ;;  %v13176_v47 = vadd.f32 %v12804_v44, %v16095_v54  ;;  %v13177_v36 = vadd.f32 %v16095_v54, %v5469_v15  ;;  %v5567_v53 = vmax.f32 %v13174_v6, 0.0 }
 0x33f   : > { %v12171_v12 = vpack.c.bf16 %v5566_v4, %v5566_v4  ;;  %v12169_v35 = vpack.c.bf16 %v5564_v3, %v5564_v3  ;;  %v5472_v43 = vpop.f32.mrb[23].mxu0  ;;  %v5929_v60 = vor.u32 %v5927_v55, %v5926_v7  ;;  %v5931_v18 = vrot.slane %v5926_v7, 4  ;;  %v6175_v5 = vld [vmem:[#allocation3 + $0x6c] sm:$0xf] }
 0x340   : > { %v5912_v14 = vor.u32 %v5910_v27, %v5909_v22  ;;  %v5914_v25 = vrot.slane %v5909_v22, 4  ;;  %v5565_v48 = vmax.f32 %v13175_v20, 0.0  ;;  %v5570_v52 = vmax.f32 %v13176_v47, 0.0 }
 0x341   : > { %v5950_v57 = vshrl.u32 %v12171_v12, 16  ;;  %v5953_v33 = vshll.u32 %v12171_v12, 16  ;;  %v5933_v29 = vshrl.u32 %v12169_v35, 16  ;;  %v5936_v31 = vshll.u32 %v12169_v35, 16  ;;  %v13879_v23 = vld [vmem:[#allocation3 + $0x48] sm:$0xff]  }
 0x342   : > { %v5930_v50 = vsel %vm14071_vm9, %v5922_v26, %v5929_v60  ;;  %v6173_v0 = vsel %vm15994_vm6, %v5931_v18, %v6172_v59  ;;  %v5913_v2 = vsel %vm14071_vm9, %v5905_v10, %v5912_v14  ;;  %v6166_v24 = vsel %vm15994_vm6, %v5914_v25, %v6165_v38  ;;  %v13878_v51 = vld [vmem:[#allocation3 + $0x3c] sm:$0xff]   ;;  %v6179_v12 = vld [vmem:[#allocation3 + $0x74] sm:$0x1] }
 0x343   : > { %6171 = vst.msk [vmem:[#allocation3 + $0x64] sm:$0xf] %vm5580_vm4, %v5930_v50  ;;  %6174 = vst [vmem:[#allocation3 + $0x68] sm:$0x1] %v6173_v0  ;;  %v16221_v45 = vrot.slane %v5950_v57, 7  ;;  %v16223_v63 = vrot.slane %v5933_v29, 7  ;;  %v13178_v61 = vadd.f32 %v12805_v58, %v16095_v54  ;;  %v13179_v37 = vadd.f32 %v16095_v54, %v5472_v43  ;;  %12825 = vmatmul.mubr.msk.bf16.gmra.mrb[40].mxu0 %vm6351_vm8, %v13878_v51 }
 0x344   : > { %6164 = vst.msk [vmem:[#allocation3 + $0x58] sm:$0xf] %vm5580_vm4, %v5913_v2  ;;  %6167 = vst [vmem:[#allocation3 + $0x5c] sm:$0x1] %v6166_v24  ;;  %v5568_v19 = vmax.f32 %v13177_v36, 0.0  ;;  %v12808_v13 = vpop.f32.mrb[24].mxu0  ;;  %12828 = vmatprep.mubr.msk.bf16.mxu0 %vm6351_vm8, %v13879_v23  ;;  %v12172_v32 = vpack.c.bf16 %v5567_v53, %v5567_v53  ;;  %v12170_v27 = vpack.c.bf16 %v5565_v48, %v5565_v48 }
 0x345   : > { %v5955_v26 = vor.u32 %v5953_v33, %v16221_v45  ;;  %v5956_v28 = vrot.slane %v16221_v45, 4  ;;  %v5938_v10 = vor.u32 %v5936_v31, %v16223_v63  ;;  %v5939_v62 = vrot.slane %v16223_v63, 4  ;;  %v5485_v55 = vpop.f32.mrb[25].mxu0  ;;  %v6186_v38 = vld [vmem:[#allocation3 + $0x80] sm:$0x1] }
 0x346   : > { %v12175_v44 = vpack.c.bf16 %v5570_v52, %v5570_v52  ;;  %v12173_v8 = vpack.c.bf16 %v5568_v19, %v5568_v19  ;;  %v16233_v21 = vpop.f32.mrb[26].mxu0  ;;  %v5571_v15 = vmax.f32 %v13178_v61, 0.0  ;;  %v5569_v7 = vmax.f32 %v13179_v37, 0.0  ;;  %v6196_v31 = vld [vmem:[#allocation3 + $0x90] sm:$0xf] }
 0x347   : > { %v6183_v4 = vsel %vm16116_vm11, %v5955_v26, %v6182_v30  ;;  %v6176_v3 = vsel %vm16116_vm11, %v5938_v10, %v6175_v5  ;;  %v5488_v22 = vpop.f32.mrb[27].mxu0  ;;  %v5958_v6 = vshrl.u32 %v12172_v32, 16  ;;  %v5961_v20 = vshll.u32 %v12172_v32, 16  ;;  %v6189_v63 = vld [vmem:[#allocation3 + $0x84] sm:$0xf] }
 0x348   : > { %6184 = vst [vmem:[#allocation3 + $0x78] sm:$0xf] %v6183_v4  ;;  %6177 = vst [vmem:[#allocation3 + $0x6c] sm:$0xf] %v6176_v3  ;;  %v5941_v58 = vshrl.u32 %v12170_v27, 16  ;;  %v5944_v59 = vshll.u32 %v12170_v27, 16  ;;  %v12176_v14 = vpack.c.bf16 %v5571_v15, %v5571_v15  ;;  %v12174_v25 = vpack.c.bf16 %v5569_v7, %v5569_v7 }
 0x349   : > { %v5984_v35 = vshrl.u32 %v12175_v44, 16  ;;  %v5987_v47 = vshll.u32 %v12175_v44, 16  ;;  %v5967_v36 = vshrl.u32 %v12173_v8, 16  ;;  %v5970_v43 = vshll.u32 %v12173_v8, 16 }
 0x34a   : > { %v5960_v60 = vrot.slane %v5958_v6, 7  ;;  %v5943_v18 = vrot.slane %v5941_v58, 7  ;;  %v13880_v57 = vld [vmem:[#allocation3 + $0x60] sm:$0xff]   ;;  %v13180_v0 = vadd.f32 %v12808_v13, %v16095_v54  ;;  %v13181_v2 = vadd.f32 %v16095_v54, %v5485_v55  ;;  %v6200_v58 = vld [vmem:[#allocation3 + $0x98] sm:$0x1] }
 0x34b   : > { %v13881_v33 = vld [vmem:[#allocation3 + $0x54] sm:$0xff]   ;;  %v5986_v29 = vrot.slane %v5984_v35, 7  ;;  %v16239_v50 = vrot.slane %v5967_v36, 7  ;;  %12832 = vmatprep.mubr.msk.bf16.mxu1 %vm6351_vm8, %v13880_v57  ;;  %v12812_v53 = vpop.f32.mrb[28].mxu0  ;;  %v5992_v32 = vshrl.u32 %v12176_v14, 16  ;;  %v5995_v27 = vshll.u32 %v12176_v14, 16 }
 0x34c   : > { %v5963_v24 = vor.u32 %v5961_v20, %v5960_v60  ;;  %v5965_v30 = vrot.slane %v5960_v60, 4  ;;  %v5946_v51 = vor.u32 %v5944_v59, %v5943_v18  ;;  %v5948_v45 = vrot.slane %v5943_v18, 4  ;;  %12829 = vmatmul.mubr.msk.bf16.gmra.mrb[44].mxu0 %vm6351_vm8, %v13881_v33  ;;  %v5501_v19 = vpop.f32.mrb[29].mxu0 }
 0x34d   : > { %v5989_v48 = vor.u32 %v5987_v47, %v5986_v29  ;;  %v5990_v23 = vrot.slane %v5986_v29, 4  ;;  %v5972_v5 = vor.u32 %v5970_v43, %v16239_v50  ;;  %v5973_v52 = vrot.slane %v16239_v50, 4  ;;  %v16255_v10 = vpop.f32.mrb[30].mxu0  ;;  %v6193_v43 = vld [vmem:[#allocation3 + $0x8c] sm:$0x1] }
 0x34e   : > { %v5964_v61 = vsel %vm14071_vm9, %v5956_v28, %v5963_v24  ;;  %v6187_v37 = vsel %vm15994_vm6, %v5965_v30, %v6186_v38  ;;  %v5947_v13 = vsel %vm14071_vm9, %v5939_v62, %v5946_v51  ;;  %v6180_v26 = vsel %vm15994_vm6, %v5948_v45, %v6179_v12  ;;  %v16263_v62 = vpop.f32.mrb[31].mxu0  ;;  %v6210_v29 = vld [vmem:[#allocation3 + $0xa8] sm:$0xf]  ;;  %v6203_v51 = vld [vmem:[#allocation3 + $0x9c] sm:$0xf] }
 0x34f   : > { %6185 = vst.msk [vmem:[#allocation3 + $0x7c] sm:$0xf] %vm5580_vm4, %v5964_v61  ;;  %6188 = vst [vmem:[#allocation3 + $0x80] sm:$0x1] %v6187_v37  ;;  %v6197_v28 = vsel %vm16116_vm11, %v5989_v48, %v6196_v31  ;;  %v6190_v55 = vsel %vm16116_vm11, %v5972_v5, %v6189_v63  ;;  %v5975_v44 = vshrl.u32 %v12174_v25, 16  ;;  %v5978_v8 = vshll.u32 %v12174_v25, 16 }
 0x350   : > { %6178 = vst.msk [vmem:[#allocation3 + $0x70] sm:$0xf] %vm5580_vm4, %v5947_v13  ;;  %6181 = vst [vmem:[#allocation3 + $0x74] sm:$0x1] %v6180_v26  ;;  %v5574_v4 = vmax.f32 %v13180_v0, 0.0  ;;  %v5572_v3 = vmax.f32 %v13181_v2, 0.0  ;;  %v13182_v7 = vadd.f32 %v16233_v21, %v16095_v54  ;;  %v13183_v6 = vadd.f32 %v16095_v54, %v5488_v22 }
 0x351   : > { %6198 = vst [vmem:[#allocation3 + $0x90] sm:$0xf] %v6197_v28  ;;  %6191 = vst [vmem:[#allocation3 + $0x84] sm:$0xf] %v6190_v55  ;;  %v5994_v15 = vrot.slane %v5992_v32, 7  ;;  %v13184_v20 = vadd.f32 %v12812_v53, %v16095_v54  ;;  %v5977_v59 = vrot.slane %v5975_v44, 7  ;;  %v13185_v35 = vadd.f32 %v16095_v54, %v5501_v19 }
 0x352   : > { %v12179_v38 = vpack.c.bf16 %v5574_v4, %v5574_v4  ;;  %v12177_v12 = vpack.c.bf16 %v5572_v3, %v5572_v3  ;;  %v5575_v60 = vmax.f32 %v13182_v7, 0.0  ;;  %v5573_v18 = vmax.f32 %v13183_v6, 0.0  ;;  %v16277_v0 = vld [vmem:[%s18089_s3 + $0x8] sm:$0xf]  ;;  %v6207_v6 = vld [vmem:[#allocation3 + $0xa4] sm:$0x1] }
 0x353   : > { %v5997_v47 = vor.u32 %v5995_v27, %v5994_v15  ;;  %v5999_v36 = vrot.slane %v5994_v15, 4  ;;  %v5980_v14 = vor.u32 %v5978_v8, %v5977_v59  ;;  %v5982_v25 = vrot.slane %v5977_v59, 4  ;;  %v6214_v15 = vld [vmem:[#allocation3 + $0xb0] sm:$0x1] }
 0x354   : > { %v6018_v57 = vshrl.u32 %v12179_v38, 16  ;;  %v6021_v33 = vshll.u32 %v12179_v38, 16  ;;  %v6001_v31 = vshrl.u32 %v12177_v12, 16  ;;  %v6004_v50 = vshll.u32 %v12177_v12, 16 }
 0x355   : > { %v5998_v21 = vsel %vm14071_vm9, %v5990_v23, %v5997_v47  ;;  %v6201_v22 = vsel %vm15994_vm6, %v5999_v36, %v6200_v58  ;;  %v5981_v2 = vsel %vm14071_vm9, %v5973_v52, %v5980_v14  ;;  %v6194_v24 = vsel %vm15994_vm6, %v5982_v25, %v6193_v43 }
 0x356   : > { %6199 = vst.msk [vmem:[#allocation3 + $0x94] sm:$0xf] %vm5580_vm4, %v5998_v21  ;;  %6202 = vst [vmem:[#allocation3 + $0x98] sm:$0x1] %v6201_v22  ;;  %v6020_v30 = vrot.slane %v6018_v57, 7  ;;  %v12180_v45 = vpack.c.bf16 %v5575_v60, %v5575_v60  ;;  %v6003_v53 = vrot.slane %v6001_v31, 7  ;;  %v12178_v48 = vpack.c.bf16 %v5573_v18, %v5573_v18 }
 0x357   : > { %v13882_v63 = vld [vmem:[#allocation3 + $0x6c] sm:$0xff]   ;;  %6192 = vst.msk [vmem:[#allocation3 + $0x88] sm:$0xf] %vm5580_vm4, %v5981_v2  ;;  %6195 = vst [vmem:[#allocation3 + $0x8c] sm:$0x1] %v6194_v24  ;;  %v5578_v23 = vmax.f32 %v13184_v20, 0.0  ;;  %v13187_v20 = vadd.f32 %v16095_v54, %v16263_v62  ;;  %v16319_v24 = vcombine.low %v6658_v40, %v6668_v17 }
 0x358   : > { %v5576_v5 = vmax.f32 %v13185_v35, 0.0  ;;  %v13883_v19 = vld [vmem:[#allocation3 + $0x78] sm:$0xff]   ;;  %v6023_v61 = vor.u32 %v6021_v33, %v6020_v30  ;;  %v6024_v37 = vrot.slane %v6020_v30, 4  ;;  %v6026_v13 = vshrl.u32 %v12180_v45, 16  ;;  %12833 = vmatmul.mubr.msk.bf16.vlgmr.msra.gmra.mrb[0].mxu1 %vm6351_vm8, %v13882_v63  ;;  %v6600_v35 = vld [vmem:[#allocation3 + $0xc] sm:$0xf] }
 0x359   : > { %v6029_v26 = vshll.u32 %v12180_v45, 16  ;;  %v6006_v52 = vor.u32 %v6004_v50, %v6003_v53  ;;  %v6007_v28 = vrot.slane %v6003_v53, 4  ;;  %v6009_v55 = vshrl.u32 %v12178_v48, 16  ;;  %12849 = vmatpush3.bf16.msra.mxu1 %v16105_v46  ;;  %12836 = vmatprep.mubr.msk.bf16.mxu1 %vm6351_vm8, %v13883_v19  ;;  %v6224_v33 = vld [vmem:[#allocation3 + $0xc0] sm:$0xf] }
 0x35a   : > { %v6012_v32 = vshll.u32 %v12178_v48, 16  ;;  %v6211_v27 = vsel %vm16116_vm11, %v6023_v61, %v6210_v29  ;;  %v6028_v44 = vrot.slane %v6026_v13, 7  ;;  %v12183_v8 = vpack.c.bf16 %v5578_v23, %v5578_v23  ;;  %13808 = vmatprep.subr.msk.bf16.mxu1 %vm6400_vm7, %v16277_v0  ;;  %v6217_v50 = vld [vmem:[#allocation3 + $0xb4] sm:$0xf]  ;;  %v16322_v48 = vld [vmem:[#allocation3 + $0x10] sm:$0xf] }
 0x35b   : > { %v12181_v4 = vpack.c.bf16 %v5576_v5, %v5576_v5  ;;  %6212 = vst [vmem:[#allocation3 + $0xa8] sm:$0xf] %v6211_v27  ;;  %v6204_v3 = vsel %vm16116_vm11, %v6006_v52, %v6203_v51  ;;  %v6011_v7 = vrot.slane %v6009_v55, 7  ;;  %v13186_v46 = vadd.f32 %v16255_v10, %v16095_v54  ;;  %v6603_v51 = vld [vmem:[#allocation3 + $0x18] sm:$0xf] }
 0x35c   : > { %6205 = vst [vmem:[#allocation3 + $0x9c] sm:$0xf] %v6204_v3  ;;  %v6031_v58 = vor.u32 %v6029_v26, %v6028_v44  ;;  %v6033_v59 = vrot.slane %v6028_v44, 4  ;;  %v6052_v38 = vshrl.u32 %v12183_v8, 16  ;;  %v6055_v12 = vshll.u32 %v12183_v8, 16 }
 0x35d   : > { %v6014_v47 = vor.u32 %v6012_v32, %v6011_v7  ;;  %v6016_v36 = vrot.slane %v6011_v7, 4  ;;  %v6035_v43 = vshrl.u32 %v12181_v4, 16  ;;  %v6038_v60 = vshll.u32 %v12181_v4, 16  ;;  %v13885_v29 = vld [vmem:[#allocation3 + $0x90] sm:$0xff]   ;;  %v6228_v40 = vld [vmem:[#allocation3 + $0xc8] sm:$0x1] }
 0x35e   : > { %v6032_v18 = vsel %vm14071_vm9, %v6024_v37, %v6031_v58  ;;  %v6215_v14 = vsel %vm15994_vm6, %v6033_v59, %v6214_v15  ;;  %v6054_v10 = vrot.slane %v6052_v38, 7  ;;  %v5579_v25 = vmax.f32 %v13186_v46, 0.0  ;;  %v13884_v57 = vld [vmem:[#allocation3 + $0x84] sm:$0xff]   ;;  %v16324_v23 = vld [vmem:[#allocation3 + $0x14] sm:$0x1] }
 0x35f   : > { %6213 = vst.msk [vmem:[#allocation3 + $0xac] sm:$0xf] %vm5580_vm4, %v6032_v18  ;;  %6216 = vst [vmem:[#allocation3 + $0xb0] sm:$0x1] %v6215_v14  ;;  %v6015_v54 = vsel %vm14071_vm9, %v6007_v28, %v6014_v47  ;;  %v6208_v62 = vsel %vm15994_vm6, %v6016_v36, %v6207_v6  ;;  %v6037_v21 = vrot.slane %v6035_v43, 7  ;;  %v5577_v22 = vmax.f32 %v13187_v20, 0.0 }
 0x360   : > { %6206 = vst.msk [vmem:[#allocation3 + $0xa0] sm:$0xf] %vm5580_vm4, %v6015_v54  ;;  %6209 = vst [vmem:[#allocation3 + $0xa4] sm:$0x1] %v6208_v62  ;;  %v6057_v31 = vor.u32 %v6055_v12, %v6054_v10  ;;  %v12184_v2 = vpack.c.bf16 %v5579_v25, %v5579_v25  ;;  %12837 = vmatmul.mubr.msk.bf16.gmra.mrb[4].mxu1 %vm6351_vm8, %v13884_v57  ;;  %v6670_v30 = vshrl.u32 %v6600_v35, 16  ;;  %v6058_v45 = vrot.slane %v6054_v10, 4 }
 0x361   : > { %v6040_v63 = vor.u32 %v6038_v60, %v6037_v21  ;;  %v12182_v53 = vpack.c.bf16 %v5577_v22, %v5577_v22  ;;  %12840 = vmatprep.mubr.msk.bf16.mxu1 %vm6351_vm8, %v13885_v29  ;;  %v6673_v5 = vshll.u32 %v6600_v35, 16  ;;  %v6221_v26 = vld [vmem:[#allocation3 + $0xbc] sm:$0x1]  ;;  %v6679_v52 = vshll.u32 %v16322_v48, 16  ;;  %v16335_v8 = vld [vmem:[#allocation3 + $0x20] sm:$0x1] }
 0x362   : > { %v6225_v39 = vsel %vm16116_vm11, %v6057_v31, %v6224_v33  ;;  %v6060_v56 = vshrl.u32 %v12184_v2, 16  ;;  %v6063_v19 = vshll.u32 %v12184_v2, 16  ;;  %v6672_v1 = vrot.slane %v6670_v30, 4  ;;  %v16333_v44 = vld [vmem:[#allocation3 + $0x1c] sm:$0xf] }
 0x363   : > { %6226 = vst [vmem:[#allocation3 + $0xc0] sm:$0xf] %v6225_v39  ;;  %v6218_v41 = vsel %vm16116_vm11, %v6040_v63, %v6217_v50  ;;  %v6043_v17 = vshrl.u32 %v12182_v53, 16  ;;  %v6046_v61 = vshll.u32 %v12182_v53, 16  ;;  %v6675_v37 = vrot.slane %v6673_v5, 5 }
 0x364   : > { %6219 = vst [vmem:[#allocation3 + $0xb4] sm:$0xf] %v6218_v41  ;;  %v6062_v13 = vrot.slane %v6060_v56, 7  ;;  %v6683_v28 = vshrl.u32 %v16322_v48, 16  ;;  %v6689_v55 = vshll.u32 %v16324_v23, 16  ;;  %v6694_v9 = vshrl.u32 %v6603_v51, 16 }
 0x365   : > { %v6045_v32 = vrot.slane %v6043_v17, 7  ;;  %v6676_v27 = vor.u32 %v6675_v37, %v6672_v1  ;;  %v6697_v4 = vshll.u32 %v6603_v51, 16  ;;  %v6681_v7 = vrot.slane %v6679_v52, 5  ;;  %v6606_v60 = vld [vmem:[#allocation3 + $0x24] sm:$0xf] }
 0x366   : > { %v6065_v3 = vor.u32 %v6063_v19, %v6062_v13  ;;  %v6067_v15 = vrot.slane %v6062_v13, 4  ;;  %v6685_v6 = vrot.slane %v6683_v28, 4  ;;  %v6041_v46 = vrot.slane %v6037_v21, 4  ;;  %v13887_v47 = vld [vmem:[#allocation3 + $0xa8] sm:$0xff]   ;;  %v6609_v63 = vld [vmem:[#allocation3 + $0x30] sm:$0xf] }
 0x367   : > { %v6048_v20 = vor.u32 %v6046_v61, %v6045_v32  ;;  %v6050_v58 = vrot.slane %v6045_v32, 4  ;;  %v13886_v59 = vld [vmem:[#allocation3 + $0x9c] sm:$0xff]   ;;  %v6677_v38 = vrot.slane %v6676_v27, 4  ;;  %v6696_v43 = vrot.slane %v6694_v9, 4  ;;  %v16341_v18 = vld [vmem:[#allocation3 + $0x28] sm:$0xf] }
 0x368   : > { %v6066_v12 = vsel %vm14071_vm9, %v6058_v45, %v6065_v3  ;;  %v6229_v35 = vsel %vm15994_vm6, %v6067_v15, %v6228_v40  ;;  %v6686_v36 = vor.u32 %v6685_v6, %v6681_v7  ;;  %12841 = vmatmul.mubr.msk.bf16.gmra.mrb[8].mxu1 %vm6351_vm8, %v13886_v59  ;;  %v6691_v25 = vrot.slane %v6689_v55, 5  ;;  %v16354_v21 = vld [vmem:[#allocation3 + $0x2c] sm:$0x1]  ;;  %v16363_v19 = vld [vmem:[#allocation3 + $0x34] sm:$0xf] }
 0x369   : > { %6227 = vst.msk [vmem:[#allocation3 + $0xc4] sm:$0xf] %vm5580_vm4, %v6066_v12  ;;  %6230 = vst [vmem:[#allocation3 + $0xc8] sm:$0x1] %v6229_v35  ;;  %v6049_v14 = vsel %vm14071_vm9, %v6041_v46, %v6048_v20  ;;  %v6222_v10 = vsel %vm15994_vm6, %v6050_v58, %v6221_v26  ;;  %v6699_v57 = vrot.slane %v6697_v4, 5  ;;  %12844 = vmatprep.mubr.msk.bf16.mxu1 %vm6351_vm8, %v13887_v47  ;;  %v6703_v62 = vshll.u32 %v16333_v44, 16 }
 0x36a   : > { %6220 = vst.msk [vmem:[#allocation3 + $0xb8] sm:$0xf] %vm5580_vm4, %v6049_v14  ;;  %6223 = vst [vmem:[#allocation3 + $0xbc] sm:$0x1] %v6222_v10  ;;  %v6687_v54 = vrot.slane %v6686_v36, 4  ;;  %v6707_v33 = vshrl.u32 %v16333_v44, 16 }
 0x36b   : > { %v6713_v42 = vshll.u32 %v16335_v8, 16  ;;  %v6700_v22 = vor.u32 %v6699_v57, %v6696_v43  ;;  %v6718_v29 = vshrl.u32 %v6606_v60, 16  ;;  %v6721_v31 = vshll.u32 %v6606_v60, 16  ;;  %v16367_v61 = vld [vmem:[#allocation3 + $0x38] sm:$0x1] }
 0x36c   : > { %v6727_v50 = vshll.u32 %v16341_v18, 16  ;;  %v6692_v2 = vsel %vm14292_vm13, %v6687_v54, %v6691_v25  ;;  %v16361_v30 = vsel %vm6400_vm7, %v16277_v0, 0  ;;  %v6705_v51 = vrot.slane %v6703_v62, 5  ;;  %v6612_v52 = vld [vmem:[#allocation3 + $0x3c] sm:$0xf] }
 0x36d   : > { %v6709_v45 = vrot.slane %v6707_v33, 4  ;;  %v6701_v53 = vrot.slane %v6700_v22, 4  ;;  %v6715_v5 = vrot.slane %v6713_v42, 5  ;;  %v6720_v39 = vrot.slane %v6718_v29, 4  ;;  %v16375_v59 = vld [vmem:[#allocation3 + $0x40] sm:$0xf] }
 0x36e   : > { %v6723_v56 = vrot.slane %v6721_v31, 5  ;;  %v6729_v41 = vrot.slane %v6727_v50, 5  ;;  %v6731_v40 = vshrl.u32 %v16341_v18, 16  ;;  %v6737_v17 = vshll.u32 %v16354_v21, 16  ;;  %v16383_v36 = vld [vmem:[#allocation3 + $0x44] sm:$0x1] }
 0x36f   : > { %v6710_v1 = vor.u32 %v6709_v45, %v6705_v51  ;;  %v6682_v0 = vsel %vm14292_vm13, %v6677_v38, %v6681_v7  ;;  %v6742_v13 = vshrl.u32 %v6609_v63, 16  ;;  %v6745_v26 = vshll.u32 %v6609_v63, 16  ;;  %v6615_v43 = vld [vmem:[#allocation3 + $0x48] sm:$0xf]  ;;  %v16387_v57 = vld [vmem:[#allocation3 + $0x4c] sm:$0xf] }
 0x370   : > { %v6724_v37 = vor.u32 %v6723_v56, %v6720_v39  ;;  %v11806_v28 = vcombine.low %v6682_v0, %v6692_v2  ;;  %v6733_v32 = vrot.slane %v6731_v40, 4  ;;  %v6751_v27 = vshll.u32 %v16363_v19, 16  ;;  %v16393_v63 = vld [vmem:[#allocation3 + $0x50] sm:$0x1]  ;;  %v16973_v16 = vld [vmem:[#allocation3 + $0xc4] sm:$0xf] }
 0x371   : > { %v6711_v55 = vrot.slane %v6710_v1, 4  ;;  %v13888_v9 = vld [vmem:[#allocation3 + $0xb4] sm:$0xff]   ;;  %v6706_v4 = vsel %vm14292_vm13, %v6701_v53, %v6705_v51  ;;  %v6744_v15 = vrot.slane %v6742_v13, 4  ;;  %v6747_v6 = vrot.slane %v6745_v26, 5 }
 0x372   : > { %v6725_v3 = vrot.slane %v6724_v37, 4  ;;  %v6734_v46 = vor.u32 %v6733_v32, %v6729_v41  ;;  %v6739_v20 = vrot.slane %v6737_v17, 5  ;;  %v6753_v58 = vrot.slane %v6751_v27, 5  ;;  %12845 = vmatmul.mubr.msk.bf16.gmra.mrb[12].mxu1 %vm6351_vm8, %v13888_v9  ;;  %v6618_v53 = vld [vmem:[#allocation3 + $0x54] sm:$0xf] }
 0x373   : > { %v6755_v7 = vshrl.u32 %v16363_v19, 16  ;;  %v6716_v38 = vsel %vm14292_vm13, %v6711_v55, %v6715_v5  ;;  %v6748_v35 = vor.u32 %v6747_v6, %v6744_v15  ;;  %v6761_v47 = vshll.u32 %v16367_v61, 16  ;;  %12850 = vmatprep.mubr.msk.bf16.mxu1 %vm6351_vm8, %v16319_v24  ;;  %v16407_v32 = vld [vmem:[#allocation3 + $0x58] sm:$0xf]  ;;  %v16410_v15 = vld [vmem:[#allocation3 + $0x5c] sm:$0x1] }
 0x374   : > { %v6730_v12 = vsel %vm14292_vm13, %v6725_v3, %v6729_v41  ;;  %v6735_v60 = vrot.slane %v6734_v46, 4  ;;  %v6766_v10 = vshrl.u32 %v6612_v52, 16  ;;  %v6769_v25 = vshll.u32 %v6612_v52, 16  ;;  %v16399_v41 = vld [vmem:[%s18089_s3 + $0xc] sm:$0xf] }
 0x375   : > { %v6757_v14 = vrot.slane %v6755_v7, 4  ;;  %v6749_v54 = vrot.slane %v6748_v35, 4  ;;  %v6763_v62 = vrot.slane %v6761_v47, 5  ;;  %v6775_v33 = vshll.u32 %v16375_v59, 16  ;;  %v6621_v6 = vld [vmem:[#allocation3 + $0x60] sm:$0xf] }
 0x376   : > { %v6779_v42 = vshrl.u32 %v16375_v59, 16  ;;  %v6740_v22 = vsel %vm14292_vm13, %v6735_v60, %v6739_v20  ;;  %v6768_v31 = vrot.slane %v6766_v10, 4  ;;  %v6771_v50 = vrot.slane %v6769_v25, 5 }
 0x377   : > { %v6758_v29 = vor.u32 %v6757_v14, %v6753_v58  ;;  %v11807_v2 = vcombine.low %v6706_v4, %v6716_v38  ;;  %v11808_v24 = vcombine.low %v6730_v12, %v6740_v22  ;;  %v6777_v51 = vrot.slane %v6775_v33, 5  ;;  %v16415_v38 = vld [vmem:[#allocation3 + $0x64] sm:$0xf]  ;;  %v16425_v33 = vld [vmem:[#allocation3 + $0x68] sm:$0x1] }
 0x378   : > { %v6781_v45 = vrot.slane %v6779_v42, 4  ;;  %v6772_v39 = vor.u32 %v6771_v50, %v6768_v31  ;;  %v6785_v56 = vshll.u32 %v16383_v36, 16  ;;  %v6790_v1 = vshrl.u32 %v6615_v43, 16  ;;  %v6624_v42 = vld [vmem:[#allocation3 + $0x6c] sm:$0xf] }
 0x379   : > { %v6759_v5 = vrot.slane %v6758_v29, 4  ;;  %v6793_v17 = vshll.u32 %v6615_v43, 16  ;;  %v6799_v0 = vshll.u32 %v16387_v57, 16  ;;  %v6803_v37 = vshrl.u32 %v16387_v57, 16 }
 0x37a   : > { %v6782_v40 = vor.u32 %v6781_v45, %v6777_v51  ;;  %v6754_v13 = vsel %vm14292_vm13, %v6749_v54, %v6753_v58  ;;  %v6773_v52 = vrot.slane %v6772_v39, 4  ;;  %v6792_v55 = vrot.slane %v6790_v1, 4  ;;  %12851 = vmatmul.mubr.msk.bf16.vlgmr.msra.gmra.mrb[16].mxu1 %vm6351_vm8, %v11806_v28 }
 0x37b   : > { %v6764_v26 = vsel %vm14292_vm13, %v6759_v5, %v6763_v62  ;;  %v6787_v9 = vrot.slane %v6785_v56, 5  ;;  %v6795_v4 = vrot.slane %v6793_v17, 5  ;;  %v6801_v3 = vrot.slane %v6799_v0, 5  ;;  %12883 = vmatpush3.bf16.msra.mxu1 %v16361_v30  ;;  %12854 = vmatprep.mubr.msk.bf16.mxu1 %vm6351_vm8, %v11807_v2  ;;  %v16428_v2 = vld [vmem:[#allocation3 + $0x70] sm:$0xf] }
 0x37c   : > { %v6783_v27 = vrot.slane %v6782_v40, 4  ;;  %v11809_v46 = vcombine.low %v6754_v13, %v6764_v26  ;;  %v6805_v20 = vrot.slane %v6803_v37, 4  ;;  %v6809_v58 = vshll.u32 %v16393_v63, 16  ;;  %13809 = vmatprep.subr.msk.bf16.mxu1 %vm6400_vm7, %v16399_v41 }
 0x37d   : > { %v6814_v7 = vshrl.u32 %v6618_v53, 16  ;;  %v6778_v28 = vsel %vm14292_vm13, %v6773_v52, %v6777_v51  ;;  %v6796_v12 = vor.u32 %v6795_v4, %v6792_v55  ;;  %v6817_v35 = vshll.u32 %v6618_v53, 16 }
 0x37e   : > { %v6823_v47 = vshll.u32 %v16407_v32, 16  ;;  %v6788_v30 = vsel %vm14292_vm13, %v6783_v27, %v6787_v9  ;;  %v6806_v43 = vor.u32 %v6805_v20, %v6801_v3  ;;  %v6811_v60 = vrot.slane %v6809_v58, 5 }
 0x37f   : > { %v6816_v14 = vrot.slane %v6814_v7, 4  ;;  %v6797_v10 = vrot.slane %v6796_v12, 4  ;;  %v6819_v25 = vrot.slane %v6817_v35, 5  ;;  %v6827_v62 = vshrl.u32 %v16407_v32, 16 }
 0x380   : > { %v6825_v54 = vrot.slane %v6823_v47, 5  ;;  %v6807_v22 = vrot.slane %v6806_v43, 4  ;;  %v6833_v29 = vshll.u32 %v16410_v15, 16  ;;  %v6838_v31 = vshrl.u32 %v6621_v6, 16  ;;  %v16447_v43 = vld [vmem:[#allocation3 + $0x7c] sm:$0xf] }
 0x381   : > { %v6841_v50 = vshll.u32 %v6621_v6, 16  ;;  %v11810_v51 = vcombine.low %v6778_v28, %v6788_v30  ;;  %v6820_v45 = vor.u32 %v6819_v25, %v6816_v14  ;;  %v6829_v53 = vrot.slane %v6827_v62, 4  ;;  %v16439_v6 = vld [vmem:[#allocation3 + $0x74] sm:$0x1] }
 0x382   : > { %v6847_v5 = vshll.u32 %v16415_v38, 16  ;;  %v6812_v39 = vsel %vm14292_vm13, %v6807_v22, %v6811_v60  ;;  %v6835_v56 = vrot.slane %v6833_v29, 5  ;;  %v6840_v1 = vrot.slane %v6838_v31, 4  ;;  %12855 = vmatmul.mubr.msk.bf16.gmra.mrb[20].mxu1 %vm6351_vm8, %v11808_v24 }
 0x383   : > { %v6843_v40 = vrot.slane %v6841_v50, 5  ;;  %v6802_v17 = vsel %vm14292_vm13, %v6797_v10, %v6801_v3  ;;  %v6821_v0 = vrot.slane %v6820_v45, 4  ;;  %v6830_v37 = vor.u32 %v6829_v53, %v6825_v54  ;;  %12858 = vmatprep.mubr.msk.bf16.mxu1 %vm6351_vm8, %v11809_v46  ;;  %v6627_v46 = vld [vmem:[#allocation3 + $0x78] sm:$0xf] }
 0x384   : > { %v6849_v13 = vrot.slane %v6847_v5, 5  ;;  %v6851_v52 = vshrl.u32 %v16415_v38, 16  ;;  %v6857_v55 = vshll.u32 %v16425_v33, 16  ;;  %v6862_v27 = vshrl.u32 %v6624_v42, 16 }
 0x385   : > { %v6844_v26 = vor.u32 %v6843_v40, %v6840_v1  ;;  %v11811_v9 = vcombine.low %v6802_v17, %v6812_v39  ;;  %v6831_v4 = vrot.slane %v6830_v37, 4  ;;  %v6865_v20 = vshll.u32 %v6624_v42, 16  ;;  %v16450_v42 = vld [vmem:[#allocation3 + $0x80] sm:$0x1]  ;;  %v6630_v40 = vld [vmem:[#allocation3 + $0x84] sm:$0xf] }
 0x386   : > { %v6871_v24 = vshll.u32 %v16428_v2, 16  ;;  %v6826_v3 = vsel %vm14292_vm13, %v6821_v0, %v6825_v54  ;;  %v6853_v7 = vrot.slane %v6851_v52, 4  ;;  %v6864_v28 = vrot.slane %v6862_v27, 4 }
 0x387   : > { %v6845_v58 = vrot.slane %v6844_v26, 4  ;;  %v6836_v12 = vsel %vm14292_vm13, %v6831_v4, %v6835_v56  ;;  %v6867_v35 = vrot.slane %v6865_v20, 5  ;;  %v6875_v30 = vshrl.u32 %v16428_v2, 16  ;;  %v16461_v26 = vld [vmem:[#allocation3 + $0x88] sm:$0xf] }
 0x388   : > { %v6873_v47 = vrot.slane %v6871_v24, 5  ;;  %v11812_v60 = vcombine.low %v6826_v3, %v6836_v12  ;;  %v6854_v14 = vor.u32 %v6853_v7, %v6849_v13  ;;  %v6859_v10 = vrot.slane %v6857_v55, 5  ;;  %v16465_v24 = vld [vmem:[#allocation3 + $0x8c] sm:$0x1]  ;;  %v6633_v12 = vld [vmem:[#allocation3 + $0x90] sm:$0xf] }
 0x389   : > { %v6881_v25 = vshll.u32 %v16439_v6, 16  ;;  %v6868_v62 = vor.u32 %v6867_v35, %v6864_v28  ;;  %v6877_v54 = vrot.slane %v6875_v30, 4  ;;  %v6886_v22 = vshrl.u32 %v6627_v46, 16 }
 0x38a   : > { %v6889_v29 = vshll.u32 %v6627_v46, 16  ;;  %v6850_v31 = vsel %vm14292_vm13, %v6845_v58, %v6849_v13  ;;  %v6855_v50 = vrot.slane %v6854_v14, 4  ;;  %v6895_v45 = vshll.u32 %v16447_v43, 16  ;;  %12859 = vmatmul.mubr.msk.bf16.gmra.mrb[24].mxu1 %vm6351_vm8, %v11810_v51 }
 0x38b   : > { %v6899_v53 = vshrl.u32 %v16447_v43, 16  ;;  %v6869_v5 = vrot.slane %v6868_v62, 4  ;;  %v6878_v39 = vor.u32 %v6877_v54, %v6873_v47  ;;  %v6888_v56 = vrot.slane %v6886_v22, 4  ;;  %12862 = vmatprep.mubr.msk.bf16.mxu1 %vm6351_vm8, %v11811_v9 }
 0x38c   : > { %v6891_v1 = vrot.slane %v6889_v29, 5  ;;  %v6860_v17 = vsel %vm14292_vm13, %v6855_v50, %v6859_v10  ;;  %v6897_v0 = vrot.slane %v6895_v45, 5  ;;  %v6905_v13 = vshll.u32 %v16450_v42, 16  ;;  %v16476_v50 = vld [vmem:[#allocation3 + $0x98] sm:$0x1] }
 0x38d   : > { %v6901_v37 = vrot.slane %v6899_v53, 4  ;;  %v11813_v52 = vcombine.low %v6850_v31, %v6860_v17  ;;  %v6879_v55 = vrot.slane %v6878_v39, 4  ;;  %v6883_v27 = vrot.slane %v6881_v25, 5  ;;  %v16471_v25 = vld [vmem:[#allocation3 + $0x94] sm:$0xf] }
 0x38e   : > { %v6892_v51 = vor.u32 %v6891_v1, %v6888_v56  ;;  %v6874_v4 = vsel %vm14292_vm13, %v6869_v5, %v6873_v47  ;;  %v6910_v9 = vshrl.u32 %v6630_v40, 16  ;;  %v6913_v3 = vshll.u32 %v6630_v40, 16  ;;  %v6636_v5 = vld [vmem:[#allocation3 + $0x9c] sm:$0xf] }
 0x38f   : > { %v6902_v20 = vor.u32 %v6901_v37, %v6897_v0  ;;  %v6884_v58 = vsel %vm14292_vm13, %v6879_v55, %v6883_v27  ;;  %v6919_v28 = vshll.u32 %v16461_v26, 16  ;;  %v6923_v46 = vshrl.u32 %v16461_v26, 16  ;;  %v16484_v55 = vld [vmem:[#allocation3 + $0xa0] sm:$0xf] }
 0x390   : > { %v6893_v7 = vrot.slane %v6892_v51, 4  ;;  %v6907_v30 = vrot.slane %v6905_v13, 5  ;;  %v6912_v14 = vrot.slane %v6910_v9, 4  ;;  %v6915_v10 = vrot.slane %v6913_v3, 5 }
 0x391   : > { %v6903_v35 = vrot.slane %v6902_v20, 4  ;;  %v11814_v47 = vcombine.low %v6874_v4, %v6884_v58  ;;  %v6921_v62 = vrot.slane %v6919_v28, 5  ;;  %v6925_v54 = vrot.slane %v6923_v46, 4  ;;  %v16487_v58 = vld [vmem:[#allocation3 + $0xa4] sm:$0x1] }
 0x392   : > { %v6929_v22 = vshll.u32 %v16465_v24, 16  ;;  %v6898_v29 = vsel %vm14292_vm13, %v6893_v7, %v6897_v0  ;;  %v6916_v31 = vor.u32 %v6915_v10, %v6912_v14  ;;  %v6934_v45 = vshrl.u32 %v6633_v12, 16  ;;  %12863 = vmatmul.mubr.msk.bf16.gmra.mrb[28].mxu1 %vm6351_vm8, %v11812_v60  ;;  %v6639_v28 = vld [vmem:[#allocation3 + $0xa8] sm:$0xf] }
 0x393   : > { %v6937_v53 = vshll.u32 %v6633_v12, 16  ;;  %v6908_v39 = vsel %vm14292_vm13, %v6903_v35, %v6907_v30  ;;  %v6926_v56 = vor.u32 %v6925_v54, %v6921_v62  ;;  %v6943_v40 = vshll.u32 %v16471_v25, 16  ;;  %12866 = vmatprep.mubr.msk.bf16.mxu1 %vm6351_vm8, %v11813_v52 }
 0x394   : > { %v6931_v1 = vrot.slane %v6929_v22, 5  ;;  %v6917_v17 = vrot.slane %v6916_v31, 4  ;;  %v6936_v37 = vrot.slane %v6934_v45, 4  ;;  %v6947_v13 = vshrl.u32 %v16471_v25, 16  ;;  %v16494_v22 = vld [vmem:[#allocation3 + $0xac] sm:$0xf] }
 0x395   : > { %v6939_v0 = vrot.slane %v6937_v53, 5  ;;  %v6927_v27 = vrot.slane %v6926_v56, 4  ;;  %v6945_v51 = vrot.slane %v6943_v40, 5  ;;  %v6953_v60 = vshll.u32 %v16476_v50, 16  ;;  %v16498_v56 = vld [vmem:[#allocation3 + $0xb0] sm:$0x1] }
 0x396   : > { %v6958_v4 = vshrl.u32 %v6636_v5, 16  ;;  %v11815_v20 = vcombine.low %v6898_v29, %v6908_v39  ;;  %v6949_v3 = vrot.slane %v6947_v13, 4  ;;  %v6961_v7 = vshll.u32 %v6636_v5, 16  ;;  %v6642_v13 = vld [vmem:[#allocation3 + $0xb4] sm:$0xf] }
 0x397   : > { %v6940_v9 = vor.u32 %v6939_v0, %v6936_v37  ;;  %v6922_v52 = vsel %vm14292_vm13, %v6917_v17, %v6921_v62  ;;  %v6932_v46 = vsel %vm14292_vm13, %v6927_v27, %v6931_v1  ;;  %v6967_v35 = vshll.u32 %v16484_v55, 16 }
 0x398   : > { %v6960_v12 = vrot.slane %v6958_v4, 4  ;;  %v6950_v14 = vor.u32 %v6949_v3, %v6945_v51  ;;  %v6955_v10 = vrot.slane %v6953_v60, 5  ;;  %v6963_v54 = vrot.slane %v6961_v7, 5  ;;  %v16508_v3 = vld [vmem:[#allocation3 + $0xb8] sm:$0xf] }
 0x399   : > { %v6941_v30 = vrot.slane %v6940_v9, 4  ;;  %v6969_v29 = vrot.slane %v6967_v35, 5  ;;  %v6971_v31 = vshrl.u32 %v16484_v55, 16  ;;  %v6977_v45 = vshll.u32 %v16487_v58, 16  ;;  %v16511_v35 = vld [vmem:[#allocation3 + $0xbc] sm:$0x1] }
 0x39a   : > { %v6982_v53 = vshrl.u32 %v6639_v28, 16  ;;  %v11816_v5 = vcombine.low %v6922_v52, %v6932_v46  ;;  %v6951_v62 = vrot.slane %v6950_v14, 4  ;;  %v6964_v39 = vor.u32 %v6963_v54, %v6960_v12  ;;  %12867 = vmatmul.mubr.msk.bf16.gmra.mrb[0].mxu1 %vm6351_vm8, %v11814_v47 }
 0x39b   : > { %v6985_v1 = vshll.u32 %v6639_v28, 16  ;;  %v6946_v40 = vsel %vm14292_vm13, %v6941_v30, %v6945_v51  ;;  %v6973_v17 = vrot.slane %v6971_v31, 4  ;;  %v6991_v0 = vshll.u32 %v16494_v22, 16  ;;  %12870 = vmatprep.mubr.msk.bf16.mxu1 %vm6351_vm8, %v11815_v20 }
 0x39c   : > { %v6984_v37 = vrot.slane %v6982_v53, 4  ;;  %v6956_v27 = vsel %vm14292_vm13, %v6951_v62, %v6955_v10  ;;  %v6965_v60 = vrot.slane %v6964_v39, 4  ;;  %v6995_v9 = vshrl.u32 %v16494_v22, 16  ;;  %v7323_v39 = vld [vmem:[#allocation3] sm:$0xe] }
 0x39d   : > { %v6987_v4 = vrot.slane %v6985_v1, 5  ;;  %v11817_v47 = vcombine.low %v6946_v40, %v6956_v27  ;;  %v6974_v7 = vor.u32 %v6973_v17, %v6969_v29  ;;  %v6979_v28 = vrot.slane %v6977_v45, 5 }
 0x39e   : > { %v6993_v51 = vrot.slane %v6991_v0, 5  ;;  %v6997_v46 = vrot.slane %v6995_v9, 4  ;;  %v7001_v12 = vshll.u32 %v16498_v56, 16  ;;  %v7006_v20 = vshrl.u32 %v6642_v13, 16 }
 0x39f   : > { %v6988_v52 = vor.u32 %v6987_v4, %v6984_v37  ;;  %v6970_v30 = vsel %vm14292_vm13, %v6965_v60, %v6969_v29  ;;  %v6975_v14 = vrot.slane %v6974_v7, 4  ;;  %v7009_v10 = vshll.u32 %v6642_v13, 16  ;;  %v7324_v13 = vld [vmem:[#allocation3 + $0xc] sm:$0xe] }
 0x3a0   : > { %v7015_v54 = vshll.u32 %v16508_v3, 16  ;;  %v6998_v53 = vor.u32 %v6997_v46, %v6993_v51  ;;  %v7008_v62 = vrot.slane %v7006_v20, 4  ;;  %v7019_v45 = vshrl.u32 %v16508_v3, 16 }
 0x3a1   : > { %v6989_v31 = vrot.slane %v6988_v52, 4  ;;  %v6980_v1 = vsel %vm14292_vm13, %v6975_v14, %v6979_v28  ;;  %v7011_v40 = vrot.slane %v7009_v10, 5  ;;  %v7025_v37 = vshll.u32 %v16511_v35, 16  ;;  %v13937_v52 = vld [vmem:[#allocation3 + $0x4] sm:$0xf] }
 0x3a2   : > { %v7017_v17 = vrot.slane %v7015_v54, 5  ;;  %v11818_v0 = vcombine.low %v6970_v30, %v6980_v1  ;;  %v6999_v27 = vrot.slane %v6998_v53, 4  ;;  %v7003_v29 = vrot.slane %v7001_v12, 5  ;;  %12871 = vmatmul.mubr.msk.bf16.gmra.mrb[4].mxu1 %vm6351_vm8, %v11816_v5  ;;  %v13938_v14 = vld [vmem:[#allocation3 + $0x8] sm:$0x1] }
 0x3a3   : > { %v7021_v60 = vrot.slane %v7019_v45, 4  ;;  %v6994_v4 = vsel %vm14292_vm13, %v6989_v31, %v6993_v51  ;;  %v7012_v9 = vor.u32 %v7011_v40, %v7008_v62  ;;  %v11837_v7 = vrot.slane %v7323_v39, 9  ;;  %12874 = vmatprep.mubr.msk.bf16.mxu1 %vm6351_vm8, %v11817_v47  ;;  %v7325_v31 = vld [vmem:[#allocation3 + $0x18] sm:$0xe] }
 0x3a4   : > { %v7389_v46 = vrot.slane %v13937_v52, 5  ;;  %v7004_v28 = vsel %vm14292_vm13, %v6999_v27, %v7003_v29  ;;  %v7027_v30 = vrot.slane %v7025_v37, 5  ;;  %v7392_v12 = vrot.slane %v13938_v14, 5  ;;  %v7326_v27 = vld [vmem:[#allocation3 + $0x24] sm:$0xe] }
 0x3a5   : > { %v7022_v20 = vor.u32 %v7021_v60, %v7017_v17  ;;  %v7013_v10 = vrot.slane %v7012_v9, 4  ;;  %v11838_v51 = vrot.slane %v7324_v13, 9  ;;  %v11819_v53 = vcombine.low %v6994_v4, %v7004_v28  ;;  %v7328_v14 = vld [vmem:[#allocation3 + $0x3c] sm:$0xe] }
 0x3a6   : > { %v16528_v5 = vsel %vm14683_vm2, %v11837_v7, %v7389_v46  ;;  %v7391_v54 = vrot.slane %v7389_v46, 4  ;;  %v7396_v45 = vrot.slane %v16322_v48, 5  ;;  %v7399_v47 = vrot.slane %v16324_v23, 5 }
 0x3a7   : > { %v7023_v62 = vrot.slane %v7022_v20, 4  ;;  %v7018_v39 = vsel %vm14292_vm13, %v7013_v10, %v7017_v17  ;;  %v16540_v40 = vsel %vm6400_vm7, %v16399_v41, 0  ;;  %v7403_v37 = vrot.slane %v16333_v44, 5  ;;  %v7327_v17 = vld [vmem:[#allocation3 + $0x30] sm:$0xe] }
 0x3a8   : > { %v16536_v1 = vsel %vm14683_vm2, %v7391_v54, %v7392_v12  ;;  %v7398_v23 = vrot.slane %v7396_v45, 4  ;;  %v11839_v60 = vrot.slane %v7325_v31, 9  ;;  %v16549_v4 = vsel %vm14683_vm2, %v11838_v51, %v7396_v45 }
 0x3a9   : > { %v7028_v29 = vsel %vm14292_vm13, %v7023_v62, %v7027_v30  ;;  %v11854_v48 = vcombine.low %v16528_v5, %v16536_v1  ;;  %v7405_v9 = vrot.slane %v7403_v37, 4  ;;  %v7406_v41 = vrot.slane %v16335_v8, 5  ;;  %v7329_v5 = vld [vmem:[#allocation3 + $0x48] sm:$0xe] }
 0x3aa   : > { %v11820_v13 = vcombine.low %v7018_v39, %v7028_v29  ;;  %v16554_v44 = vsel %vm14683_vm2, %v7398_v23, %v7399_v47  ;;  %v16558_v7 = vsel %vm14683_vm2, %v11839_v60, %v7403_v37  ;;  %v11840_v52 = vrot.slane %v7326_v27, 9  ;;  %12875 = vmatmul.mubr.msk.bf16.gmra.mrb[8].mxu1 %vm6351_vm8, %v11818_v0  ;;  %v7330_v47 = vld [vmem:[#allocation3 + $0x54] sm:$0xe]  ;;  %v7332_v23 = vld [vmem:[#allocation3 + $0x6c] sm:$0xe] }
 0x3ab   : > { %v7410_v46 = vrot.slane %v16341_v18, 5  ;;  %v16564_v28 = vsel %vm14683_vm2, %v7405_v9, %v7406_v41  ;;  %v7413_v20 = vrot.slane %v16354_v21, 5  ;;  %v11841_v8 = vrot.slane %v7327_v17, 9  ;;  %12878 = vmatprep.mubr.msk.bf16.mxu1 %vm6351_vm8, %v11819_v53 }
 0x3ac   : > { %v7417_v30 = vrot.slane %v16363_v19, 5  ;;  %v11855_v12 = vcombine.low %v16549_v4, %v16554_v44  ;;  %v11856_v18 = vcombine.low %v16558_v7, %v16564_v28  ;;  %v7420_v54 = vrot.slane %v16367_v61, 5 }
 0x3ad   : > { %v16575_v0 = vsel %vm14683_vm2, %v11840_v52, %v7410_v46  ;;  %v7412_v10 = vrot.slane %v7410_v46, 4  ;;  %v7424_v51 = vrot.slane %v16375_v59, 5  ;;  %v11842_v53 = vrot.slane %v7328_v14, 9  ;;  %v7331_v59 = vld [vmem:[#allocation3 + $0x60] sm:$0xe] }
 0x3ae   : > { %v16579_v21 = vsel %vm14683_vm2, %v11841_v8, %v7417_v30  ;;  %v7419_v19 = vrot.slane %v7417_v30, 4  ;;  %v7427_v62 = vrot.slane %v16383_v36, 5  ;;  %v7431_v45 = vrot.slane %v16387_v57, 5  ;;  %v7333_v52 = vld [vmem:[#allocation3 + $0x78] sm:$0xe] }
 0x3af   : > { %v16585_v31 = vsel %vm14683_vm2, %v7412_v10, %v7413_v20  ;;  %v7426_v61 = vrot.slane %v7424_v51, 4  ;;  %v11843_v37 = vrot.slane %v7329_v5, 9  ;;  %v16599_v29 = vsel %vm14683_vm2, %v11842_v53, %v7424_v51 }
 0x3b0   : > { %v11857_v39 = vcombine.low %v16575_v0, %v16585_v31  ;;  %v16593_v1 = vsel %vm14683_vm2, %v7419_v19, %v7420_v54  ;;  %v7433_v36 = vrot.slane %v7431_v45, 4  ;;  %v7434_v57 = vrot.slane %v16393_v63, 5  ;;  %v7334_v54 = vld [vmem:[#allocation3 + $0x84] sm:$0xe]  ;;  %v13890_v0 = vld [vmem:[#allocation3 + $0x18] sm:$0xff]  }
 0x3b1   : > { %v11858_v27 = vcombine.low %v16579_v21, %v16593_v1  ;;  %v16604_v60 = vsel %vm14683_vm2, %v7426_v61, %v7427_v62  ;;  %v16608_v17 = vsel %vm14683_vm2, %v11843_v37, %v7431_v45  ;;  %v11844_v9 = vrot.slane %v7330_v47, 9  ;;  %v7335_v61 = vld [vmem:[#allocation3 + $0x90] sm:$0xe]  ;;  %v13891_v31 = vld [vmem:[#allocation3 + $0x24] sm:$0xff]   ;;  %v8151_v1 = vld [vmem:[#allocation3 + $0xc] sm:$0xf] }
 0x3b2   : > { %v7438_v41 = vrot.slane %v16407_v32, 5  ;;  %v11859_v46 = vcombine.low %v16599_v29, %v16604_v60  ;;  %v16615_v20 = vsel %vm14683_vm2, %v7433_v36, %v7434_v57  ;;  %v11845_v63 = vrot.slane %v7331_v59, 9  ;;  %12879 = vmatmul.mubr.msk.bf16.gmra.mrb[12].mxu1 %vm6351_vm8, %v11820_v13 }
 0x3b3   : > { %v7445_v8 = vrot.slane %v16415_v38, 5  ;;  %v11860_v30 = vcombine.low %v16608_v17, %v16615_v20  ;;  %v7441_v10 = vrot.slane %v16410_v15, 5  ;;  %12884 = vmatprep.mubr.msk.bf16.mxu1 %vm6351_vm8, %v11854_v48  ;;  %v7448_v38 = vrot.slane %v16425_v33, 5  ;;  %v13892_v17 = vld [vmem:[#allocation3 + $0x30] sm:$0xff]   ;;  %v8154_v20 = vld [vmem:[#allocation3 + $0x18] sm:$0xf] }
 0x3b4   : > { %v16623_v14 = vsel %vm14683_vm2, %v11844_v9, %v7438_v41  ;;  %v7440_v32 = vrot.slane %v7438_v41, 4  ;;  %v7452_v13 = vrot.slane %v16428_v2, 5  ;;  %v11846_v53 = vrot.slane %v7332_v23, 9  ;;  %v11919_v41 = vld [vmem:[%s18089_s3 + $0x10] sm:$0xf] }
 0x3b5   : > { %v16629_v5 = vsel %vm14683_vm2, %v11845_v63, %v7445_v8  ;;  %v7447_v19 = vrot.slane %v7445_v8, 4  ;;  %v7455_v62 = vrot.slane %v16439_v6, 5  ;;  %v7459_v15 = vrot.slane %v16447_v43, 5  ;;  %v7336_v6 = vld [vmem:[#allocation3 + $0x9c] sm:$0xe] }
 0x3b6   : > { %v16635_v51 = vsel %vm14683_vm2, %v7440_v32, %v7441_v10  ;;  %v7454_v47 = vrot.slane %v7452_v13, 4  ;;  %v11847_v33 = vrot.slane %v7333_v52, 9  ;;  %v7453_v37 = vsel %vm14683_vm2, %v11846_v53, %v7452_v13 }
 0x3b7   : > { %v11861_v48 = vcombine.low %v16623_v14, %v16635_v51  ;;  %v7449_v45 = vsel %vm14683_vm2, %v7447_v19, %v7448_v38  ;;  %v7461_v59 = vrot.slane %v7459_v15, 4  ;;  %v7462_v36 = vrot.slane %v16450_v42, 5  ;;  %v7337_v14 = vld [vmem:[#allocation3 + $0xa8] sm:$0xe] }
 0x3b8   : > { %v11862_v2 = vcombine.low %v16629_v5, %v7449_v45  ;;  %v7456_v43 = vsel %vm14683_vm2, %v7454_v47, %v7455_v62  ;;  %v7460_v57 = vsel %vm14683_vm2, %v11847_v33, %v7459_v15  ;;  %v11848_v23 = vrot.slane %v7334_v54, 9 }
 0x3b9   : > { %v7466_v9 = vrot.slane %v16461_v26, 5  ;;  %v11863_v52 = vcombine.low %v7453_v37, %v7456_v43  ;;  %v7463_v63 = vsel %vm14683_vm2, %v7461_v59, %v7462_v36  ;;  %v7469_v42 = vrot.slane %v16465_v24, 5  ;;  %v16743_v43 = vld [vmem:[#allocation3 + $0x14] sm:$0x1] }
 0x3ba   : > { %v7473_v8 = vrot.slane %v16471_v25, 5  ;;  %v11864_v32 = vcombine.low %v7460_v57, %v7463_v63  ;;  %v11849_v5 = vrot.slane %v7335_v61, 9  ;;  %12885 = vmatmul.mubr.msk.bf16.vlgmr.msra.gmra.mrb[16].mxu1 %vm6351_vm8, %v11855_v12  ;;  %v7476_v38 = vrot.slane %v16476_v50, 5  ;;  %v7338_v12 = vld [vmem:[#allocation3 + $0xb4] sm:$0xe]  ;;  %18340 = vst [vmem:[#allocation22_spill] sm:$0xff] %v16743_v43 }
 0x3bb   : > { %v7468_v10 = vrot.slane %v7466_v9, 4  ;;  %v7467_v26 = vsel %vm14683_vm2, %v11848_v23, %v7466_v9  ;;  %v7480_v13 = vrot.slane %v16484_v55, 5  ;;  %12917 = vmatpush3.bf16.msra.mxu1 %v16540_v40  ;;  %12888 = vmatprep.mubr.msk.bf16.mxu1 %vm6351_vm8, %v11856_v18  ;;  %v11850_v4 = vrot.slane %v7336_v6, 9  ;;  %v16745_v57 = vld [vmem:[#allocation3 + $0x1c] sm:$0xf] }
 0x3bc   : > { %v7475_v19 = vrot.slane %v7473_v8, 4  ;;  %v7474_v25 = vsel %vm14683_vm2, %v11849_v5, %v7473_v8  ;;  %v7487_v44 = vrot.slane %v16494_v22, 5  ;;  %v7483_v54 = vrot.slane %v16487_v58, 5  ;;  %13810 = vmatprep.subr.msk.bf16.mxu1 %vm6400_vm7, %v11919_v41  ;;  %18341 = vst [vmem:[#allocation23_spill] sm:$0xff] %v16745_v57 }
 0x3bd   : > { %v7470_v24 = vsel %vm14683_vm2, %v7468_v10, %v7469_v42  ;;  %v7482_v40 = vrot.slane %v7480_v13, 4  ;;  %v11851_v28 = vrot.slane %v7337_v14, 9  ;;  %v7490_v51 = vrot.slane %v16498_v56, 5 }
 0x3be   : > { %v11865_v50 = vcombine.low %v7467_v26, %v7470_v24  ;;  %v7477_v55 = vsel %vm14683_vm2, %v7475_v19, %v7476_v38  ;;  %v7489_v18 = vrot.slane %v7487_v44, 4  ;;  %v7481_v53 = vsel %vm14683_vm2, %v11850_v4, %v7480_v13  ;;  %v16755_v26 = vld [vmem:[#allocation3 + $0x24] sm:$0xf]  ;;  %v16757_v38 = vld [vmem:[#allocation3 + $0x20] sm:$0x1]  ;;  %v13895_v4 = vld [vmem:[#allocation3 + $0x54] sm:$0xff]  }
 0x3bf   : > { %v11866_v7 = vcombine.low %v7474_v25, %v7477_v55  ;;  %v7484_v22 = vsel %vm14683_vm2, %v7482_v40, %v7483_v54  ;;  %v7494_v62 = vrot.slane %v16508_v3, 5  ;;  %v7488_v45 = vsel %vm14683_vm2, %v11851_v28, %v7487_v44  ;;  %v16763_v25 = vld [vmem:[#allocation3 + $0x34] sm:$0xf]  ;;  %v16765_v44 = vld [vmem:[#allocation3 + $0x28] sm:$0xf] }
 0x3c0   : > { %v11867_v15 = vcombine.low %v7481_v53, %v7484_v22  ;;  %v7491_v58 = vsel %vm14683_vm2, %v7489_v18, %v7490_v51  ;;  %v11852_v47 = vrot.slane %v7338_v12, 9  ;;  %v7497_v56 = vrot.slane %v16511_v35, 5  ;;  %v13889_v35 = vld [vmem:[#allocation3 + $0xc] sm:$0xff]   ;;  %18343 = vst [vmem:[#allocation25_spill] sm:$0xff] %v16765_v44  ;;  %v16767_v12 = vld [vmem:[#allocation3 + $0x38] sm:$0x1] }
 0x3c1   : > { %v11868_v33 = vcombine.low %v7488_v45, %v7491_v58  ;;  %v7496_v61 = vrot.slane %v7494_v62, 4  ;;  %v8682_v21 = vsel %vm6400_vm7, %v11919_v41, 0  ;;  %v8200_v29 = vshrl.u32 %v8151_v1, 16  ;;  %v16773_v54 = vld [vmem:[#allocation3 + $0x40] sm:$0xf] }
 0x3c2   : > { %12889 = vmatmul.mubr.msk.bf16.gmra.mrb[20].mxu1 %vm6351_vm8, %v11857_v39  ;;  %v7495_v3 = vsel %vm14683_vm2, %v11852_v47, %v7494_v62  ;;  %v16726_v39 = vld [vmem:[%s18089_s3 + $0x14] sm:$0xf]  ;;  %v8203_v60 = vshll.u32 %v8151_v1, 16  ;;  %v8227_v63 = vshll.u32 %v8154_v20, 16  ;;  %v8219_v14 = vshll.u32 %v16743_v43, 16 }
 0x3c3   : > { %v7498_v37 = vsel %vm14683_vm2, %v7496_v61, %v7497_v56  ;;  %12892 = vmatprep.mubr.msk.bf16.mxu1 %vm6351_vm8, %v11858_v27  ;;  %v16732_v27 = vld [vmem:[#allocation3 + $0x10] sm:$0xf]  ;;  %v8202_v9 = vrot.slane %v8200_v29, 4  ;;  %v8233_v10 = vshll.u32 %v16745_v57, 16  ;;  %v8237_v5 = vshrl.u32 %v16745_v57, 16  ;;  %v13901_v43 = vld [vmem:[#allocation3 + $0x9c] sm:$0xff]  }
 0x3c4   : > { %v11869_v59 = vcombine.low %v7495_v3, %v7498_v37  ;;  %18336 = vst [vmem:[#allocation17_spill] sm:$0xff] %v16732_v27  ;;  %v8213_v36 = vshrl.u32 %v16732_v27, 16  ;;  %v8205_v41 = vrot.slane %v8203_v60, 5  ;;  %v16761_v24 = vrot.slane %v8227_v63, 5  ;;  %v16781_v53 = vld [vmem:[#allocation3 + $0x44] sm:$0x1] }
 0x3c5   : > { %v16770_v55 = vrot.slane %v8219_v14, 5  ;;  %v8248_v40 = vshrl.u32 %v16755_v26, 16  ;;  %v16776_v28 = vrot.slane %v8233_v10, 5  ;;  %v16778_v18 = vrot.slane %v8237_v5, 4  ;;  %v16783_v22 = vld [vmem:[#allocation3 + $0x4c] sm:$0xf] }
 0x3c6   : > { %v8215_v8 = vrot.slane %v8213_v36, 4  ;;  %v8206_v19 = vor.u32 %v8205_v41, %v8202_v9  ;;  %v8964_v62 = vrot.slane %v16763_v25, 5  ;;  %v8257_v58 = vshll.u32 %v16765_v44, 16  ;;  %v8881_v61 = vld [vmem:[#allocation3 + $0x3c] sm:$0xe] }
 0x3c7   : > { %v8261_v47 = vshrl.u32 %v16765_v44, 16  ;;  %v16795_v56 = vld [vmem:[#allocation3 + $0x58] sm:$0xf]  ;;  %v16803_v1 = vrot.slane %v8248_v40, 4  ;;  %v8978_v60 = vrot.slane %v16783_v22, 5  ;;  %v11956_v41 = vrot.slane %v8881_v61, 9 }
 0x3c8   : > { %v8966_v37 = vrot.slane %v8964_v62, 4  ;;  %v8884_v5 = vld [vmem:[#allocation3 + $0x60] sm:$0xe]  ;;  %v13897_v61 = vld [vmem:[#allocation3 + $0x6c] sm:$0xff]   ;;  %v16855_v45 = vld [vmem:[#allocation3 + $0x7c] sm:$0xf] }
 0x3c9   : > { %v16832_v40 = vrot.slane %v8261_v47, 4  ;;  %v8985_v47 = vrot.slane %v16795_v56, 5  ;;  %v11959_v29 = vrot.slane %v8884_v5, 9  ;;  %v8281_v49 = vshll.u32 %v16763_v25, 16 }
 0x3ca   : > { %12893 = vmatmul.mubr.msk.bf16.gmra.mrb[24].mxu1 %vm6351_vm8, %v11859_v46 }
 0x3cb   : > { %12896 = vmatprep.mubr.msk.bf16.mxu1 %vm6351_vm8, %v11860_v30  ;;  %v13893_v30 = vld [vmem:[#allocation3 + $0x3c] sm:$0xff]   ;;  %v8987_v51 = vrot.slane %v8985_v47, 4 }
 0x3d2   : > { %12897 = vmatmul.mubr.msk.bf16.gmra.mrb[28].mxu1 %vm6351_vm8, %v11861_v48 }
 0x3d3   : > { %12900 = vmatprep.mubr.msk.bf16.mxu1 %vm6351_vm8, %v11862_v2  ;;  %v8209_v2 = vshll.u32 %v16732_v27, 16 }
 0x3d5   : > { %v16750_v42 = vrot.slane %v8209_v2, 5  ;;  %v16813_v2 = vld [vmem:[#allocation3 + $0x64] sm:$0xf] }
 0x3da   : > { %12901 = vmatmul.mubr.msk.bf16.gmra.mrb[0].mxu1 %vm6351_vm8, %v11863_v52  ;;  %v8224_v52 = vshrl.u32 %v8154_v20, 16 }
 0x3db   : > { %12904 = vmatprep.mubr.msk.bf16.mxu1 %vm6351_vm8, %v11864_v32  ;;  %v13894_v32 = vld [vmem:[#allocation3 + $0x48] sm:$0xff]  }
 0x3dc   : > { %v16759_v13 = vrot.slane %v8224_v52, 4  ;;  %v8883_v52 = vld [vmem:[#allocation3 + $0x54] sm:$0xe] }
 0x3e2   : > { %12905 = vmatmul.mubr.msk.bf16.gmra.mrb[4].mxu1 %vm6351_vm8, %v11865_v50  ;;  %v8216_v50 = vor.u32 %v8215_v8, %v16750_v42  ;;  %v16853_v8 = vld [vmem:[#allocation3 + $0x30] sm:$0xf] }
 0x3e3   : > { %12908 = vmatprep.mubr.msk.bf16.mxu1 %vm6351_vm8, %v11866_v7  ;;  %v8880_v7 = vld [vmem:[#allocation3 + $0x30] sm:$0xe] }
 0x3e4   : > { %v11955_v3 = vrot.slane %v8880_v7, 9  ;;  %v8980_v7 = vrot.slane %v8978_v60, 4 }
 0x3e6   : > { %v16817_v36 = vsel %vm14683_vm2, %v11955_v3, %v8964_v62  ;;  %v16835_v3 = vld [vmem:[#allocation3 + $0x68] sm:$0x1] }
 0x3e7   : > { %18346 = vst [vmem:[#allocation28_spill] sm:$0xff] %v16817_v36  ;;  %v16971_v36 = vld [vmem:[#allocation3 + $0xbc] sm:$0x1] }
 0x3ea   : > { %12909 = vmatmul.mubr.msk.bf16.gmra.mrb[8].mxu1 %vm6351_vm8, %v11867_v15  ;;  %v16787_v15 = vrot.slane %v8206_v19, 4  ;;  %v13896_v19 = vld [vmem:[#allocation3 + $0x60] sm:$0xff]  }
 0x3eb   : > { %12912 = vmatprep.mubr.msk.bf16.mxu1 %vm6351_vm8, %v11868_v33  ;;  %v16793_v33 = vld [vmem:[#allocation3 + $0x50] sm:$0x1] }
 0x3ec   : > { %v8981_v62 = vrot.slane %v16793_v33, 5 }
 0x3f2   : > { %12913 = vmatmul.mubr.msk.bf16.gmra.mrb[12].mxu1 %vm6351_vm8, %v11869_v59  ;;  %v8967_v59 = vrot.slane %v16767_v12, 5 }
 0x3f3   : > { %12918 = vmatprep.mubr.msk.bf16.mxu1 %vm6351_vm8, %v13889_v35  ;;  %v8971_v35 = vrot.slane %v16773_v54, 5 }
 0x3f4   : > { %v16821_v9 = vsel %vm14683_vm2, %v8966_v37, %v8967_v59  ;;  %v16837_v37 = vld [vmem:[#allocation3 + $0x70] sm:$0xf] }
 0x3f5   : > { %18347 = vst [vmem:[#allocation29_spill] sm:$0xff] %v16821_v9  ;;  %v8973_v14 = vrot.slane %v8971_v35, 4  ;;  %v16841_v59 = vsel %vm14683_vm2, %v11956_v41, %v8971_v35  ;;  %v16861_v41 = vsel %vm14683_vm2, %v8980_v7, %v8981_v62  ;;  %v16870_v35 = vld [vmem:[#allocation3 + $0x80] sm:$0x1]  ;;  %v8995_v62 = vrot.slane %v16835_v3, 5 }
 0x3f6   : > { %18350 = vst [vmem:[#allocation32_spill] sm:$0xff] %v16841_v59  ;;  %18353 = vst [vmem:[#allocation8_spill] sm:$0xff] %v16861_v41  ;;  %v16958_v59 = vld [vmem:[#allocation3 + $0xb8] sm:$0xf] }
 0x3fa   : > { %12919 = vmatmul.mubr.msk.bf16.vlgmr.msra.gmra.mrb[16].mxu1 %vm6351_vm8, %v13890_v0  ;;  %v8882_v0 = vld [vmem:[#allocation3 + $0x48] sm:$0xe] }
 0x3fb   : > { %12951 = vmatpush3.bf16.msra.mxu1 %v8682_v21  ;;  %12922 = vmatprep.mubr.msk.bf16.mxu1 %vm6351_vm8, %v13891_v31  ;;  %v16801_v31 = vrot.slane %v8216_v50, 4  ;;  %v11957_v10 = vrot.slane %v8882_v0, 9  ;;  %v16830_v50 = vrot.slane %v8257_v58, 5 }
 0x3fc   : > { %13811 = vmatprep.subr.msk.bf16.mxu1 %vm6400_vm7, %v16726_v39 }
 0x3fd   : > { %v16849_v58 = vsel %vm14683_vm2, %v11957_v10, %v8978_v60  ;;  %v8885_v60 = vld [vmem:[#allocation3 + $0x6c] sm:$0xe]  ;;  %v16865_v10 = vld [vmem:[#allocation3 + $0x74] sm:$0x1] }
 0x3fe   : > { %18352 = vst [vmem:[#allocation4_spill] sm:$0xff] %v16849_v58 }
 0x3ff   : > { %v16734_v46 = vpop.f32.mrb[32].mxu0 }
 0x400   : > { %18337 = vst [vmem:[#allocation19_spill] sm:$0xff] %v16734_v46  ;;  %v16736_v48 = vpop.f32.mrb[33].mxu0  ;;  %v16893_v46 = vld [vmem:[#allocation3 + $0x94] sm:$0xf] }
 0x401   : > { %18338 = vst [vmem:[#allocation20_spill] sm:$0xff] %v16736_v48  ;;  %v16741_v6 = vpop.f32.mrb[34].mxu0  ;;  %v16891_v48 = vld [vmem:[#allocation3 + $0x8c] sm:$0x1] }
 0x402   : > { %12923 = vmatmul.mubr.msk.bf16.gmra.mrb[20].mxu1 %vm6351_vm8, %v13892_v17  ;;  %18339 = vst [vmem:[#allocation21_spill] sm:$0xff] %v16741_v6  ;;  %v16748_v23 = vpop.f32.mrb[35].mxu0  ;;  %v16906_v6 = vld [vmem:[#allocation3 + $0x98] sm:$0x1] }
 0x403   : > { %12926 = vmatprep.mubr.msk.bf16.mxu1 %vm6351_vm8, %v13893_v30  ;;  %18342 = vst [vmem:[#allocation24_spill] sm:$0xff] %v16748_v23  ;;  %v16811_v30 = vld [vmem:[#allocation3 + $0x5c] sm:$0x1]  ;;  %v8887_v23 = vld [vmem:[#allocation3 + $0x84] sm:$0xe] }
 0x404   : > { %v8988_v20 = vrot.slane %v16811_v30, 5 }
 0x40a   : > { %12927 = vmatmul.mubr.msk.bf16.gmra.mrb[24].mxu1 %vm6351_vm8, %v13894_v32  ;;  %v8974_v32 = vrot.slane %v16781_v53, 5 }
 0x40b   : > { %12930 = vmatprep.mubr.msk.bf16.mxu1 %vm6351_vm8, %v13895_v4 }
 0x40c   : > { %v16799_v21 = vpop.f32.mrb[36].mxu0  ;;  %v16845_v0 = vsel %vm14683_vm2, %v8973_v14, %v8974_v32  ;;  %v11958_v14 = vrot.slane %v8883_v52, 9  ;;  %v8992_v32 = vrot.slane %v16813_v2, 5 }
 0x40d   : > { %18344 = vst [vmem:[#allocation26_spill] sm:$0xff] %v16799_v21  ;;  %v16807_v17 = vpop.f32.mrb[37].mxu0  ;;  %18351 = vst [vmem:[#allocation33_spill] sm:$0xff] %v16845_v0  ;;  %v16950_v0 = vld [vmem:[#allocation3 + $0xb0] sm:$0x1] }
 0x40e   : > { %18345 = vst [vmem:[#allocation27_spill] sm:$0xff] %v16807_v17  ;;  %v16823_v63 = vpop.f32.mrb[38].mxu0  ;;  %v16874_v7 = vsel %vm14683_vm2, %v11958_v14, %v8985_v47  ;;  %v8994_v52 = vrot.slane %v8992_v32, 4  ;;  %v16886_v5 = vsel %vm14683_vm2, %v11959_v29, %v8992_v32  ;;  %v8886_v17 = vld [vmem:[#allocation3 + $0x78] sm:$0xe]  ;;  %v9006_v47 = vrot.slane %v16855_v45, 5 }
 0x40f   : > { %18348 = vst [vmem:[#allocation30_spill] sm:$0xff] %v16823_v63  ;;  %v16828_v4 = vpop.f32.mrb[39].mxu0  ;;  %18354 = vst [vmem:[#allocation7_spill] sm:$0xff] %v16874_v7  ;;  %v11960_v63 = vrot.slane %v8885_v60, 9  ;;  %v13898_v14 = vld [vmem:[#allocation3 + $0x78] sm:$0xff]   ;;  %v11961_v60 = vrot.slane %v8886_v17, 9 }
 0x410   : > { %18349 = vst [vmem:[#allocation31_spill] sm:$0xff] %v16828_v4  ;;  %v16878_v4 = vld [vmem:[#allocation3 + $0x88] sm:$0xf]  ;;  %18356 = vst [vmem:[#allocation11_spill] sm:$0xff] %v16886_v5  ;;  %v9008_v41 = vrot.slane %v9006_v47, 4 }
 0x411   : > { %v16925_v5 = vld [vmem:[#allocation3 + $0xa0] sm:$0xf]  ;;  %v16935_v17 = vsel %vm14683_vm2, %v11961_v60, %v9006_v47  ;;  %v16948_v60 = vld [vmem:[#allocation3 + $0x3c] sm:$0xf]  ;;  %18367 = vst [vmem:[#allocation37_spill] sm:$0xff] %v16950_v0 }
 0x412   : > { %12931 = vmatmul.mubr.msk.bf16.gmra.mrb[28].mxu1 %vm6351_vm8, %v13896_v19  ;;  %v16882_v19 = vsel %vm14683_vm2, %v8987_v51, %v8988_v20  ;;  %v16899_v51 = vsel %vm14683_vm2, %v8994_v52, %v8995_v62  ;;  %v9002_v20 = vrot.slane %v16865_v10, 5  ;;  %18364 = vst [vmem:[#allocation34_spill] sm:$0xff] %v16935_v17  ;;  %v8890_v17 = vld [vmem:[#allocation3 + $0xa8] sm:$0xe]  ;;  %v8296_v57 = vshrl.u32 %v16948_v60, 16 }
 0x413   : > { %12934 = vmatprep.mubr.msk.bf16.mxu1 %vm6351_vm8, %v13897_v61  ;;  %v8999_v61 = vrot.slane %v16837_v37, 5  ;;  %18355 = vst [vmem:[#allocation5_spill] sm:$0xff] %v16882_v19  ;;  %18358 = vst [vmem:[#allocation12_spill] sm:$0xff] %v16899_v51  ;;  %v13899_v19 = vld [vmem:[#allocation3 + $0x84] sm:$0xff]   ;;  %v8285_v51 = vshrl.u32 %v16763_v25, 16  ;;  %v11962_v25 = vrot.slane %v8887_v23, 9 }
 0x415   : > { %v9001_v29 = vrot.slane %v8999_v61, 4  ;;  %v16914_v52 = vsel %vm14683_vm2, %v11960_v63, %v8999_v61  ;;  %v9013_v61 = vrot.slane %v16878_v4, 5  ;;  %v16943_v63 = vld [vmem:[#allocation3 + $0xa4] sm:$0x1]  ;;  %v16986_v44 = vrot.slane %v8285_v51, 4 }
 0x416   : > { %v16889_v21 = vpop.f32.mrb[40].mxu0  ;;  %18361 = vst [vmem:[#allocation14_spill] sm:$0xff] %v16914_v52  ;;  %18366 = vst [vmem:[#allocation36_spill] sm:$0xff] %v16943_v63  ;;  %v9016_v52 = vrot.slane %v16891_v48, 5  ;;  %v9037_v51 = vrot.slane %v16950_v0, 5  ;;  %v18379_v0 = vshrl.u32 %v16853_v8, 16 }
 0x417   : > { %18357 = vst [vmem:[#allocation9_spill] sm:$0xff] %v16889_v21  ;;  %v16902_v32 = vpop.f32.mrb[41].mxu0  ;;  %v16918_v62 = vsel %vm14683_vm2, %v9001_v29, %v9002_v20  ;;  %v9009_v21 = vrot.slane %v16870_v35, 5  ;;  %v16931_v29 = vld [vmem:[#allocation3 + $0xac] sm:$0xf]  ;;  %v16954_v23 = vsel %vm14683_vm2, %v11962_v25, %v9013_v61  ;;  %v13900_v25 = vld [vmem:[#allocation3 + $0x90] sm:$0xff]  }
 0x418   : > { %18359 = vst [vmem:[#allocation10_spill] sm:$0xff] %v16902_v32  ;;  %v16910_v7 = vpop.f32.mrb[42].mxu0  ;;  %18362 = vst [vmem:[#allocation15_spill] sm:$0xff] %v16918_v62  ;;  %v8888_v32 = vld [vmem:[#allocation3 + $0x90] sm:$0xe]  ;;  %v9015_v62 = vrot.slane %v9013_v61, 4 }
 0x419   : > { %18360 = vst [vmem:[#allocation13_spill] sm:$0xff] %v16910_v7  ;;  %v16921_v58 = vpop.f32.mrb[43].mxu0  ;;  %v16939_v20 = vsel %vm14683_vm2, %v9008_v41, %v9009_v21  ;;  %v8889_v7 = vld [vmem:[#allocation3 + $0x9c] sm:$0xe]  ;;  %v11963_v47 = vrot.slane %v8888_v32, 9  ;;  %18368 = vst [vmem:[#allocation38_spill] sm:$0xff] %v16954_v23 }
 0x41a   : > { %18363 = vst [vmem:[#allocation6_spill] sm:$0xff] %v16921_v58  ;;  %12935 = vmatmul.mubr.msk.bf16.gmra.mrb[0].mxu1 %vm6351_vm8, %v13898_v14  ;;  %18365 = vst [vmem:[#allocation35_spill] sm:$0xff] %v16939_v20  ;;  %v9020_v58 = vrot.slane %v16893_v46, 5  ;;  %v9023_v41 = vrot.slane %v16906_v6, 5  ;;  %v16962_v14 = vsel %vm14683_vm2, %v9015_v62, %v9016_v52  ;;  %v11964_v20 = vrot.slane %v8889_v7, 9 }
 0x41b   : > { %12938 = vmatprep.mubr.msk.bf16.mxu1 %vm6351_vm8, %v13899_v19  ;;  %v9027_v19 = vrot.slane %v16925_v5, 5  ;;  %18369 = vst [vmem:[#allocation39_spill] sm:$0xff] %v16962_v14  ;;  %v9034_v61 = vrot.slane %v16931_v29, 5  ;;  %v9030_v7 = vrot.slane %v16943_v63, 5  ;;  %v8274_v63 = vrot.slane %v18379_v0, 4 }
 0x41c   : > { %v9022_v21 = vrot.slane %v9020_v58, 4  ;;  %v16966_v32 = vsel %vm14683_vm2, %v11963_v47, %v9020_v58  ;;  %v16984_v47 = vrot.slane %v8281_v49, 5  ;;  %v11965_v49 = vrot.slane %v8890_v17, 9 }
 0x41d   : > { %18370 = vst [vmem:[#allocation40_spill] sm:$0xff] %v16966_v32  ;;  %v9029_v58 = vrot.slane %v9027_v19, 4  ;;  %v9036_v27 = vrot.slane %v9034_v61, 4 }
 0x41e   : > { %v16979_v52 = vsel %vm14683_vm2, %v9022_v21, %v9023_v41  ;;  %v16996_v21 = vsel %vm14683_vm2, %v11964_v20, %v9027_v19  ;;  %v9041_v20 = vrot.slane %v16958_v59, 5  ;;  %v8892_v19 = vld [vmem:[#allocation3 + $0xc0] sm:$0xe]  ;;  %v17014_v17 = vsel %vm14683_vm2, %v11965_v49, %v9034_v61 }
 0x41f   : > { %v16969_v9 = vpop.f32.mrb[44].mxu0  ;;  %18372 = vst [vmem:[#allocation42_spill] sm:$0xff] %v16979_v52  ;;  %18375 = vst [vmem:[#allocation45_spill] sm:$0xff] %v16996_v21  ;;  %v17000_v41 = vsel %vm14683_vm2, %v9029_v58, %v9030_v7  ;;  %v8299_v52 = vshll.u32 %v16948_v60, 16  ;;  %v8305_v58 = vshll.u32 %v16773_v54, 16  ;;  %v17018_v7 = vsel %vm14683_vm2, %v9036_v27, %v9037_v51 }
 0x420   : > { %18371 = vst [vmem:[#allocation41_spill] sm:$0xff] %v16969_v9  ;;  %v16982_v62 = vpop.f32.mrb[45].mxu0  ;;  %v16988_v9 = vld [vmem:[#allocation3 + $0xc8] sm:$0x1]  ;;  %18376 = vst [vmem:[#allocation46_spill] sm:$0xff] %v17000_v41  ;;  %v9048_v60 = vrot.slane %v16973_v16, 5 }
 0x421   : > { %18373 = vst [vmem:[#allocation43_spill] sm:$0xff] %v16982_v62  ;;  %v16992_v14 = vpop.f32.mrb[46].mxu0  ;;  %v8891_v62 = vld [vmem:[#allocation3 + $0xb4] sm:$0xe]  ;;  %v9043_v41 = vrot.slane %v9041_v20, 4  ;;  %v8309_v21 = vshrl.u32 %v16773_v54, 16 }
 0x422   : > { %18374 = vst [vmem:[#allocation44_spill] sm:$0xff] %v16992_v14  ;;  %v17003_v23 = vpop.f32.mrb[47].mxu0  ;;  %12939 = vmatmul.mubr.msk.bf16.gmra.mrb[4].mxu1 %vm6351_vm8, %v13900_v25  ;;  %v9044_v25 = vrot.slane %v16971_v36, 5  ;;  %v11967_v32 = vrot.slane %v8892_v19, 9  ;;  %v9050_v61 = vrot.slane %v9048_v60, 4  ;;  %v9051_v49 = vrot.slane %v16988_v9, 5 }
 0x423   : > { %18377 = vst [vmem:[#allocation47_spill] sm:$0xff] %v17003_v23  ;;  %12942 = vmatprep.mubr.msk.bf16.mxu1 %vm6351_vm8, %v13901_v43  ;;  %v11966_v23 = vrot.slane %v8891_v62, 9  ;;  %v18378_v27 = vshll.u32 %v16755_v26, 16  ;;  %v17039_v14 = vld [vmem:[#allocation3 + $0x2c] sm:$0x1]  ;;  %v18382_v54 = vshll.u32 %v16853_v8, 16  ;;  %v8288_v8 = vor.u32 %v16986_v44, %v16984_v47 }
 0x424   : > { %v17037_v62 = vsel %vm14683_vm2, %v9043_v41, %v9044_v25  ;;  %v17051_v0 = vsel %vm14683_vm2, %v9050_v61, %v9051_v49  ;;  %v8301_v26 = vrot.slane %v8299_v52, 5  ;;  %v8311_v61 = vrot.slane %v8309_v21, 4 }
 0x425   : > { %v8253_v51 = vrot.slane %v18378_v27, 5  ;;  %v17033_v43 = vsel %vm14683_vm2, %v11966_v23, %v9041_v20  ;;  %18381 = vst [vmem:[#allocation49_spill] sm:$0xff] %v17037_v62  ;;  %v8277_v19 = vrot.slane %v18382_v54, 5  ;;  %v17047_v27 = vsel %vm14683_vm2, %v11967_v32, %v9048_v60  ;;  %v13902_v54 = vld [vmem:[#allocation3 + $0xa8] sm:$0xff]   ;;  %v13903_v32 = vld [vmem:[#allocation3 + $0xb4] sm:$0xff]  }
 0x426   : > { %18380 = vst [vmem:[#allocation48_spill] sm:$0xff] %v17033_v43  ;;  %v18383_v23 = vor.u32 %v16778_v18, %v16776_v28  ;;  %v8264_v20 = vor.u32 %v16832_v40, %v16830_v50  ;;  %v8298_v60 = vrot.slane %v8296_v57, 4  ;;  %v17062_v62 = vrot.slane %v8305_v58, 5  ;;  %v8166_v43 = vld [vmem:[#allocation3 + $0x48] sm:$0xf] }
 0x427   : > { %v18384_v49 = vshll.u32 %v16757_v38, 16  ;;  %v8267_v40 = vshll.u32 %v17039_v14, 16  ;;  %v8291_v44 = vshll.u32 %v16767_v12, 16  ;;  %v8212_v57 = vsel %vm14292_vm13, %v16787_v15, %v16750_v42 }
 0x428   : > { %v8241_v41 = vrot.slane %v18383_v23, 4  ;;  %v17068_v23 = vsel %vm6400_vm7, %v16726_v39, 0  ;;  %v18385_v52 = vor.u32 %v16761_v24, %v16759_v13  ;;  %v8254_v58 = vor.u32 %v8253_v51, %v16803_v1 }
 0x429   : > { %v8245_v18 = vrot.slane %v18384_v49, 5  ;;  %v8278_v39 = vor.u32 %v8277_v19, %v8274_v63  ;;  %v8222_v12 = vsel %vm14292_vm13, %v16801_v31, %v16770_v55  ;;  %v8265_v49 = vrot.slane %v8264_v20, 4  ;;  %v8169_v20 = vld [vmem:[#allocation3 + $0x54] sm:$0xf] }
 0x42a   : > { %12943 = vmatmul.mubr.msk.bf16.gmra.mrb[8].mxu1 %vm6351_vm8, %v13902_v54  ;;  %v8231_v21 = vrot.slane %v18385_v52, 4  ;;  %v8289_v25 = vrot.slane %v8288_v8, 4  ;;  %v8302_v42 = vor.u32 %v8301_v26, %v8298_v60  ;;  %v8312_v15 = vor.u32 %v8311_v61, %v17062_v62  ;;  %v13904_v60 = vld [vmem:[#allocation3 + $0xc0] sm:$0xff]  }
 0x42b   : > { %12946 = vmatprep.mubr.msk.bf16.mxu1 %vm6351_vm8, %v13903_v32  ;;  %v8246_v54 = vsel %vm14292_vm13, %v8241_v41, %v8245_v18  ;;  %v8320_v13 = vshrl.u32 %v8166_v43, 16  ;;  %v8323_v24 = vshll.u32 %v8166_v43, 16  ;;  %v8269_v52 = vrot.slane %v8267_v40, 5 }
 0x42c   : > { %v8293_v1 = vrot.slane %v8291_v44, 5  ;;  %v8329_v63 = vshll.u32 %v16783_v22, 16  ;;  %v8333_v51 = vshrl.u32 %v16783_v22, 16  ;;  %v11920_v19 = vcombine.low %v8212_v57, %v8222_v12 }
 0x42d   : > { %v8236_v55 = vsel %vm14292_vm13, %v8231_v21, %v16776_v28  ;;  %v8255_v31 = vrot.slane %v8254_v58, 4  ;;  %v8279_v41 = vrot.slane %v8278_v39, 4  ;;  %v8270_v26 = vsel %vm14292_vm13, %v8265_v49, %v8269_v52 }
 0x42e   : > { %v11921_v8 = vcombine.low %v8236_v55, %v8246_v54  ;;  %v8294_v43 = vsel %vm14292_vm13, %v8289_v25, %v8293_v1  ;;  %v8315_v32 = vshll.u32 %v16781_v53, 16  ;;  %v8303_v61 = vrot.slane %v8302_v42, 4  ;;  %v8172_v42 = vld [vmem:[#allocation3 + $0x60] sm:$0xf] }
 0x42f   : > { %v8313_v22 = vrot.slane %v8312_v15, 4  ;;  %v8322_v18 = vrot.slane %v8320_v13, 4  ;;  %v8325_v40 = vrot.slane %v8323_v24, 5  ;;  %v17099_v44 = vrot.slane %v8329_v63, 5  ;;  %v8175_v63 = vld [vmem:[#allocation3 + $0x6c] sm:$0xf] }
 0x430   : > { %v8335_v28 = vrot.slane %v8333_v51, 4  ;;  %v8339_v57 = vshll.u32 %v16793_v33, 16  ;;  %v8344_v21 = vshrl.u32 %v8169_v20, 16  ;;  %v8260_v58 = vsel %vm14292_vm13, %v8255_v31, %v16830_v50 }
 0x431   : > { %v8284_v53 = vsel %vm14292_vm13, %v8279_v41, %v16984_v47  ;;  %v8353_v25 = vshll.u32 %v16795_v56, 16  ;;  %v8357_v39 = vshrl.u32 %v16795_v56, 16  ;;  %v11922_v12 = vcombine.low %v8260_v58, %v8270_v26 }
 0x432   : > { %12947 = vmatmul.mubr.msk.bf16.gmra.mrb[12].mxu1 %vm6351_vm8, %v13904_v60  ;;  %v17112_v54 = vcombine.low %v8284_v53, %v8294_v43  ;;  %v8317_v33 = vrot.slane %v8315_v32, 5  ;;  %v8347_v49 = vshll.u32 %v8169_v20, 16  ;;  %v8308_v50 = vsel %vm14292_vm13, %v8303_v61, %v17062_v62  ;;  %v8178_v62 = vld [vmem:[#allocation3 + $0x78] sm:$0xf]  ;;  %v8181_v53 = vld [vmem:[#allocation3 + $0x84] sm:$0xf] }
 0x433   : > { %12952 = vmatprep.mubr.msk.bf16.mxu1 %vm6351_vm8, %v11920_v19  ;;  %v8326_v15 = vor.u32 %v8325_v40, %v8322_v18  ;;  %v8377_v13 = vshll.u32 %v16813_v2, 16  ;;  %v8381_v47 = vshrl.u32 %v16813_v2, 16  ;;  %v8336_v24 = vor.u32 %v8335_v28, %v17099_v44 }
 0x434   : > { %v8318_v56 = vsel %vm14292_vm13, %v8313_v22, %v8317_v33  ;;  %v17122_v52 = vrot.slane %v8339_v57, 5  ;;  %v8346_v1 = vrot.slane %v8344_v21, 4  ;;  %v17124_v51 = vrot.slane %v8353_v25, 5  ;;  %v17135_v57 = vld [vmem:[%s18089_s3 + $0x18] sm:$0xf] }
 0x435   : > { %v8359_v19 = vrot.slane %v8357_v39, 4  ;;  %v8368_v55 = vshrl.u32 %v8172_v42, 16  ;;  %v8371_v31 = vshll.u32 %v8172_v42, 16  ;;  %v8401_v41 = vshll.u32 %v16837_v37, 16 }
 0x436   : > { %v8405_v20 = vshrl.u32 %v16837_v37, 16  ;;  %v8425_v2 = vshll.u32 %v16855_v45, 16  ;;  %v8429_v26 = vshrl.u32 %v16855_v45, 16  ;;  %v17130_v43 = vrot.slane %v8377_v13, 5 }
 0x437   : > { %v8383_v32 = vrot.slane %v8381_v47, 4  ;;  %v8392_v60 = vshrl.u32 %v8175_v63, 16  ;;  %v8395_v61 = vshll.u32 %v8175_v63, 16  ;;  %v11924_v22 = vcombine.low %v8308_v50, %v8318_v56 }
 0x438   : > { %v8349_v18 = vrot.slane %v8347_v49, 5  ;;  %v8416_v40 = vshrl.u32 %v8178_v62, 16  ;;  %v8419_v28 = vshll.u32 %v8178_v62, 16  ;;  %v8327_v37 = vrot.slane %v8326_v15, 4 }
 0x439   : > { %v8337_v21 = vrot.slane %v8336_v24, 4  ;;  %v8370_v58 = vrot.slane %v8368_v55, 4  ;;  %v8373_v45 = vrot.slane %v8371_v31, 5  ;;  %v17140_v25 = vrot.slane %v8401_v41, 5 }
 0x43a   : > { %12953 = vmatmul.mubr.msk.bf16.vlgmr.msra.gmra.mrb[16].mxu1 %vm6351_vm8, %v11921_v8  ;;  %v8407_v39 = vrot.slane %v8405_v20, 4  ;;  %v17142_v33 = vrot.slane %v8425_v2, 5  ;;  %v8431_v49 = vrot.slane %v8429_v26, 4  ;;  %v8360_v42 = vor.u32 %v8359_v19, %v17124_v51 }
 0x43b   : > { %12985 = vmatpush3.bf16.msra.mxu1 %v17068_v23  ;;  %12956 = vmatprep.mubr.msk.bf16.mxu1 %vm6351_vm8, %v11922_v12  ;;  %v8384_v50 = vor.u32 %v8383_v32, %v17130_v43  ;;  %v8394_v8 = vrot.slane %v8392_v60, 4  ;;  %v8397_v15 = vrot.slane %v8395_v61, 5  ;;  %v8418_v13 = vrot.slane %v8416_v40, 4 }
 0x43c   : > { %13812 = vmatprep.subr.msk.bf16.mxu1 %vm6400_vm7, %v17135_v57  ;;  %v8421_v47 = vrot.slane %v8419_v28, 5  ;;  %v8440_v23 = vshrl.u32 %v8181_v53, 16  ;;  %v8443_v56 = vshll.u32 %v8181_v53, 16  ;;  %v8350_v12 = vor.u32 %v8349_v18, %v8346_v1 }
 0x43d   : > { %v8363_v24 = vshll.u32 %v16811_v30, 16  ;;  %v8374_v63 = vor.u32 %v8373_v45, %v8370_v58  ;;  %v8387_v55 = vshll.u32 %v16835_v3, 16  ;;  %v8332_v19 = vsel %vm14292_vm13, %v8327_v37, %v17099_v44 }
 0x43e   : > { %v8342_v31 = vsel %vm14292_vm13, %v8337_v21, %v17122_v52  ;;  %v8408_v62 = vor.u32 %v8407_v39, %v17140_v25  ;;  %v8432_v41 = vor.u32 %v8431_v49, %v17142_v33  ;;  %v8361_v20 = vrot.slane %v8360_v42, 4  ;;  %v8184_v21 = vld [vmem:[#allocation3 + $0x90] sm:$0xf] }
 0x43f   : > { %v8385_v2 = vrot.slane %v8384_v50, 4  ;;  %v8398_v1 = vor.u32 %v8397_v15, %v8394_v8  ;;  %v8411_v30 = vshll.u32 %v16865_v10, 16  ;;  %v8422_v26 = vor.u32 %v8421_v47, %v8418_v13 }
 0x440   : > { %v8435_v3 = vshll.u32 %v16870_v35, 16  ;;  %v8442_v32 = vrot.slane %v8440_v23, 4  ;;  %v8445_v60 = vrot.slane %v8443_v56, 5  ;;  %v8351_v44 = vrot.slane %v8350_v12, 4 }
 0x441   : > { %v8365_v61 = vrot.slane %v8363_v24, 5  ;;  %v8375_v52 = vrot.slane %v8374_v63, 4  ;;  %v8389_v18 = vrot.slane %v8387_v55, 5  ;;  %v8409_v40 = vrot.slane %v8408_v62, 4  ;;  %v8187_v63 = vld [vmem:[#allocation3 + $0x9c] sm:$0xf] }
 0x442   : > { %12957 = vmatmul.mubr.msk.bf16.gmra.mrb[20].mxu1 %vm6351_vm8, %v17112_v54  ;;  %v8433_v28 = vrot.slane %v8432_v41, 4  ;;  %v8449_v37 = vshll.u32 %v16878_v4, 16  ;;  %v8453_v10 = vshrl.u32 %v16878_v4, 16  ;;  %v11925_v58 = vcombine.low %v8332_v19, %v8342_v31 }
 0x443   : > { %12960 = vmatprep.mubr.msk.bf16.mxu1 %vm6351_vm8, %v11924_v22  ;;  %v8366_v35 = vsel %vm14292_vm13, %v8361_v20, %v8365_v61  ;;  %v8390_v54 = vsel %vm14292_vm13, %v8385_v2, %v8389_v18  ;;  %v8413_v45 = vrot.slane %v8411_v30, 5  ;;  %v8399_v53 = vrot.slane %v8398_v1, 4  ;;  %v8190_v30 = vld [vmem:[#allocation3 + $0xa8] sm:$0xf]  ;;  %v8193_v18 = vld [vmem:[#allocation3 + $0xb4] sm:$0xf] }
 0x444   : > { %v8423_v39 = vrot.slane %v8422_v26, 4  ;;  %v8437_v49 = vrot.slane %v8435_v3, 5  ;;  %v8446_v42 = vor.u32 %v8445_v60, %v8442_v32  ;;  %v8356_v22 = vsel %vm14292_vm13, %v8351_v44, %v17124_v51 }
 0x445   : > { %v8380_v4 = vsel %vm14292_vm13, %v8375_v52, %v17130_v43  ;;  %v8459_v50 = vshll.u32 %v16891_v48, 16  ;;  %v8464_v8 = vshrl.u32 %v8184_v21, 16  ;;  %v8414_v15 = vsel %vm14292_vm13, %v8409_v40, %v8413_v45 }
 0x446   : > { %v8438_v13 = vsel %vm14292_vm13, %v8433_v28, %v8437_v49  ;;  %v17180_v47 = vrot.slane %v8449_v37, 5  ;;  %v8455_v23 = vrot.slane %v8453_v10, 4  ;;  %v11926_v56 = vcombine.low %v8356_v22, %v8366_v35  ;;  %v8196_v10 = vld [vmem:[#allocation3 + $0xc0] sm:$0xf] }
 0x447   : > { %v11927_v12 = vcombine.low %v8380_v4, %v8390_v54  ;;  %v8467_v24 = vshll.u32 %v8184_v21, 16  ;;  %v8473_v51 = vshll.u32 %v16893_v46, 16  ;;  %v8404_v48 = vsel %vm14292_vm13, %v8399_v53, %v17140_v25 }
 0x448   : > { %v8428_v43 = vsel %vm14292_vm13, %v8423_v39, %v17142_v33  ;;  %v17189_v55 = vrot.slane %v8446_v42, 4  ;;  %v8477_v19 = vshrl.u32 %v16893_v46, 16  ;;  %v11928_v31 = vcombine.low %v8404_v48, %v8414_v15  ;;  %v18386_v48 = vld [vmem:[#allocation36_spill] sm:$0xff] }
 0x449   : > { %v17193_v62 = vcombine.low %v8428_v43, %v8438_v13  ;;  %v17195_v41 = vrot.slane %v8459_v50, 5  ;;  %v8466_v20 = vrot.slane %v8464_v8, 4  ;;  %v8456_v25 = vor.u32 %v8455_v23, %v17180_v47 }
 0x44a   : > { %12961 = vmatmul.mubr.msk.bf16.gmra.mrb[24].mxu1 %vm6351_vm8, %v11925_v58  ;;  %v8488_v2 = vshrl.u32 %v8187_v63, 16  ;;  %v8497_v1 = vshll.u32 %v16925_v5, 16  ;;  %v8501_v33 = vshrl.u32 %v16925_v5, 16  ;;  %v8469_v26 = vrot.slane %v8467_v24, 5 }
 0x44b   : > { %12964 = vmatprep.mubr.msk.bf16.mxu1 %vm6351_vm8, %v11926_v56  ;;  %v17201_v46 = vrot.slane %v8473_v51, 5  ;;  %v8521_v3 = vshll.u32 %v16931_v29, 16  ;;  %v8525_v32 = vshrl.u32 %v16931_v29, 16  ;;  %v8452_v60 = vsel %vm14292_vm13, %v17189_v55, %v17180_v47 }
 0x44c   : > { %v8479_v44 = vrot.slane %v8477_v19, 4  ;;  %v8483_v61 = vshll.u32 %v16906_v6, 16  ;;  %v8491_v52 = vshll.u32 %v8187_v63, 16  ;;  %v8512_v40 = vshrl.u32 %v8190_v30, 16 }
 0x44d   : > { %v8515_v5 = vshll.u32 %v8190_v30, 16  ;;  %v8545_v28 = vshll.u32 %v16958_v59, 16  ;;  %v8549_v37 = vshrl.u32 %v16958_v59, 16  ;;  %v8457_v21 = vrot.slane %v8456_v25, 4  ;;  %v18387_v25 = vld [vmem:[#allocation37_spill] sm:$0xff] }
 0x44e   : > { %v8490_v58 = vrot.slane %v8488_v2, 4  ;;  %v17212_v29 = vrot.slane %v8497_v1, 5  ;;  %v8503_v35 = vrot.slane %v8501_v33, 4  ;;  %v17214_v54 = vrot.slane %v8521_v3, 5 }
 0x44f   : > { %v8527_v45 = vrot.slane %v8525_v32, 4  ;;  %v8536_v53 = vshrl.u32 %v8193_v18, 16  ;;  %v8539_v39 = vshll.u32 %v8193_v18, 16  ;;  %v8480_v6 = vor.u32 %v8479_v44, %v17201_v46 }
 0x450   : > { %v8493_v49 = vrot.slane %v8491_v52, 5  ;;  %v8560_v42 = vshrl.u32 %v8196_v10, 16  ;;  %v8563_v22 = vshll.u32 %v8196_v10, 16  ;;  %v8514_v4 = vrot.slane %v8512_v40, 4 }
 0x451   : > { %v8517_v59 = vrot.slane %v8515_v5, 5  ;;  %v17218_v50 = vrot.slane %v8545_v28, 5  ;;  %v8551_v8 = vrot.slane %v8549_v37, 4  ;;  %v8470_v15 = vor.u32 %v8469_v26, %v8466_v20 }
 0x452   : > { %12965 = vmatmul.mubr.msk.bf16.gmra.mrb[28].mxu1 %vm6351_vm8, %v11927_v12  ;;  %v8504_v13 = vor.u32 %v8503_v35, %v17212_v29  ;;  %v8569_v47 = vshll.u32 %v16973_v16, 16  ;;  %v8573_v23 = vshrl.u32 %v16973_v16, 16  ;;  %v8462_v56 = vsel %vm14292_vm13, %v8457_v21, %v17195_v41 }
 0x453   : > { %12968 = vmatprep.mubr.msk.bf16.mxu1 %vm6351_vm8, %v11928_v31  ;;  %v8528_v12 = vor.u32 %v8527_v45, %v17214_v54  ;;  %v8538_v24 = vrot.slane %v8536_v53, 4  ;;  %v8541_v51 = vrot.slane %v8539_v39, 5  ;;  %v8494_v63 = vor.u32 %v8493_v49, %v8490_v58  ;;  %v18388_v58 = vld [vmem:[#allocation17_spill] sm:$0xff]  ;;  %v18389_v53 = vld [vmem:[#allocation23_spill] sm:$0xff] }
 0x454   : > { %v8507_v43 = vshll.u32 %v18386_v48, 16  ;;  %v8562_v55 = vrot.slane %v8560_v42, 4  ;;  %v8565_v19 = vrot.slane %v8563_v22, 5  ;;  %v8481_v31 = vrot.slane %v8480_v6, 4  ;;  %v18390_v6 = vld [vmem:[#allocation25_spill] sm:$0xff] }
 0x455   : > { %v8518_v20 = vor.u32 %v8517_v59, %v8514_v4  ;;  %v8531_v2 = vshll.u32 %v18387_v25, 16  ;;  %v8552_v1 = vor.u32 %v8551_v8, %v17218_v50  ;;  %v8505_v16 = vrot.slane %v8504_v13, 4  ;;  %v8877_v59 = vld [vmem:[#allocation3 + $0xc] sm:$0xe]  ;;  %v17270_v25 = vld [vmem:[#allocation3 + $0x20] sm:$0x1] }
 0x456   : > { %v8555_v33 = vshll.u32 %v16971_v36, 16  ;;  %v17232_v30 = vrot.slane %v8569_v47, 5  ;;  %v8575_v41 = vrot.slane %v8573_v23, 4  ;;  %v8471_v26 = vrot.slane %v8470_v15, 4 }
 0x457   : > { %v8485_v3 = vrot.slane %v8483_v61, 5  ;;  %v8529_v32 = vrot.slane %v8528_v12, 4  ;;  %v8542_v44 = vor.u32 %v8541_v51, %v8538_v24  ;;  %v11930_v52 = vcombine.low %v8452_v60, %v8462_v56  ;;  %v8878_v24 = vld [vmem:[#allocation3 + $0x18] sm:$0xe] }
 0x458   : > { %v8495_v18 = vrot.slane %v8494_v63, 4  ;;  %v8509_v40 = vrot.slane %v8507_v43, 5  ;;  %v8566_v5 = vor.u32 %v8565_v19, %v8562_v55  ;;  %v8519_v37 = vrot.slane %v8518_v20, 4  ;;  %v17264_v43 = vld [vmem:[#allocation3 + $0x1c] sm:$0xf] }
 0x459   : > { %v8486_v28 = vsel %vm14292_vm13, %v8481_v31, %v8485_v3  ;;  %v8533_v10 = vrot.slane %v8531_v2, 5  ;;  %v8553_v36 = vrot.slane %v8552_v1, 4  ;;  %v8557_v21 = vrot.slane %v8555_v33, 5  ;;  %v18391_v31 = vld [vmem:[#allocation22_spill] sm:$0xff] }
 0x45a   : > { %12969 = vmatmul.mubr.msk.bf16.gmra.mrb[0].mxu1 %vm6351_vm8, %v17193_v62  ;;  %v8510_v61 = vsel %vm14292_vm13, %v8505_v16, %v8509_v40  ;;  %v8576_v60 = vor.u32 %v8575_v41, %v17232_v30  ;;  %v8943_v35 = vrot.slane %v18388_v58, 5  ;;  %v8543_v62 = vrot.slane %v8542_v44, 4  ;;  %v17272_v2 = vld [vmem:[#allocation3 + $0x28] sm:$0xf]  ;;  %v10432_v41 = vld [vmem:[#allocation3 + $0x18] sm:$0xe] }
 0x45b   : > { %12972 = vmatprep.mubr.msk.bf16.mxu1 %vm6351_vm8, %v11930_v52  ;;  %v8534_v45 = vsel %vm14292_vm13, %v8529_v32, %v8533_v10  ;;  %v8950_v39 = vrot.slane %v18389_v53, 5  ;;  %v8957_v49 = vrot.slane %v18390_v6, 5  ;;  %v8476_v42 = vsel %vm14292_vm13, %v8471_v26, %v17201_v46  ;;  %v10433_v44 = vld [vmem:[#allocation3 + $0x24] sm:$0xe]  ;;  %v17305_v40 = vld [vmem:[#allocation3 + $0x2c] sm:$0x1] }
 0x45c   : > { %v8567_v22 = vrot.slane %v8566_v5, 4  ;;  %v8579_v4 = vshll.u32 %v16988_v9, 16  ;;  %v11931_v8 = vcombine.low %v8476_v42, %v8486_v28  ;;  %v8500_v15 = vsel %vm14292_vm13, %v8495_v18, %v17212_v29  ;;  %v8879_v9 = vld [vmem:[#allocation3 + $0x24] sm:$0xe]  ;;  %v17309_v5 = vld [vmem:[#allocation3 + $0x38] sm:$0x1] }
 0x45d   : > { %v8524_v13 = vsel %vm14292_vm13, %v8519_v37, %v17214_v54  ;;  %v8558_v47 = vsel %vm14292_vm13, %v8553_v36, %v8557_v21  ;;  %v11932_v23 = vcombine.low %v8500_v15, %v8510_v61  ;;  %v8577_v46 = vrot.slane %v8576_v60, 4  ;;  %v17321_v58 = vld [vmem:[#allocation3 + $0x40] sm:$0xf] }
 0x45e   : > { %v17259_v56 = vcombine.low %v8524_v13, %v8534_v45  ;;  %v8945_v12 = vrot.slane %v8943_v35, 4  ;;  %v8548_v51 = vsel %vm14292_vm13, %v8543_v62, %v17218_v50  ;;  %v11952_v63 = vrot.slane %v8877_v59, 9  ;;  %v10434_v45 = vld [vmem:[#allocation3 + $0x30] sm:$0xe]  ;;  %v17323_v62 = vld [vmem:[#allocation3 + $0x44] sm:$0x1] }
 0x45f   : > { %v8952_v29 = vrot.slane %v8950_v39, 4  ;;  %v8959_v48 = vrot.slane %v8957_v49, 4  ;;  %v11934_v54 = vcombine.low %v8548_v51, %v8558_v47  ;;  %v8572_v55 = vsel %vm14292_vm13, %v8567_v22, %v17232_v30  ;;  %v10435_v22 = vld [vmem:[#allocation3 + $0x3c] sm:$0xe]  ;;  %v17338_v59 = vld [vmem:[#allocation3 + $0x4c] sm:$0xf] }
 0x460   : > { %v8581_v19 = vrot.slane %v8579_v4, 5  ;;  %v8946_v20 = vrot.slane %v18391_v31, 5  ;;  %v17277_v50 = vsel %vm14683_vm2, %v11952_v63, %v8943_v35  ;;  %v11953_v1 = vrot.slane %v8878_v24, 9  ;;  %v17345_v47 = vld [vmem:[#allocation3 + $0x58] sm:$0xf] }
 0x461   : > { %v8953_v16 = vrot.slane %v16757_v38, 5  ;;  %v8960_v33 = vrot.slane %v17039_v14, 5  ;;  %v17290_v3 = vsel %vm6400_vm7, %v17135_v57, 0  ;;  %v10498_v32 = vrot.slane %v17264_v43, 5  ;;  %v17307_v57 = vld [vmem:[#allocation3 + $0x34] sm:$0xf] }
 0x462   : > { %12973 = vmatmul.mubr.msk.bf16.gmra.mrb[4].mxu1 %vm6351_vm8, %v11931_v8  ;;  %v8582_v30 = vsel %vm14292_vm13, %v8577_v46, %v8581_v19  ;;  %v17286_v26 = vsel %vm14683_vm2, %v8945_v12, %v8946_v20  ;;  %v17295_v38 = vsel %vm14683_vm2, %v11953_v1, %v8950_v39  ;;  %v11954_v52 = vrot.slane %v8879_v9, 9  ;;  %v17340_v8 = vld [vmem:[#allocation3 + $0x50] sm:$0x1]  ;;  %v10436_v9 = vld [vmem:[#allocation3 + $0x48] sm:$0xe] }
 0x463   : > { %12976 = vmatprep.mubr.msk.bf16.mxu1 %vm6351_vm8, %v11932_v23  ;;  %v17299_v14 = vsel %vm14683_vm2, %v8952_v29, %v8953_v16  ;;  %v17303_v18 = vsel %vm14683_vm2, %v8959_v48, %v8960_v33  ;;  %v12067_v28 = vrot.slane %v10432_v41, 9  ;;  %v10500_v37 = vrot.slane %v10498_v32, 4  ;;  %v17358_v51 = vld [vmem:[#allocation3 + $0x5c] sm:$0x1]  ;;  %v17360_v63 = vld [vmem:[#allocation3 + $0x64] sm:$0xf] }
 0x464   : > { %v10501_v10 = vrot.slane %v17270_v25, 5  ;;  %v10505_v36 = vrot.slane %v17272_v2, 5  ;;  %v17313_v61 = vcombine.low %v8572_v55, %v8582_v30  ;;  %v11969_v21 = vcombine.low %v17277_v50, %v17286_v26  ;;  %v10437_v31 = vld [vmem:[#allocation3 + $0x54] sm:$0xe]  ;;  %v5642_v20 = vld [vmem:[#allocation3 + $0xcc] sm:$0x1] }
 0x465   : > { %v17319_v60 = vsel %vm14683_vm2, %v11954_v52, %v8957_v49  ;;  %v12068_v35 = vrot.slane %v10433_v44, 9  ;;  %v17327_v53 = vsel %vm14683_vm2, %v12067_v28, %v10498_v32  ;;  %v10508_v42 = vrot.slane %v17305_v40, 5  ;;  %v17374_v32 = vld [vmem:[#allocation3 + $0x68] sm:$0x1]  ;;  %v10438_v28 = vld [vmem:[#allocation3 + $0x60] sm:$0xe] }
 0x466   : > { %v17331_v39 = vsel %vm14683_vm2, %v10500_v37, %v10501_v10  ;;  %v10507_v6 = vrot.slane %v10505_v36, 4  ;;  %v10512_v13 = vrot.slane %v17307_v57, 5  ;;  %v12069_v12 = vrot.slane %v10434_v45, 9  ;;  %v17384_v37 = vld [vmem:[#allocation3 + $0x70] sm:$0xf] }
 0x467   : > { %18392 = vst [vmem:[#allocation36_spill] sm:$0xff] %v17331_v39  ;;  %v17349_v23 = vsel %vm14683_vm2, %v12068_v35, %v10505_v36  ;;  %v10519_v24 = vrot.slane %v17321_v58, 5  ;;  %v10515_v55 = vrot.slane %v17309_v5, 5  ;;  %v12070_v19 = vrot.slane %v10435_v22, 9  ;;  %v17386_v10 = vld [vmem:[#allocation3 + $0x74] sm:$0x1] }
 0x468   : > { %18393 = vst [vmem:[#allocation37_spill] sm:$0xff] %v17349_v23  ;;  %v17353_v46 = vsel %vm14683_vm2, %v10507_v6, %v10508_v42  ;;  %v10514_v48 = vrot.slane %v10512_v13, 4  ;;  %v17368_v1 = vsel %vm14683_vm2, %v12069_v12, %v10512_v13  ;;  %v10522_v16 = vrot.slane %v17323_v62, 5  ;;  %v17395_v42 = vld [vmem:[#allocation3 + $0x7c] sm:$0xf] }
 0x469   : > { %18394 = vst [vmem:[#allocation17_spill] sm:$0xff] %v17353_v46  ;;  %18395 = vst [vmem:[#allocation23_spill] sm:$0xff] %v17368_v1  ;;  %v10526_v33 = vrot.slane %v17338_v59, 5  ;;  %v5643_v30 = vsel %vm15994_vm6, 0, %v5642_v20  ;;  %v12071_v52 = vrot.slane %v10436_v9, 9  ;;  %v10529_v6 = vrot.slane %v17340_v8, 5 }
 0x46a   : > { %12977 = vmatmul.mubr.msk.bf16.gmra.mrb[8].mxu1 %vm6351_vm8, %v17259_v56  ;;  %v10521_v56 = vrot.slane %v10519_v24, 4  ;;  %v17378_v44 = vsel %vm14683_vm2, %v10514_v48, %v10515_v55  ;;  %5644 = vst [vmem:[#allocation3 + $0xcc] sm:$0x1] %v5643_v30  ;;  %v12072_v12 = vrot.slane %v10437_v31, 9  ;;  %v10439_v9 = vld [vmem:[#allocation3 + $0x6c] sm:$0xe] }
 0x46b   : > { %12980 = vmatprep.mubr.msk.bf16.mxu1 %vm6351_vm8, %v11934_v54  ;;  %18397 = vst [vmem:[#allocation25_spill] sm:$0xff] %v17378_v44  ;;  %v17382_v54 = vsel %vm14683_vm2, %v12070_v19, %v10519_v24  ;;  %v10528_v45 = vrot.slane %v10526_v33, 4  ;;  %v17401_v13 = vsel %vm14683_vm2, %v12071_v52, %v10526_v33  ;;  %v10533_v24 = vrot.slane %v17345_v47, 5  ;;  %v17404_v48 = vld [vmem:[#allocation3 + $0x80] sm:$0x1] }
 0x46c   : > { %18398 = vst [vmem:[#allocation22_spill] sm:$0xff] %v17382_v54  ;;  %v17392_v35 = vsel %vm14683_vm2, %v10521_v56, %v10522_v16  ;;  %18400 = vst [vmem:[#allocation50_spill] sm:$0xff] %v17401_v13  ;;  %v10536_v19 = vrot.slane %v17358_v51, 5  ;;  %v12073_v20 = vrot.slane %v10438_v28, 9  ;;  %v10540_v56 = vrot.slane %v17360_v63, 5 }
 0x46d   : > { %18399 = vst [vmem:[#allocation16_spill] sm:$0xff] %v17392_v35  ;;  %v17408_v55 = vsel %vm14683_vm2, %v10528_v45, %v10529_v6  ;;  %v17412_v16 = vld [vmem:[#allocation3 + $0x88] sm:$0xf]  ;;  %v10535_v31 = vrot.slane %v10533_v24, 4  ;;  %v10543_v41 = vrot.slane %v17374_v32, 5  ;;  %v10547_v30 = vrot.slane %v17384_v37, 5 }
 0x46e   : > { %18401 = vst [vmem:[#allocation51_spill] sm:$0xff] %v17408_v55  ;;  %v10440_v52 = vld [vmem:[#allocation3 + $0x78] sm:$0xe]  ;;  %v17418_v22 = vld [vmem:[#allocation3 + $0x8c] sm:$0x1]  ;;  %v17424_v28 = vsel %vm14683_vm2, %v12072_v12, %v10533_v24  ;;  %v17428_v6 = vsel %vm14683_vm2, %v12073_v20, %v10540_v56  ;;  %v10542_v36 = vrot.slane %v10540_v56, 4 }
 0x46f   : > { %v17420_v45 = vld [vmem:[#allocation3 + $0x94] sm:$0xf]  ;;  %18402 = vst [vmem:[#allocation52_spill] sm:$0xff] %v17424_v28  ;;  %18403 = vst [vmem:[#allocation53_spill] sm:$0xff] %v17428_v6  ;;  %v12074_v33 = vrot.slane %v10439_v9, 9  ;;  %v17434_v29 = vsel %vm14683_vm2, %v10535_v31, %v10536_v19  ;;  %v10549_v15 = vrot.slane %v10547_v30, 4 }
 0x470   : > { %18404 = vst [vmem:[#allocation54_spill] sm:$0xff] %v17434_v29  ;;  %v10550_v4 = vrot.slane %v17386_v10, 5  ;;  %v10554_v49 = vrot.slane %v17395_v42, 5  ;;  %v10441_v12 = vld [vmem:[#allocation3 + $0x84] sm:$0xe]  ;;  %v17448_v9 = vsel %vm14683_vm2, %v10542_v36, %v10543_v41  ;;  %v12075_v20 = vrot.slane %v10440_v52, 9 }
 0x471   : > { %v17442_v24 = vld [vmem:[#allocation3 + $0x98] sm:$0x1]  ;;  %18405 = vst [vmem:[#allocation55_spill] sm:$0xff] %v17448_v9  ;;  %v17452_v19 = vsel %vm14683_vm2, %v12074_v33, %v10547_v30  ;;  %v10442_v56 = vld [vmem:[#allocation3 + $0x90] sm:$0xe]  ;;  %v12076_v30 = vrot.slane %v10441_v12, 9 }
 0x472   : > { %12981 = vmatmul.mubr.msk.bf16.gmra.mrb[12].mxu1 %vm6351_vm8, %v17313_v61  ;;  %18406 = vst [vmem:[#allocation56_spill] sm:$0xff] %v17452_v19  ;;  %v17454_v31 = vld [vmem:[#allocation3 + $0xa0] sm:$0xf]  ;;  %v17460_v26 = vsel %vm14683_vm2, %v10549_v15, %v10550_v4  ;;  %v10557_v61 = vrot.slane %v17404_v48, 5  ;;  %v17463_v36 = vld [vmem:[#allocation3 + $0xa4] sm:$0x1]  ;;  %v17469_v41 = vsel %vm14683_vm2, %v12075_v20, %v10554_v49 }
 0x473   : > { %12986 = vmatprep.mubr.msk.bf16.mxu1 %vm6351_vm8, %v11969_v21  ;;  %18407 = vst [vmem:[#allocation57_spill] sm:$0xff] %v17460_v26  ;;  %v10556_v21 = vrot.slane %v10554_v49, 4  ;;  %18408 = vst [vmem:[#allocation58_spill] sm:$0xff] %v17469_v41  ;;  %v10561_v52 = vrot.slane %v17412_v16, 5  ;;  %v10443_v50 = vld [vmem:[#allocation3 + $0x9c] sm:$0xe] }
 0x474   : > { %v17472_v9 = vld [vmem:[#allocation3 + $0xac] sm:$0xf]  ;;  %v10564_v15 = vrot.slane %v17418_v22, 5  ;;  %v12077_v6 = vrot.slane %v10442_v56, 9  ;;  %v10568_v29 = vrot.slane %v17420_v45, 5  ;;  %v10571_v12 = vrot.slane %v17442_v24, 5 }
 0x475   : > { %v17476_v4 = vsel %vm14683_vm2, %v10556_v21, %v10557_v61  ;;  %v10563_v49 = vrot.slane %v10561_v52, 4  ;;  %v10575_v20 = vrot.slane %v17454_v31, 5  ;;  %v10444_v26 = vld [vmem:[#allocation3 + $0xa8] sm:$0xe]  ;;  %v17484_v19 = vld [vmem:[#allocation3 + $0xb0] sm:$0x1]  ;;  %v17490_v61 = vsel %vm14683_vm2, %v12076_v30, %v10561_v52 }
 0x476   : > { %18409 = vst [vmem:[#allocation59_spill] sm:$0xff] %v17476_v4  ;;  %v17486_v28 = vld [vmem:[#allocation3 + $0xb8] sm:$0xf]  ;;  %18410 = vst [vmem:[#allocation60_spill] sm:$0xff] %v17490_v61  ;;  %v17494_v56 = vsel %vm14683_vm2, %v12077_v6, %v10568_v29  ;;  %v10570_v21 = vrot.slane %v10568_v29, 4  ;;  %v12078_v33 = vrot.slane %v10443_v50, 9  ;;  %v18413_v52 = vcombine.low %v17295_v38, %v17299_v14 }
 0x477   : > { %18411 = vst [vmem:[#allocation61_spill] sm:$0xff] %v17494_v56  ;;  %v12034_v4 = vld [vmem:[%s18089_s3 + $0x1c] sm:$0xf]  ;;  %v17501_v41 = vsel %vm14683_vm2, %v10563_v49, %v10564_v15  ;;  %v10577_v55 = vrot.slane %v10575_v20, 4  ;;  %v10578_v13 = vrot.slane %v17463_v36, 5  ;;  %v10582_v30 = vrot.slane %v17472_v9, 5 }
 0x478   : > { %18412 = vst [vmem:[#allocation62_spill] sm:$0xff] %v17501_v41  ;;  %v17509_v29 = vld [vmem:[#allocation3 + $0xc4] sm:$0xf]  ;;  %v17515_v50 = vsel %vm14683_vm2, %v10570_v21, %v10571_v12  ;;  %v17519_v15 = vsel %vm14683_vm2, %v12078_v33, %v10575_v20  ;;  %v12079_v49 = vrot.slane %v10444_v26, 9  ;;  %v18416_v38 = vcombine.low %v17319_v60, %v17303_v18  ;;  %v17526_v14 = vld [vmem:[#allocation3 + $0xbc] sm:$0x1] }
 0x479   : > { %18414 = vst [vmem:[#allocation63_spill] sm:$0xff] %v17515_v50  ;;  %18415 = vst [vmem:[#allocation64_spill] sm:$0xff] %v17519_v15  ;;  %v17532_v12 = vsel %vm14683_vm2, %v10577_v55, %v10578_v13  ;;  %v10584_v21 = vrot.slane %v10582_v30, 4  ;;  %v10585_v33 = vrot.slane %v17484_v19, 5  ;;  %v10445_v26 = vld [vmem:[#allocation3 + $0xb4] sm:$0xe] }
 0x47a   : > { %12987 = vmatmul.mubr.msk.bf16.vlgmr.msra.gmra.mrb[16].mxu1 %vm6351_vm8, %v18413_v52  ;;  %18417 = vst [vmem:[#allocation65_spill] sm:$0xff] %v17532_v12  ;;  %v10589_v60 = vrot.slane %v17486_v28, 5  ;;  %v10446_v20 = vld [vmem:[#allocation3 + $0xc0] sm:$0xe]  ;;  %v10596_v55 = vrot.slane %v17509_v29, 5  ;;  %v12080_v6 = vrot.slane %v10445_v26, 9 }
 0x47b   : > { %13019 = vmatpush3.bf16.msra.mxu1 %v17290_v3  ;;  %12990 = vmatprep.mubr.msk.bf16.mxu1 %vm6351_vm8, %v18416_v38  ;;  %v17536_v3 = vld [vmem:[#allocation3 + $0xc8] sm:$0x1]  ;;  %v17543_v38 = vsel %vm14683_vm2, %v12079_v49, %v10582_v30  ;;  %v17547_v13 = vsel %vm14683_vm2, %v10584_v21, %v10585_v33  ;;  %v10592_v18 = vrot.slane %v17526_v14, 5  ;;  %v12081_v12 = vrot.slane %v10446_v20, 9  ;;  %v18424_v20 = vld [vmem:[#allocation28_spill] sm:$0xff]  ;;  %v18425_v52 = vld [vmem:[#allocation29_spill] sm:$0xff] }
 0x47c   : > { %13813 = vmatprep.subr.msk.bf16.mxu1 %vm6400_vm7, %v12034_v4  ;;  %18418 = vst [vmem:[#allocation66_spill] sm:$0xff] %v17543_v38  ;;  %18419 = vst [vmem:[#allocation67_spill] sm:$0xff] %v17547_v13  ;;  %v10591_v50 = vrot.slane %v10589_v60, 4  ;;  %v10598_v15 = vrot.slane %v10596_v55, 4  ;;  %v10599_v56 = vrot.slane %v17536_v3, 5  ;;  %v17556_v30 = vsel %vm14683_vm2, %v12080_v6, %v10589_v60  ;;  %v18430_v21 = vld [vmem:[#allocation4_spill] sm:$0xff] }
 0x47d   : > { %18420 = vst [vmem:[#allocation68_spill] sm:$0xff] %v17556_v30  ;;  %v17566_v33 = vsel %vm14683_vm2, %v12081_v12, %v10596_v55  ;;  %v18426_v13 = vcombine.low %v18424_v20, %v18425_v52  ;;  %v18431_v12 = vld [vmem:[#allocation8_spill] sm:$0xff]  ;;  %v18436_v52 = vld [vmem:[#allocation11_spill] sm:$0xff]  ;;  %v18439_v6 = vld [vmem:[#allocation14_spill] sm:$0xff]  ;;  %v9812_v38 = vshll.u32 %v17307_v57, 16  ;;  %v9846_v11 = vshll.u32 %v17323_v62, 16 }
 0x47e   : > { %v17560_v49 = vsel %vm14683_vm2, %v10591_v50, %v10592_v18  ;;  %18422 = vst [vmem:[#allocation70_spill] sm:$0xff] %v17566_v33  ;;  %v17570_v26 = vsel %vm14683_vm2, %v10598_v15, %v10599_v56  ;;  %v18427_v50 = vld [vmem:[#allocation32_spill] sm:$0xff]  ;;  %v18428_v18 = vld [vmem:[#allocation33_spill] sm:$0xff]  ;;  %v18432_v55 = vcombine.low %v18430_v21, %v18431_v12  ;;  %v18433_v56 = vld [vmem:[#allocation7_spill] sm:$0xff]  ;;  %v9912_v62 = vshrl.u32 %v17360_v63, 16 }
 0x47f   : > { %18421 = vst [vmem:[#allocation69_spill] sm:$0xff] %v17560_v49  ;;  %18423 = vst [vmem:[#allocation71_spill] sm:$0xff] %v17570_v26  ;;  %v18429_v60 = vcombine.low %v18427_v50, %v18428_v18  ;;  %v18434_v15 = vld [vmem:[#allocation5_spill] sm:$0xff]  ;;  %v18440_v26 = vld [vmem:[#allocation15_spill] sm:$0xff] }
 0x480   : > { %v18435_v49 = vcombine.low %v18433_v56, %v18434_v15  ;;  %v18441_v50 = vcombine.low %v18439_v6, %v18440_v26  ;;  %v18442_v18 = vld [vmem:[#allocation34_spill] sm:$0xff]  ;;  %v18454_v6 = vcombine.low %v17014_v17, %v17018_v7  ;;  %v10237_v7 = vsel %vm6400_vm7, %v12034_v4, 0  ;;  %v13910_v4 = vld [vmem:[#allocation3 + $0x54] sm:$0xff]   ;;  %v17675_v61 = vld [vmem:[#allocation3 + $0xd0] sm:$0xf] }
 0x481   : > { %v18445_v12 = vld [vmem:[#allocation38_spill] sm:$0xff]  ;;  %v18465_v34 = vld [vmem:[#allocation23_spill] sm:$0xff] }
 0x482   : > { %12991 = vmatmul.mubr.msk.bf16.gmra.mrb[20].mxu1 %vm6351_vm8, %v18426_v13  ;;  %v18437_v13 = vld [vmem:[#allocation12_spill] sm:$0xff]  ;;  %v18449_v15 = vld [vmem:[#allocation42_spill] sm:$0xff] }
 0x483   : > { %12994 = vmatprep.mubr.msk.bf16.mxu1 %vm6351_vm8, %v18429_v60  ;;  %v18438_v20 = vcombine.low %v18436_v52, %v18437_v13  ;;  %v18443_v60 = vld [vmem:[#allocation35_spill] sm:$0xff]  ;;  %v18451_v13 = vld [vmem:[#allocation45_spill] sm:$0xff] }
 0x484   : > { %v18444_v21 = vcombine.low %v18442_v18, %v18443_v60  ;;  %v18456_v18 = vld [vmem:[#allocation49_spill] sm:$0xff]  ;;  %v13920_v54 = vld [vmem:[#allocation3 + $0xcc] sm:$0xff]  }
 0x485   : > { %v13906_v17 = vld [vmem:[#allocation3 + $0x24] sm:$0xff]  }
 0x48a   : > { %12995 = vmatmul.mubr.msk.bf16.gmra.mrb[24].mxu1 %vm6351_vm8, %v18432_v55  ;;  %v18446_v55 = vld [vmem:[#allocation39_spill] sm:$0xff] }
 0x48b   : > { %12998 = vmatprep.mubr.msk.bf16.mxu1 %vm6351_vm8, %v18435_v49  ;;  %v18447_v56 = vcombine.low %v18445_v12, %v18446_v55  ;;  %v18448_v49 = vld [vmem:[#allocation40_spill] sm:$0xff]  ;;  %v13914_v12 = vld [vmem:[#allocation3 + $0x84] sm:$0xff]  }
 0x48c   : > { %v18450_v52 = vcombine.low %v18448_v49, %v18449_v15  ;;  %v18459_v49 = vcombine.low %v17047_v27, %v17051_v0  ;;  %v13907_v15 = vld [vmem:[#allocation3 + $0x30] sm:$0xff]   ;;  %v13908_v27 = vld [vmem:[#allocation3 + $0x3c] sm:$0xff]   ;;  %v13909_v0 = vld [vmem:[#allocation3 + $0x48] sm:$0xff]  }
 0x492   : > { %12999 = vmatmul.mubr.msk.bf16.gmra.mrb[28].mxu1 %vm6351_vm8, %v18438_v20  ;;  %v18452_v20 = vld [vmem:[#allocation46_spill] sm:$0xff] }
 0x493   : > { %13002 = vmatprep.mubr.msk.bf16.mxu1 %vm6351_vm8, %v18441_v50  ;;  %v18453_v26 = vcombine.low %v18451_v13, %v18452_v20  ;;  %v18455_v50 = vld [vmem:[#allocation48_spill] sm:$0xff]  ;;  %v13911_v13 = vld [vmem:[#allocation3 + $0x60] sm:$0xff]   ;;  %v13912_v20 = vld [vmem:[#allocation3 + $0x6c] sm:$0xff]  }
 0x494   : > { %v18457_v60 = vcombine.low %v18455_v50, %v18456_v18  ;;  %v9764_v50 = vshll.u32 %v17264_v43, 16  ;;  %v9768_v18 = vshrl.u32 %v17264_v43, 16 }
 0x49a   : > { %13003 = vmatmul.mubr.msk.bf16.gmra.mrb[0].mxu1 %vm6351_vm8, %v18444_v21  ;;  %v5697_v21 = vld [vmem:[#allocation3 + $0xd4] sm:$0x1] }
 0x49b   : > { %13006 = vmatprep.mubr.msk.bf16.mxu1 %vm6351_vm8, %v18447_v56  ;;  %v5698_v55 = vsel %vm16013_vm3, 0, %v5697_v21  ;;  %v13905_v56 = vld [vmem:[#allocation3 + $0x18] sm:$0xff]  }
 0x49c   : > { %5699 = vst [vmem:[#allocation3 + $0xd4] sm:$0x1] %v5698_v55  ;;  %v13915_v55 = vld [vmem:[#allocation3 + $0x90] sm:$0xff]  }
 0x4a2   : > { %13007 = vmatmul.mubr.msk.bf16.gmra.mrb[4].mxu1 %vm6351_vm8, %v18450_v52  ;;  %v17633_v52 = vld [vmem:[%s18089_s3 + $0x20] sm:$0xf] }
 0x4a3   : > { %13010 = vmatprep.mubr.msk.bf16.mxu1 %vm6351_vm8, %v18453_v26  ;;  %v13913_v26 = vld [vmem:[#allocation3 + $0x78] sm:$0xff]  }
 0x4aa   : > { %13011 = vmatmul.mubr.msk.bf16.gmra.mrb[8].mxu1 %vm6351_vm8, %v18454_v6  ;;  %v9706_v6 = vld [vmem:[#allocation3 + $0x18] sm:$0xf] }
 0x4ab   : > { %13014 = vmatprep.mubr.msk.bf16.mxu1 %vm6351_vm8, %v18457_v60  ;;  %v9755_v60 = vshrl.u32 %v9706_v6, 16  ;;  %v9758_v21 = vshll.u32 %v9706_v6, 16  ;;  %v9712_v6 = vld [vmem:[#allocation3 + $0x30] sm:$0xf] }
 0x4b2   : > { %13015 = vmatmul.mubr.msk.bf16.gmra.mrb[12].mxu1 %vm6351_vm8, %v18459_v49  ;;  %v9770_v49 = vrot.slane %v9768_v18, 4 }
 0x4b3   : > { %13020 = vmatprep.mubr.msk.bf16.mxu1 %vm6351_vm8, %v13905_v56  ;;  %v9766_v56 = vrot.slane %v9764_v50, 5  ;;  %v13916_v50 = vld [vmem:[#allocation3 + $0x9c] sm:$0xff]  }
 0x4b5   : > { %v9771_v43 = vor.u32 %v9770_v49, %v9766_v56 }
 0x4ba   : > { %13021 = vmatmul.mubr.msk.bf16.vlgmr.msra.gmra.mrb[16].mxu1 %vm6351_vm8, %v13906_v17  ;;  %v9709_v17 = vld [vmem:[#allocation3 + $0x24] sm:$0xf] }
 0x4bb   : > { %13053 = vmatpush3.bf16.msra.mxu1 %v10237_v7  ;;  %13024 = vmatprep.mubr.msk.bf16.mxu1 %vm6351_vm8, %v13907_v15  ;;  %v9757_v7 = vrot.slane %v9755_v60, 4  ;;  %v9760_v15 = vrot.slane %v9758_v21, 5  ;;  %v9772_v60 = vrot.slane %v9771_v43, 4  ;;  %v9803_v21 = vshrl.u32 %v9712_v6, 16 }
 0x4bc   : > { %13814 = vmatprep.subr.msk.bf16.mxu1 %vm6400_vm7, %v17633_v52 }
 0x4bd   : > { %v9805_v43 = vrot.slane %v9803_v21, 4  ;;  %v9836_v21 = vshll.u32 %v17321_v58, 16 }
 0x4c2   : > { %13025 = vmatmul.mubr.msk.bf16.gmra.mrb[20].mxu1 %vm6351_vm8, %v13908_v27  ;;  %v9779_v27 = vshrl.u32 %v9709_v17, 16 }
 0x4c3   : > { %13028 = vmatprep.mubr.msk.bf16.mxu1 %vm6351_vm8, %v13909_v0  ;;  %v9782_v0 = vshll.u32 %v9709_v17, 16  ;;  %v9806_v17 = vshll.u32 %v9712_v6, 16 }
 0x4c4   : > { %v9781_v18 = vrot.slane %v9779_v27, 4 }
 0x4c5   : > { %v9784_v33 = vrot.slane %v9782_v0, 5  ;;  %v9808_v6 = vrot.slane %v9806_v17, 5  ;;  %v9721_v17 = vld [vmem:[#allocation3 + $0x54] sm:$0xf] }
 0x4c6   : > { %v9878_v39 = vshll.u32 %v9721_v17, 16 }
 0x4ca   : > { %13029 = vmatmul.mubr.msk.bf16.gmra.mrb[24].mxu1 %vm6351_vm8, %v13910_v4  ;;  %v9788_v4 = vshll.u32 %v17272_v2, 16 }
 0x4cb   : > { %13032 = vmatprep.mubr.msk.bf16.mxu1 %vm6351_vm8, %v13911_v13  ;;  %v9792_v13 = vshrl.u32 %v17272_v2, 16  ;;  %v9816_v2 = vshrl.u32 %v17307_v57, 16 }
 0x4cc   : > { %v17652_v30 = vrot.slane %v9788_v4, 5  ;;  %v9822_v4 = vshll.u32 %v17309_v5, 16 }
 0x4cd   : > { %v9818_v57 = vrot.slane %v9816_v2, 4 }
 0x4d2   : > { %13033 = vmatmul.mubr.msk.bf16.gmra.mrb[28].mxu1 %vm6351_vm8, %v13912_v20  ;;  %v9761_v20 = vor.u32 %v9760_v15, %v9757_v7  ;;  %v9798_v7 = vshll.u32 %v17305_v40, 16  ;;  %v9785_v15 = vor.u32 %v9784_v33, %v9781_v18  ;;  %v9718_v40 = vld [vmem:[#allocation3 + $0x48] sm:$0xf]  ;;  %v13918_v33 = vld [vmem:[#allocation3 + $0xb4] sm:$0xff]   ;;  %v13919_v18 = vld [vmem:[#allocation3 + $0xc0] sm:$0xff]  }
 0x4d3   : > { %13036 = vmatprep.mubr.msk.bf16.mxu1 %vm6351_vm8, %v13913_v26  ;;  %v9774_v26 = vshll.u32 %v17270_v25, 16 }
 0x4d4   : > { %v9762_v25 = vrot.slane %v9761_v20, 4 }
 0x4d5   : > { %v9776_v49 = vrot.slane %v9774_v26, 5  ;;  %v17667_v26 = vrot.slane %v9798_v7, 5  ;;  %v9854_v7 = vshll.u32 %v9718_v40, 16 }
 0x4d6   : > { %v9767_v20 = vsel %vm14292_vm13, %v9762_v25, %v9766_v56  ;;  %v9809_v56 = vor.u32 %v9808_v6, %v9805_v43  ;;  %v9851_v25 = vshrl.u32 %v9718_v40, 16  ;;  %v9884_v6 = vshll.u32 %v17345_v47, 16 }
 0x4d7   : > { %v9777_v0 = vsel %vm14292_vm13, %v9772_v60, %v9776_v49  ;;  %v17669_v49 = vrot.slane %v9822_v4, 5  ;;  %v10447_v4 = vld [vmem:[#allocation3 + $0xcc] sm:$0xe]  ;;  %v9856_v1 = vrot.slane %v9854_v7, 5 }
 0x4d8   : > { %v9853_v44 = vrot.slane %v9851_v25, 4  ;;  %v9724_v25 = vld [vmem:[#allocation3 + $0x60] sm:$0xf] }
 0x4da   : > { %13037 = vmatmul.mubr.msk.bf16.gmra.mrb[0].mxu1 %vm6351_vm8, %v13914_v12  ;;  %v9794_v12 = vrot.slane %v9792_v13, 4  ;;  %v9715_v13 = vld [vmem:[#allocation3 + $0x3c] sm:$0xf] }
 0x4db   : > { %13040 = vmatprep.mubr.msk.bf16.mxu1 %vm6351_vm8, %v13915_v55  ;;  %v13917_v55 = vld [vmem:[#allocation3 + $0xa8] sm:$0xff]   ;;  %v9827_v60 = vshrl.u32 %v9715_v13, 16  ;;  %v9830_v5 = vshll.u32 %v9715_v13, 16 }
 0x4dc   : > { %v9795_v27 = vor.u32 %v9794_v12, %v17652_v30  ;;  %v12035_v12 = vcombine.low %v9767_v20, %v9777_v0  ;;  %v9864_v0 = vshrl.u32 %v17338_v59, 16  ;;  %v12082_v20 = vrot.slane %v10447_v4, 9 }
 0x4dd   : > { %v9829_v43 = vrot.slane %v9827_v60, 4  ;;  %v9832_v40 = vrot.slane %v9830_v5, 5 }
 0x4de   : > { %v9796_v41 = vrot.slane %v9795_v27, 4  ;;  %v9860_v27 = vshll.u32 %v17338_v59, 16  ;;  %v9875_v59 = vshrl.u32 %v9721_v17, 16  ;;  %v9866_v60 = vrot.slane %v9864_v0, 4 }
 0x4df   : > { %v9810_v17 = vrot.slane %v9809_v56, 4  ;;  %v9833_v4 = vor.u32 %v9832_v40, %v9829_v43 }
 0x4e0   : > { %v17692_v23 = vrot.slane %v9860_v27, 5  ;;  %v9801_v27 = vsel %vm14292_vm13, %v9796_v41, %v17667_v26  ;;  %v9908_v26 = vshll.u32 %v17360_v63, 16 }
 0x4e2   : > { %13041 = vmatmul.mubr.msk.bf16.gmra.mrb[4].mxu1 %vm6351_vm8, %v13916_v50  ;;  %v17663_v50 = vrot.slane %v9812_v38, 5  ;;  %v9840_v38 = vshrl.u32 %v17321_v58, 16  ;;  %v10603_v58 = vrot.slane %v17675_v61, 5 }
 0x4e3   : > { %13044 = vmatprep.mubr.msk.bf16.mxu1 %vm6351_vm8, %v13917_v55  ;;  %v9786_v55 = vrot.slane %v9785_v15, 4  ;;  %v17677_v15 = vld [vmem:[#allocation3 + $0xd4] sm:$0x1] }
 0x4e4   : > { %v9819_v2 = vor.u32 %v9818_v57, %v17663_v50  ;;  %v10606_v13 = vrot.slane %v17677_v15, 5  ;;  %v9888_v57 = vshrl.u32 %v17345_v47, 16  ;;  %v9842_v35 = vrot.slane %v9840_v38, 4 }
 0x4e5   : > { %v17690_v46 = vsel %vm14683_vm2, %v12082_v20, %v10603_v58  ;;  %v9791_v5 = vsel %vm14292_vm13, %v9786_v55, %v17652_v30  ;;  %v9857_v55 = vor.u32 %v9856_v1, %v9853_v44  ;;  %v9902_v20 = vshll.u32 %v9724_v25, 16 }
 0x4e6   : > { %v9890_v38 = vrot.slane %v9888_v57, 4  ;;  %v9820_v0 = vrot.slane %v9819_v2, 4  ;;  %v9899_v57 = vshrl.u32 %v9724_v25, 16  ;;  %v9848_v44 = vrot.slane %v9846_v11, 5 }
 0x4e7   : > { %v9858_v56 = vrot.slane %v9857_v55, 4  ;;  %v9894_v2 = vshll.u32 %v17358_v51, 16  ;;  %v9904_v63 = vrot.slane %v9902_v20, 5  ;;  %v17733_v51 = vld [vmem:[%s18091_s5] sm:$0x3]  ;;  %v9918_v20 = vshll.u32 %v17374_v32, 16 }
 0x4e8   : > { %v9825_v1 = vsel %vm14292_vm13, %v9820_v0, %v17669_v49  ;;  %v9914_v49 = vrot.slane %v9912_v62, 4 }
 0x4e9   : > { %v9896_v0 = vrot.slane %v9894_v2, 5  ;;  %v9863_v55 = vsel %vm14292_vm13, %v9858_v56, %v17692_v23  ;;  %v9920_v56 = vrot.slane %v9918_v20, 5  ;;  %v9942_v2 = vshll.u32 %v17386_v10, 16 }
 0x4ea   : > { %13045 = vmatmul.mubr.msk.bf16.gmra.mrb[8].mxu1 %vm6351_vm8, %v13918_v33  ;;  %v17686_v33 = vrot.slane %v9836_v21, 5  ;;  %v17701_v21 = vrot.slane %v9884_v6, 5  ;;  %v9880_v6 = vrot.slane %v9878_v39, 5  ;;  %v9870_v39 = vshll.u32 %v17340_v8, 16 }
 0x4eb   : > { %13048 = vmatprep.mubr.msk.bf16.mxu1 %vm6351_vm8, %v13919_v18  ;;  %v10605_v18 = vrot.slane %v10603_v58, 4  ;;  %v9877_v58 = vrot.slane %v9875_v59, 4  ;;  %v9901_v59 = vrot.slane %v9899_v57, 4  ;;  %v9932_v8 = vshll.u32 %v17384_v37, 16 }
 0x4ec   : > { %v9843_v30 = vor.u32 %v9842_v35, %v17686_v33  ;;  %v9891_v41 = vor.u32 %v9890_v38, %v17701_v21  ;;  %v9834_v35 = vrot.slane %v9833_v4, 4  ;;  %v17726_v38 = vrot.slane %v9908_v26, 5 }
 0x4ed   : > { %v17696_v47 = vsel %vm14683_vm2, %v10605_v18, %v10606_v13  ;;  %v9867_v13 = vor.u32 %v9866_v60, %v17692_v23  ;;  %v12036_v18 = vcombine.low %v9791_v5, %v9801_v27  ;;  %v9881_v40 = vor.u32 %v9880_v6, %v9877_v58  ;;  %v9727_v60 = vld [vmem:[#allocation3 + $0x6c] sm:$0xf] }
 0x4ee   : > { %v12099_v7 = vcombine.low %v17690_v46, %v17696_v47  ;;  %v9892_v5 = vrot.slane %v9891_v41, 4  ;;  %v9872_v27 = vrot.slane %v9870_v39, 5  ;;  %v9923_v11 = vshrl.u32 %v9727_v60, 16  ;;  %v13926_v46 = vld [vmem:[%s14050_s10 + $0x28] sm:$0xff]   ;;  %v13927_v47 = vld [vmem:[%s14050_s10 + $0x30] sm:$0xff]  }
 0x4ef   : > { %v9868_v43 = vrot.slane %v9867_v13, 4  ;;  %v9926_v4 = vshll.u32 %v9727_v60, 16  ;;  %v9882_v13 = vrot.slane %v9881_v40, 4  ;;  %v9905_v6 = vor.u32 %v9904_v63, %v9901_v59 }
 0x4f0   : > { %v9915_v57 = vor.u32 %v9914_v49, %v17726_v38  ;;  %v9925_v62 = vrot.slane %v9923_v11, 4  ;;  %v9984_v10 = vshrl.u32 %v17412_v16, 16  ;;  %v10008_v11 = vshrl.u32 %v17420_v45, 16 }
 0x4f1   : > { %v9873_v58 = vsel %vm14292_vm13, %v9868_v43, %v9872_v27  ;;  %v9887_v32 = vsel %vm14292_vm13, %v9882_v13, %v17701_v21  ;;  %v9733_v43 = vld [vmem:[#allocation3 + $0x84] sm:$0xf] }
 0x4f2   : > { %13049 = vmatmul.mubr.msk.bf16.gmra.mrb[12].mxu1 %vm6351_vm8, %v13920_v54  ;;  %v9815_v54 = vsel %vm14292_vm13, %v9810_v17, %v17663_v50  ;;  %v10707_v50 = vsel %vm6400_vm7, %v17633_v52, 0  ;;  %v9936_v17 = vshrl.u32 %v17384_v37, 16  ;;  %v9839_v52 = vsel %vm14292_vm13, %v9834_v35, %v17686_v33 }
 0x4f3   : > { %13054 = vmatprep.mubr.msk.bf16.mxu1 %vm6351_vm8, %v12035_v12  ;;  %v9844_v12 = vrot.slane %v9843_v30, 4  ;;  %v12037_v25 = vcombine.low %v9815_v54, %v9825_v1  ;;  %v9730_v30 = vld [vmem:[#allocation3 + $0x78] sm:$0xf]  ;;  %v9897_v33 = vsel %vm14292_vm13, %v9892_v5, %v9896_v0  ;;  %v9928_v54 = vrot.slane %v9926_v4, 5 }
 0x4f4   : > { %v9938_v41 = vrot.slane %v9936_v17, 4  ;;  %v9947_v26 = vshrl.u32 %v9730_v30, 16  ;;  %v9950_v23 = vshll.u32 %v9730_v30, 16  ;;  %v9956_v1 = vshll.u32 %v17395_v42, 16 }
 0x4f5   : > { %v9849_v37 = vsel %vm14292_vm13, %v9844_v12, %v9848_v44  ;;  %v9960_v44 = vshrl.u32 %v17395_v42, 16  ;;  %v12039_v35 = vcombine.low %v9863_v55, %v9873_v58  ;;  %v9906_v12 = vrot.slane %v9905_v6, 4 }
 0x4f6   : > { %v12038_v39 = vcombine.low %v9839_v52, %v9849_v37  ;;  %v12040_v40 = vcombine.low %v9887_v32, %v9897_v33  ;;  %v9949_v63 = vrot.slane %v9947_v26, 4  ;;  %v9952_v60 = vrot.slane %v9950_v23, 5 }
 0x4f7   : > { %v9916_v42 = vrot.slane %v9915_v57, 4  ;;  %v9929_v5 = vor.u32 %v9928_v54, %v9925_v62  ;;  %v9958_v49 = vrot.slane %v9956_v1, 5  ;;  %v9971_v21 = vshrl.u32 %v9733_v43, 16  ;;  %v9739_v62 = vld [vmem:[#allocation3 + $0x9c] sm:$0xf] }
 0x4f8   : > { %v9974_v27 = vshll.u32 %v9733_v43, 16  ;;  %v10004_v0 = vshll.u32 %v17420_v45, 16  ;;  %v9911_v4 = vsel %vm14292_vm13, %v9906_v12, %v17726_v38  ;;  %v9944_v37 = vrot.slane %v9942_v2, 5 }
 0x4f9   : > { %v9953_v55 = vor.u32 %v9952_v60, %v9949_v63  ;;  %v9921_v58 = vsel %vm14292_vm13, %v9916_v42, %v9920_v56  ;;  %v9930_v13 = vrot.slane %v9929_v5, 4  ;;  %v9973_v6 = vrot.slane %v9971_v21, 4  ;;  %v9742_v42 = vld [vmem:[#allocation3 + $0xa8] sm:$0xf] }
 0x4fa   : > { %13055 = vmatmul.mubr.msk.bf16.vlgmr.msra.gmra.mrb[16].mxu1 %vm6351_vm8, %v12036_v18  ;;  %v17753_v18 = vrot.slane %v9932_v8, 5  ;;  %v9980_v8 = vshll.u32 %v17412_v16, 16  ;;  %v9966_v16 = vshll.u32 %v17404_v48, 16  ;;  %v9976_v57 = vrot.slane %v9974_v27, 5 }
 0x4fb   : > { %13087 = vmatpush3.bf16.msra.mxu1 %v10707_v50  ;;  %13058 = vmatprep.mubr.msk.bf16.mxu1 %vm6351_vm8, %v12037_v25  ;;  %v9736_v50 = vld [vmem:[#allocation3 + $0x90] sm:$0xf]  ;;  %v9962_v25 = vrot.slane %v9960_v44, 4  ;;  %v17776_v23 = vrot.slane %v10004_v0, 5  ;;  %v10010_v38 = vrot.slane %v10008_v11, 4  ;;  %v12041_v54 = vcombine.low %v9911_v4, %v9921_v58 }
 0x4fc   : > { %13815 = vmatprep.subr.msk.bf16.mxu1 %vm1040_vm0, %v17733_v51  ;;  %v9939_v59 = vor.u32 %v9938_v41, %v17753_v18  ;;  %v9995_v17 = vshrl.u32 %v9736_v50, 16  ;;  %v9998_v52 = vshll.u32 %v9736_v50, 16  ;;  %v17774_v20 = vrot.slane %v9980_v8, 5 }
 0x4fd   : > { %v9963_v33 = vor.u32 %v9962_v25, %v9958_v49  ;;  %v9986_v41 = vrot.slane %v9984_v10, 4  ;;  %v9954_v44 = vrot.slane %v9953_v55, 4  ;;  %v9935_v48 = vsel %vm14292_vm13, %v9930_v13, %v17753_v18 }
 0x4fe   : > { %v9940_v30 = vrot.slane %v9939_v59, 4  ;;  %v9997_v45 = vrot.slane %v9995_v17, 4  ;;  %v10000_v26 = vrot.slane %v9998_v52, 5  ;;  %v10019_v12 = vshrl.u32 %v9739_v62, 16 }
 0x4ff   : > { %v9987_v32 = vor.u32 %v9986_v41, %v17774_v20  ;;  %v10022_v56 = vshll.u32 %v9739_v62, 16  ;;  %v9968_v43 = vrot.slane %v9966_v16, 5  ;;  %v10011_v63 = vor.u32 %v10010_v38, %v17776_v23 }
 0x500   : > { %v9945_v1 = vsel %vm14292_vm13, %v9940_v30, %v9944_v37  ;;  %v10001_v59 = vor.u32 %v10000_v26, %v9997_v45  ;;  %v9990_v60 = vshll.u32 %v17418_v22, 16  ;;  %v10028_v18 = vshll.u32 %v17454_v31, 16 }
 0x501   : > { %v12042_v2 = vcombine.low %v9935_v48, %v9945_v1  ;;  %v10032_v50 = vshrl.u32 %v17454_v31, 16  ;;  %v10014_v25 = vshll.u32 %v17442_v24, 16  ;;  %v10052_v21 = vshll.u32 %v17472_v9, 16  ;;  %v9748_v1 = vld [vmem:[#allocation3 + $0xc0] sm:$0xf] }
 0x502   : > { %13059 = vmatmul.mubr.msk.bf16.gmra.mrb[20].mxu1 %vm6351_vm8, %v12038_v39  ;;  %v9964_v39 = vrot.slane %v9963_v33, 4  ;;  %v10056_v27 = vshrl.u32 %v17472_v9, 16  ;;  %v9988_v10 = vrot.slane %v9987_v32, 4  ;;  %v10021_v17 = vrot.slane %v10019_v12, 4  ;;  %v9745_v9 = vld [vmem:[#allocation3 + $0xb4] sm:$0xf] }
 0x503   : > { %13062 = vmatprep.mubr.msk.bf16.mxu1 %vm6351_vm8, %v12039_v35  ;;  %v9977_v35 = vor.u32 %v9976_v57, %v9973_v6  ;;  %v10002_v52 = vrot.slane %v10001_v59, 4  ;;  %v10012_v22 = vrot.slane %v10011_v63, 4  ;;  %v10043_v0 = vshrl.u32 %v9742_v42, 16  ;;  %v9751_v63 = vld [vmem:[#allocation3 + $0xcc] sm:$0xf] }
 0x504   : > { %v9969_v5 = vsel %vm14292_vm13, %v9964_v39, %v9968_v43  ;;  %v10046_v11 = vshll.u32 %v9742_v42, 16  ;;  %v9992_v31 = vrot.slane %v9990_v60, 5  ;;  %v17797_v30 = vrot.slane %v10028_v18, 5 }
 0x505   : > { %v9978_v8 = vrot.slane %v9977_v35, 4  ;;  %v10034_v37 = vrot.slane %v10032_v50, 4  ;;  %v10016_v24 = vrot.slane %v10014_v25, 5  ;;  %v17800_v55 = vrot.slane %v10052_v21, 5 }
 0x506   : > { %v10058_v58 = vrot.slane %v10056_v27, 4  ;;  %v9993_v33 = vsel %vm14292_vm13, %v9988_v10, %v9992_v31  ;;  %v10038_v6 = vshll.u32 %v17463_v36, 16  ;;  %v10007_v57 = vsel %vm14292_vm13, %v10002_v52, %v17776_v23 }
 0x507   : > { %v9983_v13 = vsel %vm14292_vm13, %v9978_v8, %v17774_v20  ;;  %v10017_v41 = vsel %vm14292_vm13, %v10012_v22, %v10016_v24  ;;  %v10045_v45 = vrot.slane %v10043_v0, 4  ;;  %v10048_v26 = vrot.slane %v10046_v11, 5 }
 0x508   : > { %v10035_v38 = vor.u32 %v10034_v37, %v17797_v30  ;;  %v10067_v62 = vshrl.u32 %v9745_v9, 16  ;;  %v10076_v20 = vshll.u32 %v17486_v28, 16  ;;  %v10070_v36 = vshll.u32 %v9745_v9, 16 }
 0x509   : > { %v10100_v48 = vshll.u32 %v17509_v29, 16  ;;  %v10104_v23 = vshrl.u32 %v17509_v29, 16  ;;  %v12044_v39 = vcombine.low %v9983_v13, %v9993_v33  ;;  %v12045_v35 = vcombine.low %v10007_v57, %v10017_v41 }
 0x50a   : > { %13063 = vmatmul.mubr.msk.bf16.gmra.mrb[24].mxu1 %vm6351_vm8, %v12040_v40  ;;  %v9959_v40 = vsel %vm14292_vm13, %v9954_v44, %v9958_v49  ;;  %v10024_v49 = vrot.slane %v10022_v56, 5  ;;  %v10059_v44 = vor.u32 %v10058_v58, %v17800_v55  ;;  %v10040_v12 = vrot.slane %v10038_v6, 5 }
 0x50b   : > { %13066 = vmatprep.mubr.msk.bf16.mxu1 %vm6351_vm8, %v12041_v54  ;;  %v12043_v4 = vcombine.low %v9959_v40, %v9969_v5  ;;  %v10080_v54 = vshrl.u32 %v17486_v28, 16  ;;  %v10049_v56 = vor.u32 %v10048_v26, %v10045_v45  ;;  %v10091_v43 = vshrl.u32 %v9748_v1, 16 }
 0x50c   : > { %v10025_v16 = vor.u32 %v10024_v49, %v10021_v17  ;;  %v10094_v59 = vshll.u32 %v9748_v1, 16  ;;  %v10036_v40 = vrot.slane %v10035_v38, 4  ;;  %v10069_v28 = vrot.slane %v10067_v62, 4 }
 0x50d   : > { %v10078_v60 = vrot.slane %v10076_v20, 5  ;;  %v10082_v18 = vrot.slane %v10080_v54, 4  ;;  %v10060_v50 = vrot.slane %v10059_v44, 4  ;;  %v10072_v42 = vrot.slane %v10070_v36, 5 }
 0x50e   : > { %v10026_v32 = vrot.slane %v10025_v16, 4  ;;  %v10102_v5 = vrot.slane %v10100_v48, 5  ;;  %v10106_v29 = vrot.slane %v10104_v23, 4  ;;  %v10115_v25 = vshrl.u32 %v9751_v63, 16 }
 0x50f   : > { %v10118_v21 = vshll.u32 %v9751_v63, 16  ;;  %v10124_v27 = vshll.u32 %v17675_v61, 16  ;;  %v10050_v8 = vrot.slane %v10049_v56, 4  ;;  %v10093_v17 = vrot.slane %v10091_v43, 4  ;;  %v18460_v56 = vld [vmem:[#allocation36_spill] sm:$0xff]  ;;  %v18463_v63 = vld [vmem:[#allocation17_spill] sm:$0xff] }
 0x510   : > { %v10096_v49 = vrot.slane %v10094_v59, 5  ;;  %v10031_v52 = vsel %vm14292_vm13, %v10026_v32, %v17797_v30  ;;  %v10041_v22 = vsel %vm14292_vm13, %v10036_v40, %v10040_v12  ;;  %v10083_v0 = vor.u32 %v10082_v18, %v10078_v60  ;;  %v18462_v59 = vld [vmem:[#allocation37_spill] sm:$0xff]  ;;  %v18468_v18 = vld [vmem:[#allocation22_spill] sm:$0xff] }
 0x511   : > { %v10086_v31 = vshll.u32 %v17526_v14, 16  ;;  %v10107_v37 = vor.u32 %v10106_v29, %v10102_v5  ;;  %v10120_v24 = vrot.slane %v10118_v21, 5  ;;  %v10126_v58 = vrot.slane %v10124_v27, 5  ;;  %v18474_v29 = vld [vmem:[#allocation52_spill] sm:$0xff]  ;;  %v18477_v27 = vld [vmem:[#allocation53_spill] sm:$0xff] }
 0x512   : > { %13067 = vmatmul.mubr.msk.bf16.gmra.mrb[28].mxu1 %vm6351_vm8, %v12042_v2  ;;  %v10062_v2 = vshll.u32 %v17484_v19, 16  ;;  %v10128_v19 = vshrl.u32 %v17675_v61, 16  ;;  %v10117_v61 = vrot.slane %v10115_v25, 4  ;;  %v12046_v13 = vcombine.low %v10031_v52, %v10041_v22  ;;  %v18475_v25 = vld [vmem:[#allocation54_spill] sm:$0xff]  ;;  %v18484_v22 = vld [vmem:[#allocation59_spill] sm:$0xff] }
 0x513   : > { %13070 = vmatprep.mubr.msk.bf16.mxu1 %vm6351_vm8, %v12043_v4  ;;  %v10073_v4 = vor.u32 %v10072_v42, %v10069_v28  ;;  %v10055_v30 = vsel %vm14292_vm13, %v10050_v8, %v17800_v55  ;;  %v10097_v33 = vor.u32 %v10096_v49, %v10093_v17  ;;  %v10110_v16 = vshll.u32 %v17536_v3, 16  ;;  %v18466_v28 = vld [vmem:[#allocation25_spill] sm:$0xff]  ;;  %v18471_v42 = vld [vmem:[#allocation50_spill] sm:$0xff] }
 0x514   : > { %v10064_v10 = vrot.slane %v10062_v2, 5  ;;  %v10130_v9 = vrot.slane %v10128_v19, 4  ;;  %v10084_v57 = vrot.slane %v10083_v0, 4  ;;  %v10088_v41 = vrot.slane %v10086_v31, 5  ;;  %v18478_v19 = vld [vmem:[#allocation55_spill] sm:$0xff]  ;;  %v18481_v17 = vld [vmem:[#allocation57_spill] sm:$0xff] }
 0x515   : > { %v10108_v45 = vrot.slane %v10107_v37, 4  ;;  %v10074_v14 = vrot.slane %v10073_v4, 4  ;;  %v10121_v26 = vor.u32 %v10120_v24, %v10117_v61  ;;  %v10134_v62 = vshll.u32 %v17677_v15, 16  ;;  %v18483_v52 = vld [vmem:[#allocation58_spill] sm:$0xff]  ;;  %v18489_v37 = vld [vmem:[#allocation61_spill] sm:$0xff]  ;;  %v18490_v61 = vld [vmem:[#allocation63_spill] sm:$0xff] }
 0x516   : > { %v10065_v11 = vsel %vm14292_vm13, %v10060_v50, %v10064_v10  ;;  %v10131_v38 = vor.u32 %v10130_v9, %v10126_v58  ;;  %v10098_v20 = vrot.slane %v10097_v33, 4  ;;  %v10112_v54 = vrot.slane %v10110_v16, 5  ;;  %v18469_v50 = vld [vmem:[#allocation16_spill] sm:$0xff]  ;;  %v18487_v4 = vld [vmem:[#allocation62_spill] sm:$0xff]  ;;  %v18493_v9 = vld [vmem:[#allocation65_spill] sm:$0xff] }
 0x517   : > { %v12047_v6 = vcombine.low %v10055_v30, %v10065_v11  ;;  %v10089_v55 = vsel %vm14292_vm13, %v10084_v57, %v10088_v41  ;;  %v10079_v1 = vsel %vm14292_vm13, %v10074_v14, %v10078_v60  ;;  %v10122_v44 = vrot.slane %v10121_v26, 4  ;;  %v18480_v10 = vld [vmem:[#allocation56_spill] sm:$0xff]  ;;  %v18495_v30 = vld [vmem:[#allocation66_spill] sm:$0xff]  ;;  %v18496_v33 = vld [vmem:[#allocation67_spill] sm:$0xff] }
 0x518   : > { %v10113_v3 = vsel %vm14292_vm13, %v10108_v45, %v10112_v54  ;;  %v10132_v36 = vrot.slane %v10131_v38, 4  ;;  %v10136_v48 = vrot.slane %v10134_v62, 5  ;;  %v12048_v23 = vcombine.low %v10079_v1, %v10089_v55  ;;  %v18486_v11 = vld [vmem:[#allocation60_spill] sm:$0xff]  ;;  %v18499_v57 = vld [vmem:[#allocation69_spill] sm:$0xff]  ;;  %v18501_v45 = vld [vmem:[#allocation70_spill] sm:$0xff] }
 0x519   : > { %v10127_v15 = vsel %vm14292_vm13, %v10122_v44, %v10126_v58  ;;  %v18461_v2 = vcombine.low %v17327_v53, %v18460_v56  ;;  %v11071_v43 = vsel %vm1040_vm0, %v17733_v51, 0  ;;  %v18464_v40 = vcombine.low %v18462_v59, %v18463_v63  ;;  %v18472_v51 = vld [vmem:[#allocation51_spill] sm:$0xff]  ;;  %v18492_v58 = vld [vmem:[#allocation64_spill] sm:$0xff]  ;;  %v13921_v38 = vld [vmem:[%s14050_s10] sm:$0xff]  }
 0x51a   : > { %13071 = vmatmul.mubr.msk.bf16.gmra.mrb[0].mxu1 %vm6351_vm8, %v12044_v39  ;;  %v10103_v39 = vsel %vm14292_vm13, %v10098_v20, %v10102_v5  ;;  %v10137_v32 = vsel %vm14292_vm13, %v10132_v36, %v10136_v48  ;;  %v18467_v60 = vcombine.low %v18465_v34, %v18466_v28  ;;  %v18470_v53 = vcombine.low %v18468_v18, %v18469_v50  ;;  %v18502_v14 = vld [vmem:[#allocation71_spill] sm:$0xff]  ;;  %v13923_v20 = vld [vmem:[%s14050_s10 + $0x10] sm:$0xff]   ;;  %v13924_v54 = vld [vmem:[%s14050_s10 + $0x18] sm:$0xff]  }
 0x51b   : > { %13074 = vmatprep.mubr.msk.bf16.mxu1 %vm6351_vm8, %v12045_v35  ;;  %v12049_v35 = vcombine.low %v10103_v39, %v10113_v3  ;;  %v12050_v12 = vcombine.low %v10127_v15, %v10137_v32  ;;  %v18473_v5 = vcombine.low %v18471_v42, %v18472_v51  ;;  %v18476_v21 = vcombine.low %v18474_v29, %v18475_v25  ;;  %v13922_v62 = vld [vmem:[%s14050_s10 + $0x8] sm:$0xff]   ;;  %v13925_v55 = vld [vmem:[%s14050_s10 + $0x20] sm:$0xff]   ;;  %v13931_v44 = vld [vmem:[%s14050_s10 + $0x50] sm:$0xff]  }
 0x51c   : > { %v18479_v8 = vcombine.low %v18477_v27, %v18478_v19  ;;  %v18482_v49 = vcombine.low %v18480_v10, %v18481_v17  ;;  %v18485_v0 = vcombine.low %v18483_v52, %v18484_v22  ;;  %v18488_v31 = vcombine.low %v18486_v11, %v18487_v4  ;;  %v13929_v3 = vld [vmem:[%s14050_s10 + $0x40] sm:$0xff]   ;;  %v13930_v1 = vld [vmem:[%s14050_s10 + $0x48] sm:$0xff]   ;;  %v13932_v36 = vld [vmem:[%s14050_s10 + $0x58] sm:$0xff]  }
 0x51d   : > { %v18491_v24 = vcombine.low %v18489_v37, %v18490_v61  ;;  %v18497_v16 = vcombine.low %v18495_v30, %v18496_v33  ;;  %v18503_v26 = vcombine.low %v18501_v45, %v18502_v14  ;;  %v13933_v48 = vld [vmem:[%s14050_s10 + $0x60] sm:$0xff]   ;;  %v13935_v39 = vld [vmem:[%s14050_s10 + $0x70] sm:$0xff]   ;;  %v18504_v32 = vld [vmem:[#allocation21_spill] sm:$0xff] }
 0x51e   : > { %v17956_v15 = vld [vmem:[%s18090_s4] ss:$0 sm:$0xff]  ;;  %v18505_v56 = vld [vmem:[#allocation24_spill] sm:$0xff]  ;;  %v18506_v59 = vld [vmem:[#allocation19_spill] sm:$0xff] }
 0x51f   : > { %v6567_v63 = vadd.f32 %v18506_v59, %v17956_v15  ;;  %v18509_v19 = vld [vmem:[#allocation27_spill] sm:$0xff] }
 0x520   : > { %v18511_v11 = vld [vmem:[#allocation31_spill] sm:$0xff] }
 0x521   : > { %v6570_v4 = vadd.f32 %v17956_v15, %v18511_v11 }
 0x522   : > { %13075 = vmatmul.mubr.msk.bf16.gmra.mrb[4].mxu1 %vm6351_vm8, %v12046_v13  ;;  %v18494_v13 = vcombine.low %v18492_v58, %v18493_v9 }
 0x523   : > { %13078 = vmatprep.mubr.msk.bf16.mxu1 %vm6351_vm8, %v12047_v6  ;;  %v18498_v6 = vld [vmem:[#allocation68_spill] sm:$0xff] }
 0x524   : > { %v18500_v41 = vcombine.low %v18498_v6, %v18499_v57  ;;  %v18512_v57 = vld [vmem:[#allocation9_spill] sm:$0xff] }
 0x52a   : > { %13079 = vmatmul.mubr.msk.bf16.gmra.mrb[8].mxu1 %vm6351_vm8, %v12048_v23  ;;  %v13934_v23 = vld [vmem:[%s14050_s10 + $0x68] sm:$0xff]  }
 0x52b   : > { %13082 = vmatprep.mubr.msk.bf16.mxu1 %vm6351_vm8, %v12049_v35  ;;  %v13936_v35 = vld [vmem:[%s14050_s10 + $0x78] sm:$0xff]  }
 0x532   : > { %13083 = vmatmul.mubr.msk.bf16.gmra.mrb[12].mxu1 %vm6351_vm8, %v12050_v12  ;;  %v6568_v12 = vadd.f32 %v18504_v32, %v17956_v15 }
 0x533   : > { %13088 = vmatprep.mubr.msk.bf16.mxu1 %vm6351_vm8, %v18461_v2  ;;  %v6566_v2 = vadd.f32 %v17956_v15, %v18505_v56 }
 0x53a   : > { %13089 = vmatmul.mubr.msk.bf16.vlgmr.msra.gmra.mrb[16].mxu1 %vm6351_vm8, %v18464_v40  ;;  %v18507_v40 = vld [vmem:[#allocation20_spill] sm:$0xff] }
 0x53b   : > { %13121 = vmatpush3.bf16.msra.mxu1 %v11071_v43  ;;  %13092 = vmatprep.mubr.msk.bf16.mxu1 %vm6351_vm8, %v18467_v60  ;;  %v17965_v43 = vld [vmem:[%s18092_s6] ss:$0 sm:$0xff]  ;;  %v6565_v34 = vadd.f32 %v17956_v15, %v18507_v40 }
 0x53c   : > { %v13195_v50 = vadd.f32 %v17965_v43, %v6568_v12  ;;  %v13198_v51 = vadd.f32 %v17965_v43, %v6566_v2  ;;  %v13210_v6 = vadd.f32 %v17965_v43, %v6570_v4  ;;  %v18516_v2 = vld [vmem:[#allocation41_spill] sm:$0xff] }
 0x53d   : > { %v6579_v59 = vadd.f32 %v18516_v2, %v17956_v15 }
 0x542   : > { %13093 = vmatmul.mubr.msk.bf16.gmra.mrb[20].mxu1 %vm6351_vm8, %v18470_v53 }
 0x543   : > { %13096 = vmatprep.mubr.msk.bf16.mxu1 %vm6351_vm8, %v18473_v5  ;;  %v18508_v5 = vld [vmem:[#allocation26_spill] sm:$0xff] }
 0x544   : > { %v6571_v29 = vadd.f32 %v18508_v5, %v17956_v15  ;;  %v18519_v5 = vld [vmem:[#allocation47_spill] sm:$0xff] }
 0x546   : > { %v13201_v61 = vadd.f32 %v17965_v43, %v6571_v29  ;;  %v6578_v29 = vadd.f32 %v17956_v15, %v18519_v5 }
 0x54a   : > { %13097 = vmatmul.mubr.msk.bf16.gmra.mrb[24].mxu1 %vm6351_vm8, %v18476_v21 }
 0x54b   : > { %13100 = vmatprep.mubr.msk.bf16.mxu1 %vm6351_vm8, %v18479_v8  ;;  %v6569_v8 = vadd.f32 %v17956_v15, %v18509_v19 }
 0x54d   : > { %v13204_v58 = vadd.f32 %v17965_v43, %v6569_v8 }
 0x552   : > { %13101 = vmatmul.mubr.msk.bf16.gmra.mrb[28].mxu1 %vm6351_vm8, %v18482_v49  ;;  %v18510_v49 = vld [vmem:[#allocation30_spill] sm:$0xff] }
 0x553   : > { %13104 = vmatprep.mubr.msk.bf16.mxu1 %vm6351_vm8, %v18485_v0  ;;  %v6572_v52 = vadd.f32 %v18510_v49, %v17956_v15 }
 0x555   : > { %v13207_v30 = vadd.f32 %v17965_v43, %v6572_v52 }
 0x55a   : > { %13105 = vmatmul.mubr.msk.bf16.gmra.mrb[0].mxu1 %vm6351_vm8, %v18488_v31 }
 0x55b   : > { %13108 = vmatprep.mubr.msk.bf16.mxu1 %vm6351_vm8, %v18491_v24 }
 0x562   : > { %13109 = vmatmul.mubr.msk.bf16.gmra.mrb[4].mxu1 %vm6351_vm8, %v18494_v13 }
 0x563   : > { %13112 = vmatprep.mubr.msk.bf16.mxu1 %vm6351_vm8, %v18497_v16 }
 0x56a   : > { %13113 = vmatmul.mubr.msk.bf16.gmra.mrb[8].mxu1 %vm6351_vm8, %v18500_v41  ;;  %v6575_v41 = vadd.f32 %v18512_v57, %v17956_v15 }
 0x56b   : > { %13116 = vmatprep.mubr.msk.bf16.mxu1 %vm6351_vm8, %v18503_v26 }
 0x572   : > { %13117 = vmatmul.mubr.msk.bf16.gmra.mrb[12].mxu1 %vm6351_vm8, %v12099_v7  ;;  %v13928_v7 = vld [vmem:[%s14050_s10 + $0x38] sm:$0xff]   ;;  %s12152_s10 = sshll.u32 %s18521_s25, 8 }
 0x573   : > { %13122 = vmatprep.mubr.msk.bf16.mxu1 %vm991_vm10, %v13921_v38  ;;  %s17982_s12 = scalar_lea.vmem %s18093_s7, %s12152_s10  ;;  %v18513_v38 = vld [vmem:[#allocation10_spill] sm:$0xff] }
 0x57a   : > { %13123 = vmatmul.mubr.msk.bf16.vlgmr.msra.gmra.mrb[16].mxu1 %vm991_vm10, %v13922_v62  ;;  %v6573_v62 = vadd.f32 %v17956_v15, %v18513_v38 }
 0x57b   : > { %13126 = vmatprep.mubr.msk.bf16.mxu1 %vm991_vm10, %v13923_v20 }
 0x582   : > { %13127 = vmatmul.mubr.msk.bf16.gmra.mrb[20].mxu1 %vm991_vm10, %v13924_v54 }
 0x583   : > { %13130 = vmatprep.mubr.msk.bf16.mxu1 %vm991_vm10, %v13925_v55  ;;  %v18514_v55 = vld [vmem:[#allocation13_spill] sm:$0xff] }
 0x58a   : > { %13131 = vmatmul.mubr.msk.bf16.gmra.mrb[24].mxu1 %vm991_vm10, %v13926_v46  ;;  %v6576_v46 = vadd.f32 %v18514_v55, %v17956_v15 }
 0x58b   : > { %13134 = vmatprep.mubr.msk.bf16.mxu1 %vm991_vm10, %v13927_v47 }
 0x592   : > { %13135 = vmatmul.mubr.msk.bf16.gmra.mrb[28].mxu1 %vm991_vm10, %v13928_v7  ;;  %v18515_v7 = vld [vmem:[#allocation6_spill] sm:$0xff] }
 0x593   : > { %13138 = vmatprep.mubr.msk.bf16.mxu1 %vm991_vm10, %v13929_v3  ;;  %v6574_v3 = vadd.f32 %v17956_v15, %v18515_v7 }
 0x595   : > { %v13222_v56 = vadd.f32 %v17965_v43, %v6574_v3 }
 0x59a   : > { %13139 = vmatmul.mubr.msk.bf16.gmra.mrb[0].mxu1 %vm991_vm10, %v13930_v1 }
 0x59b   : > { %13142 = vmatprep.mubr.msk.bf16.mxu1 %vm991_vm10, %v13931_v44  ;;  %v13213_v44 = vadd.f32 %v17965_v43, %v6575_v41 }
 0x5a2   : > { %13143 = vmatmul.mubr.msk.bf16.gmra.mrb[4].mxu1 %vm991_vm10, %v13932_v36 }
 0x5a3   : > { %13146 = vmatprep.mubr.msk.bf16.mxu1 %vm991_vm10, %v13933_v48  ;;  %v13216_v48 = vadd.f32 %v17965_v43, %v6573_v62 }
 0x5aa   : > { %13147 = vmatmul.mubr.msk.bf16.gmra.mrb[8].mxu1 %vm991_vm10, %v13934_v23 }
 0x5ab   : > { %13150 = vmatprep.mubr.msk.bf16.mxu1 %vm991_vm10, %v13935_v39 }
 0x5b2   : > { %13151 = vmatmul.mubr.msk.bf16.gmra.mrb[12].mxu1 %vm991_vm10, %v13936_v35  ;;  %v13219_v35 = vadd.f32 %v17965_v43, %v6576_v46 }
 0x64d   : > { %v13124_v28 = vpop.f32.mrb[16].mxu1 }
 0x64e   : > { %v13189_v60 = vadd.f32 %v13124_v28, %v6567_v63  ;;  %v11107_v18 = vpop.f32.mrb[17].mxu1  ;;  %v18517_v28 = vld [vmem:[#allocation43_spill] sm:$0xff] }
 0x64f   : > { %v13192_v53 = vadd.f32 %v11107_v18, %v6565_v34  ;;  %v13125_v42 = vpop.f32.mrb[18].mxu1 }
 0x650   : > { %v13190_v25 = vadd.f32 %v13189_v60, %v17965_v43  ;;  %v13196_v21 = vadd.f32 %v13195_v50, %v13125_v42  ;;  %v11110_v27 = vpop.f32.mrb[19].mxu1  ;;  %v6577_v60 = vadd.f32 %v17956_v15, %v18517_v28 }
 0x651   : > { %v13193_v10 = vadd.f32 %v13192_v53, %v17965_v43  ;;  %v13199_v17 = vadd.f32 %v13198_v51, %v11110_v27  ;;  %v18518_v53 = vld [vmem:[#allocation44_spill] sm:$0xff] }
 0x652   : > { %v11268_v22 = vmax.f32 %v13190_v25, 0.0  ;;  %v11269_v0 = vmax.f32 %v13196_v21, 0.0  ;;  %v6580_v42 = vadd.f32 %v18518_v53, %v17956_v15  ;;  %v13225_v21 = vadd.f32 %v17965_v43, %v6579_v59 }
 0x653   : > { %v11266_v31 = vmax.f32 %v13193_v10, 0.0  ;;  %v11267_v37 = vmax.f32 %v13199_v17, 0.0  ;;  %v13228_v19 = vadd.f32 %v17965_v43, %v6577_v60 }
 0x654   : > { %11300 = vst.msk [vmem:[%s17982_s12 + $0x10] sm:$0xff] %vm6351_vm8, %v11268_v22  ;;  %11301 = vst.msk [vmem:[%s17982_s12 + $0x18] sm:$0xff] %vm6351_vm8, %v11269_v0  ;;  %v13231_v17 = vadd.f32 %v17965_v43, %v6580_v42  ;;  %v13234_v22 = vadd.f32 %v17965_v43, %v6578_v29 }
 0x655   : > { %11298 = vst.msk [vmem:[%s17982_s12] sm:$0xff] %vm6351_vm8, %v11266_v31  ;;  %11299 = vst.msk [vmem:[%s17982_s12 + $0x8] sm:$0xff] %vm6351_vm8, %v11267_v37  ;;  %v13128_v24 = vpop.f32.mrb[20].mxu1 }
 0x656   : > { %v13202_v9 = vadd.f32 %v13201_v61, %v13128_v24  ;;  %v11123_v13 = vpop.f32.mrb[21].mxu1  ;;  %v13238_v24 = vadd.f32 %v17965_v43, %v17956_v15 }
 0x657   : > { %v13205_v33 = vadd.f32 %v13204_v58, %v11123_v13  ;;  %v13129_v16 = vpop.f32.mrb[22].mxu1 }
 0x658   : > { %v11272_v45 = vmax.f32 %v13202_v9, 0.0  ;;  %v13208_v14 = vadd.f32 %v13207_v30, %v13129_v16  ;;  %v11126_v26 = vpop.f32.mrb[23].mxu1 }
 0x659   : > { %v11270_v20 = vmax.f32 %v13205_v33, 0.0  ;;  %v13211_v54 = vadd.f32 %v13210_v6, %v11126_v26 }
 0x65a   : > { %11304 = vst.msk [vmem:[%s17982_s12 + $0x30] sm:$0xff] %vm6351_vm8, %v11272_v45  ;;  %v11273_v47 = vmax.f32 %v13208_v14, 0.0 }
 0x65b   : > { %11302 = vst.msk [vmem:[%s17982_s12 + $0x20] sm:$0xff] %vm6351_vm8, %v11270_v20  ;;  %v11271_v1 = vmax.f32 %v13211_v54, 0.0 }
 0x65c   : > { %11305 = vst.msk [vmem:[%s17982_s12 + $0x38] sm:$0xff] %vm6351_vm8, %v11273_v47 }
 0x65d   : > { %11303 = vst.msk [vmem:[%s17982_s12 + $0x28] sm:$0xff] %vm6351_vm8, %v11271_v1  ;;  %v13132_v36 = vpop.f32.mrb[24].mxu1 }
 0x65e   : > { %v13214_v23 = vadd.f32 %v13213_v44, %v13132_v36  ;;  %v11139_v39 = vpop.f32.mrb[25].mxu1 }
 0x65f   : > { %v13217_v32 = vadd.f32 %v13216_v48, %v11139_v39  ;;  %v13133_v12 = vpop.f32.mrb[26].mxu1 }
 0x660   : > { %v11276_v63 = vmax.f32 %v13214_v23, 0.0  ;;  %v13220_v40 = vadd.f32 %v13219_v35, %v13133_v12  ;;  %v11142_v34 = vpop.f32.mrb[27].mxu1 }
 0x661   : > { %v11274_v18 = vmax.f32 %v13217_v32, 0.0  ;;  %v13223_v50 = vadd.f32 %v13222_v56, %v11142_v34 }
 0x662   : > { %11308 = vst.msk [vmem:[%s17982_s12 + $0x50] sm:$0xff] %vm6351_vm8, %v11276_v63  ;;  %v11277_v51 = vmax.f32 %v13220_v40, 0.0 }
 0x663   : > { %11306 = vst.msk [vmem:[%s17982_s12 + $0x40] sm:$0xff] %vm6351_vm8, %v11274_v18  ;;  %v11275_v25 = vmax.f32 %v13223_v50, 0.0 }
 0x664   : > { %11309 = vst.msk [vmem:[%s17982_s12 + $0x58] sm:$0xff] %vm6351_vm8, %v11277_v51 }
 0x665   : > { %11307 = vst.msk [vmem:[%s17982_s12 + $0x48] sm:$0xff] %vm6351_vm8, %v11275_v25  ;;  %v13136_v27 = vpop.f32.mrb[28].mxu1 }
 0x666   : > { %v13226_v8 = vadd.f32 %v13225_v21, %v13136_v27  ;;  %v11155_v10 = vpop.f32.mrb[29].mxu1 }
 0x667   : > { %v13229_v49 = vadd.f32 %v13228_v19, %v11155_v10  ;;  %v13137_v52 = vpop.f32.mrb[30].mxu1 }
 0x668   : > { %v11280_v0 = vmax.f32 %v13226_v8, 0.0  ;;  %v13232_v11 = vadd.f32 %v13231_v17, %v13137_v52  ;;  %v11158_v4 = vpop.f32.mrb[31].mxu1 }
 0x669   : > { %v11278_v31 = vmax.f32 %v13229_v49, 0.0  ;;  %v13235_v37 = vadd.f32 %v13234_v22, %v11158_v4 }
 0x66a   : > { %11312 = vst.msk [vmem:[%s17982_s12 + $0x70] sm:$0xff] %vm6351_vm8, %v11280_v0  ;;  %v11281_v61 = vmax.f32 %v13232_v11, 0.0 }
 0x66b   : > { %11310 = vst.msk [vmem:[%s17982_s12 + $0x60] sm:$0xff] %vm6351_vm8, %v11278_v31  ;;  %v11279_v58 = vmax.f32 %v13235_v37, 0.0 }
 0x66c   : > { %11313 = vst.msk [vmem:[%s17982_s12 + $0x78] sm:$0xff] %vm6351_vm8, %v11281_v61 }
 0x66d   : > { %11311 = vst.msk [vmem:[%s17982_s12 + $0x68] sm:$0xff] %vm6351_vm8, %v11279_v58  ;;  %v13140_v9 = vpop.f32.mrb[0].mxu1 }
 0x66e   : > { %v13237_v13 = vadd.f32 %v13238_v24, %v13140_v9  ;;  %v11171_v30 = vpop.f32.mrb[1].mxu1 }
 0x66f   : > { %v13239_v33 = vadd.f32 %v13238_v24, %v11171_v30  ;;  %v13141_v16 = vpop.f32.mrb[2].mxu1 }
 0x670   : > { %v11284_v6 = vmax.f32 %v13237_v13, 0.0  ;;  %v13241_v57 = vadd.f32 %v13238_v24, %v13141_v16  ;;  %v11174_v41 = vpop.f32.mrb[3].mxu1 }
 0x671   : > { %v11282_v45 = vmax.f32 %v13239_v33, 0.0  ;;  %v13243_v15 = vadd.f32 %v13238_v24, %v11174_v41 }
 0x672   : > { %11316 = vst.msk [vmem:[%s17982_s12 + $0x90] sm:$0xff] %vm6351_vm8, %v11284_v6  ;;  %v11285_v43 = vmax.f32 %v13241_v57, 0.0 }
 0x673   : > { %11314 = vst.msk [vmem:[%s17982_s12 + $0x80] sm:$0xff] %vm6351_vm8, %v11282_v45  ;;  %v11283_v14 = vmax.f32 %v13243_v15, 0.0 }
 0x674   : > { %11317 = vst.msk [vmem:[%s17982_s12 + $0x98] sm:$0xff] %vm6351_vm8, %v11285_v43 }
 0x675   : > { %11315 = vst.msk [vmem:[%s17982_s12 + $0x88] sm:$0xff] %vm6351_vm8, %v11283_v14  ;;  %v13144_v26 = vpop.f32.mrb[4].mxu1 }
 0x676   : > { %v13245_v38 = vadd.f32 %v13238_v24, %v13144_v26  ;;  %v11187_v62 = vpop.f32.mrb[5].mxu1 }
 0x677   : > { %v13247_v20 = vadd.f32 %v13238_v24, %v11187_v62  ;;  %v13145_v54 = vpop.f32.mrb[6].mxu1 }
 0x678   : > { %v11288_v55 = vmax.f32 %v13245_v38, 0.0  ;;  %v13249_v46 = vadd.f32 %v13238_v24, %v13145_v54  ;;  %v11190_v47 = vpop.f32.mrb[7].mxu1 }
 0x679   : > { %v11286_v7 = vmax.f32 %v13247_v20, 0.0  ;;  %v13251_v3 = vadd.f32 %v13238_v24, %v11190_v47 }
 0x67a   : > { %11320 = vst.msk [vmem:[%s17982_s12 + $0xb0] sm:$0xff] %vm6351_vm8, %v11288_v55  ;;  %v11289_v1 = vmax.f32 %v13249_v46, 0.0 }
 0x67b   : > { %11318 = vst.msk [vmem:[%s17982_s12 + $0xa0] sm:$0xff] %vm6351_vm8, %v11286_v7  ;;  %v11287_v44 = vmax.f32 %v13251_v3, 0.0 }
 0x67c   : > { %11321 = vst.msk [vmem:[%s17982_s12 + $0xb8] sm:$0xff] %vm6351_vm8, %v11289_v1 }
 0x67d   : > { %11319 = vst.msk [vmem:[%s17982_s12 + $0xa8] sm:$0xff] %vm6351_vm8, %v11287_v44  ;;  %v13148_v36 = vpop.f32.mrb[8].mxu1 }
 0x67e   : > { %v13253_v48 = vadd.f32 %v13238_v24, %v13148_v36  ;;  %v11203_v23 = vpop.f32.mrb[9].mxu1 }
 0x67f   : > { %v13255_v39 = vadd.f32 %v13238_v24, %v11203_v23  ;;  %v13149_v35 = vpop.f32.mrb[10].mxu1 }
 0x680   : > { %v11292_v32 = vmax.f32 %v13253_v48, 0.0  ;;  %v13257_v12 = vadd.f32 %v13238_v24, %v13149_v35  ;;  %v11206_v56 = vpop.f32.mrb[11].mxu1 }
 0x681   : > { %v11290_v2 = vmax.f32 %v13255_v39, 0.0  ;;  %v13259_v59 = vadd.f32 %v13238_v24, %v11206_v56 }
 0x682   : > { %11324 = vst.msk [vmem:[%s17982_s12 + $0xd0] sm:$0xff] %vm6351_vm8, %v11292_v32  ;;  %v11293_v63 = vmax.f32 %v13257_v12, 0.0 }
 0x683   : > { %11322 = vst.msk [vmem:[%s17982_s12 + $0xc0] sm:$0xff] %vm6351_vm8, %v11290_v2  ;;  %v11291_v40 = vmax.f32 %v13259_v59, 0.0 }
 0x684   : > { %11325 = vst.msk [vmem:[%s17982_s12 + $0xd8] sm:$0xff] %vm6351_vm8, %v11293_v63 }
 0x685   : > { %11323 = vst.msk [vmem:[%s17982_s12 + $0xc8] sm:$0xff] %vm6351_vm8, %v11291_v40  ;;  %v13152_v34 = vpop.f32.mrb[12].mxu1 }
 0x686   : > { %v13261_v28 = vadd.f32 %v13238_v24, %v13152_v34  ;;  %v11219_v60 = vpop.f32.mrb[13].mxu1 }
 0x687   : > { %v13263_v18 = vadd.f32 %v13238_v24, %v11219_v60  ;;  %v13153_v50 = vpop.f32.mrb[14].mxu1 }
 0x688   : > { %v11296_v53 = vmax.f32 %v13261_v28, 0.0  ;;  %v13265_v42 = vadd.f32 %v13238_v24, %v13153_v50  ;;  %v11222_v51 = vpop.f32.mrb[15].mxu1 }
 0x689   : > { %v11294_v5 = vmax.f32 %v13263_v18, 0.0  ;;  %v13267_v29 = vadd.f32 %v13238_v24, %v11222_v51 }
 0x68a   : > { %11328 = vst.msk [vmem:[%s17982_s12 + $0xf0] sm:$0xff] %vm6351_vm8, %v11296_v53  ;;  %v11297_v25 = vmax.f32 %v13265_v42, 0.0 }
 0x68b   : > { %11326 = vst.msk [vmem:[%s17982_s12 + $0xe0] sm:$0xff] %vm6351_vm8, %v11294_v5  ;;  %v11295_v21 = vmax.f32 %v13267_v29, 0.0 }
 0x68c   : > { %11329 = vst.msk [vmem:[%s17982_s12 + $0xf8] sm:$0xff] %vm6351_vm8, %v11297_v25 }
 0x68d   : > { %11327 = vst.msk [vmem:[%s17982_s12 + $0xe8] sm:$0xff] %vm6351_vm8, %v11295_v21 }
 0x68e PF: > { %s17_s24 = sadd.s32 1, %s13945_s24  }
 0x68f   : > { %p14_p4 = scmp.ge.s32.totalorder %s17_s24, 4  }
 0x691   :  { %16 = sbr.rel (!%p14_p4) target bundleno = 1 (0x1), region = 100 }

</bundles_post_ra>
